<compile_context>
chip_gen: v6e
topology: v6e:2x2x1
jax: 0.10.0
libtpu: 0.0.40
codegen_flags: <defaults>
</compile_context>

<pallas_src>
from functools import partial

import numpy as np

import jax
import jax.numpy as jnp
from jax.experimental import pallas as pl
from jax.experimental.pallas import tpu as pltpu

MAX_PED = 8      # peds per sequence, zero-padded (sublane multiple)
POS_PAD = 8      # coordinate dim (2) zero-padded to 8
NSEQ = 16        # sequences per grid step -> GEMM M = NSEQ * MAX_PED**2 = 1024

_HI = jax.lax.Precision.HIGHEST   # host-side weight folding / reference only

_WEIGHT_KEYS = (
    "w_se", "b_se", "w1", "b1", "w2", "b2",
    "bn1_gamma", "bn1_beta", "bn1_mean", "bn1_var",
    "bn2_gamma", "bn2_beta", "bn2_mean", "bn2_var",
)


# ---------------------------------------------------------------------------
# Pallas kernel: one grid step == NSEQ sequences.
# Flat pair layout (per sequence): row = i*P + j, i = anchor ped, j = neighbour ped,
# matching the torch .repeat() semantics of the reference forward.
# ---------------------------------------------------------------------------
def _pool_kernel(ph_ref, pos_ref, mask_ref,
                 w1s_ref, w1p_ref, b1_ref, w2_ref, b2_ref,
                 out_ref):
    """
    ph_ref   : (NSEQ, P, POS_PAD+H)  [pos | hidden] per ped (zero rows for padding)
    pos_ref  : (NSEQ, P, POS_PAD)    end positions (zero-padded)
    mask_ref : (NSEQ, P, B)          lane-dense {1,0} neighbour-valid mask
    w1s_ref  : (POS_PAD+H, MID)      stacked first pre-pool Linear (spatial-emb + BN folded)
    w1p_ref  : (POS_PAD, MID)        position-only half (anchor term)
    b1_ref   : (1, MID) f32          folded bias (Linear + BN + spatial-emb bias)
    w2_ref   : (MID, B), b2_ref : (1, B) f32   second pre-pool Linear (BN folded)
    out_ref  : (NSEQ, P, B) f32      max-pooled social features per anchor ped
    """
    ph = ph_ref[...]
    pos = pos_ref[...]
    NS, P, PH = ph.shape
    MID, B = w2_ref.shape
    cdt = w2_ref.dtype   # compute/storage dtype of the big intermediate (bf16 default)

    # First pre-pool Linear, fused over [pos | hid] (spatial embedding, concat and
    # tile folded away on the host):
    #   j_term[s, j] = [pos[s,j] | hid[s,j]] @ W1_stack + b1
    jt = jnp.dot(ph.reshape(NS * P, PH), w1s_ref[...],
                 preferred_element_type=jnp.float32)
    jt = (jt + b1_ref[...]).astype(cdt).reshape(NS, 1, P, MID)

    # Anchor term (from rel_pos = pos_j - pos_i):  pos[s,i] @ W1_pos
    at = jnp.dot(pos.reshape(NS * P, POS_PAD), w1p_ref[...],
                 preferred_element_type=jnp.float32)
    at = at.astype(cdt).reshape(NS, P, 1, MID)

    # y[s, i, j] = ReLU(j_term[s, j] - anchor[s, i]); built/stored in cdt (bf16
    # halves the 1 MiB-per-8-seq slab; on v5e this is f32 VALU math + bf16 stores).
    y = jnp.maximum(jt - at, 0).reshape(NS * P * P, MID)

    # Second pre-pool Linear: the one big GEMM, (NS*P*P, MID) @ (MID, B).
    z = jnp.dot(y, w2_ref[...], preferred_element_type=jnp.float32)
    z = jnp.maximum(z + b2_ref[...], 0.0).reshape(NS, P, P, B)

    # Zero padded neighbours (j >= num_ped); exact sentinel since z >= 0 post-ReLU
    # and every real anchor has at least itself as a valid neighbour.
    z = z * mask_ref[...].astype(jnp.float32)[:, None, :, :]
    out_ref[...] = jnp.max(z, axis=2)                         # max over neighbours j


# ---------------------------------------------------------------------------
# Host-side weight folding
# ---------------------------------------------------------------------------
def _fold_bn(w, b, gamma, beta, mean, var, eps=1e-5):
    """Eval-mode BatchNorm1d folded into the preceding Linear (w: (in,out), b: (out,))."""
    scale = gamma / jnp.sqrt(var + eps)
    return w * scale[None, :], (b - mean) * scale + beta


def _fold_params(w):
    """Fold BN (eval) and the spatial embedding Linear(2, E) into the pre-pool MLP."""
    E = w["w_se"].shape[1]
    w1f, b1f = _fold_bn(w["w1"], w["b1"], w["bn1_gamma"], w["bn1_beta"],
                        w["bn1_mean"], w["bn1_var"])
    w2f, b2f = _fold_bn(w["w2"], w["b2"], w["bn2_gamma"], w["bn2_beta"],
                        w["bn2_mean"], w["bn2_var"])
    mid = w1f.shape[1]
    # spatial_embedding(rel) @ W1[:E]  ==  rel @ (W_se @ W1[:E]) + b_se @ W1[:E]
    w1_pos = jnp.zeros((POS_PAD, mid), jnp.float32)
    w1_pos = w1_pos.at[:2, :].set(jnp.dot(w["w_se"], w1f[:E], precision=_HI))
    w1_hid = w1f[E:]
    w1_stack = jnp.concatenate([w1_pos, w1_hid], axis=0)       # (POS_PAD + H, MID)
    b1_tot = b1f + jnp.dot(w["b_se"], w1f[:E], precision=_HI)
    return w1_stack, w1_pos, b1_tot, w2f, b2f


# ---------------------------------------------------------------------------
# Host-side index prep (numpy) + jitted device forward
# ---------------------------------------------------------------------------
def _pack_indices(seq_start_end, nseq):
    """One gather packs (S_pad, P, ...) blocks; one gather unpacks the valid rows."""
    starts = np.asarray([s for s, _ in seq_start_end], dtype=np.int32)
    ends = np.asarray([e for _, e in seq_start_end], dtype=np.int32)
    npeds = ends - starts
    if not (np.all(npeds >= 1) and np.all(npeds <= MAX_PED)):
        raise ValueError(f"each sequence must have 1..{MAX_PED} pedestrians")
    S = len(starts)
    n_blocks = -(-S // nseq)
    # even grid length (and >= 2): lets v7x's two TensorCores split the blocks evenly.
    n_blocks = max(2, n_blocks + (n_blocks & 1))
    pad = n_blocks * nseq - S
    p = np.arange(MAX_PED, dtype=np.int32)
    valid = p[None, :] < npeds[:, None]                                # (S, P)
    gather = np.where(valid, starts[:, None] + p[None, :], 0)
    gather = np.pad(gather, ((0, pad), (0, 0))).astype(np.int32)       # (S_pad, P)
    valid = np.pad(valid, ((0, pad), (0, 0)))                          # (S_pad, P)
    out_rows = np.concatenate(
        [s * MAX_PED + np.arange(n, dtype=np.int32) for s, n in enumerate(npeds)])
    return jnp.asarray(gather), jnp.asarray(valid), jnp.asarray(out_rows)


@partial(jax.jit, static_argnames=("nseq", "use_bf16"))
def _forward_device(weights, h_flat, end_pos, gather_idx, valid, out_rows,
                    *, nseq, use_bf16):
    P = MAX_PED
    S_pad = gather_idx.shape[0]
    H = h_flat.shape[1]
    PH = POS_PAD + H

    w1_stack, w1_pos, b1, w2, b2 = _fold_params(weights)
    MID, B = w2.shape

    mm = jnp.bfloat16 if use_bf16 else jnp.float32

    # Pack every sequence into dense (S_pad, P, ...) tiles with a single gather.
    hid_pad = jnp.where(valid[..., None], h_flat[gather_idx], 0.0)          # (S_pad,P,H)
    pos_pad = jnp.where(valid[..., None], end_pos[gather_idx], 0.0)         # (S_pad,P,2)
    pos_pad = jnp.pad(pos_pad, ((0, 0), (0, 0), (0, POS_PAD - 2)))          # (S_pad,P,POS_PAD)
    ph = jnp.concatenate([pos_pad, hid_pad], axis=-1).astype(mm)            # (S_pad,P,PH)
    pos_only = pos_pad.astype(mm)
    # Lane-dense neighbour mask (no in-kernel lane broadcast / relayout needed).
    mask = jnp.broadcast_to(valid[..., None], (S_pad, P, B)).astype(mm)

    grid_spec = pltpu.PrefetchScalarGridSpec(
        num_scalar_prefetch=0,
        grid=(S_pad // nseq,),
        in_specs=[
            pl.BlockSpec((nseq, P, PH), lambda s: (s, 0, 0)),
            pl.BlockSpec((nseq, P, POS_PAD), lambda s: (s, 0, 0)),
            pl.BlockSpec((nseq, P, B), lambda s: (s, 0, 0)),
            pl.BlockSpec((PH, MID), lambda s: (0, 0)),
            pl.BlockSpec((POS_PAD, MID), lambda s: (0, 0)),
            pl.BlockSpec((1, MID), lambda s: (0, 0)),
            pl.BlockSpec((MID, B), lambda s: (0, 0)),
            pl.BlockSpec((1, B), lambda s: (0, 0)),
        ],
        out_specs=pl.BlockSpec((nseq, P, B), lambda s: (s, 0, 0)),
    )

    out = pl.pallas_call(
        _pool_kernel,
        out_shape=jax.ShapeDtypeStruct((S_pad, P, B), jnp.float32),
        grid_spec=grid_spec,
        compiler_params=pltpu.CompilerParams(
            # no cross-step accumulator -> shard blocks across v7x's 2 TensorCores
            dimension_semantics=("parallel",),
            vmem_limit_bytes=32 * 1024 * 1024,
        ),
    )(ph, pos_only, mask,
      w1_stack.astype(mm), w1_pos.astype(mm), b1.reshape(1, MID),
      w2.astype(mm), b2.reshape(1, B))

    # torch.cat(pool_h, dim=0): one gather of the valid anchor rows.
    return out.reshape(S_pad * P, B)[out_rows]


def pool_hidden_net_forward(params, h_states, seq_start_end, end_pos,
                            nseq=NSEQ, use_bf16=True):
    h_flat = jnp.asarray(h_states, jnp.float32).reshape(-1, params["h_dim"])
    gather_idx, valid, out_rows = _pack_indices(seq_start_end, nseq)
    weights = {k: params[k] for k in _WEIGHT_KEYS}
    return _forward_device(weights, h_flat, jnp.asarray(end_pos, jnp.float32),
                           gather_idx, valid, out_rows,
                           nseq=nseq, use_bf16=use_bf16)


# ---------------------------------------------------------------------------
# Deterministic parameter init (synthetic, PyTorch-like Linear init; weights (in,out))
# ---------------------------------------------------------------------------
def init_params(key, embedding_dim=32, h_dim=32, mid_dim=512, bottleneck_dim=128):
    ks = jax.random.split(key, 12)

    def linear(k, fan_in, fan_out):
        kw, kb = jax.random.split(k)
        bound = 1.0 / jnp.sqrt(jnp.float32(fan_in))
        w = jax.random.uniform(kw, (fan_in, fan_out), jnp.float32, -bound, bound)
        b = jax.random.uniform(kb, (fan_out,), jnp.float32, -bound, bound)
        return w, b

    w_se, b_se = linear(ks[0], 2, embedding_dim)
    w1, b1 = linear(ks[1], embedding_dim + h_dim, mid_dim)
    w2, b2 = linear(ks[2], mid_dim, bottleneck_dim)
    return dict(
        embedding_dim=embedding_dim, h_dim=h_dim,
        mid_dim=mid_dim, bottleneck_dim=bottleneck_dim,
        w_se=w_se, b_se=b_se, w1=w1, b1=b1, w2=w2, b2=b2,
        bn1_gamma=jax.random.uniform(ks[3], (mid_dim,), jnp.float32, 0.5, 1.5),
        bn1_beta=0.1 * jax.random.normal(ks[4], (mid_dim,), jnp.float32),
        bn1_mean=0.1 * jax.random.normal(ks[5], (mid_dim,), jnp.float32),
        bn1_var=jax.random.uniform(ks[6], (mid_dim,), jnp.float32, 0.5, 1.5),
        bn2_gamma=jax.random.uniform(ks[7], (bottleneck_dim,), jnp.float32, 0.5, 1.5),
        bn2_beta=0.1 * jax.random.normal(ks[8], (bottleneck_dim,), jnp.float32),
        bn2_mean=0.1 * jax.random.normal(ks[9], (bottleneck_dim,), jnp.float32),
        bn2_var=jax.random.uniform(ks[10], (bottleneck_dim,), jnp.float32, 0.5, 1.5),
    )


# ---------------------------------------------------------------------------
# Pure-JAX reference mirroring the PyTorch forward (eval-mode BN folded identically)
# ---------------------------------------------------------------------------
def reference_forward(params, h_states, seq_start_end, end_pos):
    h_flat = h_states.reshape(-1, params["h_dim"])
    w1f, b1f = _fold_bn(params["w1"], params["b1"], params["bn1_gamma"],
                        params["bn1_beta"], params["bn1_mean"], params["bn1_var"])
    w2f, b2f = _fold_bn(params["w2"], params["b2"], params["bn2_gamma"],
                        params["bn2_beta"], params["bn2_mean"], params["bn2_var"])
    dot = partial(jnp.dot, precision=_HI)
    outs = []
    for (start, end) in seq_start_end:
        n = end - start
        hid = h_flat[start:end]
        pos = end_pos[start:end]
        pos1 = jnp.tile(pos, (n, 1))                 # curr_end_pos.repeat(num_ped, 1)
        pos2 = jnp.repeat(pos, n, axis=0)            # self.repeat(curr_end_pos, num_ped)
        rel = pos1 - pos2
        emb = dot(rel, params["w_se"]) + params["b_se"]
        hid1 = jnp.tile(hid, (n, 1))
        x = jnp.concatenate([emb, hid1], axis=1)
        y = jnp.maximum(dot(x, w1f) + b1f, 0.0)
        z = jnp.maximum(dot(y, w2f) + b2f, 0.0)
        outs.append(z.reshape(n, n, -1).max(axis=1))
    return jnp.concatenate(outs, axis=0)


if __name__ == "__main__":
    key = jax.random.PRNGKey(0)
    kp, kh, ke = jax.random.split(key, 3)
    params = init_params(kp)

    # 20 sequences of 1..8 pedestrians -> 2 grid blocks of NSEQ=16 sequences
    # (even grid for v7x; second block partially padded), exercising padded paths.
    sizes = [3, 4, 8, 2, 5, 7, 1, 6, 4, 3, 8, 2, 6, 5, 7, 3, 4, 2, 8, 1]
    bounds = np.concatenate([[0], np.cumsum(sizes)])
    seq_start_end = [(int(bounds[i]), int(bounds[i + 1])) for i in range(len(sizes))]
    total_peds = int(bounds[-1])

    h_states = jax.random.normal(kh, (1, total_peds, params["h_dim"]), jnp.float32)
    end_pos = jax.random.normal(ke, (total_peds, 2), jnp.float32)

    ref = reference_forward(params, h_states, seq_start_end, end_pos)

    # Default fast path: bf16 MXU inputs, f32 accumulation.
    pool_h = jax.block_until_ready(
        pool_hidden_net_forward(params, h_states, seq_start_end, end_pos))
    assert pool_h.shape == (total_peds, params["bottleneck_dim"])
    if not bool(jnp.allclose(pool_h, ref, rtol=5e-2, atol=5e-2)):
        raise SystemExit("bf16 mismatch vs reference, max abs err = "
                         f"{float(jnp.max(jnp.abs(pool_h - ref)))}")

    # f32-input path (default MXU precision, f32 accumulation).
    pool_h_f32 = jax.block_until_ready(
        pool_hidden_net_forward(params, h_states, seq_start_end, end_pos,
                                use_bf16=False))
    if not bool(jnp.allclose(pool_h_f32, ref, rtol=5e-2, atol=5e-2)):
        raise SystemExit("f32 mismatch vs reference, max abs err = "
                         f"{float(jnp.max(jnp.abs(pool_h_f32 - ref)))}")

    print("KERNEL_OK")
</pallas_src>

<mosaic_0001>
module attributes {stable_mosaic.version = 11 : i64} {
  func.func @_pool_kernel(%arg0: i32, %arg1: memref<16x8x40xbf16, #tpu.memory_space<vmem>>, %arg2: memref<16x8x8xbf16, #tpu.memory_space<vmem>>, %arg3: memref<16x8x128xbf16, #tpu.memory_space<vmem>>, %arg4: memref<40x512xbf16, #tpu.memory_space<vmem>>, %arg5: memref<8x512xbf16, #tpu.memory_space<vmem>>, %arg6: memref<1x512xf32, #tpu.memory_space<vmem>>, %arg7: memref<512x128xbf16, #tpu.memory_space<vmem>>, %arg8: memref<1x128xf32, #tpu.memory_space<vmem>>, %arg9: memref<16x8x128xf32, #tpu.memory_space<vmem>>) attributes {dimension_semantics = [#tpu.dimension_semantics<parallel>], iteration_bounds = array<i64: 2>, scalar_prefetch = 0 : i64, scratch_operands = 0 : i64, tpu.core_type = #tpu.core_type<tc>, window_params = [{transform_indices = @transform_0, window_bounds = array<i64: 16, 8, 40>}, {transform_indices = @transform_1, window_bounds = array<i64: 16, 8, 8>}, {transform_indices = @transform_2, window_bounds = array<i64: 16, 8, 128>}, {pipeline_mode = #tpu.pipeline_mode<synchronous>, transform_indices = @transform_3, window_bounds = array<i64: 40, 512>}, {pipeline_mode = #tpu.pipeline_mode<synchronous>, transform_indices = @transform_4, window_bounds = array<i64: 8, 512>}, {pipeline_mode = #tpu.pipeline_mode<synchronous>, transform_indices = @transform_5, window_bounds = array<i64: 1, 512>}, {pipeline_mode = #tpu.pipeline_mode<synchronous>, transform_indices = @transform_6, window_bounds = array<i64: 512, 128>}, {pipeline_mode = #tpu.pipeline_mode<synchronous>, transform_indices = @transform_7, window_bounds = array<i64: 1, 128>}, {transform_indices = @transform_8, window_bounds = array<i64: 16, 8, 128>}]} {
    %c0 = arith.constant 0 : index
    %c0_0 = arith.constant 0 : index
    %c0_1 = arith.constant 0 : index
    %0 = vector.load %arg1[%c0, %c0_0, %c0_1] : memref<16x8x40xbf16, #tpu.memory_space<vmem>>, vector<16x8x40xbf16>
    %c0_2 = arith.constant 0 : index
    %c0_3 = arith.constant 0 : index
    %c0_4 = arith.constant 0 : index
    %1 = vector.load %arg2[%c0_2, %c0_3, %c0_4] : memref<16x8x8xbf16, #tpu.memory_space<vmem>>, vector<16x8x8xbf16>
    %2 = vector.shape_cast %0 : vector<16x8x40xbf16> to vector<128x40xbf16>
    %c0_5 = arith.constant 0 : index
    %c0_6 = arith.constant 0 : index
    %3 = vector.load %arg4[%c0_5, %c0_6] : memref<40x512xbf16, #tpu.memory_space<vmem>>, vector<40x512xbf16>
    %cst = arith.constant dense<0.000000e+00> : vector<128x512xf32>
    %4 = tpu.matmul %2, %3, %cst {dimension_numbers = #tpu.dot_dimension_numbers<[1], [0], [0], [1], [0, 0, 1, 1], [], []>} : vector<128x40xbf16>, vector<40x512xbf16>, vector<128x512xf32> -> vector<128x512xf32>
    %c0_7 = arith.constant 0 : index
    %c0_8 = arith.constant 0 : index
    %5 = vector.load %arg6[%c0_7, %c0_8] : memref<1x512xf32, #tpu.memory_space<vmem>>, vector<1x512xf32>
    %6 = vector.broadcast %5 : vector<1x512xf32> to vector<128x512xf32>
    %7 = arith.addf %4, %6 : vector<128x512xf32>
    %8 = arith.truncf %7 : vector<128x512xf32> to vector<128x512xbf16>
    %9 = vector.shape_cast %8 : vector<128x512xbf16> to vector<16x1x8x512xbf16>
    %10 = vector.shape_cast %1 : vector<16x8x8xbf16> to vector<128x8xbf16>
    %c0_9 = arith.constant 0 : index
    %c0_10 = arith.constant 0 : index
    %11 = vector.load %arg5[%c0_9, %c0_10] : memref<8x512xbf16, #tpu.memory_space<vmem>>, vector<8x512xbf16>
    %cst_11 = arith.constant dense<0.000000e+00> : vector<128x512xf32>
    %12 = tpu.matmul %10, %11, %cst_11 {dimension_numbers = #tpu.dot_dimension_numbers<[1], [0], [0], [1], [0, 0, 1, 1], [], []>} : vector<128x8xbf16>, vector<8x512xbf16>, vector<128x512xf32> -> vector<128x512xf32>
    %13 = arith.truncf %12 : vector<128x512xf32> to vector<128x512xbf16>
    %14 = vector.shape_cast %13 : vector<128x512xbf16> to vector<16x8x1x512xbf16>
    %15 = vector.broadcast %9 : vector<16x1x8x512xbf16> to vector<16x8x8x512xbf16>
    %16 = vector.broadcast %14 : vector<16x8x1x512xbf16> to vector<16x8x8x512xbf16>
    %17 = arith.subf %15, %16 : vector<16x8x8x512xbf16>
    %cst_12 = arith.constant 0.000000e+00 : bf16
    %18 = vector.broadcast %cst_12 : bf16 to vector<16x8x8x512xbf16>
    %19 = arith.maximumf %17, %18 : vector<16x8x8x512xbf16>
    %20 = vector.shape_cast %19 : vector<16x8x8x512xbf16> to vector<1024x512xbf16>
    %c0_13 = arith.constant 0 : index
    %c0_14 = arith.constant 0 : index
    %21 = vector.load %arg7[%c0_13, %c0_14] : memref<512x128xbf16, #tpu.memory_space<vmem>>, vector<512x128xbf16>
    %cst_15 = arith.constant dense<0.000000e+00> : vector<1024x128xf32>
    %22 = tpu.matmul %20, %21, %cst_15 {dimension_numbers = #tpu.dot_dimension_numbers<[1], [0], [0], [1], [0, 0, 1, 1], [], []>} : vector<1024x512xbf16>, vector<512x128xbf16>, vector<1024x128xf32> -> vector<1024x128xf32>
    %c0_16 = arith.constant 0 : index
    %c0_17 = arith.constant 0 : index
    %23 = vector.load %arg8[%c0_16, %c0_17] : memref<1x128xf32, #tpu.memory_space<vmem>>, vector<1x128xf32>
    %24 = vector.broadcast %23 : vector<1x128xf32> to vector<1024x128xf32>
    %25 = arith.addf %22, %24 : vector<1024x128xf32>
    %cst_18 = arith.constant 0.000000e+00 : f32
    %26 = vector.broadcast %cst_18 : f32 to vector<1024x128xf32>
    %27 = arith.maximumf %25, %26 : vector<1024x128xf32>
    %28 = vector.shape_cast %27 : vector<1024x128xf32> to vector<16x8x8x128xf32>
    %c0_19 = arith.constant 0 : index
    %c0_20 = arith.constant 0 : index
    %c0_21 = arith.constant 0 : index
    %29 = vector.load %arg3[%c0_19, %c0_20, %c0_21] : memref<16x8x128xbf16, #tpu.memory_space<vmem>>, vector<16x8x128xbf16>
    %30 = arith.extf %29 : vector<16x8x128xbf16> to vector<16x8x128xf32>
    %31 = vector.shape_cast %30 : vector<16x8x128xf32> to vector<16x1x8x128xf32>
    %32 = vector.broadcast %31 : vector<16x1x8x128xf32> to vector<16x8x8x128xf32>
    %33 = arith.mulf %28, %32 : vector<16x8x8x128xf32>
    %cst_22 = arith.constant dense<0xFF800000> : vector<16x8x128xf32>
    %34 = vector.multi_reduction <maximumf>, %33, %cst_22 [2] : vector<16x8x8x128xf32> to vector<16x8x128xf32>
    %c0_23 = arith.constant 0 : index
    %c0_24 = arith.constant 0 : index
    %c0_25 = arith.constant 0 : index
    %35 = vector.load %arg9[%c0_23, %c0_24, %c0_25] : memref<16x8x128xf32, #tpu.memory_space<vmem>>, vector<16x8x128xf32>
    tpu.vector_store %arg9[%c0_23, %c0_24, %c0_25], %34 {strides = array<i32>} : memref<16x8x128xf32, #tpu.memory_space<vmem>>, vector<16x8x128xf32>,
    return
  }
  func.func @transform_0(%arg0: i32) -> (i32, i32, i32) {
    %c0_i32 = arith.constant 0 : i32
    %c0_i32_0 = arith.constant 0 : i32
    %c0_i32_1 = arith.constant 0 : i32
    return %arg0, %c0_i32, %c0_i32_0 : i32, i32, i32
  }
  func.func @transform_1(%arg0: i32) -> (i32, i32, i32) {
    %c0_i32 = arith.constant 0 : i32
    %c0_i32_0 = arith.constant 0 : i32
    %c0_i32_1 = arith.constant 0 : i32
    return %arg0, %c0_i32, %c0_i32_0 : i32, i32, i32
  }
  func.func @transform_2(%arg0: i32) -> (i32, i32, i32) {
    %c0_i32 = arith.constant 0 : i32
    %c0_i32_0 = arith.constant 0 : i32
    %c0_i32_1 = arith.constant 0 : i32
    return %arg0, %c0_i32, %c0_i32_0 : i32, i32, i32
  }
  func.func @transform_3(%arg0: i32) -> (i32, i32) {
    %c0_i32 = arith.constant 0 : i32
    %c0_i32_0 = arith.constant 0 : i32
    %c0_i32_1 = arith.constant 0 : i32
    return %c0_i32, %c0_i32_0 : i32, i32
  }
  func.func @transform_4(%arg0: i32) -> (i32, i32) {
    %c0_i32 = arith.constant 0 : i32
    %c0_i32_0 = arith.constant 0 : i32
    %c0_i32_1 = arith.constant 0 : i32
    return %c0_i32, %c0_i32_0 : i32, i32
  }
  func.func @transform_5(%arg0: i32) -> (i32, i32) {
    %c0_i32 = arith.constant 0 : i32
    %c0_i32_0 = arith.constant 0 : i32
    %c0_i32_1 = arith.constant 0 : i32
    return %c0_i32, %c0_i32_0 : i32, i32
  }
  func.func @transform_6(%arg0: i32) -> (i32, i32) {
    %c0_i32 = arith.constant 0 : i32
    %c0_i32_0 = arith.constant 0 : i32
    %c0_i32_1 = arith.constant 0 : i32
    return %c0_i32, %c0_i32_0 : i32, i32
  }
  func.func @transform_7(%arg0: i32) -> (i32, i32) {
    %c0_i32 = arith.constant 0 : i32
    %c0_i32_0 = arith.constant 0 : i32
    %c0_i32_1 = arith.constant 0 : i32
    return %c0_i32, %c0_i32_0 : i32, i32
  }
  func.func @transform_8(%arg0: i32) -> (i32, i32, i32) {
    %c0_i32 = arith.constant 0 : i32
    %c0_i32_0 = arith.constant 0 : i32
    %c0_i32_1 = arith.constant 0 : i32
    return %arg0, %c0_i32, %c0_i32_0 : i32, i32, i32
  }
}

</mosaic_0001>

<bundles_post_ra>
// kernel: _forward_device.1
= control target key start
LH: loop header
LB: loop body
LE: loop exit
PB: predicated region body
PF: predicated region fallthrough
CT: control target
= control target key end

     0   :  { %s14837_s27 = smov 0   ;;  %s19046_s0 = inlined_call_operand.vmem [shape: bf16[32,8,40], index: 0, kind: input, shape index: {}]   ;;  %s19047_s1 = inlined_call_operand.vmem [shape: bf16[32,8,8], index: 1, kind: input, shape index: {}]   ;;  %s19048_s2 = inlined_call_operand.vmem [shape: bf16[32,8,128], index: 2, kind: input, shape index: {}]   ;;  %s19049_s3 = inlined_call_operand.vmem [shape: bf16[40,512], index: 3, kind: input, shape index: {}]   ;;  %s19050_s4 = inlined_call_operand.vmem [shape: bf16[8,512], index: 4, kind: input, shape index: {}]   ;;  %s19051_s5 = inlined_call_operand.vmem [shape: f32[1,512], index: 5, kind: input, shape index: {}]   ;;  %s19052_s6 = inlined_call_operand.vmem [shape: bf16[512,128], index: 6, kind: input, shape index: {}]   ;;  %s19053_s7 = inlined_call_operand.vmem [shape: f32[1,128], index: 7, kind: input, shape index: {}]   ;;  %s19054_s8 = inlined_call_operand.vmem [shape: f32[32,8,128], index: 8, kind: output, shape index: {}]  }
   0x1 LB: > { %s13871_s28 = sadd.s32 4294967295, %s14788_s27   ;;  %p13875_p0 = scmp.ge.s32.totalorder %s14788_s27, 1  ;;  %s14788_s27 = sphi %s14837_s27, %s18_s27  }
   0x2   : > { %p285_p1 = scmp.lt.s32.totalorder %s14788_s27, 3 }
   0x4   : > { %p286_p2 = pnand %p13875_p0, %p285_p1 }
   0x6   : > { %289 = sbr.rel (%p286_p2) target bundleno = 1459 (0x5b3), region = 52 }
   0xb   : > { %v394_v0 = vld [vmem:[%s19049_s3 + $0x40] sm:$0xff]  ;;  %vm533_vm0 = vcmask 1043456   ;;  %v395_v1 = vld [vmem:[%s19049_s3 + $0x48] sm:$0xff]  ;;  %s13876_s11 = sshll.u32 %s13871_s28, 4  ;;  %v19055_v7 = vmov 0   ;;  %vm508_vm1 = vcmask 326656  }
   0xc   : > { %v13901_v2 = vcombine.high %v394_v0, %v394_v0  ;;  %v13903_v3 = vcombine.high %v395_v1, %v395_v1  ;;  %v13900_v4 = vcombine.low %v394_v0, %v394_v0  ;;  %v13902_v5 = vcombine.low %v395_v1, %v395_v1  ;;  %v14712_v6 = vld [vmem:[%s19049_s3 + $0x24] ss:$16 sps:$4 sm:$0xff]   ;;  %578 = vmatprep.mubr.bf16.mxu0 %v19055_v7  ;;  %p330_p3 = scmp.lt.s32.totalorder %s13876_s11, 31  ;;  %v14714_v8 = vld [vmem:[%s19049_s3 + $0x2c] ss:$16 sps:$4 sm:$0xff]  }
   0xd   : > { %691 = vmatprep.mubr.bf16.mxu1 %v19055_v7  ;;  %v14716_v11 = vld [vmem:[%s19049_s3 + $0x20] ss:$16 sps:$4 sm:$0xff]   ;;  %v14717_v12 = vld [vmem:[%s19049_s3 + $0x28] ss:$16 sps:$4 sm:$0xff]   ;;  %v14718_v13 = vld [vmem:[%s19049_s3 + $0x4] ss:$16 sps:$4 sm:$0xff]  }
   0xe   : > { %13904 = vmatprep.subr.msk.bf16.mxu0 %vm533_vm0, %v13901_v2  ;;  %13913 = vmatprep.subr.msk.bf16.mxu1 %vm533_vm0, %v13903_v3  ;;  %v535_v9 = vsel %vm533_vm0, %v13900_v4, 0  ;;  %v541_v10 = vsel %vm533_vm0, %v13902_v5, 0  ;;  %s19512_s11 = smov (!%p330_p3, %s13876_s11), 31  ;;  %v14720_v14 = vld [vmem:[%s19049_s3 + $0xc] ss:$16 sps:$4 sm:$0xff]   ;;  %v964_v15 = vld [vmem:[%s19050_s4] sm:$0xff] }
   0xf   : > { %557 = vmatpush1.bf16.msra.mxu0 %v535_v9  ;;  %670 = vmatpush1.bf16.msra.mxu1 %v541_v10  ;;  %s14878_s24 = sshll.u32 %s19512_s11, 2  ;;  %v965_v16 = vld [vmem:[%s19050_s4 + $0x8] sm:$0xff]  ;;  %v14722_v17 = vld [vmem:[%s19049_s3] ss:$16 sps:$4 sm:$0xff]   ;;  %v13963_v19 = vcombine.high %v964_v15, %v964_v15  ;;  %v13962_v21 = vcombine.low %v964_v15, %v964_v15  ;;  %vm1016_vm2 = vcmask 64512   ;;  %v14744_v38 = vld [vmem:[%s19052_s6 + $0x38] sm:$0xff]   ;;  %v398_v10 = vlaneseq }
  0x10   : > { %558 = vmatprep.subr.bf16.mxu0 %v14712_v6  ;;  %671 = vmatprep.subr.bf16.mxu1 %v14714_v8  ;;  %s14893_s13 = scalar_lea.vmem %s19046_s0, %s14878_s24  ;;  %v14723_v18 = vld [vmem:[%s19049_s3 + $0x8] ss:$16 sps:$4 sm:$0xff]   ;;  %v13965_v20 = vcombine.high %v965_v16, %v965_v16  ;;  %v13964_v22 = vcombine.low %v965_v16, %v965_v16  ;;  %s14909_s18 = scalar_lea.vmem %s19047_s1, %s14878_s24  ;;  %v14746_v40 = vld [vmem:[%s19052_s6 + $0x30] sm:$0xff]   ;;  %v14750_v45 = vld [vmem:[%s19052_s6 + $0x20] sm:$0xff]   ;;  %vm13640_vm3 = vcmask 1041409   ;;  %vm13642_vm4 = vcmask 1042434  }
  0x11   : > { %v14724_v23 = vld [vmem:[%s14893_s13] sm:$0xff]   ;;  %v1042_v24 = vsel %vm533_vm0, %v13962_v21, 0  ;;  %v14729_v26 = vld [vmem:[%s14893_s13 + $0x8] sm:$0xff]   ;;  %v14730_v27 = vld [vmem:[%s14893_s13 + $0x10] sm:$0xff]   ;;  %vm13644_vm5 = vcmask 1043459   ;;  %vm13646_vm6 = vcmask 1044484  }
  0x12   : > { %v1048_v25 = vsel %vm533_vm0, %v13964_v22, 0  ;;  %v14731_v28 = vld [vmem:[%s14893_s13 + $0x18] sm:$0xff]   ;;  %v14732_v29 = vld [vmem:[%s14893_s13 + $0x20] sm:$0xff]   ;;  %v14733_v30 = vld [vmem:[%s14893_s13 + $0x28] sm:$0xff]   ;;  %vm13648_vm7 = vcmask 1045509   ;;  %vm13650_vm8 = vcmask 1046534  }
  0x13   : > { %559 = vmatpush1.bf16.msra.mxu0 %v14716_v11  ;;  %672 = vmatpush1.bf16.msra.mxu1 %v14717_v12  ;;  %v14734_v31 = vld [vmem:[%s14893_s13 + $0x30] sm:$0xff]   ;;  %v14735_v32 = vld [vmem:[%s14893_s13 + $0x38] sm:$0xff]   ;;  %v14736_v33 = vld [vmem:[%s14909_s18] sm:$0xff]   ;;  %v15114_v11 = vshrl.u32 %v398_v10, 7  ;;  %s16545_s13 = scalar_lea.vmem %s19048_s2, %s14878_s24  ;;  %vm13652_vm9 = vcmask 1047559   ;;  %s13883_s24 = sshll.u32 %s19512_s11, 3 }
  0x14   : > { %560 = vmatprep.subr.bf16.mxu0 %v14718_v13  ;;  %673 = vmatprep.subr.bf16.mxu1 %v14720_v14  ;;  %v14737_v34 = vld [vmem:[%s14909_s18 + $0x8] sm:$0xff]   ;;  %v14738_v35 = vld [vmem:[%s14909_s18 + $0x10] sm:$0xff]   ;;  %v14739_v36 = vld [vmem:[%s14909_s18 + $0x18] sm:$0xff]   ;;  %s16878_s15 = scalar_lea.vmem %s19054_s8, %s13883_s24 }
  0x15   : > { %v14740_v37 = vld [vmem:[%s14909_s18 + $0x20] sm:$0xff]   ;;  %v14745_v39 = vld [vmem:[%s19052_s6 + $0xb8] sm:$0xff]   ;;  %v14747_v41 = vld [vmem:[%s19052_s6 + $0xb0] sm:$0xff]   ;;  %v15117_v12 = vsub.s32 0, %v15114_v11  ;;  %v15120_v13 = vsub.s32 2, %v15114_v11  ;;  %v15123_v14 = vsub.s32 1, %v15114_v11 }
  0x16   : > { %v14741_v42 = vld [vmem:[%s14909_s18 + $0x28] sm:$0xff]   ;;  %v14751_v46 = vld [vmem:[%s19052_s6 + $0xa0] sm:$0xff]   ;;  %v14742_v47 = vld [vmem:[%s14909_s18 + $0x30] sm:$0xff]   ;;  %v15126_v15 = vsub.s32 3, %v15114_v11 }
  0x17   : > { %561 = vmatpush1.bf16.msra.mxu0 %v14722_v17  ;;  %674 = vmatpush1.bf16.msra.mxu1 %v14723_v18  ;;  %v14748_v43 = vld [vmem:[%s19052_s6 + $0x28] sm:$0xff]   ;;  %v14752_v48 = vld [vmem:[%s19052_s6 + $0x18] sm:$0xff]   ;;  %v14754_v50 = vld [vmem:[%s19052_s6 + $0x10] sm:$0xff]  }
  0x18   : > { %13966 = vmatprep.subr.msk.bf16.mxu0 %vm533_vm0, %v13963_v19  ;;  %13975 = vmatprep.subr.msk.bf16.mxu1 %vm533_vm0, %v13965_v20  ;;  %v14749_v44 = vld [vmem:[%s19052_s6 + $0xa8] sm:$0xff]   ;;  %v14753_v49 = vld [vmem:[%s19052_s6 + $0x98] sm:$0xff]   ;;  %v14755_v51 = vld [vmem:[%s19052_s6 + $0x90] sm:$0xff]  }
  0x19   : > { %v14743_v52 = vld [vmem:[%s14909_s18 + $0x38] sm:$0xff]   ;;  %v14756_v53 = vld [vmem:[%s19052_s6 + $0x8] sm:$0xff]   ;;  %v14758_v55 = vld [vmem:[%s19052_s6] sm:$0xff]  }
  0x1a   : > { %13905 = vmatmul.mubr.msk.bf16.vlgmr.msra.gmra.mxu0 %vm508_vm1, %v14724_v23  ;;  %13914 = vmatmul.mubr.msk.bf16.vlgmr.msra.gmra.mxu1 %vm508_vm1, %v14724_v23  ;;  %v14757_v54 = vld [vmem:[%s19052_s6 + $0x88] sm:$0xff]   ;;  %v14759_v56 = vld [vmem:[%s19052_s6 + $0x80] sm:$0xff]   ;;  %v14760_v57 = vld [vmem:[%s19052_s6 + $0x78] sm:$0xff]  }
  0x1b   : > { %1068 = vmatpush1.bf16.msra.mxu0 %v1042_v24  ;;  %1181 = vmatpush1.bf16.msra.mxu1 %v1048_v25  ;;  %v14761_v58 = vld [vmem:[%s19052_s6 + $0xf8] sm:$0xff]   ;;  %v14762_v59 = vld [vmem:[%s19052_s6 + $0x70] sm:$0xff]   ;;  %v14764_v61 = vld [vmem:[%s19052_s6 + $0x68] sm:$0xff]  }
  0x1c   : > { %588 = vmatprep.mubr.bf16.mxu0 %v19055_v7  ;;  %701 = vmatprep.mubr.bf16.mxu1 %v19055_v7  ;;  %v14763_v60 = vld [vmem:[%s19052_s6 + $0xf0] sm:$0xff]   ;;  %v14765_v62 = vld [vmem:[%s19052_s6 + $0xe8] sm:$0xff]   ;;  %v14766_v63 = vld [vmem:[%s19052_s6 + $0x60] sm:$0xff]  }
  0x1d   : > { %11366 = vmatprep.subr.bf16.mxu0 %v19055_v7  ;;  %11911 = vmatprep.subr.bf16.mxu1 %v19055_v7  ;;  %v14767_v0 = vld [vmem:[%s19052_s6 + $0xe0] sm:$0xff]   ;;  %v14768_v1 = vld [vmem:[%s19052_s6 + $0x58] sm:$0xff]   ;;  %v14770_v3 = vld [vmem:[%s19052_s6 + $0x50] sm:$0xff]  }
  0x1e   : > { %v14769_v2 = vld [vmem:[%s19052_s6 + $0xd8] sm:$0xff]   ;;  %v14771_v4 = vld [vmem:[%s19052_s6 + $0xd0] sm:$0xff]   ;;  %v14772_v5 = vld [vmem:[%s19052_s6 + $0x48] sm:$0xff]  }
  0x1f   : > { %v14773_v6 = vld [vmem:[%s19052_s6 + $0xc8] sm:$0xff]   ;;  %v14774_v8 = vld [vmem:[%s19052_s6 + $0x40] sm:$0xff]  }
  0x20   : > { %v14775_v9 = vld [vmem:[%s19052_s6 + $0xc0] sm:$0xff]  }
  0x21   : > { %v396_v16 = vld [vmem:[%s19051_s5] sm:$0xf] }
  0x22   : > { %13906 = vmatmul.mubr.msk.bf16.gmra.mxu0 %vm508_vm1, %v14729_v26  ;;  %13915 = vmatmul.mubr.msk.bf16.gmra.mxu1 %vm508_vm1, %v14729_v26  ;;  %v15132_v17 = vrot.slane %v396_v16, %v15117_v12  ;;  %v15135_v18 = vrot.slane %v396_v16, %v15120_v13  ;;  %v15138_v19 = vrot.slane %v396_v16, %v15123_v14 }
  0x23   : > { %598 = vmatprep.mubr.bf16.mxu0 %v19055_v7  ;;  %711 = vmatprep.mubr.bf16.mxu1 %v19055_v7  ;;  %v15141_v20 = vrot.slane %v396_v16, %v15126_v15 }
  0x2a   : > { %13907 = vmatmul.mubr.msk.bf16.gmra.mxu0 %vm508_vm1, %v14730_v27  ;;  %13916 = vmatmul.mubr.msk.bf16.gmra.mxu1 %vm508_vm1, %v14730_v27 }
  0x2b   : > { %608 = vmatprep.mubr.bf16.mxu0 %v19055_v7  ;;  %721 = vmatprep.mubr.bf16.mxu1 %v19055_v7 }
  0x32   : > { %13908 = vmatmul.mubr.msk.bf16.gmra.mxu0 %vm508_vm1, %v14731_v28  ;;  %13917 = vmatmul.mubr.msk.bf16.gmra.mxu1 %vm508_vm1, %v14731_v28 }
  0x33   : > { %618 = vmatprep.mubr.bf16.mxu0 %v19055_v7  ;;  %731 = vmatprep.mubr.bf16.mxu1 %v19055_v7 }
  0x3a   : > { %13909 = vmatmul.mubr.msk.bf16.gmra.mxu0 %vm508_vm1, %v14732_v29  ;;  %13918 = vmatmul.mubr.msk.bf16.gmra.mxu1 %vm508_vm1, %v14732_v29 }
  0x3b   : > { %628 = vmatprep.mubr.bf16.mxu0 %v19055_v7  ;;  %741 = vmatprep.mubr.bf16.mxu1 %v19055_v7 }
  0x42   : > { %13910 = vmatmul.mubr.msk.bf16.gmra.mxu0 %vm508_vm1, %v14733_v30  ;;  %13919 = vmatmul.mubr.msk.bf16.gmra.mxu1 %vm508_vm1, %v14733_v30 }
  0x43   : > { %638 = vmatprep.mubr.bf16.mxu0 %v19055_v7  ;;  %751 = vmatprep.mubr.bf16.mxu1 %v19055_v7 }
  0x4a   : > { %13911 = vmatmul.mubr.msk.bf16.gmra.mxu0 %vm508_vm1, %v14734_v31  ;;  %13920 = vmatmul.mubr.msk.bf16.gmra.mxu1 %vm508_vm1, %v14734_v31 }
  0x4b   : > { %648 = vmatprep.mubr.bf16.mxu0 %v19055_v7  ;;  %761 = vmatprep.mubr.bf16.mxu1 %v19055_v7 }
  0x52   : > { %13912 = vmatmul.mubr.msk.bf16.gmra.mxu0 %vm508_vm1, %v14735_v32  ;;  %13921 = vmatmul.mubr.msk.bf16.gmra.mxu1 %vm508_vm1, %v14735_v32 }
  0x53   : > { %1085 = vmatprep.mubr.bf16.mxu0 %v19055_v7  ;;  %1198 = vmatprep.mubr.bf16.mxu1 %v19055_v7 }
  0x5a   : > { %13967 = vmatmul.mubr.msk.bf16.vlgmr.msra.gmra.mxu0 %vm1016_vm2, %v14736_v33  ;;  %13976 = vmatmul.mubr.msk.bf16.vlgmr.msra.gmra.mxu1 %vm1016_vm2, %v14736_v33 }
  0x5b   : > { %1095 = vmatprep.mubr.bf16.mxu0 %v19055_v7  ;;  %1208 = vmatprep.mubr.bf16.mxu1 %v19055_v7 }
  0x5c   : > { %11367 = vmatpush1.bf16.msra.mxu0 %v14744_v38  ;;  %11912 = vmatpush1.bf16.msra.mxu1 %v14745_v39 }
  0x5d   : > { %11368 = vmatprep.subr.bf16.mxu0 %v19055_v7  ;;  %11913 = vmatprep.subr.bf16.mxu1 %v19055_v7 }
  0x60   : > { %11369 = vmatpush1.bf16.msra.mxu0 %v14746_v40  ;;  %11914 = vmatpush1.bf16.msra.mxu1 %v14747_v41 }
  0x61   : > { %11370 = vmatprep.subr.bf16.mxu0 %v19055_v7  ;;  %11915 = vmatprep.subr.bf16.mxu1 %v19055_v7 }
  0x62   : > { %13968 = vmatmul.mubr.msk.bf16.gmra.mxu0 %vm1016_vm2, %v14737_v34  ;;  %13977 = vmatmul.mubr.msk.bf16.gmra.mxu1 %vm1016_vm2, %v14737_v34 }
  0x63   : > { %1105 = vmatprep.mubr.bf16.mxu0 %v19055_v7  ;;  %1218 = vmatprep.mubr.bf16.mxu1 %v19055_v7 }
  0x64   : > { %11371 = vmatpush1.bf16.msra.mxu0 %v14748_v43  ;;  %11916 = vmatpush1.bf16.msra.mxu1 %v14749_v44 }
  0x65   : > { %11372 = vmatprep.subr.bf16.mxu0 %v19055_v7  ;;  %11917 = vmatprep.subr.bf16.mxu1 %v19055_v7 }
  0x68   : > { %11373 = vmatpush1.bf16.msra.mxu0 %v14750_v45  ;;  %11918 = vmatpush1.bf16.msra.mxu1 %v14751_v46 }
  0x69   : > { %11374 = vmatprep.subr.bf16.mxu0 %v19055_v7  ;;  %11919 = vmatprep.subr.bf16.mxu1 %v19055_v7 }
  0x6a   : > { %13969 = vmatmul.mubr.msk.bf16.gmra.mxu0 %vm1016_vm2, %v14738_v35  ;;  %13978 = vmatmul.mubr.msk.bf16.gmra.mxu1 %vm1016_vm2, %v14738_v35 }
  0x6b   : > { %1115 = vmatprep.mubr.bf16.mxu0 %v19055_v7  ;;  %1228 = vmatprep.mubr.bf16.mxu1 %v19055_v7 }
  0x6c   : > { %11375 = vmatpush1.bf16.msra.mxu0 %v14752_v48  ;;  %11920 = vmatpush1.bf16.msra.mxu1 %v14753_v49 }
  0x6d   : > { %11376 = vmatprep.subr.bf16.mxu0 %v19055_v7  ;;  %11921 = vmatprep.subr.bf16.mxu1 %v19055_v7 }
  0x70   : > { %11377 = vmatpush1.bf16.msra.mxu0 %v14754_v50  ;;  %11922 = vmatpush1.bf16.msra.mxu1 %v14755_v51 }
  0x71   : > { %11378 = vmatprep.subr.bf16.mxu0 %v19055_v7  ;;  %11923 = vmatprep.subr.bf16.mxu1 %v19055_v7 }
  0x72   : > { %13970 = vmatmul.mubr.msk.bf16.gmra.mxu0 %vm1016_vm2, %v14739_v36  ;;  %13979 = vmatmul.mubr.msk.bf16.gmra.mxu1 %vm1016_vm2, %v14739_v36 }
  0x73   : > { %1125 = vmatprep.mubr.bf16.mxu0 %v19055_v7  ;;  %1238 = vmatprep.mubr.bf16.mxu1 %v19055_v7 }
  0x74   : > { %11379 = vmatpush1.bf16.msra.mxu0 %v14756_v53  ;;  %11924 = vmatpush1.bf16.msra.mxu1 %v14757_v54 }
  0x75   : > { %11380 = vmatprep.subr.bf16.mxu0 %v19055_v7  ;;  %11925 = vmatprep.subr.bf16.mxu1 %v19055_v7 }
  0x78   : > { %11381 = vmatpush1.bf16.msra.mxu0 %v14758_v55  ;;  %11926 = vmatpush1.bf16.msra.mxu1 %v14759_v56 }
  0x79   : > { %11382 = vmatprep.subr.bf16.mxu0 %v19055_v7  ;;  %11927 = vmatprep.subr.bf16.mxu1 %v19055_v7 }
  0x7a   : > { %13971 = vmatmul.mubr.msk.bf16.gmra.mxu0 %vm1016_vm2, %v14740_v37  ;;  %13980 = vmatmul.mubr.msk.bf16.gmra.mxu1 %vm1016_vm2, %v14740_v37 }
  0x7b   : > { %1135 = vmatprep.mubr.bf16.mxu0 %v19055_v7  ;;  %1248 = vmatprep.mubr.bf16.mxu1 %v19055_v7 }
  0x7c   : > { %11383 = vmatpush2.bf16.msra.mxu0 %v14760_v57  ;;  %11928 = vmatpush2.bf16.msra.mxu1 %v14761_v58 }
  0x7d   : > { %11384 = vmatprep.subr.bf16.mxu0 %v19055_v7  ;;  %11929 = vmatprep.subr.bf16.mxu1 %v19055_v7 }
  0x80   : > { %11385 = vmatpush2.bf16.msra.mxu0 %v14762_v59  ;;  %11930 = vmatpush2.bf16.msra.mxu1 %v14763_v60 }
  0x81   : > { %11386 = vmatprep.subr.bf16.mxu0 %v19055_v7  ;;  %11931 = vmatprep.subr.bf16.mxu1 %v19055_v7 }
  0x82   : > { %13972 = vmatmul.mubr.msk.bf16.gmra.mxu0 %vm1016_vm2, %v14741_v42  ;;  %13981 = vmatmul.mubr.msk.bf16.gmra.mxu1 %vm1016_vm2, %v14741_v42 }
  0x83   : > { %1145 = vmatprep.mubr.bf16.mxu0 %v19055_v7  ;;  %1258 = vmatprep.mubr.bf16.mxu1 %v19055_v7 }
  0x84   : > { %11387 = vmatpush2.bf16.msra.mxu0 %v14764_v61  ;;  %11932 = vmatpush2.bf16.msra.mxu1 %v14765_v62 }
  0x85   : > { %11388 = vmatprep.subr.bf16.mxu0 %v19055_v7  ;;  %11933 = vmatprep.subr.bf16.mxu1 %v19055_v7 }
  0x88   : > { %11389 = vmatpush2.bf16.msra.mxu0 %v14766_v63  ;;  %11934 = vmatpush2.bf16.msra.mxu1 %v14767_v0 }
  0x89   : > { %11390 = vmatprep.subr.bf16.mxu0 %v19055_v7  ;;  %11935 = vmatprep.subr.bf16.mxu1 %v19055_v7 }
  0x8a   : > { %13973 = vmatmul.mubr.msk.bf16.gmra.mxu0 %vm1016_vm2, %v14742_v47  ;;  %13982 = vmatmul.mubr.msk.bf16.gmra.mxu1 %vm1016_vm2, %v14742_v47 }
  0x8b   : > { %1155 = vmatprep.mubr.bf16.mxu0 %v19055_v7  ;;  %1268 = vmatprep.mubr.bf16.mxu1 %v19055_v7 }
  0x8c   : > { %11391 = vmatpush2.bf16.msra.mxu0 %v14768_v1  ;;  %11936 = vmatpush2.bf16.msra.mxu1 %v14769_v2 }
  0x8d   : > { %11392 = vmatprep.subr.bf16.mxu0 %v19055_v7  ;;  %11937 = vmatprep.subr.bf16.mxu1 %v19055_v7 }
  0x90   : > { %11393 = vmatpush2.bf16.msra.mxu0 %v14770_v3  ;;  %11938 = vmatpush2.bf16.msra.mxu1 %v14771_v4 }
  0x91   : > { %11394 = vmatprep.subr.bf16.mxu0 %v19055_v7  ;;  %11939 = vmatprep.subr.bf16.mxu1 %v19055_v7 }
  0x92   : > { %13974 = vmatmul.mubr.msk.bf16.gmra.mxu0 %vm1016_vm2, %v14743_v52  ;;  %13983 = vmatmul.mubr.msk.bf16.gmra.mxu1 %vm1016_vm2, %v14743_v52 }
  0x94   : > { %11395 = vmatpush2.bf16.msra.mxu0 %v14772_v5  ;;  %11940 = vmatpush2.bf16.msra.mxu1 %v14773_v6 }
  0x95   : > { %11396 = vmatprep.subr.bf16.mxu0 %v19055_v7  ;;  %11941 = vmatprep.subr.bf16.mxu1 %v19055_v7 }
  0x98   : > { %11397 = vmatpush2.bf16.msra.mxu0 %v14774_v8  ;;  %11942 = vmatpush2.bf16.msra.mxu1 %v14775_v9 }
  0xda   : > { %v580_v21 = vpop.f32.mrf.mxu0  ;;  %v693_v22 = vpop.f32.mrf.mxu1 }
  0xdb   : > { %v581_v25 = vadd.f32 %v580_v21, %v15132_v17  ;;  %v694_v26 = vadd.f32 %v693_v22, %v15135_v18 }
  0xdc   : > { %v582_v23 = vpop.f32.mrf.mxu0  ;;  %v695_v24 = vpop.f32.mrf.mxu1 }
  0xdd   : > { %v583_v27 = vadd.f32 %v582_v23, %v15138_v19  ;;  %v696_v28 = vadd.f32 %v695_v24, %v15141_v20 }
  0xde   : > { %v584_v29 = vpop.f32.mrf.mxu0  ;;  %v697_v30 = vpop.f32.mrf.mxu1 }
  0xdf   : > { %v15147_v31 = vpack.c.bf16 %v583_v27, %v581_v25  ;;  %v15149_v32 = vpack.c.bf16 %v696_v28, %v694_v26  ;;  %v585_v33 = vadd.f32 %v584_v29, %v15132_v17  ;;  %v698_v34 = vadd.f32 %v697_v30, %v15135_v18 }
  0xe0   : > { %v586_v35 = vpop.f32.mrf.mxu0  ;;  %v699_v36 = vpop.f32.mrf.mxu1 }
  0xe1   : > { %v587_v37 = vadd.f32 %v586_v35, %v15138_v19  ;;  %v700_v38 = vadd.f32 %v699_v36, %v15141_v20 }
  0xe2   : > { %v590_v39 = vpop.f32.mrf.mxu0  ;;  %v703_v40 = vpop.f32.mrf.mxu1 }
  0xe3   : > { %v15155_v41 = vpack.c.bf16 %v587_v37, %v585_v33  ;;  %v15157_v42 = vpack.c.bf16 %v700_v38, %v698_v34  ;;  %v591_v43 = vadd.f32 %v590_v39, %v15132_v17  ;;  %v704_v44 = vadd.f32 %v703_v40, %v15135_v18 }
  0xe4   : > { %v592_v45 = vpop.f32.mrf.mxu0  ;;  %v705_v46 = vpop.f32.mrf.mxu1 }
  0xe5   : > { %v593_v47 = vadd.f32 %v592_v45, %v15138_v19  ;;  %v706_v48 = vadd.f32 %v705_v46, %v15141_v20 }
  0xe6   : > { %v594_v49 = vpop.f32.mrf.mxu0  ;;  %v707_v50 = vpop.f32.mrf.mxu1 }
  0xe7   : > { %v15163_v51 = vpack.c.bf16 %v593_v47, %v591_v43  ;;  %v15165_v52 = vpack.c.bf16 %v706_v48, %v704_v44  ;;  %v595_v53 = vadd.f32 %v594_v49, %v15132_v17  ;;  %v708_v54 = vadd.f32 %v707_v50, %v15135_v18 }
  0xe8   : > { %v596_v55 = vpop.f32.mrf.mxu0  ;;  %v709_v56 = vpop.f32.mrf.mxu1 }
  0xe9   : > { %v597_v57 = vadd.f32 %v596_v55, %v15138_v19  ;;  %v710_v58 = vadd.f32 %v709_v56, %v15141_v20 }
  0xea   : > { %v600_v59 = vpop.f32.mrf.mxu0  ;;  %v713_v60 = vpop.f32.mrf.mxu1 }
  0xeb   : > { %v15171_v61 = vpack.c.bf16 %v597_v57, %v595_v53  ;;  %v15173_v62 = vpack.c.bf16 %v710_v58, %v708_v54  ;;  %v601_v63 = vadd.f32 %v600_v59, %v15132_v17  ;;  %v714_v0 = vadd.f32 %v713_v60, %v15135_v18 }
  0xec   : > { %v602_v1 = vpop.f32.mrf.mxu0  ;;  %v715_v2 = vpop.f32.mrf.mxu1 }
  0xed   : > { %19184 = vst [vmem:[#allocation2_spill] sm:$0xff] %v15171_v61  ;;  %19185 = vst [vmem:[#allocation3_spill] sm:$0xff] %v15173_v62  ;;  %v603_v3 = vadd.f32 %v602_v1, %v15138_v19  ;;  %v716_v4 = vadd.f32 %v715_v2, %v15141_v20 }
  0xee   : > { %v604_v5 = vpop.f32.mrf.mxu0  ;;  %v717_v6 = vpop.f32.mrf.mxu1 }
  0xef   : > { %v15179_v8 = vpack.c.bf16 %v603_v3, %v601_v63  ;;  %v15181_v9 = vpack.c.bf16 %v716_v4, %v714_v0  ;;  %v605_v10 = vadd.f32 %v604_v5, %v15132_v17  ;;  %v718_v16 = vadd.f32 %v717_v6, %v15135_v18 }
  0xf0   : > { %v606_v21 = vpop.f32.mrf.mxu0  ;;  %v719_v22 = vpop.f32.mrf.mxu1 }
  0xf1   : > { %19186 = vst [vmem:[#allocation4_spill] sm:$0xff] %v15179_v8  ;;  %19187 = vst [vmem:[#allocation5_spill] sm:$0xff] %v15181_v9  ;;  %v607_v23 = vadd.f32 %v606_v21, %v15138_v19  ;;  %v720_v24 = vadd.f32 %v719_v22, %v15141_v20 }
  0xf2   : > { %v610_v25 = vpop.f32.mrf.mxu0  ;;  %v723_v26 = vpop.f32.mrf.mxu1 }
  0xf3   : > { %v15187_v27 = vpack.c.bf16 %v607_v23, %v605_v10  ;;  %v15189_v28 = vpack.c.bf16 %v720_v24, %v718_v16  ;;  %v611_v29 = vadd.f32 %v610_v25, %v15132_v17  ;;  %v724_v30 = vadd.f32 %v723_v26, %v15135_v18 }
  0xf4   : > { %v612_v33 = vpop.f32.mrf.mxu0  ;;  %v725_v34 = vpop.f32.mrf.mxu1 }
  0xf5   : > { %19188 = vst [vmem:[#allocation6_spill] sm:$0xff] %v15187_v27  ;;  %19189 = vst [vmem:[#allocation7_spill] sm:$0xff] %v15189_v28  ;;  %v613_v35 = vadd.f32 %v612_v33, %v15138_v19  ;;  %v726_v36 = vadd.f32 %v725_v34, %v15141_v20 }
  0xf6   : > { %v614_v37 = vpop.f32.mrf.mxu0  ;;  %v727_v38 = vpop.f32.mrf.mxu1 }
  0xf7   : > { %v15195_v39 = vpack.c.bf16 %v613_v35, %v611_v29  ;;  %v15197_v40 = vpack.c.bf16 %v726_v36, %v724_v30  ;;  %v615_v43 = vadd.f32 %v614_v37, %v15132_v17  ;;  %v728_v44 = vadd.f32 %v727_v38, %v15135_v18 }
  0xf8   : > { %v616_v45 = vpop.f32.mrf.mxu0  ;;  %v729_v46 = vpop.f32.mrf.mxu1 }
  0xf9   : > { %19190 = vst [vmem:[#allocation8_spill] sm:$0xff] %v15195_v39  ;;  %19191 = vst [vmem:[#allocation9_spill] sm:$0xff] %v15197_v40  ;;  %v617_v47 = vadd.f32 %v616_v45, %v15138_v19  ;;  %v730_v48 = vadd.f32 %v729_v46, %v15141_v20 }
  0xfa   : > { %v620_v49 = vpop.f32.mrf.mxu0  ;;  %v733_v50 = vpop.f32.mrf.mxu1 }
  0xfb   : > { %v15203_v53 = vpack.c.bf16 %v617_v47, %v615_v43  ;;  %v15205_v54 = vpack.c.bf16 %v730_v48, %v728_v44  ;;  %v621_v55 = vadd.f32 %v620_v49, %v15132_v17  ;;  %v734_v56 = vadd.f32 %v733_v50, %v15135_v18 }
  0xfc   : > { %v622_v57 = vpop.f32.mrf.mxu0  ;;  %v735_v58 = vpop.f32.mrf.mxu1 }
  0xfd   : > { %19192 = vst [vmem:[#allocation10_spill] sm:$0xff] %v15203_v53  ;;  %19193 = vst [vmem:[#allocation11_spill] sm:$0xff] %v15205_v54  ;;  %v623_v59 = vadd.f32 %v622_v57, %v15138_v19  ;;  %v736_v60 = vadd.f32 %v735_v58, %v15141_v20 }
  0xfe   : > { %v624_v63 = vpop.f32.mrf.mxu0  ;;  %v737_v0 = vpop.f32.mrf.mxu1 }
  0xff   : > { %v15211_v1 = vpack.c.bf16 %v623_v59, %v621_v55  ;;  %v15213_v2 = vpack.c.bf16 %v736_v60, %v734_v56  ;;  %v625_v3 = vadd.f32 %v624_v63, %v15132_v17  ;;  %v738_v4 = vadd.f32 %v737_v0, %v15135_v18 }
 0x100   : > { %v626_v5 = vpop.f32.mrf.mxu0  ;;  %v739_v6 = vpop.f32.mrf.mxu1 }
 0x101   : > { %19194 = vst [vmem:[#allocation12_spill] sm:$0xff] %v15211_v1  ;;  %19195 = vst [vmem:[#allocation13_spill] sm:$0xff] %v15213_v2  ;;  %v627_v10 = vadd.f32 %v626_v5, %v15138_v19  ;;  %v740_v16 = vadd.f32 %v739_v6, %v15141_v20 }
 0x102   : > { %v630_v21 = vpop.f32.mrf.mxu0  ;;  %v743_v22 = vpop.f32.mrf.mxu1 }
 0x103   : > { %v15219_v23 = vpack.c.bf16 %v627_v10, %v625_v3  ;;  %v15221_v24 = vpack.c.bf16 %v740_v16, %v738_v4  ;;  %v631_v25 = vadd.f32 %v630_v21, %v15132_v17  ;;  %v744_v26 = vadd.f32 %v743_v22, %v15135_v18 }
 0x104   : > { %v632_v29 = vpop.f32.mrf.mxu0  ;;  %v745_v30 = vpop.f32.mrf.mxu1 }
 0x105   : > { %19196 = vst [vmem:[#allocation14_spill] sm:$0xff] %v15219_v23  ;;  %19197 = vst [vmem:[#allocation15_spill] sm:$0xff] %v15221_v24  ;;  %v633_v33 = vadd.f32 %v632_v29, %v15138_v19  ;;  %v746_v34 = vadd.f32 %v745_v30, %v15141_v20 }
 0x106   : > { %v634_v35 = vpop.f32.mrf.mxu0  ;;  %v747_v36 = vpop.f32.mrf.mxu1 }
 0x107   : > { %v15227_v37 = vpack.c.bf16 %v633_v33, %v631_v25  ;;  %v15229_v38 = vpack.c.bf16 %v746_v34, %v744_v26  ;;  %v635_v43 = vadd.f32 %v634_v35, %v15132_v17  ;;  %v748_v44 = vadd.f32 %v747_v36, %v15135_v18 }
 0x108   : > { %v636_v45 = vpop.f32.mrf.mxu0  ;;  %v749_v46 = vpop.f32.mrf.mxu1  ;;  %v14791_v33 = vmov 1966171168  }
 0x109   : > { %19198 = vst [vmem:[#allocation16_spill] sm:$0xff] %v15227_v37  ;;  %19199 = vst [vmem:[#allocation17_spill] sm:$0xff] %v15229_v38  ;;  %v637_v47 = vadd.f32 %v636_v45, %v15138_v19  ;;  %v750_v48 = vadd.f32 %v749_v46, %v15141_v20  ;;  %v1348_v34 = vunpack.c.l.s4 %v14791_v33 }
 0x10a   : > { %v640_v49 = vpop.f32.mrf.mxu0  ;;  %v753_v50 = vpop.f32.mrf.mxu1 }
 0x10b   : > { %v15235_v55 = vpack.c.bf16 %v637_v47, %v635_v43  ;;  %v15237_v56 = vpack.c.bf16 %v750_v48, %v748_v44  ;;  %v641_v57 = vadd.f32 %v640_v49, %v15132_v17  ;;  %v754_v58 = vadd.f32 %v753_v50, %v15135_v18 }
 0x10c   : > { %v642_v59 = vpop.f32.mrf.mxu0  ;;  %v755_v60 = vpop.f32.mrf.mxu1 }
 0x10d   : > { %19200 = vst [vmem:[#allocation18_spill] sm:$0xff] %v15235_v55  ;;  %19201 = vst [vmem:[#allocation19_spill] sm:$0xff] %v15237_v56  ;;  %v643_v63 = vadd.f32 %v642_v59, %v15138_v19  ;;  %v756_v0 = vadd.f32 %v755_v60, %v15141_v20 }
 0x10e   : > { %v644_v3 = vpop.f32.mrf.mxu0  ;;  %v757_v4 = vpop.f32.mrf.mxu1 }
 0x10f   : > { %v15243_v5 = vpack.c.bf16 %v643_v63, %v641_v57  ;;  %v15245_v6 = vpack.c.bf16 %v756_v0, %v754_v58  ;;  %v645_v10 = vadd.f32 %v644_v3, %v15132_v17  ;;  %v758_v16 = vadd.f32 %v757_v4, %v15135_v18 }
 0x110   : > { %v646_v21 = vpop.f32.mrf.mxu0  ;;  %v759_v22 = vpop.f32.mrf.mxu1  ;;  %v1349_v57 = vunpack.c.0.s8 %v1348_v34 }
 0x111   : > { %19202 = vst [vmem:[#allocation20_spill] sm:$0xff] %v15243_v5  ;;  %19203 = vst [vmem:[#allocation21_spill] sm:$0xff] %v15245_v6  ;;  %v647_v25 = vadd.f32 %v646_v21, %v15138_v19  ;;  %v760_v26 = vadd.f32 %v759_v22, %v15141_v20 }
 0x112   : > { %v650_v29 = vpop.f32.mrf.mxu0  ;;  %v763_v30 = vpop.f32.mrf.mxu1 }
 0x113   : > { %v15251_v35 = vpack.c.bf16 %v647_v25, %v645_v10  ;;  %v15253_v36 = vpack.c.bf16 %v760_v26, %v758_v16  ;;  %v651_v43 = vadd.f32 %v650_v29, %v15132_v17  ;;  %v764_v44 = vadd.f32 %v763_v30, %v15135_v18 }
 0x114   : > { %v652_v45 = vpop.f32.mrf.mxu0  ;;  %v765_v46 = vpop.f32.mrf.mxu1  ;;  %v15272_v26 = vsub.s32 %v1349_v57, %v15114_v11 }
 0x115   : > { %19204 = vst [vmem:[#allocation22_spill] sm:$0xff] %v15251_v35  ;;  %19205 = vst [vmem:[#allocation23_spill] sm:$0xff] %v15253_v36  ;;  %v653_v47 = vadd.f32 %v652_v45, %v15138_v19  ;;  %v766_v48 = vadd.f32 %v765_v46, %v15141_v20 }
 0x116   : > { %v654_v49 = vpop.f32.mrf.mxu0  ;;  %v767_v50 = vpop.f32.mrf.mxu1 }
 0x117   : > { %v15259_v58 = vpack.c.bf16 %v653_v47, %v651_v43  ;;  %v15261_v59 = vpack.c.bf16 %v766_v48, %v764_v44  ;;  %v655_v60 = vadd.f32 %v654_v49, %v15132_v17  ;;  %v768_v63 = vadd.f32 %v767_v50, %v15135_v18 }
 0x118   : > { %v656_v0 = vpop.f32.mrf.mxu0  ;;  %v769_v3 = vpop.f32.mrf.mxu1 }
 0x119   : > { %19206 = vst [vmem:[#allocation24_spill] sm:$0xff] %v15259_v58  ;;  %19207 = vst [vmem:[#allocation25_spill] sm:$0xff] %v15261_v59  ;;  %v657_v4 = vadd.f32 %v656_v0, %v15138_v19  ;;  %v770_v10 = vadd.f32 %v769_v3, %v15141_v20 }
 0x11a   : > { %v1087_v16 = vpop.f32.mrf.mxu0  ;;  %v1200_v21 = vpop.f32.mrf.mxu1 }
 0x11b   : > { %v15267_v22 = vpack.c.bf16 %v657_v4, %v655_v60  ;;  %v15269_v25 = vpack.c.bf16 %v770_v10, %v768_v63 }
 0x11c   : > { %v1089_v29 = vpop.f32.mrf.mxu0  ;;  %v1202_v30 = vpop.f32.mrf.mxu1 }
 0x11d   : > { %19208 = vst [vmem:[#allocation26_spill] sm:$0xff] %v15267_v22  ;;  %19209 = vst [vmem:[#allocation27_spill] sm:$0xff] %v15269_v25  ;;  %v13984_v17 = vpack.c.bf16 %v1089_v29, %v1087_v16  ;;  %v13986_v33 = vpack.c.bf16 %v1202_v30, %v1200_v21 }
 0x11e   : > { %v1091_v18 = vpop.f32.mrf.mxu0  ;;  %v1204_v34 = vpop.f32.mrf.mxu1 }
 0x11f   : > { %v1353_v43 = vrot.slane %v13984_v17, %v15272_v26  ;;  %v1367_v19 = vrot.slane %v13986_v33, %v15272_v26 }
 0x120   : > { %v1093_v20 = vpop.f32.mrf.mxu0  ;;  %v1206_v44 = vpop.f32.mrf.mxu1 }
 0x121   : > { %v1375_v45 = vcombine.low %v1353_v43, %v1367_v19  ;;  %v1376_v46 = vcombine.high %v1353_v43, %v1367_v19  ;;  %v13985_v47 = vpack.c.bf16 %v1093_v20, %v1091_v18  ;;  %v13987_v48 = vpack.c.bf16 %v1206_v44, %v1204_v34 }
 0x122   : > { %v1097_v49 = vpop.f32.mrf.mxu0  ;;  %v1210_v50 = vpop.f32.mrf.mxu1 }
 0x123   : > { %v1385_v11 = vrot.slane %v1375_v45, %v15272_v26  ;;  %v1399_v57 = vrot.slane %v1376_v46, %v15272_v26  ;;  %v1360_v60 = vrot.slane %v13985_v47, %v15272_v26  ;;  %v1374_v63 = vrot.slane %v13987_v48, %v15272_v26 }
 0x124   : > { %v1099_v0 = vpop.f32.mrf.mxu0  ;;  %v1212_v3 = vpop.f32.mrf.mxu1 }
 0x125   : > { %v1407_v4 = vcombine.high %v1385_v11, %v1385_v11  ;;  %v1409_v10 = vcombine.high %v1399_v57, %v1399_v57  ;;  %v1888_v16 = vunpack.i.h.s16 %v1385_v11  ;;  %v1890_v21 = vunpack.i.h.s16 %v1399_v57 }
 0x126   : > { %v1377_v29 = vcombine.low %v1360_v60, %v1374_v63  ;;  %v1378_v30 = vcombine.high %v1360_v60, %v1374_v63  ;;  %v1101_v17 = vpop.f32.mrf.mxu0  ;;  %v1214_v33 = vpop.f32.mrf.mxu1  ;;  %v15282_v45 = vpack.i.b16 %v1385_v11, %v1385_v11  ;;  %v15284_v46 = vpack.i.b16 %v1399_v57, %v1399_v57 }
 0x127   : > { %v1892_v18 = vunpack.i.h.s16 %v1407_v4  ;;  %v1894_v34 = vunpack.i.h.s16 %v1409_v10  ;;  %v13988_v47 = vpack.c.bf16 %v1099_v0, %v1097_v49  ;;  %v13990_v48 = vpack.c.bf16 %v1212_v3, %v1210_v50 }
 0x128   : > { %v1392_v43 = vrot.slane %v1377_v29, %v15272_v26  ;;  %v1406_v19 = vrot.slane %v1378_v30, %v15272_v26  ;;  %v1103_v20 = vpop.f32.mrf.mxu0  ;;  %v1216_v44 = vpop.f32.mrf.mxu1  ;;  %v15286_v7 = vpack.i.b16 %v1888_v16, %v1888_v16  ;;  %v15288_v25 = vpack.i.b16 %v1890_v21, %v1890_v21 }
 0x129   : > { %v1421_v30 = vrot.slane %v13988_v47, %v15272_v26  ;;  %v1435_v36 = vrot.slane %v13990_v48, %v15272_v26  ;;  %v15292_v11 = vpack.i.b16 %v1407_v4, %v1407_v4  ;;  %v15294_v57 = vpack.i.b16 %v1892_v18, %v1892_v18 }
 0x12a   : > { %v1408_v60 = vcombine.high %v1392_v43, %v1392_v43  ;;  %v1410_v63 = vcombine.high %v1406_v19, %v1406_v19  ;;  %v1107_v22 = vpop.f32.mrf.mxu0  ;;  %v1220_v59 = vpop.f32.mrf.mxu1  ;;  %v1896_v58 = vunpack.i.h.s16 %v1392_v43  ;;  %v1898_v29 = vunpack.i.h.s16 %v1406_v19 }
 0x12b   : > { %v15296_v49 = vpack.i.b16 %v1409_v10, %v1409_v10  ;;  %v15298_v50 = vpack.i.b16 %v1894_v34, %v1894_v34  ;;  %v15300_v16 = vpack.i.b16 %v1392_v43, %v1392_v43  ;;  %v15302_v21 = vpack.i.b16 %v1406_v19, %v1406_v19 }
 0x12c   : > { %v1109_v0 = vpop.f32.mrf.mxu0  ;;  %v1222_v3 = vpop.f32.mrf.mxu1  ;;  %v1443_v35 = vcombine.low %v1421_v30, %v1435_v36  ;;  %v1444_v6 = vcombine.high %v1421_v30, %v1435_v36  ;;  %v1900_v5 = vunpack.i.h.s16 %v1408_v60  ;;  %v1902_v47 = vunpack.i.h.s16 %v1410_v63 }
 0x12d   : > { %v13989_v56 = vpack.c.bf16 %v1103_v20, %v1101_v17  ;;  %v13991_v48 = vpack.c.bf16 %v1216_v44, %v1214_v33  ;;  %v15304_v4 = vpack.i.b16 %v1896_v58, %v1896_v58  ;;  %v15306_v18 = vpack.i.b16 %v1898_v29, %v1898_v29 }
 0x12e   : > { %v1453_v10 = vrot.slane %v1443_v35, %v15272_v26  ;;  %v1467_v34 = vrot.slane %v1444_v6, %v15272_v26  ;;  %v15310_v55 = vpack.i.b16 %v1408_v60, %v1408_v60  ;;  %v15312_v43 = vpack.i.b16 %v1410_v63, %v1410_v63  ;;  %v1111_v30 = vpop.f32.mrf.mxu0  ;;  %v1224_v38 = vpop.f32.mrf.mxu1 }
 0x12f   : > { %v1428_v19 = vrot.slane %v13989_v56, %v15272_v26  ;;  %v1442_v36 = vrot.slane %v13991_v48, %v15272_v26  ;;  %v13992_v58 = vpack.c.bf16 %v1109_v0, %v1107_v22  ;;  %v13994_v20 = vpack.c.bf16 %v1222_v3, %v1220_v59 }
 0x130   : > { %v1475_v17 = vcombine.high %v1453_v10, %v1453_v10  ;;  %v1477_v33 = vcombine.high %v1467_v34, %v1467_v34  ;;  %v1904_v44 = vunpack.i.h.s16 %v1453_v10  ;;  %v1906_v29 = vunpack.i.h.s16 %v1467_v34  ;;  %v1113_v0 = vpop.f32.mrf.mxu0  ;;  %v1226_v3 = vpop.f32.mrf.mxu1 }
 0x131   : > { %v1445_v37 = vcombine.low %v1428_v19, %v1442_v36  ;;  %v1446_v35 = vcombine.high %v1428_v19, %v1442_v36  ;;  %v15316_v24 = vpack.i.b16 %v1900_v5, %v1900_v5  ;;  %v15318_v6 = vpack.i.b16 %v1902_v47, %v1902_v47 }
 0x132   : > { %v15322_v60 = vrot.slane %v15282_v45, %v15117_v12  ;;  %v15326_v56 = vrot.slane %v15282_v45, %v15123_v14  ;;  %v1908_v63 = vunpack.i.h.s16 %v1475_v17  ;;  %v1910_v48 = vunpack.i.h.s16 %v1477_v33 }
 0x133   : > { %v1460_v59 = vrot.slane %v1445_v37, %v15272_v26  ;;  %v1474_v22 = vrot.slane %v1446_v35, %v15272_v26  ;;  %v15330_v5 = vpack.i.b16 %v1453_v10, %v1453_v10  ;;  %v15332_v47 = vpack.i.b16 %v1467_v34, %v1467_v34 }
 0x134   : > { %v1489_v19 = vrot.slane %v13992_v58, %v15272_v26  ;;  %v1503_v36 = vrot.slane %v13994_v20, %v15272_v26  ;;  %v15336_v23 = vpack.i.b16 %v1904_v44, %v1904_v44  ;;  %v15338_v2 = vpack.i.b16 %v1906_v29, %v1906_v29  ;;  %v1117_v58 = vpop.f32.mrf.mxu0  ;;  %v1230_v20 = vpop.f32.mrf.mxu1 }
 0x135   : > { %v1476_v1 = vcombine.high %v1460_v59, %v1460_v59  ;;  %v1478_v54 = vcombine.high %v1474_v22, %v1474_v22  ;;  %v1912_v53 = vunpack.i.h.s16 %v1460_v59  ;;  %v1914_v37 = vunpack.i.h.s16 %v1474_v22 }
 0x136   : > { %v1511_v40 = vcombine.low %v1489_v19, %v1503_v36  ;;  %v1512_v35 = vcombine.high %v1489_v19, %v1503_v36  ;;  %v15340_v39 = vpack.i.b16 %v1475_v17, %v1475_v17  ;;  %v15342_v10 = vpack.i.b16 %v1908_v63, %v1908_v63 }
 0x137   : > { %v15344_v34 = vpack.i.b16 %v1477_v33, %v1477_v33  ;;  %v15346_v28 = vpack.i.b16 %v1910_v48, %v1910_v48  ;;  %v1916_v44 = vunpack.i.h.s16 %v1476_v1  ;;  %v1918_v27 = vunpack.i.h.s16 %v1478_v54 }
 0x138   : > { %19210 = vst [vmem:[#allocation28_spill] sm:$0xff] %v15342_v10  ;;  %v1521_v29 = vrot.slane %v1511_v40, %v15272_v26  ;;  %v1535_v9 = vrot.slane %v1512_v35, %v15272_v26  ;;  %v15350_v8 = vpack.i.b16 %v1460_v59, %v1460_v59  ;;  %v15352_v62 = vpack.i.b16 %v1474_v22, %v1474_v22  ;;  %v1119_v10 = vpop.f32.mrf.mxu0  ;;  %v1232_v35 = vpop.f32.mrf.mxu1 }
 0x139   : > { %19211 = vst [vmem:[#allocation29_spill] sm:$0xff] %v15344_v34  ;;  %19212 = vst [vmem:[#allocation30_spill] sm:$0xff] %v15346_v28  ;;  %v13993_v17 = vpack.c.bf16 %v1113_v0, %v1111_v30  ;;  %v13995_v19 = vpack.c.bf16 %v1226_v3, %v1224_v38  ;;  %v15354_v63 = vpack.i.b16 %v1912_v53, %v1912_v53 }
 0x13a   : > { %19213 = vst [vmem:[#allocation31_spill] sm:$0xff] %v15352_v62  ;;  %v15356_v33 = vpack.i.b16 %v1914_v37, %v1914_v37  ;;  %v1543_v48 = vcombine.high %v1521_v29, %v1521_v29  ;;  %v1545_v36 = vcombine.high %v1535_v9, %v1535_v9  ;;  %v1920_v61 = vunpack.i.h.s16 %v1521_v29 }
 0x13b   : > { %19214 = vst [vmem:[#allocation32_spill] sm:$0xff] %v15354_v63  ;;  %v1922_v28 = vunpack.i.h.s16 %v1535_v9  ;;  %v1496_v34 = vrot.slane %v13993_v17, %v15272_v26  ;;  %v1510_v40 = vrot.slane %v13995_v19, %v15272_v26  ;;  %v15360_v59 = vpack.i.b16 %v1476_v1, %v1476_v1 }
 0x13c   : > { %19215 = vst [vmem:[#allocation33_spill] sm:$0xff] %v15356_v33  ;;  %v15362_v22 = vpack.i.b16 %v1916_v44, %v1916_v44  ;;  %v15364_v30 = vpack.i.b16 %v1478_v54, %v1478_v54  ;;  %v15366_v53 = vpack.i.b16 %v1918_v27, %v1918_v27  ;;  %v15368_v38 = vpack.i.b16 %v1521_v29, %v1521_v29 }
 0x13d   : > { %v15370_v0 = vpack.i.b16 %v1535_v9, %v1535_v9  ;;  %v1513_v3 = vcombine.low %v1496_v34, %v1510_v40  ;;  %v1514_v37 = vcombine.high %v1496_v34, %v1510_v40  ;;  %v1924_v33 = vunpack.i.h.s16 %v1543_v48 }
 0x13e   : > { %19216 = vst [vmem:[#allocation34_spill] sm:$0xff] %v15366_v53  ;;  %19217 = vst [vmem:[#allocation35_spill] sm:$0xff] %v15368_v38  ;;  %v1926_v17 = vunpack.i.h.s16 %v1545_v36  ;;  %v13996_v62 = vpack.c.bf16 %v1119_v10, %v1117_v58  ;;  %v13998_v19 = vpack.c.bf16 %v1232_v35, %v1230_v20  ;;  %v15372_v63 = vpack.i.b16 %v1920_v61, %v1920_v61 }
 0x13f   : > { %19218 = vst [vmem:[#allocation36_spill] sm:$0xff] %v15370_v0  ;;  %v15374_v1 = vpack.i.b16 %v1922_v28, %v1922_v28  ;;  %v1528_v44 = vrot.slane %v1513_v3, %v15272_v26  ;;  %v1542_v54 = vrot.slane %v1514_v37, %v15272_v26  ;;  %v15378_v27 = vpack.i.b16 %v1543_v48, %v1543_v48 }
 0x140   : > { %19219 = vst [vmem:[#allocation37_spill] sm:$0xff] %v15372_v63  ;;  %v15380_v29 = vpack.i.b16 %v1545_v36, %v1545_v36  ;;  %v1557_v9 = vrot.slane %v13996_v62, %v15272_v26  ;;  %v1571_v34 = vrot.slane %v13998_v19, %v15272_v26  ;;  %v4192_v28 = vpack.i.b16 %v15322_v60, %v15322_v60 }
 0x141   : > { %19220 = vst [vmem:[#allocation38_spill] sm:$0xff] %v15374_v1  ;;  %19221 = vst [vmem:[#allocation39_spill] sm:$0xff] %v15378_v27  ;;  %v1544_v40 = vcombine.high %v1528_v44, %v1528_v44  ;;  %v1546_v0 = vcombine.high %v1542_v54, %v1542_v54  ;;  %v1928_v10 = vunpack.i.h.s16 %v1528_v44  ;;  %v1930_v58 = vunpack.i.h.s16 %v1542_v54 }
 0x142   : > { %19222 = vst [vmem:[#allocation40_spill] sm:$0xff] %v15380_v29  ;;  %v1579_v61 = vcombine.low %v1557_v9, %v1571_v34  ;;  %v1580_v20 = vcombine.high %v1557_v9, %v1571_v34  ;;  %v4199_v35 = vpack.i.b16 %v15326_v56, %v15326_v56  ;;  %v15388_v48 = vpack.i.b16 %v1924_v33, %v1924_v33 }
 0x143   : > { %v15390_v36 = vpack.i.b16 %v1926_v17, %v1926_v17  ;;  %v2162_v62 = vrot.slane %v15286_v7, %v15117_v12  ;;  %v2166_v3 = vrot.slane %v15286_v7, %v15123_v14  ;;  %v1932_v37 = vunpack.i.h.s16 %v1544_v40  ;;  %v1121_v17 = vpop.f32.mrf.mxu0 }
 0x144   : > { %19223 = vst [vmem:[#allocation41_spill] sm:$0xff] %v15388_v48  ;;  %v1934_v19 = vunpack.i.h.s16 %v1546_v0  ;;  %v1589_v9 = vrot.slane %v1579_v61, %v15272_v26  ;;  %v1603_v34 = vrot.slane %v1580_v20, %v15272_v26  ;;  %v15398_v60 = vpack.i.b16 %v1528_v44, %v1528_v44 }
 0x145   : > { %19224 = vst [vmem:[#allocation42_spill] sm:$0xff] %v15390_v36  ;;  %v15400_v29 = vpack.i.b16 %v1928_v10, %v1928_v10  ;;  %v15402_v56 = vpack.i.b16 %v1542_v54, %v1542_v54  ;;  %v15404_v33 = vpack.i.b16 %v1930_v58, %v1930_v58  ;;  %v1234_v36 = vpop.f32.mrf.mxu1  ;;  %v4197_v1 = vrot.slane %v4192_v28, %v15117_v12 }
 0x146   : > { %19225 = vst [vmem:[#allocation43_spill] sm:$0xff] %v15398_v60  ;;  %v15406_v48 = vcombine.high %v1589_v9, %v1589_v9  ;;  %v15408_v27 = vcombine.high %v1603_v34, %v1603_v34  ;;  %v4204_v61 = vrot.slane %v4199_v35, %v15117_v12  ;;  %v15412_v63 = vpack.i.b16 %v1544_v40, %v1544_v40  ;;  %v1123_v40 = vpop.f32.mrf.mxu0 }
 0x147   : > { %19226 = vst [vmem:[#allocation44_spill] sm:$0xff] %v15400_v29  ;;  %19227 = vst [vmem:[#allocation45_spill] sm:$0xff] %v15402_v56  ;;  %v15414_v44 = vpack.i.b16 %v1546_v0, %v1546_v0  ;;  %v4220_v10 = vpack.i.b16 %v2162_v62, %v2162_v62  ;;  %v4227_v20 = vpack.i.b16 %v2166_v3, %v2166_v3  ;;  %v1938_v56 = vunpack.i.h.s16 %v1603_v34 }
 0x148   : > { %19228 = vst [vmem:[#allocation46_spill] sm:$0xff] %v15404_v33  ;;  %19229 = vst [vmem:[#allocation47_spill] sm:$0xff] %v15412_v63  ;;  %v15416_v54 = vpack.i.b16 %v1932_v37, %v1932_v37  ;;  %v15418_v58 = vpack.i.b16 %v1934_v19, %v1934_v19  ;;  %v1936_v33 = vunpack.i.h.s16 %v1589_v9  ;;  %v15420_v29 = vpack.i.b16 %v1589_v9, %v1589_v9  ;;  %v1236_v63 = vpop.f32.mrf.mxu1 }
 0x149   : > { %19230 = vst [vmem:[#allocation48_spill] sm:$0xff] %v15414_v44  ;;  %v15422_v60 = vpack.i.b16 %v1603_v34, %v1603_v34  ;;  %v4225_v28 = vrot.slane %v4220_v10, %v15117_v12  ;;  %v4232_v35 = vrot.slane %v4227_v20, %v15117_v12  ;;  %v1940_v0 = vunpack.i.h.s16 %v15406_v48 }
 0x14a   : > { %19231 = vst [vmem:[#allocation49_spill] sm:$0xff] %v15416_v54  ;;  %19232 = vst [vmem:[#allocation50_spill] sm:$0xff] %v15418_v58  ;;  %v1942_v62 = vunpack.i.h.s16 %v15408_v27  ;;  %v14080_v3 = vcombine.low %v4197_v1, %v4204_v61  ;;  %v2154_v37 = vrot.slane %v15282_v45, %v15120_v13  ;;  %v2158_v9 = vrot.slane %v15282_v45, %v15126_v15 }
 0x14b   : > { %19233 = vst [vmem:[#allocation51_spill] sm:$0xff] %v15420_v29  ;;  %19234 = vst [vmem:[#allocation52_spill] sm:$0xff] %v15422_v60  ;;  %v14082_v19 = vcombine.low %v4225_v28, %v4232_v35  ;;  %v2170_v34 = vrot.slane %v15286_v7, %v15120_v13  ;;  %v2174_v10 = vrot.slane %v15286_v7, %v15126_v15  ;;  %v19235_v28 = vmov 0  }
 0x14c   : > { %v9311_v20 = vsub.bf16 %v15147_v31, %v14080_v3  ;;  %v4206_v60 = vpack.i.b16 %v2154_v37, %v2154_v37  ;;  %v13997_v29 = vpack.c.bf16 %v1123_v40, %v1121_v17  ;;  %v13999_v58 = vpack.c.bf16 %v1236_v63, %v1234_v36  ;;  %v15446_v36 = vpop.f32.mrf.mxu0 }
 0x14d   : > { %v9313_v1 = vsub.bf16 %v15147_v31, %v14082_v19  ;;  %v4213_v61 = vpack.i.b16 %v2158_v9, %v2158_v9  ;;  %v4234_v44 = vpack.i.b16 %v2170_v34, %v2170_v34  ;;  %v4241_v54 = vpack.i.b16 %v2174_v10, %v2174_v10 }
 0x14e   : > { %v9567_v35 = vmax.bf16 %v19235_v28, %v9311_v20  ;;  %v4211_v45 = vrot.slane %v4206_v60, %v15117_v12  ;;  %v1564_v38 = vrot.slane %v13997_v29, %v15272_v26  ;;  %v1578_v53 = vrot.slane %v13999_v58, %v15272_v26  ;;  %v15452_v60 = vpop.f32.mrf.mxu1 }
 0x14f   : > { %v9569_v7 = vmax.bf16 %v19235_v28, %v9313_v1  ;;  %v4218_v3 = vrot.slane %v4213_v61, %v15117_v12  ;;  %v4239_v17 = vrot.slane %v4234_v44, %v15117_v12  ;;  %v4246_v63 = vrot.slane %v4241_v54, %v15117_v12 }
 0x150   : > { %v1581_v40 = vcombine.low %v1564_v38, %v1578_v53  ;;  %v1582_v37 = vcombine.high %v1564_v38, %v1578_v53  ;;  %v2178_v19 = vrot.slane %v15284_v46, %v15117_v12  ;;  %v2182_v29 = vrot.slane %v15284_v46, %v15123_v14 }
 0x151   : > { %v14337_v58 = vcombine.low %v9567_v35, %v9569_v7  ;;  %v14338_v9 = vcombine.high %v9567_v35, %v9569_v7  ;;  %v14081_v34 = vcombine.low %v4211_v45, %v4218_v3  ;;  %v14083_v10 = vcombine.low %v4239_v17, %v4246_v63  ;;  %v1242_v3 = vpop.f32.mrf.mxu1 }
 0x152   : > { %v15454_v20 = vpack.i.b16 %v1936_v33, %v1936_v33  ;;  %v15456_v44 = vpack.i.b16 %v1938_v56, %v1938_v56  ;;  %v1596_v54 = vrot.slane %v1581_v40, %v15272_v26  ;;  %v15460_v53 = vrot.slane %v1582_v37, %v15272_v26  ;;  %v1129_v56 = vpop.f32.mrf.mxu0 }
 0x153   : > { %v15464_v38 = vpack.i.b16 %v15406_v48, %v15406_v48  ;;  %v15468_v1 = vpack.i.b16 %v15408_v27, %v15408_v27  ;;  %11398 = vmatprep.mubr.bf16.mxu0 %v14338_v9  ;;  %v9312_v61 = vsub.bf16 %v15149_v32, %v14081_v34  ;;  %v9314_v33 = vsub.bf16 %v15149_v32, %v14083_v10 }
 0x154   : > { %19236 = vst [vmem:[#allocation53_spill] sm:$0xff] %v15454_v20  ;;  %19237 = vst [vmem:[#allocation54_spill] sm:$0xff] %v15456_v44  ;;  %v15472_v35 = vcombine.high %v1596_v54, %v1596_v54  ;;  %v15476_v45 = vcombine.high %v15460_v53, %v15460_v53  ;;  %11399 = vmatmul.mubr.bf16.vlgmr.msra.gmra.mxu0 %v14337_v58  ;;  %v4248_v7 = vpack.i.b16 %v2178_v19, %v2178_v19 }
 0x155   : > { %19238 = vst [vmem:[#allocation55_spill] sm:$0xff] %v15464_v38  ;;  %19239 = vst [vmem:[#allocation56_spill] sm:$0xff] %v15468_v1  ;;  %v4255_v48 = vpack.i.b16 %v2182_v29, %v2182_v29  ;;  %v9568_v17 = vmax.bf16 %v19235_v28, %v9312_v61  ;;  %v9570_v27 = vmax.bf16 %v19235_v28, %v9314_v33  ;;  %v1944_v34 = vunpack.i.h.s16 %v1596_v54  ;;  %v1131_v33 = vpop.f32.mrf.mxu0 }
 0x156   : > { %v2194_v63 = vrot.slane %v15288_v25, %v15117_v12  ;;  %v2198_v40 = vrot.slane %v15288_v25, %v15123_v14  ;;  %v15484_v37 = vpack.i.b16 %v1940_v0, %v1940_v0  ;;  %v15486_v9 = vpack.i.b16 %v1942_v62, %v1942_v62 }
 0x157   : > { %v1946_v58 = vunpack.i.h.s16 %v15460_v53  ;;  %v14339_v19 = vcombine.low %v9568_v17, %v9570_v27  ;;  %v14340_v29 = vcombine.high %v9568_v17, %v9570_v27  ;;  %v15489_v10 = vpack.i.b16 %v1596_v54, %v1596_v54  ;;  %v1133_v1 = vpop.f32.mrf.mxu0 }
 0x158   : > { %19240 = vst [vmem:[#allocation57_spill] sm:$0xff] %v15484_v37  ;;  %19241 = vst [vmem:[#allocation58_spill] sm:$0xff] %v15486_v9  ;;  %v15493_v61 = vpack.i.b16 %v15460_v53, %v15460_v53  ;;  %v4253_v0 = vrot.slane %v4248_v7, %v15117_v12  ;;  %v4260_v62 = vrot.slane %v4255_v48, %v15117_v12  ;;  %v1244_v9 = vpop.f32.mrf.mxu1 }
 0x159   : > { %19242 = vst [vmem:[#allocation59_spill] sm:$0xff] %v15489_v10  ;;  %11943 = vmatprep.mubr.bf16.mxu1 %v14340_v29  ;;  %v4276_v37 = vpack.i.b16 %v2194_v63, %v2194_v63  ;;  %v4283_v44 = vpack.i.b16 %v2198_v40, %v2198_v40  ;;  %v2186_v54 = vrot.slane %v15284_v46, %v15120_v13 }
 0x15a   : > { %19243 = vst [vmem:[#allocation60_spill] sm:$0xff] %v15493_v61  ;;  %v2190_v53 = vrot.slane %v15284_v46, %v15126_v15  ;;  %11944 = vmatmul.mubr.bf16.vlgmr.msra.gmra.mxu1 %v14339_v19  ;;  %v14084_v17 = vcombine.low %v4253_v0, %v4260_v62  ;;  %v2202_v27 = vrot.slane %v15288_v25, %v15120_v13  ;;  %v1246_v62 = vpop.f32.mrf.mxu1 }
 0x15b   : > { %v2206_v7 = vrot.slane %v15288_v25, %v15126_v15  ;;  %v14000_v48 = vpack.c.bf16 %v1129_v56, %v15446_v36  ;;  %v4281_v29 = vrot.slane %v4276_v37, %v15117_v12  ;;  %v4288_v63 = vrot.slane %v4283_v44, %v15117_v12 }
 0x15c   : > { %v4262_v40 = vpack.i.b16 %v2186_v54, %v2186_v54  ;;  %v4269_v38 = vpack.i.b16 %v2190_v53, %v2190_v53  ;;  %v9315_v61 = vsub.bf16 %v15147_v31, %v14084_v17  ;;  %v4290_v46 = vpack.i.b16 %v2202_v27, %v2202_v27 }
 0x15d   : > { %v4297_v19 = vpack.i.b16 %v2206_v7, %v2206_v7  ;;  %v1625_v0 = vrot.slane %v14000_v48, %v15272_v26  ;;  %v14086_v10 = vcombine.low %v4281_v29, %v4288_v63  ;;  %v14002_v36 = vpack.c.bf16 %v1242_v3, %v15452_v60 }
 0x15e   : > { %v4267_v20 = vrot.slane %v4262_v40, %v15117_v12  ;;  %v4274_v25 = vrot.slane %v4269_v38, %v15117_v12  ;;  %v15515_v56 = vpack.i.b16 %v1944_v34, %v1944_v34  ;;  %v4295_v44 = vrot.slane %v4290_v46, %v15117_v12 }
 0x15f   : > { %v4302_v37 = vrot.slane %v4297_v19, %v15117_v12  ;;  %v14001_v54 = vpack.c.bf16 %v1133_v1, %v1131_v33  ;;  %v9317_v53 = vsub.bf16 %v15147_v31, %v14086_v10  ;;  %v1639_v27 = vrot.slane %v14002_v36, %v15272_v26 }
 0x160   : > { %19244 = vst [vmem:[#allocation61_spill] sm:$0xff] %v15515_v56  ;;  %v14085_v17 = vcombine.low %v4267_v20, %v4274_v25  ;;  %v14003_v7 = vpack.c.bf16 %v1246_v62, %v1244_v9  ;;  %v15521_v48 = vpack.i.b16 %v1946_v58, %v1946_v58  ;;  %v9571_v29 = vmax.bf16 %v19235_v28, %v9315_v61 }
 0x161   : > { %v14087_v38 = vcombine.low %v4295_v44, %v4302_v37  ;;  %v1632_v60 = vrot.slane %v14001_v54, %v15272_v26  ;;  %v9573_v3 = vmax.bf16 %v19235_v28, %v9317_v53  ;;  %v1647_v63 = vcombine.low %v1625_v0, %v1639_v27  ;;  %v15541_v53 = vpop.f32.mrf.mxu0 }
 0x162   : > { %19245 = vst [vmem:[#allocation62_spill] sm:$0xff] %v15521_v48  ;;  %v9316_v34 = vsub.bf16 %v15149_v32, %v14085_v17  ;;  %v1648_v40 = vcombine.high %v1625_v0, %v1639_v27  ;;  %v15529_v1 = vpack.i.b16 %v15472_v35, %v15472_v35  ;;  %v15533_v20 = vpack.i.b16 %v15476_v45, %v15476_v45  ;;  %v15543_v17 = vpop.f32.mrf.mxu1 }
 0x163   : > { %v9318_v9 = vsub.bf16 %v15149_v32, %v14087_v38  ;;  %v1646_v58 = vrot.slane %v14003_v7, %v15272_v26  ;;  %v14342_v10 = vcombine.high %v9571_v29, %v9573_v3  ;;  %v1657_v33 = vrot.slane %v1647_v63, %v15272_v26 }
 0x164   : > { %19246 = vst [vmem:[#allocation63_spill] sm:$0xff] %v15529_v1  ;;  %19247 = vst [vmem:[#allocation64_spill] sm:$0xff] %v15533_v20  ;;  %v9572_v61 = vmax.bf16 %v19235_v28, %v9316_v34  ;;  %v1671_v46 = vrot.slane %v1648_v40, %v15272_v26  ;;  %v14341_v25 = vcombine.low %v9571_v29, %v9573_v3  ;;  %v19248_v27 = vunpack.i.h.s16 %v15472_v35 }
 0x165   : > { %v9574_v19 = vmax.bf16 %v19235_v28, %v9318_v9  ;;  %v1649_v0 = vcombine.low %v1632_v60, %v1646_v58  ;;  %v1650_v62 = vcombine.high %v1632_v60, %v1646_v58  ;;  %11406 = vmatprep.mubr.bf16.mxu0 %v14342_v10  ;;  %v1679_v36 = vcombine.high %v1657_v33, %v1657_v33 }
 0x166   : > { %v1681_v44 = vcombine.high %v1671_v46, %v1671_v46  ;;  %v1952_v37 = vunpack.i.h.s16 %v1657_v33  ;;  %v1954_v54 = vunpack.i.h.s16 %v1671_v46  ;;  %v15548_v7 = vpack.i.b16 %v19248_v27, %v19248_v27  ;;  %11407 = vmatmul.mubr.bf16.gmra.mxu0 %v14341_v25 }
 0x167   : > { %v19250_v38 = vunpack.i.h.s16 %v15476_v45  ;;  %v14344_v29 = vcombine.high %v9572_v61, %v9574_v19  ;;  %v1664_v60 = vrot.slane %v1649_v0, %v15272_v26  ;;  %v1956_v3 = vunpack.i.h.s16 %v1679_v36 }
 0x168   : > { %19249 = vst [vmem:[#allocation65_spill] sm:$0xff] %v15548_v7  ;;  %v1958_v63 = vunpack.i.h.s16 %v1681_v44  ;;  %v2210_v40 = vrot.slane %v15292_v11, %v15117_v12  ;;  %v2214_v35 = vrot.slane %v15292_v11, %v15123_v14  ;;  %v15561_v9 = vrot.slane %v1650_v62, %v15272_v26 }
 0x169   : > { %v15553_v34 = vpack.i.b16 %v19250_v38, %v19250_v38  ;;  %11951 = vmatprep.mubr.bf16.mxu1 %v14344_v29  ;;  %v15563_v45 = vcombine.high %v1664_v60, %v1664_v60  ;;  %v2226_v58 = vrot.slane %v15294_v57, %v15117_v12  ;;  %v2230_v10 = vrot.slane %v15294_v57, %v15123_v14  ;;  %v1139_v29 = vpop.f32.mrf.mxu0 }
 0x16a   : > { %v15569_v0 = vpack.i.b16 %v1657_v33, %v1657_v33  ;;  %v15571_v25 = vpack.i.b16 %v1952_v37, %v1952_v37  ;;  %v15573_v27 = vpack.i.b16 %v1671_v46, %v1671_v46  ;;  %v15575_v38 = vpack.i.b16 %v1954_v54, %v1954_v54 }
 0x16b   : > { %19251 = vst [vmem:[#allocation66_spill] sm:$0xff] %v15553_v34  ;;  %v1252_v34 = vpop.f32.mrf.mxu1  ;;  %v15577_v62 = vpack.i.b16 %v1679_v36, %v1679_v36  ;;  %v15579_v20 = vpack.i.b16 %v1956_v3, %v1956_v3  ;;  %v15581_v7 = vpack.i.b16 %v1681_v44, %v1681_v44  ;;  %v1960_v1 = vunpack.i.h.s16 %v1664_v60 }
 0x16c   : > { %19252 = vst [vmem:[#allocation67_spill] sm:$0xff] %v15573_v27  ;;  %19253 = vst [vmem:[#allocation68_spill] sm:$0xff] %v15575_v38  ;;  %v15583_v48 = vpack.i.b16 %v1958_v63, %v1958_v63  ;;  %v15585_v56 = vpack.i.b16 %v1664_v60, %v1664_v60  ;;  %v14343_v33 = vcombine.low %v9572_v61, %v9574_v19  ;;  %v1962_v54 = vunpack.i.h.s16 %v15561_v9  ;;  %v1141_v61 = vpop.f32.mrf.mxu0 }
 0x16d   : > { %19254 = vst [vmem:[#allocation69_spill] sm:$0xff] %v15577_v62  ;;  %19255 = vst [vmem:[#allocation70_spill] sm:$0xff] %v15579_v20  ;;  %v4304_v37 = vpack.i.b16 %v2210_v40, %v2210_v40  ;;  %v15589_v46 = vcombine.high %v15561_v9, %v15561_v9  ;;  %v15595_v3 = vpack.i.b16 %v15561_v9, %v15561_v9  ;;  %v1254_v19 = vpop.f32.mrf.mxu1 }
 0x16e   : > { %19256 = vst [vmem:[#allocation71_spill] sm:$0xff] %v15581_v7  ;;  %19257 = vst [vmem:[#allocation72_spill] sm:$0xff] %v15583_v48  ;;  %11952 = vmatmul.mubr.bf16.gmra.mxu1 %v14343_v33  ;;  %v4311_v63 = vpack.i.b16 %v2214_v35, %v2214_v35  ;;  %v4332_v60 = vpack.i.b16 %v2226_v58, %v2226_v58  ;;  %v15598_v40 = vpack.i.b16 %v1960_v1, %v1960_v1  ;;  %v1143_v38 = vpop.f32.mrf.mxu0 }
 0x16f   : > { %19258 = vst [vmem:[#allocation73_spill] sm:$0xff] %v15585_v56  ;;  %19259 = vst [vmem:[#allocation74_spill] sm:$0xff] %v15595_v3  ;;  %v4309_v44 = vrot.slane %v4304_v37, %v15117_v12  ;;  %v4339_v56 = vpack.i.b16 %v2230_v10, %v2230_v10  ;;  %v2218_v48 = vrot.slane %v15292_v11, %v15120_v13  ;;  %v1256_v27 = vpop.f32.mrf.mxu1 }
 0x170   : > { %19260 = vst [vmem:[#allocation75_spill] sm:$0xff] %v15598_v40  ;;  %v2222_v36 = vrot.slane %v15292_v11, %v15126_v15  ;;  %v2234_v9 = vrot.slane %v15294_v57, %v15120_v13  ;;  %v4316_v33 = vrot.slane %v4311_v63, %v15117_v12  ;;  %v4337_v37 = vrot.slane %v4332_v60, %v15117_v12 }
 0x171   : > { %v4344_v35 = vrot.slane %v4339_v56, %v15117_v12  ;;  %v2238_v58 = vrot.slane %v15294_v57, %v15126_v15  ;;  %v4318_v1 = vpack.i.b16 %v2218_v48, %v2218_v48  ;;  %v14004_v40 = vpack.c.bf16 %v1139_v29, %v15541_v53 }
 0x172   : > { %v4325_v10 = vpack.i.b16 %v2222_v36, %v2222_v36  ;;  %v4346_v3 = vpack.i.b16 %v2234_v9, %v2234_v9  ;;  %v14088_v7 = vcombine.low %v4309_v44, %v4316_v33  ;;  %v14006_v62 = vpack.c.bf16 %v1252_v34, %v15543_v17 }
 0x173   : > { %v14090_v20 = vcombine.low %v4337_v37, %v4344_v35  ;;  %v4353_v11 = vpack.i.b16 %v2238_v58, %v2238_v58  ;;  %v4323_v63 = vrot.slane %v4318_v1, %v15117_v12  ;;  %v1693_v57 = vrot.slane %v14004_v40, %v15272_v26 }
 0x174   : > { %v4330_v60 = vrot.slane %v4325_v10, %v15117_v12  ;;  %v4351_v56 = vrot.slane %v4346_v3, %v15117_v12  ;;  %v9319_v48 = vsub.bf16 %v15147_v31, %v14088_v7  ;;  %v1707_v29 = vrot.slane %v14006_v62, %v15272_v26 }
 0x175   : > { %v9321_v36 = vsub.bf16 %v15147_v31, %v14090_v20  ;;  %v4358_v53 = vrot.slane %v4353_v11, %v15117_v12  ;;  %v15623_v17 = vpack.i.b16 %v15563_v45, %v15563_v45  ;;  %v14005_v44 = vpack.c.bf16 %v1143_v38, %v1141_v61 }
 0x176   : > { %v14089_v34 = vcombine.low %v4323_v63, %v4330_v60  ;;  %v14007_v9 = vpack.c.bf16 %v1256_v27, %v1254_v19  ;;  %v9575_v33 = vmax.bf16 %v19235_v28, %v9319_v48  ;;  %v1715_v37 = vcombine.low %v1693_v57, %v1707_v29  ;;  %v15636_v48 = vpop.f32.mrf.mxu0 }
 0x177   : > { %19261 = vst [vmem:[#allocation76_spill] sm:$0xff] %v15623_v17  ;;  %v9577_v3 = vmax.bf16 %v19235_v28, %v9321_v36  ;;  %v14091_v40 = vcombine.low %v4351_v56, %v4358_v53  ;;  %v1716_v20 = vcombine.high %v1693_v57, %v1707_v29  ;;  %v1700_v35 = vrot.slane %v14005_v44, %v15272_v26  ;;  %v15641_v44 = vpop.f32.mrf.mxu1 }
 0x178   : > { %v9320_v7 = vsub.bf16 %v15149_v32, %v14089_v34  ;;  %v1714_v62 = vrot.slane %v14007_v9, %v15272_v26  ;;  %v1966_v58 = vunpack.i.h.s16 %v15589_v46  ;;  %v1725_v27 = vrot.slane %v1715_v37, %v15272_v26 }
 0x179   : > { %v14346_v1 = vcombine.high %v9575_v33, %v9577_v3  ;;  %v9322_v10 = vsub.bf16 %v15149_v32, %v14091_v40  ;;  %v1739_v38 = vrot.slane %v1716_v20, %v15272_v26  ;;  %v14345_v11 = vcombine.low %v9575_v33, %v9577_v3 }
 0x17a   : > { %v1717_v61 = vcombine.low %v1700_v35, %v1714_v62  ;;  %v1718_v19 = vcombine.high %v1700_v35, %v1714_v62  ;;  %v9576_v63 = vmax.bf16 %v19235_v28, %v9320_v7  ;;  %v1747_v56 = vcombine.high %v1725_v27, %v1725_v27 }
 0x17b   : > { %11414 = vmatprep.mubr.bf16.mxu0 %v14346_v1  ;;  %v9578_v60 = vmax.bf16 %v19235_v28, %v9322_v10  ;;  %v1968_v57 = vunpack.i.h.s16 %v1725_v27  ;;  %v15638_v36 = vpack.i.b16 %v1962_v54, %v1962_v54  ;;  %v1749_v53 = vcombine.high %v1739_v38, %v1739_v38  ;;  %v1149_v10 = vpop.f32.mrf.mxu0 }
 0x17c   : > { %v1970_v29 = vunpack.i.h.s16 %v1739_v38  ;;  %v1732_v34 = vrot.slane %v1717_v61, %v15272_v26  ;;  %11415 = vmatmul.mubr.bf16.gmra.mxu0 %v14345_v11  ;;  %v19263_v9 = vunpack.i.h.s16 %v15563_v45  ;;  %v15650_v3 = vpack.i.b16 %v15589_v46, %v15589_v46 }
 0x17d   : > { %19262 = vst [vmem:[#allocation77_spill] sm:$0xff] %v15638_v36  ;;  %v14348_v40 = vcombine.high %v9576_v63, %v9578_v60  ;;  %v1972_v37 = vunpack.i.h.s16 %v1747_v56  ;;  %v15652_v54 = vpack.i.b16 %v1966_v58, %v1966_v58  ;;  %v1974_v7 = vunpack.i.h.s16 %v1749_v53 }
 0x17e   : > { %v15646_v33 = vpack.i.b16 %v19263_v9, %v19263_v9  ;;  %19265 = vst [vmem:[#allocation79_spill] sm:$0xff] %v15650_v3  ;;  %v15655_v20 = vrot.slane %v1718_v19, %v15272_v26  ;;  %v2242_v35 = vrot.slane %v15296_v49, %v15117_v12  ;;  %v15659_v45 = vpack.i.b16 %v1725_v27, %v1725_v27  ;;  %v1262_v9 = vpop.f32.mrf.mxu1 }
 0x17f   : > { %19266 = vst [vmem:[#allocation80_spill] sm:$0xff] %v15652_v54  ;;  %11959 = vmatprep.mubr.bf16.mxu1 %v14348_v40  ;;  %v15661_v62 = vpack.i.b16 %v1968_v57, %v1968_v57  ;;  %v15663_v1 = vpack.i.b16 %v1739_v38, %v1739_v38  ;;  %v15665_v46 = vcombine.high %v1732_v34, %v1732_v34  ;;  %v1976_v19 = vunpack.i.h.s16 %v1732_v34 }
 0x180   : > { %19264 = vst [vmem:[#allocation78_spill] sm:$0xff] %v15646_v33  ;;  %19267 = vst [vmem:[#allocation81_spill] sm:$0xff] %v15659_v45  ;;  %v15667_v61 = vpack.i.b16 %v1970_v29, %v1970_v29  ;;  %v15669_v58 = vpack.i.b16 %v1747_v56, %v1747_v56  ;;  %v15671_v11 = vpack.i.b16 %v1749_v53, %v1749_v53  ;;  %v1978_v29 = vunpack.i.h.s16 %v15655_v20 }
 0x181   : > { %19268 = vst [vmem:[#allocation82_spill] sm:$0xff] %v15661_v62  ;;  %19269 = vst [vmem:[#allocation83_spill] sm:$0xff] %v15663_v1  ;;  %v15673_v54 = vpack.i.b16 %v1972_v37, %v1972_v37  ;;  %v15675_v40 = vpack.i.b16 %v1974_v7, %v1974_v7  ;;  %v15677_v27 = vpack.i.b16 %v1732_v34, %v1732_v34  ;;  %v1151_v7 = vpop.f32.mrf.mxu0 }
 0x182   : > { %19270 = vst [vmem:[#allocation84_spill] sm:$0xff] %v15667_v61  ;;  %19271 = vst [vmem:[#allocation85_spill] sm:$0xff] %v15669_v58  ;;  %v14347_v57 = vcombine.low %v9576_v63, %v9578_v60  ;;  %v15681_v38 = vcombine.high %v15655_v20, %v15655_v20  ;;  %v15686_v56 = vpack.i.b16 %v15655_v20, %v15655_v20 }
 0x183   : > { %19272 = vst [vmem:[#allocation86_spill] sm:$0xff] %v15671_v11  ;;  %19273 = vst [vmem:[#allocation87_spill] sm:$0xff] %v15673_v54  ;;  %v2246_v53 = vrot.slane %v15296_v49, %v15123_v14  ;;  %v2258_v34 = vrot.slane %v15298_v50, %v15117_v12  ;;  %v2262_v63 = vrot.slane %v15298_v50, %v15123_v14  ;;  %v1264_v11 = vpop.f32.mrf.mxu1 }
 0x184   : > { %19274 = vst [vmem:[#allocation88_spill] sm:$0xff] %v15675_v40  ;;  %19275 = vst [vmem:[#allocation89_spill] sm:$0xff] %v15677_v27  ;;  %11960 = vmatmul.mubr.bf16.gmra.mxu1 %v14347_v57  ;;  %v4360_v60 = vpack.i.b16 %v2242_v35, %v2242_v35  ;;  %v15695_v27 = vpack.i.b16 %v1976_v19, %v1976_v19  ;;  %v2250_v20 = vrot.slane %v15296_v49, %v15120_v13 }
 0x185   : > { %19276 = vst [vmem:[#allocation90_spill] sm:$0xff] %v15686_v56  ;;  %v4367_v40 = vpack.i.b16 %v2246_v53, %v2246_v53  ;;  %v2254_v56 = vrot.slane %v15296_v49, %v15126_v15  ;;  %v4388_v37 = vpack.i.b16 %v2258_v34, %v2258_v34  ;;  %v4395_v54 = vpack.i.b16 %v2262_v63, %v2262_v63 }
 0x186   : > { %19277 = vst [vmem:[#allocation91_spill] sm:$0xff] %v15695_v27  ;;  %v4365_v57 = vrot.slane %v4360_v60, %v15117_v12  ;;  %v2266_v58 = vrot.slane %v15298_v50, %v15120_v13  ;;  %v2270_v19 = vrot.slane %v15298_v50, %v15126_v15  ;;  %v4374_v53 = vpack.i.b16 %v2250_v20, %v2250_v20  ;;  %v1153_v60 = vpop.f32.mrf.mxu0 }
 0x187   : > { %v4372_v35 = vrot.slane %v4367_v40, %v15117_v12  ;;  %v4381_v27 = vpack.i.b16 %v2254_v56, %v2254_v56  ;;  %v4393_v61 = vrot.slane %v4388_v37, %v15117_v12  ;;  %v4400_v1 = vrot.slane %v4395_v54, %v15117_v12  ;;  %v1266_v40 = vpop.f32.mrf.mxu1 }
 0x188   : > { %v4402_v49 = vpack.i.b16 %v2266_v58, %v2266_v58  ;;  %v14008_v62 = vpack.c.bf16 %v1149_v10, %v15636_v48  ;;  %v4379_v63 = vrot.slane %v4374_v53, %v15117_v12  ;;  %v4409_v3 = vpack.i.b16 %v2270_v19, %v2270_v19 }
 0x189   : > { %v14092_v34 = vcombine.low %v4365_v57, %v4372_v35  ;;  %v4386_v45 = vrot.slane %v4381_v27, %v15117_v12  ;;  %v14094_v33 = vcombine.low %v4393_v61, %v4400_v1  ;;  %v14010_v37 = vpack.c.bf16 %v1262_v9, %v15641_v44 }
 0x18a   : > { %v4407_v50 = vrot.slane %v4402_v49, %v15117_v12  ;;  %v1761_v56 = vrot.slane %v14008_v62, %v15272_v26  ;;  %v4414_v58 = vrot.slane %v4409_v3, %v15117_v12  ;;  %v14009_v10 = vpack.c.bf16 %v1153_v60, %v1151_v7 }
 0x18b   : > { %v9323_v54 = vsub.bf16 %v15147_v31, %v14092_v34  ;;  %v14093_v48 = vcombine.low %v4379_v63, %v4386_v45  ;;  %v15719_v20 = vpack.i.b16 %v15665_v46, %v15665_v46  ;;  %v9325_v27 = vsub.bf16 %v15147_v31, %v14094_v33 }
 0x18c   : > { %v1775_v1 = vrot.slane %v14010_v37, %v15272_v26  ;;  %v14011_v61 = vpack.c.bf16 %v1266_v40, %v1264_v11  ;;  %v14095_v62 = vcombine.low %v4407_v50, %v4414_v58  ;;  %v1768_v9 = vrot.slane %v14009_v10, %v15272_v26  ;;  %v15740_v58 = vpop.f32.mrf.mxu0 }
 0x18d   : > { %19278 = vst [vmem:[#allocation92_spill] sm:$0xff] %v15719_v20  ;;  %v9579_v57 = vmax.bf16 %v19235_v28, %v9323_v54  ;;  %v9324_v44 = vsub.bf16 %v15149_v32, %v14093_v48  ;;  %v9581_v3 = vmax.bf16 %v19235_v28, %v9325_v27  ;;  %v1982_v19 = vunpack.i.h.s16 %v15681_v38 }
 0x18e   : > { %v1783_v45 = vcombine.low %v1761_v56, %v1775_v1  ;;  %v1784_v7 = vcombine.high %v1761_v56, %v1775_v1  ;;  %v1782_v35 = vrot.slane %v14011_v61, %v15272_v26  ;;  %v15729_v53 = vpack.i.b16 %v1978_v29, %v1978_v29 }
 0x18f   : > { %v15733_v31 = vpack.i.b16 %v15681_v38, %v15681_v38  ;;  %v9326_v33 = vsub.bf16 %v15149_v32, %v14095_v62  ;;  %v14350_v11 = vcombine.high %v9579_v57, %v9581_v3  ;;  %v9580_v63 = vmax.bf16 %v19235_v28, %v9324_v44  ;;  %v15742_v32 = vpop.f32.mrf.mxu1 }
 0x190   : > { %19279 = vst [vmem:[#allocation93_spill] sm:$0xff] %v15729_v53  ;;  %v1793_v49 = vrot.slane %v1783_v45, %v15272_v26  ;;  %v1807_v60 = vrot.slane %v1784_v7, %v15272_v26  ;;  %v1785_v34 = vcombine.low %v1768_v9, %v1782_v35  ;;  %v1786_v50 = vcombine.high %v1768_v9, %v1782_v35 }
 0x191   : > { %19280 = vst [vmem:[#allocation94_spill] sm:$0xff] %v15733_v31  ;;  %v9582_v40 = vmax.bf16 %v19235_v28, %v9326_v33  ;;  %v14349_v56 = vcombine.low %v9579_v57, %v9581_v3  ;;  %11422 = vmatprep.mubr.bf16.mxu0 %v14350_v11  ;;  %v19281_v48 = vunpack.i.h.s16 %v15665_v46  ;;  %v15749_v27 = vpack.i.b16 %v1982_v19, %v1982_v19 }
 0x192   : > { %v1815_v29 = vcombine.high %v1793_v49, %v1793_v49  ;;  %v1817_v37 = vcombine.high %v1807_v60, %v1807_v60  ;;  %v1984_v54 = vunpack.i.h.s16 %v1793_v49  ;;  %v1986_v38 = vunpack.i.h.s16 %v1807_v60 }
 0x193   : > { %v15747_v10 = vpack.i.b16 %v19281_v48, %v19281_v48  ;;  %19283 = vst [vmem:[#allocation96_spill] sm:$0xff] %v15749_v27  ;;  %v14352_v1 = vcombine.high %v9580_v63, %v9582_v40  ;;  %v1800_v61 = vrot.slane %v1785_v34, %v15272_v26  ;;  %11423 = vmatmul.mubr.bf16.gmra.mxu0 %v14349_v56  ;;  %v1159_v34 = vpop.f32.mrf.mxu0  ;;  %v1272_v56 = vpop.f32.mrf.mxu1 }
 0x194   : > { %v1988_v57 = vunpack.i.h.s16 %v1815_v29  ;;  %v1990_v62 = vunpack.i.h.s16 %v1817_v37  ;;  %v2274_v44 = vrot.slane %v15300_v16, %v15117_v12  ;;  %v2278_v9 = vrot.slane %v15300_v16, %v15123_v14 }
 0x195   : > { %19282 = vst [vmem:[#allocation95_spill] sm:$0xff] %v15747_v10  ;;  %11967 = vmatprep.mubr.bf16.mxu1 %v14352_v1  ;;  %v15757_v46 = vrot.slane %v1786_v50, %v15272_v26  ;;  %v15759_v3 = vcombine.high %v1800_v61, %v1800_v61  ;;  %v2290_v45 = vrot.slane %v15304_v4, %v15117_v12  ;;  %v1992_v27 = vunpack.i.h.s16 %v1800_v61 }
 0x196   : > { %v2294_v7 = vrot.slane %v15304_v4, %v15123_v14  ;;  %v15765_v35 = vpack.i.b16 %v1793_v49, %v1793_v49  ;;  %v15767_v19 = vpack.i.b16 %v1984_v54, %v1984_v54  ;;  %v15769_v33 = vpack.i.b16 %v1807_v60, %v1807_v60 }
 0x197   : > { %v15771_v11 = vpack.i.b16 %v1986_v38, %v1986_v38  ;;  %v15773_v50 = vpack.i.b16 %v1815_v29, %v1815_v29  ;;  %v15775_v48 = vpack.i.b16 %v1988_v57, %v1988_v57  ;;  %v15777_v1 = vpack.i.b16 %v1817_v37, %v1817_v37 }
 0x198   : > { %19284 = vst [vmem:[#allocation97_spill] sm:$0xff] %v15765_v35  ;;  %19285 = vst [vmem:[#allocation98_spill] sm:$0xff] %v15767_v19  ;;  %v15779_v31 = vpack.i.b16 %v1990_v62, %v1990_v62  ;;  %v15781_v10 = vpack.i.b16 %v1800_v61, %v1800_v61  ;;  %v14351_v49 = vcombine.low %v9580_v63, %v9582_v40  ;;  %v1994_v38 = vunpack.i.h.s16 %v15757_v46  ;;  %v1161_v63 = vpop.f32.mrf.mxu0  ;;  %v1274_v40 = vpop.f32.mrf.mxu1 }
 0x199   : > { %19286 = vst [vmem:[#allocation99_spill] sm:$0xff] %v15769_v33  ;;  %19287 = vst [vmem:[#allocation100_spill] sm:$0xff] %v15771_v11  ;;  %v4416_v54 = vpack.i.b16 %v2274_v44, %v2274_v44  ;;  %v15785_v60 = vcombine.high %v15757_v46, %v15757_v46  ;;  %v15791_v57 = vpack.i.b16 %v15757_v46, %v15757_v46 }
 0x19a   : > { %19288 = vst [vmem:[#allocation101_spill] sm:$0xff] %v15773_v50  ;;  %19289 = vst [vmem:[#allocation102_spill] sm:$0xff] %v15775_v48  ;;  %11968 = vmatmul.mubr.bf16.gmra.mxu1 %v14351_v49  ;;  %v4423_v62 = vpack.i.b16 %v2278_v9, %v2278_v9  ;;  %v4444_v61 = vpack.i.b16 %v2290_v45, %v2290_v45  ;;  %v15794_v44 = vpack.i.b16 %v1992_v27, %v1992_v27  ;;  %v1163_v11 = vpop.f32.mrf.mxu0  ;;  %v1276_v33 = vpop.f32.mrf.mxu1 }
 0x19b   : > { %19290 = vst [vmem:[#allocation103_spill] sm:$0xff] %v15777_v1  ;;  %19291 = vst [vmem:[#allocation104_spill] sm:$0xff] %v15779_v31  ;;  %v4421_v37 = vrot.slane %v4416_v54, %v15117_v12  ;;  %v2282_v31 = vrot.slane %v15300_v16, %v15120_v13  ;;  %v2286_v29 = vrot.slane %v15300_v16, %v15126_v15 }
 0x19c   : > { %19292 = vst [vmem:[#allocation105_spill] sm:$0xff] %v15781_v10  ;;  %19293 = vst [vmem:[#allocation106_spill] sm:$0xff] %v15791_v57  ;;  %v4451_v10 = vpack.i.b16 %v2294_v7, %v2294_v7  ;;  %v2298_v46 = vrot.slane %v15304_v4, %v15120_v13  ;;  %v4428_v49 = vrot.slane %v4423_v62, %v15117_v12 }
 0x19d   : > { %19294 = vst [vmem:[#allocation107_spill] sm:$0xff] %v15794_v44  ;;  %v4449_v54 = vrot.slane %v4444_v61, %v15117_v12  ;;  %v2302_v45 = vrot.slane %v15304_v4, %v15126_v15  ;;  %v4430_v27 = vpack.i.b16 %v2282_v31, %v2282_v31  ;;  %v4437_v7 = vpack.i.b16 %v2286_v29, %v2286_v29 }
 0x19e   : > { %v4456_v9 = vrot.slane %v4451_v10, %v15117_v12  ;;  %v4458_v57 = vpack.i.b16 %v2298_v46, %v2298_v46  ;;  %v14012_v44 = vpack.c.bf16 %v1159_v34, %v15740_v58  ;;  %v14096_v1 = vcombine.low %v4421_v37, %v4428_v49 }
 0x19f   : > { %v4465_v16 = vpack.i.b16 %v2302_v45, %v2302_v45  ;;  %v14014_v50 = vpack.c.bf16 %v1272_v56, %v15742_v32  ;;  %v4435_v62 = vrot.slane %v4430_v27, %v15117_v12  ;;  %v4442_v61 = vrot.slane %v4437_v7, %v15117_v12 }
 0x1a0   : > { %v14098_v48 = vcombine.low %v4449_v54, %v4456_v9  ;;  %v4463_v10 = vrot.slane %v4458_v57, %v15117_v12  ;;  %v1829_v4 = vrot.slane %v14012_v44, %v15272_v26  ;;  %v9327_v31 = vsub.bf16 %v15155_v41, %v14096_v1 }
 0x1a1   : > { %v4470_v58 = vrot.slane %v4465_v16, %v15117_v12  ;;  %v1843_v34 = vrot.slane %v14014_v50, %v15272_v26  ;;  %v15819_v32 = vpack.i.b16 %v15759_v3, %v15759_v3  ;;  %v14097_v56 = vcombine.low %v4435_v62, %v4442_v61 }
 0x1a2   : > { %v9329_v29 = vsub.bf16 %v15155_v41, %v14098_v48  ;;  %v14013_v37 = vpack.c.bf16 %v1163_v11, %v1161_v63  ;;  %v14015_v46 = vpack.c.bf16 %v1276_v33, %v1274_v40  ;;  %v9583_v49 = vmax.bf16 %v19235_v28, %v9327_v31 }
 0x1a3   : > { %19295 = vst [vmem:[#allocation108_spill] sm:$0xff] %v15819_v32  ;;  %v14099_v44 = vcombine.low %v4463_v10, %v4470_v58  ;;  %v1851_v54 = vcombine.low %v1829_v4, %v1843_v34  ;;  %v9328_v1 = vsub.bf16 %v15157_v42, %v14097_v56  ;;  %v1852_v48 = vcombine.high %v1829_v4, %v1843_v34 }
 0x1a4   : > { %v9585_v57 = vmax.bf16 %v19235_v28, %v9329_v29  ;;  %v1836_v9 = vrot.slane %v14013_v37, %v15272_v26  ;;  %v1850_v50 = vrot.slane %v14015_v46, %v15272_v26  ;;  %v1998_v45 = vunpack.i.h.s16 %v15785_v60 }
 0x1a5   : > { %v9330_v7 = vsub.bf16 %v15157_v42, %v14099_v44  ;;  %v1861_v33 = vrot.slane %v1851_v54, %v15272_v26  ;;  %v1875_v11 = vrot.slane %v1852_v48, %v15272_v26  ;;  %v9584_v62 = vmax.bf16 %v19235_v28, %v9328_v1 }
 0x1a6   : > { %v14354_v27 = vcombine.high %v9583_v49, %v9585_v57  ;;  %v1853_v63 = vcombine.low %v1836_v9, %v1850_v50  ;;  %v1854_v40 = vcombine.high %v1836_v9, %v1850_v50  ;;  %v14353_v16 = vcombine.low %v9583_v49, %v9585_v57 }
 0x1a7   : > { %v9586_v61 = vmax.bf16 %v19235_v28, %v9330_v7  ;;  %v1883_v10 = vcombine.high %v1861_v33, %v1861_v33  ;;  %v2000_v4 = vunpack.i.h.s16 %v1861_v33  ;;  %v15832_v31 = vpack.i.b16 %v1994_v38, %v1994_v38 }
 0x1a8   : > { %11430 = vmatprep.mubr.bf16.mxu0 %v14354_v27  ;;  %v1885_v29 = vcombine.high %v1875_v11, %v1875_v11  ;;  %v2002_v58 = vunpack.i.h.s16 %v1875_v11  ;;  %v1868_v34 = vrot.slane %v1853_v63, %v15272_v26  ;;  %v19297_v56 = vunpack.i.h.s16 %v15759_v3 }
 0x1a9   : > { %19296 = vst [vmem:[#allocation109_spill] sm:$0xff] %v15832_v31  ;;  %11431 = vmatmul.mubr.bf16.gmra.mxu0 %v14353_v16  ;;  %v15842_v46 = vpack.i.b16 %v15785_v60, %v15785_v60  ;;  %v14356_v49 = vcombine.high %v9584_v62, %v9586_v61  ;;  %v2004_v57 = vunpack.i.h.s16 %v1883_v10  ;;  %v15844_v44 = vpack.i.b16 %v1998_v45, %v1998_v45 }
 0x1aa   : > { %v15838_v37 = vpack.i.b16 %v19297_v56, %v19297_v56  ;;  %v2006_v38 = vunpack.i.h.s16 %v1885_v29  ;;  %v15847_v54 = vrot.slane %v1854_v40, %v15272_v26  ;;  %v2306_v1 = vrot.slane %v15302_v21, %v15117_v12 }
 0x1ab   : > { %19299 = vst [vmem:[#allocation111_spill] sm:$0xff] %v15842_v46  ;;  %19300 = vst [vmem:[#allocation112_spill] sm:$0xff] %v15844_v44  ;;  %11975 = vmatprep.mubr.bf16.mxu1 %v14356_v49  ;;  %v15851_v3 = vpack.i.b16 %v1861_v33, %v1861_v33  ;;  %v15853_v48 = vpack.i.b16 %v2000_v4, %v2000_v4  ;;  %v15855_v9 = vpack.i.b16 %v1875_v11, %v1875_v11  ;;  %v19343_v46 = vld [vmem:[#allocation8_spill] sm:$0xff] }
 0x1ac   : > { %19298 = vst [vmem:[#allocation110_spill] sm:$0xff] %v15838_v37  ;;  %v15857_v60 = vcombine.high %v1868_v34, %v1868_v34  ;;  %v15859_v50 = vpack.i.b16 %v2002_v58, %v2002_v58  ;;  %v15861_v45 = vpack.i.b16 %v1883_v10, %v1883_v10  ;;  %v15863_v27 = vpack.i.b16 %v1885_v29, %v1885_v29 }
 0x1ad   : > { %19301 = vst [vmem:[#allocation113_spill] sm:$0xff] %v15851_v3  ;;  %19302 = vst [vmem:[#allocation114_spill] sm:$0xff] %v15853_v48  ;;  %v2008_v26 = vunpack.i.h.s16 %v1868_v34  ;;  %v15865_v7 = vpack.i.b16 %v2004_v57, %v2004_v57  ;;  %v15867_v63 = vpack.i.b16 %v2006_v38, %v2006_v38  ;;  %v15869_v40 = vpack.i.b16 %v1868_v34, %v1868_v34 }
 0x1ae   : > { %19303 = vst [vmem:[#allocation115_spill] sm:$0xff] %v15855_v9  ;;  %19304 = vst [vmem:[#allocation116_spill] sm:$0xff] %v15859_v50  ;;  %v14355_v33 = vcombine.low %v9584_v62, %v9586_v61  ;;  %v15873_v11 = vcombine.high %v15847_v54, %v15847_v54  ;;  %v15878_v10 = vpack.i.b16 %v15847_v54, %v15847_v54 }
 0x1af   : > { %19305 = vst [vmem:[#allocation117_spill] sm:$0xff] %v15861_v45  ;;  %19306 = vst [vmem:[#allocation118_spill] sm:$0xff] %v15863_v27  ;;  %v2310_v4 = vrot.slane %v15302_v21, %v15123_v14  ;;  %v2322_v58 = vrot.slane %v15306_v18, %v15117_v12  ;;  %v2326_v62 = vrot.slane %v15306_v18, %v15123_v14 }
 0x1b0   : > { %19307 = vst [vmem:[#allocation119_spill] sm:$0xff] %v15865_v7  ;;  %19308 = vst [vmem:[#allocation120_spill] sm:$0xff] %v15867_v63  ;;  %11976 = vmatmul.mubr.bf16.gmra.mxu1 %v14355_v33  ;;  %v4472_v61 = vpack.i.b16 %v2306_v1, %v2306_v1  ;;  %v15887_v34 = vpack.i.b16 %v2008_v26, %v2008_v26  ;;  %v2314_v49 = vrot.slane %v15302_v21, %v15120_v13 }
 0x1b1   : > { %19309 = vst [vmem:[#allocation121_spill] sm:$0xff] %v15869_v40  ;;  %19310 = vst [vmem:[#allocation122_spill] sm:$0xff] %v15878_v10  ;;  %v4479_v56 = vpack.i.b16 %v2310_v4, %v2310_v4  ;;  %v2318_v57 = vrot.slane %v15302_v21, %v15126_v15  ;;  %v4500_v29 = vpack.i.b16 %v2322_v58, %v2322_v58 }
 0x1b2   : > { %19311 = vst [vmem:[#allocation123_spill] sm:$0xff] %v15887_v34  ;;  %v4477_v38 = vrot.slane %v4472_v61, %v15117_v12  ;;  %v4507_v33 = vpack.i.b16 %v2326_v62, %v2326_v62  ;;  %v2330_v16 = vrot.slane %v15306_v18, %v15120_v13  ;;  %v2334_v1 = vrot.slane %v15306_v18, %v15126_v15 }
 0x1b3   : > { %v4484_v10 = vrot.slane %v4479_v56, %v15117_v12  ;;  %v4486_v26 = vpack.i.b16 %v2314_v49, %v2314_v49  ;;  %v4493_v4 = vpack.i.b16 %v2318_v57, %v2318_v57  ;;  %v4505_v34 = vrot.slane %v4500_v29, %v15117_v12 }
 0x1b4   : > { %v4512_v40 = vrot.slane %v4507_v33, %v15117_v12  ;;  %v4514_v63 = vpack.i.b16 %v2330_v16, %v2330_v16  ;;  %v2338_v21 = vrot.slane %v15310_v55, %v15117_v12  ;;  %v4521_v27 = vpack.i.b16 %v2334_v1, %v2334_v1 }
 0x1b5   : > { %v14100_v58 = vcombine.low %v4477_v38, %v4484_v10  ;;  %v4491_v62 = vrot.slane %v4486_v26, %v15117_v12  ;;  %v4498_v61 = vrot.slane %v4493_v4, %v15117_v12  ;;  %v2342_v18 = vrot.slane %v15310_v55, %v15123_v14 }
 0x1b6   : > { %v14102_v56 = vcombine.low %v4505_v34, %v4512_v40  ;;  %v4519_v7 = vrot.slane %v4514_v63, %v15117_v12  ;;  %v2354_v29 = vrot.slane %v15316_v24, %v15117_v12  ;;  %v4526_v49 = vrot.slane %v4521_v27, %v15117_v12 }
 0x1b7   : > { %v9331_v16 = vsub.bf16 %v15155_v41, %v14100_v58  ;;  %v14101_v57 = vcombine.low %v4491_v62, %v4498_v61  ;;  %v2358_v10 = vrot.slane %v15316_v24, %v15123_v14  ;;  %v4528_v33 = vpack.i.b16 %v2338_v21, %v2338_v21 }
 0x1b8   : > { %v9333_v38 = vsub.bf16 %v15155_v41, %v14102_v56  ;;  %v4535_v40 = vpack.i.b16 %v2342_v18, %v2342_v18  ;;  %v4556_v34 = vpack.i.b16 %v2354_v29, %v2354_v29  ;;  %v14103_v1 = vcombine.low %v4519_v7, %v4526_v49 }
 0x1b9   : > { %v9587_v63 = vmax.bf16 %v19235_v28, %v9331_v16  ;;  %v9332_v26 = vsub.bf16 %v15157_v42, %v14101_v57  ;;  %v4563_v4 = vpack.i.b16 %v2358_v10, %v2358_v10  ;;  %v4533_v58 = vrot.slane %v4528_v33, %v15117_v12 }
 0x1ba   : > { %v9589_v45 = vmax.bf16 %v19235_v28, %v9333_v38  ;;  %v4540_v27 = vrot.slane %v4535_v40, %v15117_v12  ;;  %v4561_v62 = vrot.slane %v4556_v34, %v15117_v12  ;;  %v9334_v61 = vsub.bf16 %v15157_v42, %v14103_v1 }
 0x1bb   : > { %v9588_v21 = vmax.bf16 %v19235_v28, %v9332_v26  ;;  %v4568_v56 = vrot.slane %v4563_v4, %v15117_v12  ;;  %v2346_v7 = vrot.slane %v15310_v55, %v15120_v13  ;;  %v2350_v49 = vrot.slane %v15310_v55, %v15126_v15 }
 0x1bc   : > { %v14358_v18 = vcombine.high %v9587_v63, %v9589_v45  ;;  %v14357_v29 = vcombine.low %v9587_v63, %v9589_v45  ;;  %v14104_v16 = vcombine.low %v4533_v58, %v4540_v27  ;;  %v9590_v57 = vmax.bf16 %v19235_v28, %v9334_v61 }
 0x1bd   : > { %v14106_v10 = vcombine.low %v4561_v62, %v4568_v56  ;;  %v2362_v38 = vrot.slane %v15316_v24, %v15120_v13  ;;  %v2366_v33 = vrot.slane %v15316_v24, %v15126_v15  ;;  %v4542_v34 = vpack.i.b16 %v2346_v7, %v2346_v7 }
 0x1be   : > { %11438 = vmatprep.mubr.bf16.mxu0 %v14358_v18  ;;  %v9335_v40 = vsub.bf16 %v15155_v41, %v14104_v16  ;;  %v4549_v1 = vpack.i.b16 %v2350_v49, %v2350_v49  ;;  %v2370_v45 = vrot.slane %v15312_v43, %v15117_v12  ;;  %v14360_v63 = vcombine.high %v9588_v21, %v9590_v57 }
 0x1bf   : > { %11439 = vmatmul.mubr.bf16.gmra.mxu0 %v14357_v29  ;;  %v14359_v55 = vcombine.low %v9588_v21, %v9590_v57  ;;  %v9337_v26 = vsub.bf16 %v15155_v41, %v14106_v10  ;;  %v4570_v4 = vpack.i.b16 %v2362_v38, %v2362_v38  ;;  %v4547_v27 = vrot.slane %v4542_v34, %v15117_v12 }
 0x1c0   : > { %v9591_v58 = vmax.bf16 %v19235_v28, %v9335_v40  ;;  %v4554_v24 = vrot.slane %v4549_v1, %v15117_v12  ;;  %v4577_v62 = vpack.i.b16 %v2366_v33, %v2366_v33  ;;  %11983 = vmatprep.mubr.bf16.mxu1 %v14360_v63  ;;  %v2374_v7 = vrot.slane %v15312_v43, %v15123_v14 }
 0x1c1   : > { %v9593_v61 = vmax.bf16 %v19235_v28, %v9337_v26  ;;  %v4575_v56 = vrot.slane %v4570_v4, %v15117_v12  ;;  %v2386_v21 = vrot.slane %v15318_v6, %v15117_v12  ;;  %11984 = vmatmul.mubr.bf16.gmra.mxu1 %v14359_v55  ;;  %v2390_v16 = vrot.slane %v15318_v6, %v15123_v14 }
 0x1c2   : > { %v4582_v18 = vrot.slane %v4577_v62, %v15117_v12  ;;  %v14105_v29 = vcombine.low %v4547_v27, %v4554_v24  ;;  %v4584_v49 = vpack.i.b16 %v2370_v45, %v2370_v45  ;;  %v4591_v38 = vpack.i.b16 %v2374_v7, %v2374_v7 }
 0x1c3   : > { %v14362_v57 = vcombine.high %v9591_v58, %v9593_v61  ;;  %v14361_v10 = vcombine.low %v9591_v58, %v9593_v61  ;;  %v4612_v33 = vpack.i.b16 %v2386_v21, %v2386_v21  ;;  %v4619_v63 = vpack.i.b16 %v2390_v16, %v2390_v16 }
 0x1c4   : > { %v14107_v40 = vcombine.low %v4575_v56, %v4582_v18  ;;  %v9336_v34 = vsub.bf16 %v15157_v42, %v14105_v29  ;;  %v4589_v1 = vrot.slane %v4584_v49, %v15117_v12  ;;  %v4596_v55 = vrot.slane %v4591_v38, %v15117_v12 }
 0x1c5   : > { %11446 = vmatprep.mubr.bf16.mxu0 %v14362_v57  ;;  %v4617_v26 = vrot.slane %v4612_v33, %v15117_v12  ;;  %v2378_v4 = vrot.slane %v15312_v43, %v15120_v13  ;;  %v2382_v45 = vrot.slane %v15312_v43, %v15126_v15  ;;  %v4624_v24 = vrot.slane %v4619_v63, %v15117_v12 }
 0x1c6   : > { %v9338_v58 = vsub.bf16 %v15157_v42, %v14107_v40  ;;  %v9592_v27 = vmax.bf16 %v19235_v28, %v9336_v34  ;;  %v2394_v62 = vrot.slane %v15318_v6, %v15120_v13  ;;  %v14108_v61 = vcombine.low %v4589_v1, %v4596_v55 }
 0x1c7   : > { %11447 = vmatmul.mubr.bf16.gmra.mxu0 %v14361_v10  ;;  %v2398_v56 = vrot.slane %v15318_v6, %v15126_v15  ;;  %v4598_v7 = vpack.i.b16 %v2378_v4, %v2378_v4  ;;  %v4605_v21 = vpack.i.b16 %v2382_v45, %v2382_v45  ;;  %v14110_v29 = vcombine.low %v4617_v26, %v4624_v24 }
 0x1c8   : > { %v9594_v18 = vmax.bf16 %v19235_v28, %v9338_v58  ;;  %v4626_v43 = vpack.i.b16 %v2394_v62, %v2394_v62  ;;  %v2402_v16 = vrot.slane %v15330_v5, %v15117_v12  ;;  %v9339_v49 = vsub.bf16 %v15155_v41, %v14108_v61 }
 0x1c9   : > { %v4603_v57 = vrot.slane %v4598_v7, %v15117_v12  ;;  %v4610_v38 = vrot.slane %v4605_v21, %v15117_v12  ;;  %v4633_v10 = vpack.i.b16 %v2398_v56, %v2398_v56  ;;  %v9341_v6 = vsub.bf16 %v15155_v41, %v14110_v29 }
 0x1ca   : > { %v14364_v33 = vcombine.high %v9592_v27, %v9594_v18  ;;  %v14363_v40 = vcombine.low %v9592_v27, %v9594_v18  ;;  %v4631_v34 = vrot.slane %v4626_v43, %v15117_v12  ;;  %v9595_v1 = vmax.bf16 %v19235_v28, %v9339_v49 }
 0x1cb   : > { %v4638_v63 = vrot.slane %v4633_v10, %v15117_v12  ;;  %v14109_v55 = vcombine.low %v4603_v57, %v4610_v38  ;;  %v2406_v26 = vrot.slane %v15330_v5, %v15123_v14  ;;  %v9597_v4 = vmax.bf16 %v19235_v28, %v9341_v6 }
 0x1cc   : > { %11991 = vmatprep.mubr.bf16.mxu1 %v14364_v33  ;;  %v2418_v45 = vrot.slane %v15336_v23, %v15117_v12  ;;  %v2422_v58 = vrot.slane %v15336_v23, %v15123_v14  ;;  %v4640_v41 = vpack.i.b16 %v2402_v16, %v2402_v16  ;;  %v2410_v61 = vrot.slane %v15330_v5, %v15120_v13 }
 0x1cd   : > { %11992 = vmatmul.mubr.bf16.gmra.mxu1 %v14363_v40  ;;  %v14111_v27 = vcombine.low %v4631_v34, %v4638_v63  ;;  %v9340_v24 = vsub.bf16 %v15157_v42, %v14109_v55  ;;  %v4647_v62 = vpack.i.b16 %v2406_v26, %v2406_v26  ;;  %v14366_v56 = vcombine.high %v9595_v1, %v9597_v4 }
 0x1ce   : > { %v14365_v7 = vcombine.low %v9595_v1, %v9597_v4  ;;  %v4645_v21 = vrot.slane %v4640_v41, %v15117_v12  ;;  %v4668_v18 = vpack.i.b16 %v2418_v45, %v2418_v45  ;;  %v4675_v16 = vpack.i.b16 %v2422_v58, %v2422_v58 }
 0x1cf   : > { %v9342_v29 = vsub.bf16 %v15157_v42, %v14111_v27  ;;  %v9596_v43 = vmax.bf16 %v19235_v28, %v9340_v24  ;;  %v4652_v49 = vrot.slane %v4647_v62, %v15117_v12  ;;  %11454 = vmatprep.mubr.bf16.mxu0 %v14366_v56  ;;  %v2414_v38 = vrot.slane %v15330_v5, %v15126_v15 }
 0x1d0   : > { %v4673_v57 = vrot.slane %v4668_v18, %v15117_v12  ;;  %v2426_v10 = vrot.slane %v15336_v23, %v15120_v13  ;;  %v2430_v33 = vrot.slane %v15336_v23, %v15126_v15  ;;  %11455 = vmatmul.mubr.bf16.gmra.mxu0 %v14365_v7  ;;  %v4680_v42 = vrot.slane %v4675_v16, %v15117_v12 }
 0x1d1   : > { %v9598_v40 = vmax.bf16 %v19235_v28, %v9342_v29  ;;  %v14112_v6 = vcombine.low %v4645_v21, %v4652_v49  ;;  %v4654_v34 = vpack.i.b16 %v2410_v61, %v2410_v61  ;;  %v4661_v1 = vpack.i.b16 %v2414_v38, %v2414_v38 }
 0x1d2   : > { %v4682_v63 = vpack.i.b16 %v2426_v10, %v2426_v10  ;;  %v4689_v55 = vpack.i.b16 %v2430_v33, %v2430_v33  ;;  %v2434_v26 = vrot.slane %v15332_v47, %v15117_v12  ;;  %v14114_v45 = vcombine.low %v4673_v57, %v4680_v42 }
 0x1d3   : > { %v14368_v5 = vcombine.high %v9596_v43, %v9598_v40  ;;  %v14367_v4 = vcombine.low %v9596_v43, %v9598_v40  ;;  %v9343_v58 = vsub.bf16 %v15163_v51, %v14112_v6  ;;  %v4659_v23 = vrot.slane %v4654_v34, %v15117_v12 }
 0x1d4   : > { %v4666_v41 = vrot.slane %v4661_v1, %v15117_v12  ;;  %v4687_v27 = vrot.slane %v4682_v63, %v15117_v12  ;;  %v4694_v24 = vrot.slane %v4689_v55, %v15117_v12  ;;  %v9345_v62 = vsub.bf16 %v15163_v51, %v14114_v45 }
 0x1d5   : > { %11999 = vmatprep.mubr.bf16.mxu1 %v14368_v5  ;;  %v9599_v61 = vmax.bf16 %v19235_v28, %v9343_v58  ;;  %v2438_v56 = vrot.slane %v15332_v47, %v15123_v14  ;;  %v2450_v7 = vrot.slane %v15338_v2, %v15117_v12  ;;  %v2454_v29 = vrot.slane %v15338_v2, %v15123_v14 }
 0x1d6   : > { %12000 = vmatmul.mubr.bf16.gmra.mxu1 %v14367_v4  ;;  %v14113_v21 = vcombine.low %v4659_v23, %v4666_v41  ;;  %v14115_v18 = vcombine.low %v4687_v27, %v4694_v24  ;;  %v4696_v43 = vpack.i.b16 %v2434_v26, %v2434_v26  ;;  %v9601_v49 = vmax.bf16 %v19235_v28, %v9345_v62 }
 0x1d7   : > { %v4703_v16 = vpack.i.b16 %v2438_v56, %v2438_v56  ;;  %v4724_v57 = vpack.i.b16 %v2450_v7, %v2450_v7  ;;  %v2442_v38 = vrot.slane %v15332_v47, %v15120_v13  ;;  %v4731_v42 = vpack.i.b16 %v2454_v29, %v2454_v29 }
 0x1d8   : > { %v9344_v10 = vsub.bf16 %v15165_v52, %v14113_v21  ;;  %v9346_v33 = vsub.bf16 %v15165_v52, %v14115_v18  ;;  %v4701_v40 = vrot.slane %v4696_v43, %v15117_v12  ;;  %v14370_v6 = vcombine.high %v9599_v61, %v9601_v49 }
 0x1d9   : > { %v14369_v34 = vcombine.low %v9599_v61, %v9601_v49  ;;  %v4708_v1 = vrot.slane %v4703_v16, %v15117_v12  ;;  %v4729_v63 = vrot.slane %v4724_v57, %v15117_v12  ;;  %v4736_v5 = vrot.slane %v4731_v42, %v15117_v12 }
 0x1da   : > { %v9600_v55 = vmax.bf16 %v19235_v28, %v9344_v10  ;;  %v9602_v26 = vmax.bf16 %v19235_v28, %v9346_v33  ;;  %v2446_v4 = vrot.slane %v15332_v47, %v15126_v15  ;;  %11462 = vmatprep.mubr.bf16.mxu0 %v14370_v6  ;;  %v2458_v58 = vrot.slane %v15338_v2, %v15120_v13 }
 0x1db   : > { %v14116_v45 = vcombine.low %v4701_v40, %v4708_v1  ;;  %v2462_v23 = vrot.slane %v15338_v2, %v15126_v15  ;;  %v4710_v41 = vpack.i.b16 %v2442_v38, %v2442_v38  ;;  %11463 = vmatmul.mubr.bf16.gmra.mxu0 %v14369_v34  ;;  %v14118_v62 = vcombine.low %v4729_v63, %v4736_v5  ;;  %v19312_v38 = vld [vmem:[#allocation28_spill] sm:$0xff] }
 0x1dc   : > { %v14372_v27 = vcombine.high %v9600_v55, %v9602_v26  ;;  %v14371_v24 = vcombine.low %v9600_v55, %v9602_v26  ;;  %v4717_v61 = vpack.i.b16 %v2446_v4, %v2446_v4  ;;  %v4738_v21 = vpack.i.b16 %v2458_v58, %v2458_v58 }
 0x1dd   : > { %v9347_v56 = vsub.bf16 %v15163_v51, %v14116_v45  ;;  %v4715_v7 = vrot.slane %v4710_v41, %v15117_v12  ;;  %v4745_v47 = vpack.i.b16 %v2462_v23, %v2462_v23  ;;  %v9349_v18 = vsub.bf16 %v15163_v51, %v14118_v62 }
 0x1de   : > { %12007 = vmatprep.mubr.bf16.mxu1 %v14372_v27  ;;  %v4722_v29 = vrot.slane %v4717_v61, %v15117_v12  ;;  %v2466_v2 = vrot.slane %v15340_v39, %v15117_v12  ;;  %v2470_v43 = vrot.slane %v15340_v39, %v15123_v14  ;;  %v4743_v16 = vrot.slane %v4738_v21, %v15117_v12 }
 0x1df   : > { %12008 = vmatmul.mubr.bf16.gmra.mxu1 %v14371_v24  ;;  %v9603_v49 = vmax.bf16 %v19235_v28, %v9347_v56  ;;  %v4750_v57 = vrot.slane %v4745_v47, %v15117_v12  ;;  %v2482_v10 = vrot.slane %v19312_v38, %v15117_v12  ;;  %v9605_v33 = vmax.bf16 %v19235_v28, %v9349_v18 }
 0x1e0   : > { %v14117_v40 = vcombine.low %v4715_v7, %v4722_v29  ;;  %v2486_v42 = vrot.slane %v19312_v38, %v15123_v14  ;;  %v4752_v6 = vpack.i.b16 %v2466_v2, %v2466_v2  ;;  %v4759_v1 = vpack.i.b16 %v2470_v43, %v2470_v43 }
 0x1e1   : > { %v14119_v34 = vcombine.low %v4743_v16, %v4750_v57  ;;  %v4780_v63 = vpack.i.b16 %v2482_v10, %v2482_v10  ;;  %v2474_v55 = vrot.slane %v15340_v39, %v15120_v13  ;;  %v14374_v26 = vcombine.high %v9603_v49, %v9605_v33 }
 0x1e2   : > { %v9348_v5 = vsub.bf16 %v15165_v52, %v14117_v40  ;;  %v14373_v4 = vcombine.low %v9603_v49, %v9605_v33  ;;  %v4757_v45 = vrot.slane %v4752_v6, %v15117_v12  ;;  %v4764_v23 = vrot.slane %v4759_v1, %v15117_v12  ;;  %v19313_v49 = vld [vmem:[#allocation29_spill] sm:$0xff] }
 0x1e3   : > { %v9350_v58 = vsub.bf16 %v15165_v52, %v14119_v34  ;;  %v4785_v41 = vrot.slane %v4780_v63, %v15117_v12  ;;  %v4787_v27 = vpack.i.b16 %v2486_v42, %v2486_v42  ;;  %11470 = vmatprep.mubr.bf16.mxu0 %v14374_v26  ;;  %v2478_v62 = vrot.slane %v15340_v39, %v15126_v15 }
 0x1e4   : > { %v9604_v24 = vmax.bf16 %v19235_v28, %v9348_v5  ;;  %v2490_v61 = vrot.slane %v19312_v38, %v15120_v13  ;;  %v2494_v56 = vrot.slane %v19312_v38, %v15126_v15  ;;  %11471 = vmatmul.mubr.bf16.gmra.mxu0 %v14373_v4  ;;  %v14120_v47 = vcombine.low %v4757_v45, %v4764_v23 }
 0x1e5   : > { %v9606_v7 = vmax.bf16 %v19235_v28, %v9350_v58  ;;  %v4792_v21 = vrot.slane %v4787_v27, %v15117_v12  ;;  %v4766_v18 = vpack.i.b16 %v2474_v55, %v2474_v55  ;;  %v4773_v29 = vpack.i.b16 %v2478_v62, %v2478_v62  ;;  %v19314_v55 = vld [vmem:[#allocation30_spill] sm:$0xff] }
 0x1e6   : > { %v4794_v2 = vpack.i.b16 %v2490_v61, %v2490_v61  ;;  %v4801_v43 = vpack.i.b16 %v2494_v56, %v2494_v56  ;;  %v2498_v16 = vrot.slane %v19313_v49, %v15117_v12  ;;  %v9351_v33 = vsub.bf16 %v15163_v51, %v14120_v47 }
 0x1e7   : > { %v14376_v39 = vcombine.high %v9604_v24, %v9606_v7  ;;  %v14375_v57 = vcombine.low %v9604_v24, %v9606_v7  ;;  %v14122_v10 = vcombine.low %v4785_v41, %v4792_v21  ;;  %v4771_v38 = vrot.slane %v4766_v18, %v15117_v12 }
 0x1e8   : > { %v4778_v40 = vrot.slane %v4773_v29, %v15117_v12  ;;  %v4799_v42 = vrot.slane %v4794_v2, %v15117_v12  ;;  %v4806_v6 = vrot.slane %v4801_v43, %v15117_v12  ;;  %v9607_v1 = vmax.bf16 %v19235_v28, %v9351_v33 }
 0x1e9   : > { %12015 = vmatprep.mubr.bf16.mxu1 %v14376_v39  ;;  %v9353_v34 = vsub.bf16 %v15163_v51, %v14122_v10  ;;  %v2502_v63 = vrot.slane %v19313_v49, %v15123_v14  ;;  %v2514_v26 = vrot.slane %v19314_v55, %v15117_v12  ;;  %v2518_v45 = vrot.slane %v19314_v55, %v15123_v14 }
 0x1ea   : > { %12016 = vmatmul.mubr.bf16.gmra.mxu1 %v14375_v57  ;;  %v14121_v5 = vcombine.low %v4771_v38, %v4778_v40  ;;  %v14123_v4 = vcombine.low %v4799_v42, %v4806_v6  ;;  %v4808_v58 = vpack.i.b16 %v2498_v16, %v2498_v16  ;;  %v2506_v24 = vrot.slane %v19313_v49, %v15120_v13 }
 0x1eb   : > { %v9609_v23 = vmax.bf16 %v19235_v28, %v9353_v34  ;;  %v4815_v41 = vpack.i.b16 %v2502_v63, %v2502_v63  ;;  %v4836_v27 = vpack.i.b16 %v2514_v26, %v2514_v26  ;;  %v4843_v7 = vpack.i.b16 %v2518_v45, %v2518_v45 }
 0x1ec   : > { %v9352_v62 = vsub.bf16 %v15165_v52, %v14121_v5  ;;  %v9354_v61 = vsub.bf16 %v15165_v52, %v14123_v4  ;;  %v4813_v56 = vrot.slane %v4808_v58, %v15117_v12  ;;  %v2510_v39 = vrot.slane %v19313_v49, %v15126_v15 }
 0x1ed   : > { %v14378_v21 = vcombine.high %v9607_v1, %v9609_v23  ;;  %v14377_v47 = vcombine.low %v9607_v1, %v9609_v23  ;;  %v4820_v18 = vrot.slane %v4815_v41, %v15117_v12  ;;  %v4841_v29 = vrot.slane %v4836_v27, %v15117_v12  ;;  %v19315_v27 = vld [vmem:[#allocation32_spill] sm:$0xff] }
 0x1ee   : > { %v9608_v2 = vmax.bf16 %v19235_v28, %v9352_v62  ;;  %v9610_v43 = vmax.bf16 %v19235_v28, %v9354_v61  ;;  %v4848_v16 = vrot.slane %v4843_v7, %v15117_v12  ;;  %v2522_v10 = vrot.slane %v19314_v55, %v15120_v13 }
 0x1ef   : > { %11478 = vmatprep.mubr.bf16.mxu0 %v14378_v21  ;;  %v14124_v57 = vcombine.low %v4813_v56, %v4820_v18  ;;  %v2526_v33 = vrot.slane %v19314_v55, %v15126_v15  ;;  %v4822_v38 = vpack.i.b16 %v2506_v24, %v2506_v24  ;;  %v4829_v34 = vpack.i.b16 %v2510_v39, %v2510_v39 }
 0x1f0   : > { %v14380_v40 = vcombine.high %v9608_v2, %v9610_v43  ;;  %11479 = vmatmul.mubr.bf16.gmra.mxu0 %v14377_v47  ;;  %v14379_v42 = vcombine.low %v9608_v2, %v9610_v43  ;;  %v14126_v6 = vcombine.low %v4841_v29, %v4848_v16  ;;  %v4850_v26 = vpack.i.b16 %v2522_v10, %v2522_v10 }
 0x1f1   : > { %v9355_v1 = vsub.bf16 %v15163_v51, %v14124_v57  ;;  %v4827_v63 = vrot.slane %v4822_v38, %v15117_v12  ;;  %v4857_v49 = vpack.i.b16 %v2526_v33, %v2526_v33  ;;  %v4834_v4 = vrot.slane %v4829_v34, %v15117_v12 }
 0x1f2   : > { %12023 = vmatprep.mubr.bf16.mxu1 %v14380_v40  ;;  %v9357_v5 = vsub.bf16 %v15163_v51, %v14126_v6  ;;  %v2530_v55 = vrot.slane %v15350_v8, %v15117_v12  ;;  %v2534_v45 = vrot.slane %v15350_v8, %v15123_v14  ;;  %v4855_v23 = vrot.slane %v4850_v26, %v15117_v12 }
 0x1f3   : > { %12024 = vmatmul.mubr.bf16.gmra.mxu1 %v14379_v42  ;;  %v9611_v58 = vmax.bf16 %v19235_v28, %v9355_v1  ;;  %v4862_v41 = vrot.slane %v4857_v49, %v15117_v12  ;;  %v2546_v24 = vrot.slane %v19315_v27, %v15117_v12  ;;  %v14125_v62 = vcombine.low %v4827_v63, %v4834_v4  ;;  %v19316_v4 = vld [vmem:[#allocation31_spill] sm:$0xff] }
 0x1f4   : > { %v9613_v51 = vmax.bf16 %v19235_v28, %v9357_v5  ;;  %v2550_v61 = vrot.slane %v19315_v27, %v15123_v14  ;;  %v4864_v56 = vpack.i.b16 %v2530_v55, %v2530_v55  ;;  %v4871_v21 = vpack.i.b16 %v2534_v45, %v2534_v45 }
 0x1f5   : > { %v14127_v7 = vcombine.low %v4855_v23, %v4862_v41  ;;  %v4892_v47 = vpack.i.b16 %v2546_v24, %v2546_v24  ;;  %v2538_v18 = vrot.slane %v15350_v8, %v15120_v13  ;;  %v9356_v2 = vsub.bf16 %v15165_v52, %v14125_v62  ;;  %v19317_v23 = vld [vmem:[#allocation2_spill] sm:$0xff] }
 0x1f6   : > { %v14382_v29 = vcombine.high %v9611_v58, %v9613_v51  ;;  %v14381_v43 = vcombine.low %v9611_v58, %v9613_v51  ;;  %v4869_v16 = vrot.slane %v4864_v56, %v15117_v12  ;;  %v4876_v57 = vrot.slane %v4871_v21, %v15117_v12  ;;  %v19318_v21 = vld [vmem:[#allocation33_spill] sm:$0xff] }
 0x1f7   : > { %v9358_v39 = vsub.bf16 %v15165_v52, %v14127_v7  ;;  %v4897_v10 = vrot.slane %v4892_v47, %v15117_v12  ;;  %v4899_v33 = vpack.i.b16 %v2550_v61, %v2550_v61  ;;  %v9612_v38 = vmax.bf16 %v19235_v28, %v9356_v2 }
 0x1f8   : > { %11486 = vmatprep.mubr.bf16.mxu0 %v14382_v29  ;;  %v2542_v40 = vrot.slane %v15350_v8, %v15126_v15  ;;  %v2554_v42 = vrot.slane %v19315_v27, %v15120_v13  ;;  %v2558_v6 = vrot.slane %v19315_v27, %v15126_v15  ;;  %v14128_v1 = vcombine.low %v4869_v16, %v4876_v57 }
 0x1f9   : > { %v9614_v34 = vmax.bf16 %v19235_v28, %v9358_v39  ;;  %11487 = vmatmul.mubr.bf16.gmra.mxu0 %v14381_v43  ;;  %v4904_v52 = vrot.slane %v4899_v33, %v15117_v12  ;;  %v4878_v63 = vpack.i.b16 %v2538_v18, %v2538_v18  ;;  %v2562_v55 = vrot.slane %v19316_v4, %v15117_v12  ;;  %v19319_v33 = vld [vmem:[#allocation3_spill] sm:$0xff] }
 0x1fa   : > { %v4885_v26 = vpack.i.b16 %v2542_v40, %v2542_v40  ;;  %v4906_v49 = vpack.i.b16 %v2554_v42, %v2554_v42  ;;  %v4913_v5 = vpack.i.b16 %v2558_v6, %v2558_v6  ;;  %v9359_v41 = vsub.bf16 %v19317_v23, %v14128_v1 }
 0x1fb   : > { %v14384_v8 = vcombine.high %v9612_v38, %v9614_v34  ;;  %v14383_v45 = vcombine.low %v9612_v38, %v9614_v34  ;;  %v14130_v58 = vcombine.low %v4897_v10, %v4904_v52  ;;  %v4883_v27 = vrot.slane %v4878_v63, %v15117_v12 }
 0x1fc   : > { %v4890_v24 = vrot.slane %v4885_v26, %v15117_v12  ;;  %v4911_v51 = vrot.slane %v4906_v49, %v15117_v12  ;;  %v4918_v62 = vrot.slane %v4913_v5, %v15117_v12  ;;  %v9615_v56 = vmax.bf16 %v19235_v28, %v9359_v41 }
 0x1fd   : > { %12031 = vmatprep.mubr.bf16.mxu1 %v14384_v8  ;;  %v9361_v61 = vsub.bf16 %v19317_v23, %v14130_v58  ;;  %v2566_v7 = vrot.slane %v19316_v4, %v15123_v14  ;;  %v2578_v47 = vrot.slane %v19318_v21, %v15117_v12  ;;  %v2582_v2 = vrot.slane %v19318_v21, %v15123_v14 }
 0x1fe   : > { %12032 = vmatmul.mubr.bf16.gmra.mxu1 %v14383_v45  ;;  %v14129_v18 = vcombine.low %v4883_v27, %v4890_v24  ;;  %v14131_v29 = vcombine.low %v4911_v51, %v4918_v62  ;;  %v4920_v43 = vpack.i.b16 %v2562_v55, %v2562_v55  ;;  %v2570_v10 = vrot.slane %v19316_v4, %v15120_v13 }
 0x1ff   : > { %v9617_v16 = vmax.bf16 %v19235_v28, %v9361_v61  ;;  %v4927_v39 = vpack.i.b16 %v2566_v7, %v2566_v7  ;;  %v4948_v57 = vpack.i.b16 %v2578_v47, %v2578_v47  ;;  %v4955_v6 = vpack.i.b16 %v2582_v2, %v2582_v2 }
 0x200   : > { %v9360_v38 = vsub.bf16 %v19319_v33, %v14129_v18  ;;  %v9362_v40 = vsub.bf16 %v19319_v33, %v14131_v29  ;;  %v4925_v42 = vrot.slane %v4920_v43, %v15117_v12  ;;  %v2574_v55 = vrot.slane %v19316_v4, %v15126_v15 }
 0x201   : > { %v14386_v34 = vcombine.high %v9615_v56, %v9617_v16  ;;  %v14385_v52 = vcombine.low %v9615_v56, %v9617_v16  ;;  %v4932_v1 = vrot.slane %v4927_v39, %v15117_v12  ;;  %v4953_v63 = vrot.slane %v4948_v57, %v15117_v12 }
 0x202   : > { %v9616_v26 = vmax.bf16 %v19235_v28, %v9360_v38  ;;  %v9618_v49 = vmax.bf16 %v19235_v28, %v9362_v40  ;;  %v4960_v5 = vrot.slane %v4955_v6, %v15117_v12  ;;  %v2586_v45 = vrot.slane %v19318_v21, %v15120_v13 }
 0x203   : > { %11494 = vmatprep.mubr.bf16.mxu0 %v14386_v34  ;;  %v14132_v8 = vcombine.low %v4925_v42, %v4932_v1  ;;  %v2590_v58 = vrot.slane %v19318_v21, %v15126_v15  ;;  %v4934_v41 = vpack.i.b16 %v2570_v10, %v2570_v10  ;;  %v4941_v62 = vpack.i.b16 %v2574_v55, %v2574_v55 }
 0x204   : > { %v14388_v27 = vcombine.high %v9616_v26, %v9618_v49  ;;  %11495 = vmatmul.mubr.bf16.gmra.mxu0 %v14385_v52  ;;  %v14387_v24 = vcombine.low %v9616_v26, %v9618_v49  ;;  %v14134_v51 = vcombine.low %v4953_v63, %v4960_v5  ;;  %v4962_v7 = vpack.i.b16 %v2586_v45, %v2586_v45 }
 0x205   : > { %v9363_v61 = vsub.bf16 %v19317_v23, %v14132_v8  ;;  %v4939_v56 = vrot.slane %v4934_v41, %v15117_v12  ;;  %v4969_v4 = vpack.i.b16 %v2590_v58, %v2590_v58  ;;  %v4946_v18 = vrot.slane %v4941_v62, %v15117_v12 }
 0x206   : > { %12039 = vmatprep.mubr.bf16.mxu1 %v14388_v27  ;;  %v9365_v47 = vsub.bf16 %v19317_v23, %v14134_v51  ;;  %v2594_v21 = vrot.slane %v15360_v59, %v15117_v12  ;;  %v2598_v29 = vrot.slane %v15360_v59, %v15123_v14  ;;  %v4967_v43 = vrot.slane %v4962_v7, %v15117_v12 }
 0x207   : > { %12040 = vmatmul.mubr.bf16.gmra.mxu1 %v14387_v24  ;;  %v9619_v2 = vmax.bf16 %v19235_v28, %v9363_v61  ;;  %v4974_v16 = vrot.slane %v4969_v4, %v15117_v12  ;;  %v2610_v39 = vrot.slane %v15362_v22, %v15117_v12  ;;  %v14133_v10 = vcombine.low %v4939_v56, %v4946_v18 }
 0x208   : > { %v9621_v57 = vmax.bf16 %v19235_v28, %v9365_v47  ;;  %v2614_v38 = vrot.slane %v15362_v22, %v15123_v14  ;;  %v4976_v40 = vpack.i.b16 %v2594_v21, %v2594_v21  ;;  %v4983_v6 = vpack.i.b16 %v2598_v29, %v2598_v29 }
 0x209   : > { %v14135_v42 = vcombine.low %v4967_v43, %v4974_v16  ;;  %v5004_v34 = vpack.i.b16 %v2610_v39, %v2610_v39  ;;  %v2602_v52 = vrot.slane %v15360_v59, %v15120_v13  ;;  %v9364_v63 = vsub.bf16 %v19319_v33, %v14133_v10 }
 0x20a   : > { %v14390_v1 = vcombine.high %v9619_v2, %v9621_v57  ;;  %v14389_v26 = vcombine.low %v9619_v2, %v9621_v57  ;;  %v4981_v49 = vrot.slane %v4976_v40, %v15117_v12  ;;  %v4988_v55 = vrot.slane %v4983_v6, %v15117_v12  ;;  %v19320_v40 = vld [vmem:[#allocation34_spill] sm:$0xff] }
 0x20b   : > { %v9366_v5 = vsub.bf16 %v19319_v33, %v14135_v42  ;;  %v5009_v8 = vrot.slane %v5004_v34, %v15117_v12  ;;  %v5011_v45 = vpack.i.b16 %v2614_v38, %v2614_v38  ;;  %v9620_v58 = vmax.bf16 %v19235_v28, %v9364_v63 }
 0x20c   : > { %11502 = vmatprep.mubr.bf16.mxu0 %v14390_v1  ;;  %v2606_v41 = vrot.slane %v15360_v59, %v15126_v15  ;;  %v2618_v27 = vrot.slane %v15362_v22, %v15120_v13  ;;  %v2622_v24 = vrot.slane %v15362_v22, %v15126_v15  ;;  %v14136_v61 = vcombine.low %v4981_v49, %v4988_v55 }
 0x20d   : > { %v9622_v51 = vmax.bf16 %v19235_v28, %v9366_v5  ;;  %11503 = vmatmul.mubr.bf16.gmra.mxu0 %v14389_v26  ;;  %v5016_v62 = vrot.slane %v5011_v45, %v15117_v12  ;;  %v4990_v56 = vpack.i.b16 %v2602_v52, %v2602_v52  ;;  %v2626_v18 = vrot.slane %v15364_v30, %v15117_v12 }
 0x20e   : > { %v4997_v7 = vpack.i.b16 %v2606_v41, %v2606_v41  ;;  %v5018_v4 = vpack.i.b16 %v2618_v27, %v2618_v27  ;;  %v5025_v47 = vpack.i.b16 %v2622_v24, %v2622_v24  ;;  %v9367_v2 = vsub.bf16 %v19317_v23, %v14136_v61 }
 0x20f   : > { %v14392_v59 = vcombine.high %v9620_v58, %v9622_v51  ;;  %v14391_v21 = vcombine.low %v9620_v58, %v9622_v51  ;;  %v14138_v29 = vcombine.low %v5009_v8, %v5016_v62  ;;  %v4995_v22 = vrot.slane %v4990_v56, %v15117_v12 }
 0x210   : > { %v5002_v43 = vrot.slane %v4997_v7, %v15117_v12  ;;  %v5023_v16 = vrot.slane %v5018_v4, %v15117_v12  ;;  %v5030_v39 = vrot.slane %v5025_v47, %v15117_v12  ;;  %v9623_v10 = vmax.bf16 %v19235_v28, %v9367_v2 }
 0x211   : > { %12047 = vmatprep.mubr.bf16.mxu1 %v14392_v59  ;;  %v9369_v57 = vsub.bf16 %v19317_v23, %v14138_v29  ;;  %v2630_v38 = vrot.slane %v15364_v30, %v15123_v14  ;;  %v2642_v42 = vrot.slane %v19320_v40, %v15117_v12  ;;  %v2646_v52 = vrot.slane %v19320_v40, %v15123_v14 }
 0x212   : > { %12048 = vmatmul.mubr.bf16.gmra.mxu1 %v14391_v21  ;;  %v14137_v6 = vcombine.low %v4995_v22, %v5002_v43  ;;  %v14139_v34 = vcombine.low %v5023_v16, %v5030_v39  ;;  %v5032_v1 = vpack.i.b16 %v2626_v18, %v2626_v18  ;;  %v2634_v5 = vrot.slane %v15364_v30, %v15120_v13 }
 0x213   : > { %v9625_v63 = vmax.bf16 %v19235_v28, %v9369_v57  ;;  %v5039_v26 = vpack.i.b16 %v2630_v38, %v2630_v38  ;;  %v5060_v49 = vpack.i.b16 %v2642_v42, %v2642_v42  ;;  %v5067_v58 = vpack.i.b16 %v2646_v52, %v2646_v52 }
 0x214   : > { %v9368_v55 = vsub.bf16 %v19319_v33, %v14137_v6  ;;  %v9370_v8 = vsub.bf16 %v19319_v33, %v14139_v34  ;;  %v5037_v45 = vrot.slane %v5032_v1, %v15117_v12  ;;  %v2638_v7 = vrot.slane %v15364_v30, %v15126_v15  ;;  %v16223_v57 = vpop.f32.mrf.mxu0 }
 0x215   : > { %v14394_v41 = vcombine.high %v9623_v10, %v9625_v63  ;;  %v14393_v27 = vcombine.low %v9623_v10, %v9625_v63  ;;  %v5044_v24 = vrot.slane %v5039_v26, %v15117_v12  ;;  %v5065_v51 = vrot.slane %v5060_v49, %v15117_v12  ;;  %v19322_v63 = vld [vmem:[#allocation37_spill] sm:$0xff] }
 0x216   : > { %v9624_v62 = vmax.bf16 %v19235_v28, %v9368_v55  ;;  %v9626_v61 = vmax.bf16 %v19235_v28, %v9370_v8  ;;  %v5072_v56 = vrot.slane %v5067_v58, %v15117_v12  ;;  %v2650_v47 = vrot.slane %v19320_v40, %v15120_v13  ;;  %v11402_v49 = vpop.f32.mrf.mxu0 }
 0x217   : > { %11510 = vmatprep.mubr.bf16.mxu0 %v14394_v41  ;;  %v14140_v4 = vcombine.low %v5037_v45, %v5044_v24  ;;  %v2654_v18 = vrot.slane %v19320_v40, %v15126_v15  ;;  %v5046_v59 = vpack.i.b16 %v2634_v5, %v2634_v5  ;;  %v5053_v22 = vpack.i.b16 %v2638_v7, %v2638_v7  ;;  %v19321_v40 = vld [vmem:[#allocation35_spill] sm:$0xff]  ;;  %v19324_v49 = vld [vmem:[#allocation4_spill] sm:$0xff] }
 0x218   : > { %v14396_v21 = vcombine.high %v9624_v62, %v9626_v61  ;;  %11511 = vmatmul.mubr.bf16.gmra.mxu0 %v14393_v27  ;;  %v14395_v29 = vcombine.low %v9624_v62, %v9626_v61  ;;  %v14142_v2 = vcombine.low %v5065_v51, %v5072_v56  ;;  %v5074_v39 = vpack.i.b16 %v2650_v47, %v2650_v47  ;;  %v16241_v24 = vpop.f32.mrf.mxu0 }
 0x219   : > { %v9371_v43 = vsub.bf16 %v19317_v23, %v14140_v4  ;;  %v5051_v16 = vrot.slane %v5046_v59, %v15117_v12  ;;  %v5081_v30 = vpack.i.b16 %v2654_v18, %v2654_v18  ;;  %v5058_v38 = vrot.slane %v5053_v22, %v15117_v12 }
 0x21a   : > { %12055 = vmatprep.mubr.bf16.mxu1 %v14396_v21  ;;  %v9373_v10 = vsub.bf16 %v19317_v23, %v14142_v2  ;;  %v2658_v42 = vrot.slane %v19321_v40, %v15117_v12  ;;  %v2662_v6 = vrot.slane %v19321_v40, %v15123_v14  ;;  %v5079_v52 = vrot.slane %v5074_v39, %v15117_v12  ;;  %v16248_v59 = vpop.f32.mrf.mxu1  ;;  %v11405_v21 = vpop.f32.mrf.mxu0 }
 0x21b   : > { %12056 = vmatmul.mubr.bf16.gmra.mxu1 %v14395_v29  ;;  %v9627_v34 = vmax.bf16 %v19235_v28, %v9371_v43  ;;  %v5086_v1 = vrot.slane %v5081_v30, %v15117_v12  ;;  %v2674_v26 = vrot.slane %v19322_v63, %v15117_v12  ;;  %v14141_v5 = vcombine.low %v5051_v16, %v5058_v38 }
 0x21c   : > { %v9629_v23 = vmax.bf16 %v19235_v28, %v9373_v10  ;;  %v2678_v55 = vrot.slane %v19322_v63, %v15123_v14  ;;  %v5088_v8 = vpack.i.b16 %v2658_v42, %v2658_v42  ;;  %v5095_v58 = vpack.i.b16 %v2662_v6, %v2662_v6  ;;  %v11947_v10 = vpop.f32.mrf.mxu1 }
 0x21d   : > { %v14143_v45 = vcombine.low %v5079_v52, %v5086_v1  ;;  %v5116_v41 = vpack.i.b16 %v2674_v26, %v2674_v26  ;;  %v2666_v27 = vrot.slane %v19321_v40, %v15120_v13  ;;  %v9372_v62 = vsub.bf16 %v19319_v33, %v14141_v5 }
 0x21e   : > { %v14398_v51 = vcombine.high %v9627_v34, %v9629_v23  ;;  %v14397_v61 = vcombine.low %v9627_v34, %v9629_v23  ;;  %v5093_v56 = vrot.slane %v5088_v8, %v15117_v12  ;;  %v5100_v4 = vrot.slane %v5095_v58, %v15117_v12  ;;  %v19323_v34 = vld [vmem:[#allocation36_spill] sm:$0xff] }
 0x21f   : > { %v9374_v7 = vsub.bf16 %v19319_v33, %v14143_v45  ;;  %v5121_v47 = vrot.slane %v5116_v41, %v15117_v12  ;;  %v5123_v18 = vpack.i.b16 %v2678_v55, %v2678_v55  ;;  %v9628_v29 = vmax.bf16 %v19235_v28, %v9372_v62 }
 0x220   : > { %11518 = vmatprep.mubr.bf16.mxu0 %v14398_v51  ;;  %v2670_v2 = vrot.slane %v19321_v40, %v15126_v15  ;;  %v2682_v22 = vrot.slane %v19322_v63, %v15120_v13  ;;  %v2686_v33 = vrot.slane %v19322_v63, %v15126_v15  ;;  %v14144_v39 = vcombine.low %v5093_v56, %v5100_v4  ;;  %v16262_v63 = vpop.f32.mrf.mxu1  ;;  %v19325_v51 = vld [vmem:[#allocation38_spill] sm:$0xff] }
 0x221   : > { %v9630_v43 = vmax.bf16 %v19235_v28, %v9374_v7  ;;  %11519 = vmatmul.mubr.bf16.gmra.mxu0 %v14397_v61  ;;  %v5128_v16 = vrot.slane %v5123_v18, %v15117_v12  ;;  %v5102_v30 = vpack.i.b16 %v2666_v27, %v2666_v27  ;;  %v2690_v40 = vrot.slane %v19323_v34, %v15117_v12 }
 0x222   : > { %v5109_v38 = vpack.i.b16 %v2670_v2, %v2670_v2  ;;  %v5130_v42 = vpack.i.b16 %v2682_v22, %v2682_v22  ;;  %v5137_v6 = vpack.i.b16 %v2686_v33, %v2686_v33  ;;  %v9375_v23 = vsub.bf16 %v19324_v49, %v14144_v39  ;;  %v11950_v61 = vpop.f32.mrf.mxu1  ;;  %v19326_v22 = vld [vmem:[#allocation5_spill] sm:$0xff] }
 0x223   : > { %v14400_v52 = vcombine.high %v9628_v29, %v9630_v43  ;;  %v14399_v1 = vcombine.low %v9628_v29, %v9630_v43  ;;  %v14146_v26 = vcombine.low %v5121_v47, %v5128_v16  ;;  %v5107_v5 = vrot.slane %v5102_v30, %v15117_v12 }
 0x224   : > { %v5114_v55 = vrot.slane %v5109_v38, %v15117_v12  ;;  %v5135_v8 = vrot.slane %v5130_v42, %v15117_v12  ;;  %v5142_v45 = vrot.slane %v5137_v6, %v15117_v12  ;;  %v9631_v41 = vmax.bf16 %v19235_v28, %v9375_v23 }
 0x225   : > { %12063 = vmatprep.mubr.bf16.mxu1 %v14400_v52  ;;  %v9377_v58 = vsub.bf16 %v19324_v49, %v14146_v26  ;;  %v2694_v27 = vrot.slane %v19323_v34, %v15123_v14  ;;  %v2706_v62 = vrot.slane %v19325_v51, %v15117_v12  ;;  %v2710_v4 = vrot.slane %v19325_v51, %v15123_v14 }
 0x226   : > { %12064 = vmatmul.mubr.bf16.gmra.mxu1 %v14399_v1  ;;  %v14145_v56 = vcombine.low %v5107_v5, %v5114_v55  ;;  %v14147_v7 = vcombine.low %v5135_v8, %v5142_v45  ;;  %v5144_v47 = vpack.i.b16 %v2690_v40, %v2690_v40  ;;  %v2698_v2 = vrot.slane %v19323_v34, %v15120_v13  ;;  %v16293_v8 = vpop.f32.mrf.mxu0 }
 0x227   : > { %v9633_v18 = vmax.bf16 %v19235_v28, %v9377_v58  ;;  %v5151_v21 = vpack.i.b16 %v2694_v27, %v2694_v27  ;;  %v5172_v29 = vpack.i.b16 %v2706_v62, %v2706_v62  ;;  %v5179_v39 = vpack.i.b16 %v2710_v4, %v2710_v4 }
 0x228   : > { %v9376_v33 = vsub.bf16 %v19326_v22, %v14145_v56  ;;  %v9378_v43 = vsub.bf16 %v19326_v22, %v14147_v7  ;;  %v5149_v16 = vrot.slane %v5144_v47, %v15117_v12  ;;  %v2702_v1 = vrot.slane %v19323_v34, %v15126_v15  ;;  %v11410_v7 = vpop.f32.mrf.mxu0  ;;  %v19327_v47 = vld [vmem:[#allocation39_spill] sm:$0xff] }
 0x229   : > { %v14402_v30 = vcombine.high %v9631_v41, %v9633_v18  ;;  %v14401_v10 = vcombine.low %v9631_v41, %v9633_v18  ;;  %v5156_v38 = vrot.slane %v5151_v21, %v15117_v12  ;;  %v5177_v42 = vrot.slane %v5172_v29, %v15117_v12 }
 0x22a   : > { %v9632_v6 = vmax.bf16 %v19235_v28, %v9376_v33  ;;  %v9634_v40 = vmax.bf16 %v19235_v28, %v9378_v43  ;;  %v5184_v52 = vrot.slane %v5179_v39, %v15117_v12  ;;  %v2714_v23 = vrot.slane %v19325_v51, %v15120_v13  ;;  %v19328_v43 = vld [vmem:[#allocation41_spill] sm:$0xff]  ;;  %v16308_v39 = vpop.f32.mrf.mxu0 }
 0x22b   : > { %11526 = vmatprep.mubr.bf16.mxu0 %v14402_v30  ;;  %v14148_v26 = vcombine.low %v5149_v16, %v5156_v38  ;;  %v2718_v5 = vrot.slane %v19325_v51, %v15126_v15  ;;  %v5158_v55 = vpack.i.b16 %v2698_v2, %v2698_v2  ;;  %v5165_v27 = vpack.i.b16 %v2702_v1, %v2702_v1 }
 0x22c   : > { %v14404_v45 = vcombine.high %v9632_v6, %v9634_v40  ;;  %11527 = vmatmul.mubr.bf16.gmra.mxu0 %v14401_v10  ;;  %v14403_v58 = vcombine.low %v9632_v6, %v9634_v40  ;;  %v14150_v41 = vcombine.low %v5177_v42, %v5184_v52  ;;  %v5186_v61 = vpack.i.b16 %v2714_v23, %v2714_v23 }
 0x22d   : > { %v9379_v62 = vsub.bf16 %v19324_v49, %v14148_v26  ;;  %v5163_v34 = vrot.slane %v5158_v55, %v15117_v12  ;;  %v5193_v56 = vpack.i.b16 %v2718_v5, %v2718_v5  ;;  %v5170_v51 = vrot.slane %v5165_v27, %v15117_v12  ;;  %v11413_v26 = vpop.f32.mrf.mxu0 }
 0x22e   : > { %12071 = vmatprep.mubr.bf16.mxu1 %v14404_v45  ;;  %v9381_v4 = vsub.bf16 %v19324_v49, %v14150_v41  ;;  %v2722_v18 = vrot.slane %v19327_v47, %v15117_v12  ;;  %v2726_v21 = vrot.slane %v19327_v47, %v15123_v14  ;;  %v5191_v2 = vrot.slane %v5186_v61, %v15117_v12 }
 0x22f   : > { %12072 = vmatmul.mubr.bf16.gmra.mxu1 %v14403_v58  ;;  %v9635_v29 = vmax.bf16 %v19235_v28, %v9379_v62  ;;  %v5198_v33 = vrot.slane %v5193_v56, %v15117_v12  ;;  %v2738_v16 = vrot.slane %v19328_v43, %v15117_v12  ;;  %v14149_v10 = vcombine.low %v5163_v34, %v5170_v51  ;;  %v16317_v58 = vpop.f32.mrf.mxu1 }
 0x230   : > { %v9637_v30 = vmax.bf16 %v19235_v28, %v9381_v4  ;;  %v2742_v38 = vrot.slane %v19328_v43, %v15123_v14  ;;  %v5200_v42 = vpack.i.b16 %v2722_v18, %v2722_v18  ;;  %v5207_v40 = vpack.i.b16 %v2726_v21, %v2726_v21 }
 0x231   : > { %v14151_v6 = vcombine.low %v5191_v2, %v5198_v33  ;;  %v5228_v52 = vpack.i.b16 %v2738_v16, %v2738_v16  ;;  %v2730_v1 = vrot.slane %v19327_v47, %v15120_v13  ;;  %v9380_v5 = vsub.bf16 %v19326_v22, %v14149_v10  ;;  %v11955_v51 = vpop.f32.mrf.mxu1  ;;  %v19329_v10 = vld [vmem:[#allocation40_spill] sm:$0xff] }
 0x232   : > { %v14406_v23 = vcombine.high %v9635_v29, %v9637_v30  ;;  %v14405_v55 = vcombine.low %v9635_v29, %v9637_v30  ;;  %v5205_v45 = vrot.slane %v5200_v42, %v15117_v12  ;;  %v5212_v27 = vrot.slane %v5207_v40, %v15117_v12 }
 0x233   : > { %v9382_v41 = vsub.bf16 %v19326_v22, %v14151_v6  ;;  %v5233_v62 = vrot.slane %v5228_v52, %v15117_v12  ;;  %v5235_v34 = vpack.i.b16 %v2742_v38, %v2742_v38  ;;  %v9636_v61 = vmax.bf16 %v19235_v28, %v9380_v5  ;;  %v16333_v38 = vpop.f32.mrf.mxu1 }
 0x234   : > { %11534 = vmatprep.mubr.bf16.mxu0 %v14406_v23  ;;  %v2734_v56 = vrot.slane %v19327_v47, %v15126_v15  ;;  %v2746_v7 = vrot.slane %v19328_v43, %v15120_v13  ;;  %v2750_v4 = vrot.slane %v19328_v43, %v15126_v15  ;;  %v14152_v29 = vcombine.low %v5205_v45, %v5212_v27  ;;  %v19330_v27 = vld [vmem:[#allocation42_spill] sm:$0xff] }
 0x235   : > { %v9638_v18 = vmax.bf16 %v19235_v28, %v9382_v41  ;;  %11535 = vmatmul.mubr.bf16.gmra.mxu0 %v14405_v55  ;;  %v5240_v21 = vrot.slane %v5235_v34, %v15117_v12  ;;  %v5214_v2 = vpack.i.b16 %v2730_v1, %v2730_v1  ;;  %v2754_v47 = vrot.slane %v19329_v10, %v15117_v12  ;;  %v11958_v5 = vpop.f32.mrf.mxu1 }
 0x236   : > { %v5221_v33 = vpack.i.b16 %v2734_v56, %v2734_v56  ;;  %v5242_v16 = vpack.i.b16 %v2746_v7, %v2746_v7  ;;  %v5249_v30 = vpack.i.b16 %v2750_v4, %v2750_v4  ;;  %v9383_v43 = vsub.bf16 %v19324_v49, %v14152_v29 }
 0x237   : > { %v14408_v42 = vcombine.high %v9636_v61, %v9638_v18  ;;  %v14407_v6 = vcombine.low %v9636_v61, %v9638_v18  ;;  %v14154_v40 = vcombine.low %v5233_v62, %v5240_v21  ;;  %v5219_v52 = vrot.slane %v5214_v2, %v15117_v12 }
 0x238   : > { %v5226_v26 = vrot.slane %v5221_v33, %v15117_v12  ;;  %v5247_v23 = vrot.slane %v5242_v16, %v15117_v12  ;;  %v5254_v1 = vrot.slane %v5249_v30, %v15117_v12  ;;  %v9639_v45 = vmax.bf16 %v19235_v28, %v9383_v43 }
 0x239   : > { %12079 = vmatprep.mubr.bf16.mxu1 %v14408_v42  ;;  %v9385_v55 = vsub.bf16 %v19324_v49, %v14154_v40  ;;  %v2758_v41 = vrot.slane %v19329_v10, %v15123_v14  ;;  %v2770_v62 = vrot.slane %v19330_v27, %v15117_v12  ;;  %v2774_v56 = vrot.slane %v19330_v27, %v15123_v14 }
 0x23a   : > { %12080 = vmatmul.mubr.bf16.gmra.mxu1 %v14407_v6  ;;  %v14153_v34 = vcombine.low %v5219_v52, %v5226_v26  ;;  %v14155_v61 = vcombine.low %v5247_v23, %v5254_v1  ;;  %v5256_v7 = vpack.i.b16 %v2754_v47, %v2754_v47  ;;  %v2762_v21 = vrot.slane %v19329_v10, %v15120_v13 }
 0x23b   : > { %v9641_v4 = vmax.bf16 %v19235_v28, %v9385_v55  ;;  %v5263_v51 = vpack.i.b16 %v2758_v41, %v2758_v41  ;;  %v5284_v18 = vpack.i.b16 %v2770_v62, %v2770_v62  ;;  %v5291_v16 = vpack.i.b16 %v2774_v56, %v2774_v56 }
 0x23c   : > { %v9384_v29 = vsub.bf16 %v19326_v22, %v14153_v34  ;;  %v9386_v2 = vsub.bf16 %v19326_v22, %v14155_v61  ;;  %v5261_v33 = vrot.slane %v5256_v7, %v15117_v12  ;;  %v2766_v26 = vrot.slane %v19329_v10, %v15126_v15 }
 0x23d   : > { %v14410_v30 = vcombine.high %v9639_v45, %v9641_v4  ;;  %v14409_v42 = vcombine.low %v9639_v45, %v9641_v4  ;;  %v5268_v6 = vrot.slane %v5263_v51, %v15117_v12  ;;  %v5289_v47 = vrot.slane %v5284_v18, %v15117_v12  ;;  %v16365_v45 = vpop.f32.mrf.mxu0 }
 0x23e   : > { %v9640_v40 = vmax.bf16 %v19235_v28, %v9384_v29  ;;  %v9642_v43 = vmax.bf16 %v19235_v28, %v9386_v2  ;;  %v5296_v52 = vrot.slane %v5291_v16, %v15117_v12  ;;  %v2778_v1 = vrot.slane %v19330_v27, %v15120_v13 }
 0x23f   : > { %11542 = vmatprep.mubr.bf16.mxu0 %v14410_v30  ;;  %v14156_v23 = vcombine.low %v5261_v33, %v5268_v6  ;;  %v2782_v5 = vrot.slane %v19330_v27, %v15126_v15  ;;  %v5270_v55 = vpack.i.b16 %v2762_v21, %v2762_v21  ;;  %v5277_v61 = vpack.i.b16 %v2766_v26, %v2766_v26  ;;  %v11418_v51 = vpop.f32.mrf.mxu0  ;;  %v19331_v21 = vld [vmem:[#allocation43_spill] sm:$0xff] }
 0x240   : > { %v14412_v41 = vcombine.high %v9640_v40, %v9642_v43  ;;  %11543 = vmatmul.mubr.bf16.gmra.mxu0 %v14409_v42  ;;  %v14411_v62 = vcombine.low %v9640_v40, %v9642_v43  ;;  %v14158_v34 = vcombine.low %v5289_v47, %v5296_v52  ;;  %v5298_v7 = vpack.i.b16 %v2778_v1, %v2778_v1  ;;  %v19332_v42 = vld [vmem:[#allocation44_spill] sm:$0xff] }
 0x241   : > { %v9387_v56 = vsub.bf16 %v19324_v49, %v14156_v23  ;;  %v5275_v10 = vrot.slane %v5270_v55, %v15117_v12  ;;  %v5305_v4 = vpack.i.b16 %v2782_v5, %v2782_v5  ;;  %v5282_v27 = vrot.slane %v5277_v61, %v15117_v12  ;;  %v16380_v47 = vpop.f32.mrf.mxu0 }
 0x242   : > { %12087 = vmatprep.mubr.bf16.mxu1 %v14412_v41  ;;  %v9389_v18 = vsub.bf16 %v19324_v49, %v14158_v34  ;;  %v2786_v29 = vrot.slane %v19331_v21, %v15117_v12  ;;  %v2790_v2 = vrot.slane %v19331_v21, %v15123_v14  ;;  %v5303_v16 = vrot.slane %v5298_v7, %v15117_v12 }
 0x243   : > { %12088 = vmatmul.mubr.bf16.gmra.mxu1 %v14411_v62  ;;  %v9643_v33 = vmax.bf16 %v19235_v28, %v9387_v56  ;;  %v5310_v30 = vrot.slane %v5305_v4, %v15117_v12  ;;  %v2802_v6 = vrot.slane %v19332_v42, %v15117_v12  ;;  %v14157_v40 = vcombine.low %v5275_v10, %v5282_v27  ;;  %v11421_v55 = vpop.f32.mrf.mxu0 }
 0x244   : > { %v9645_v49 = vmax.bf16 %v19235_v28, %v9389_v18  ;;  %v2806_v43 = vrot.slane %v19332_v42, %v15123_v14  ;;  %v5312_v52 = vpack.i.b16 %v2786_v29, %v2786_v29  ;;  %v5319_v23 = vpack.i.b16 %v2790_v2, %v2790_v2  ;;  %v16389_v56 = vpop.f32.mrf.mxu1 }
 0x245   : > { %v14159_v26 = vcombine.low %v5303_v16, %v5310_v30  ;;  %v5340_v1 = vpack.i.b16 %v2802_v6, %v2802_v6  ;;  %v2794_v5 = vrot.slane %v19331_v21, %v15120_v13  ;;  %v9388_v62 = vsub.bf16 %v19326_v22, %v14157_v40 }
 0x246   : > { %v14414_v41 = vcombine.high %v9643_v33, %v9645_v49  ;;  %v14413_v34 = vcombine.low %v9643_v33, %v9645_v49  ;;  %v5317_v61 = vrot.slane %v5312_v52, %v15117_v12  ;;  %v5324_v7 = vrot.slane %v5319_v23, %v15117_v12  ;;  %v11963_v33 = vpop.f32.mrf.mxu1  ;;  %v19333_v52 = vld [vmem:[#allocation45_spill] sm:$0xff] }
 0x247   : > { %v9390_v10 = vsub.bf16 %v19326_v22, %v14159_v26  ;;  %v5345_v4 = vrot.slane %v5340_v1, %v15117_v12  ;;  %v5347_v51 = vpack.i.b16 %v2806_v43, %v2806_v43  ;;  %v9644_v18 = vmax.bf16 %v19235_v28, %v9388_v62 }
 0x248   : > { %11550 = vmatprep.mubr.bf16.mxu0 %v14414_v41  ;;  %v2798_v27 = vrot.slane %v19331_v21, %v15126_v15  ;;  %v2810_v29 = vrot.slane %v19332_v42, %v15120_v13  ;;  %v2814_v2 = vrot.slane %v19332_v42, %v15126_v15  ;;  %v14160_v30 = vcombine.low %v5317_v61, %v5324_v7  ;;  %v16405_v26 = vpop.f32.mrf.mxu1  ;;  %v19334_v42 = vld [vmem:[#allocation6_spill] sm:$0xff] }
 0x249   : > { %v9646_v22 = vmax.bf16 %v19235_v28, %v9390_v10  ;;  %11551 = vmatmul.mubr.bf16.gmra.mxu0 %v14413_v34  ;;  %v5352_v16 = vrot.slane %v5347_v51, %v15117_v12  ;;  %v5326_v6 = vpack.i.b16 %v2794_v5, %v2794_v5  ;;  %v2818_v21 = vrot.slane %v19333_v52, %v15117_v12 }
 0x24a   : > { %v5333_v49 = vpack.i.b16 %v2798_v27, %v2798_v27  ;;  %v5354_v40 = vpack.i.b16 %v2810_v29, %v2810_v29  ;;  %v5361_v43 = vpack.i.b16 %v2814_v2, %v2814_v2  ;;  %v9391_v41 = vsub.bf16 %v19334_v42, %v14160_v30  ;;  %v11966_v10 = vpop.f32.mrf.mxu1 }
 0x24b   : > { %v14416_v23 = vcombine.high %v9644_v18, %v9646_v22  ;;  %v14415_v1 = vcombine.low %v9644_v18, %v9646_v22  ;;  %v14162_v55 = vcombine.low %v5345_v4, %v5352_v16  ;;  %v5331_v62 = vrot.slane %v5326_v6, %v15117_v12  ;;  %v19335_v4 = vld [vmem:[#allocation46_spill] sm:$0xff] }
 0x24c   : > { %v5338_v34 = vrot.slane %v5333_v49, %v15117_v12  ;;  %v5359_v61 = vrot.slane %v5354_v40, %v15117_v12  ;;  %v5366_v5 = vrot.slane %v5361_v43, %v15117_v12  ;;  %v9647_v51 = vmax.bf16 %v19235_v28, %v9391_v41  ;;  %v19336_v40 = vld [vmem:[#allocation7_spill] sm:$0xff] }
 0x24d   : > { %12095 = vmatprep.mubr.bf16.mxu1 %v14416_v23  ;;  %v9393_v7 = vsub.bf16 %v19334_v42, %v14162_v55  ;;  %v2822_v18 = vrot.slane %v19333_v52, %v15123_v14  ;;  %v2834_v27 = vrot.slane %v19335_v4, %v15117_v12  ;;  %v2838_v33 = vrot.slane %v19335_v4, %v15123_v14 }
 0x24e   : > { %12096 = vmatmul.mubr.bf16.gmra.mxu1 %v14415_v1  ;;  %v14161_v29 = vcombine.low %v5331_v62, %v5338_v34  ;;  %v14163_v2 = vcombine.low %v5359_v61, %v5366_v5  ;;  %v5368_v22 = vpack.i.b16 %v2818_v21, %v2818_v21  ;;  %v2826_v49 = vrot.slane %v19333_v52, %v15120_v13 }
 0x24f   : > { %v9649_v16 = vmax.bf16 %v19235_v28, %v9393_v7  ;;  %v5375_v30 = vpack.i.b16 %v2822_v18, %v2822_v18  ;;  %v5396_v6 = vpack.i.b16 %v2834_v27, %v2834_v27  ;;  %v5403_v1 = vpack.i.b16 %v2838_v33, %v2838_v33 }
 0x250   : > { %v9392_v43 = vsub.bf16 %v19336_v40, %v14161_v29  ;;  %v9394_v23 = vsub.bf16 %v19336_v40, %v14163_v2  ;;  %v5373_v55 = vrot.slane %v5368_v22, %v15117_v12  ;;  %v2830_v7 = vrot.slane %v19333_v52, %v15126_v15 }
 0x251   : > { %v14418_v41 = vcombine.high %v9647_v51, %v9649_v16  ;;  %v14417_v62 = vcombine.low %v9647_v51, %v9649_v16  ;;  %v5380_v34 = vrot.slane %v5375_v30, %v15117_v12  ;;  %v5401_v21 = vrot.slane %v5396_v6, %v15117_v12 }
 0x252   : > { %v9648_v61 = vmax.bf16 %v19235_v28, %v9392_v43  ;;  %v9650_v5 = vmax.bf16 %v19235_v28, %v9394_v23  ;;  %v5408_v10 = vrot.slane %v5403_v1, %v15117_v12  ;;  %v2842_v27 = vrot.slane %v19335_v4, %v15120_v13 }
 0x253   : > { %11558 = vmatprep.mubr.bf16.mxu0 %v14418_v41  ;;  %v14164_v18 = vcombine.low %v5373_v55, %v5380_v34  ;;  %v2846_v51 = vrot.slane %v19335_v4, %v15126_v15  ;;  %v5382_v29 = vpack.i.b16 %v2826_v49, %v2826_v49  ;;  %v5389_v16 = vpack.i.b16 %v2830_v7, %v2830_v7  ;;  %v16439_v23 = vpop.f32.mrf.mxu0  ;;  %v19337_v4 = vld [vmem:[#allocation47_spill] sm:$0xff] }
 0x254   : > { %v14420_v2 = vcombine.high %v9648_v61, %v9650_v5  ;;  %11559 = vmatmul.mubr.bf16.gmra.mxu0 %v14417_v62  ;;  %v14419_v33 = vcombine.low %v9648_v61, %v9650_v5  ;;  %v14166_v22 = vcombine.low %v5401_v21, %v5408_v10  ;;  %v5410_v43 = vpack.i.b16 %v2842_v27, %v2842_v27  ;;  %v19338_v61 = vld [vmem:[#allocation49_spill] sm:$0xff] }
 0x255   : > { %v9395_v30 = vsub.bf16 %v19334_v42, %v14164_v18  ;;  %v5387_v6 = vrot.slane %v5382_v29, %v15117_v12  ;;  %v5417_v52 = vpack.i.b16 %v2846_v51, %v2846_v51  ;;  %v5394_v1 = vrot.slane %v5389_v16, %v15117_v12  ;;  %v11426_v10 = vpop.f32.mrf.mxu0 }
 0x256   : > { %12103 = vmatprep.mubr.bf16.mxu1 %v14420_v2  ;;  %v9397_v55 = vsub.bf16 %v19334_v42, %v14166_v22  ;;  %v2850_v49 = vrot.slane %v19337_v4, %v15117_v12  ;;  %v2854_v41 = vrot.slane %v19337_v4, %v15123_v14  ;;  %v5415_v34 = vrot.slane %v5410_v43, %v15117_v12 }
 0x257   : > { %12104 = vmatmul.mubr.bf16.gmra.mxu1 %v14419_v33  ;;  %v9651_v62 = vmax.bf16 %v19235_v28, %v9395_v30  ;;  %v5422_v21 = vrot.slane %v5417_v52, %v15117_v12  ;;  %v2866_v5 = vrot.slane %v19338_v61, %v15117_v12  ;;  %v14165_v18 = vcombine.low %v5387_v6, %v5394_v1  ;;  %v16457_v16 = vpop.f32.mrf.mxu0 }
 0x258   : > { %v9653_v7 = vmax.bf16 %v19235_v28, %v9397_v55  ;;  %v2870_v27 = vrot.slane %v19338_v61, %v15123_v14  ;;  %v5424_v51 = vpack.i.b16 %v2850_v49, %v2850_v49  ;;  %v5431_v2 = vpack.i.b16 %v2854_v41, %v2854_v41 }
 0x259   : > { %v14167_v29 = vcombine.low %v5415_v34, %v5422_v21  ;;  %v5452_v33 = vpack.i.b16 %v2866_v5, %v2866_v5  ;;  %v2858_v22 = vrot.slane %v19337_v4, %v15120_v13  ;;  %v9396_v43 = vsub.bf16 %v19336_v40, %v14165_v18  ;;  %v11429_v41 = vpop.f32.mrf.mxu0 }
 0x25a   : > { %v14422_v30 = vcombine.high %v9651_v62, %v9653_v7  ;;  %v14421_v52 = vcombine.low %v9651_v62, %v9653_v7  ;;  %v5429_v10 = vrot.slane %v5424_v51, %v15117_v12  ;;  %v5436_v55 = vrot.slane %v5431_v2, %v15117_v12  ;;  %v16471_v7 = vpop.f32.mrf.mxu1 }
 0x25b   : > { %v9398_v6 = vsub.bf16 %v19336_v40, %v14167_v29  ;;  %v5457_v1 = vrot.slane %v5452_v33, %v15117_v12  ;;  %v5459_v49 = vpack.i.b16 %v2870_v27, %v2870_v27  ;;  %v9652_v34 = vmax.bf16 %v19235_v28, %v9396_v43 }
 0x25c   : > { %11566 = vmatprep.mubr.bf16.mxu0 %v14422_v30  ;;  %v2862_v21 = vrot.slane %v19337_v4, %v15126_v15  ;;  %v2874_v5 = vrot.slane %v19338_v61, %v15120_v13  ;;  %v2878_v62 = vrot.slane %v19338_v61, %v15126_v15  ;;  %v14168_v51 = vcombine.low %v5429_v10, %v5436_v55  ;;  %v19339_v4 = vld [vmem:[#allocation48_spill] sm:$0xff]  ;;  %v11971_v41 = vpop.f32.mrf.mxu1 }
 0x25d   : > { %v9654_v18 = vmax.bf16 %v19235_v28, %v9398_v6  ;;  %11567 = vmatmul.mubr.bf16.gmra.mxu0 %v14421_v52  ;;  %v5464_v27 = vrot.slane %v5459_v49, %v15117_v12  ;;  %v5438_v29 = vpack.i.b16 %v2858_v22, %v2858_v22  ;;  %v2882_v43 = vrot.slane %v19339_v4, %v15117_v12 }
 0x25e   : > { %v5445_v2 = vpack.i.b16 %v2862_v21, %v2862_v21  ;;  %v5466_v33 = vpack.i.b16 %v2874_v5, %v2874_v5  ;;  %v5473_v30 = vpack.i.b16 %v2878_v62, %v2878_v62  ;;  %v9399_v61 = vsub.bf16 %v19334_v42, %v14168_v51  ;;  %v16482_v10 = vpop.f32.mrf.mxu1 }
 0x25f   : > { %v14424_v50 = vcombine.high %v9652_v34, %v9654_v18  ;;  %v14423_v9 = vcombine.low %v9652_v34, %v9654_v18  ;;  %v14170_v48 = vcombine.low %v5457_v1, %v5464_v27  ;;  %v5443_v3 = vrot.slane %v5438_v29, %v15117_v12  ;;  %v19340_v34 = vld [vmem:[#allocation50_spill] sm:$0xff] }
 0x260   : > { %v5450_v52 = vrot.slane %v5445_v2, %v15117_v12  ;;  %v5471_v6 = vrot.slane %v5466_v33, %v15117_v12  ;;  %v5478_v22 = vrot.slane %v5473_v30, %v15117_v12  ;;  %v9655_v49 = vmax.bf16 %v19235_v28, %v9399_v61  ;;  %v11974_v51 = vpop.f32.mrf.mxu1 }
 0x261   : > { %12111 = vmatprep.mubr.bf16.mxu1 %v14424_v50  ;;  %v9401_v55 = vsub.bf16 %v19334_v42, %v14170_v48  ;;  %v2886_v1 = vrot.slane %v19339_v4, %v15123_v14  ;;  %v2898_v21 = vrot.slane %v19340_v34, %v15117_v12  ;;  %v2902_v18 = vrot.slane %v19340_v34, %v15123_v14 }
 0x262   : > { %12112 = vmatmul.mubr.bf16.gmra.mxu1 %v14423_v9  ;;  %v14169_v5 = vcombine.low %v5443_v3, %v5450_v52  ;;  %v14171_v62 = vcombine.low %v5471_v6, %v5478_v22  ;;  %v5480_v27 = vpack.i.b16 %v2882_v43, %v2882_v43  ;;  %v2890_v2 = vrot.slane %v19339_v4, %v15120_v13 }
 0x263   : > { %v9657_v50 = vmax.bf16 %v19235_v28, %v9401_v55  ;;  %v5487_v29 = vpack.i.b16 %v2886_v1, %v2886_v1  ;;  %v5508_v48 = vpack.i.b16 %v2898_v21, %v2898_v21  ;;  %v5515_v3 = vpack.i.b16 %v2902_v18, %v2902_v18 }
 0x264   : > { %v9400_v33 = vsub.bf16 %v19336_v40, %v14169_v5  ;;  %v9402_v30 = vsub.bf16 %v19336_v40, %v14171_v62  ;;  %v5485_v9 = vrot.slane %v5480_v27, %v15117_v12  ;;  %v2894_v1 = vrot.slane %v19339_v4, %v15126_v15 }
 0x265   : > { %v14426_v41 = vcombine.high %v9655_v49, %v9657_v50  ;;  %v14425_v61 = vcombine.low %v9655_v49, %v9657_v50  ;;  %v5492_v52 = vrot.slane %v5487_v29, %v15117_v12  ;;  %v5513_v43 = vrot.slane %v5508_v48, %v15117_v12 }
 0x266   : > { %v9656_v6 = vmax.bf16 %v19235_v28, %v9400_v33  ;;  %v9658_v22 = vmax.bf16 %v19235_v28, %v9402_v30  ;;  %v5520_v55 = vrot.slane %v5515_v3, %v15117_v12  ;;  %v2906_v5 = vrot.slane %v19340_v34, %v15120_v13 }
 0x267   : > { %11574 = vmatprep.mubr.bf16.mxu0 %v14426_v41  ;;  %v14172_v21 = vcombine.low %v5485_v9, %v5492_v52  ;;  %v2910_v49 = vrot.slane %v19340_v34, %v15126_v15  ;;  %v5494_v62 = vpack.i.b16 %v2890_v2, %v2890_v2  ;;  %v5501_v50 = vpack.i.b16 %v2894_v1, %v2894_v1  ;;  %v19341_v34 = vld [vmem:[#allocation51_spill] sm:$0xff] }
 0x268   : > { %v14428_v18 = vcombine.high %v9656_v6, %v9658_v22  ;;  %11575 = vmatmul.mubr.bf16.gmra.mxu0 %v14425_v61  ;;  %v14427_v27 = vcombine.low %v9656_v6, %v9658_v22  ;;  %v14174_v51 = vcombine.low %v5513_v43, %v5520_v55  ;;  %v5522_v33 = vpack.i.b16 %v2906_v5, %v2906_v5  ;;  %v19342_v6 = vld [vmem:[#allocation53_spill] sm:$0xff] }
 0x269   : > { %v9403_v29 = vsub.bf16 %v19334_v42, %v14172_v21  ;;  %v5499_v48 = vrot.slane %v5494_v62, %v15117_v12  ;;  %v5529_v4 = vpack.i.b16 %v2910_v49, %v2910_v49  ;;  %v16511_v30 = vpop.f32.mrf.mxu0  ;;  %v5506_v3 = vrot.slane %v5501_v50, %v15117_v12 }
 0x26a   : > { %12119 = vmatprep.mubr.bf16.mxu1 %v14428_v18  ;;  %v9405_v9 = vsub.bf16 %v19334_v42, %v14174_v51  ;;  %v2914_v2 = vrot.slane %v19341_v34, %v15117_v12  ;;  %v2918_v41 = vrot.slane %v19341_v34, %v15123_v14  ;;  %v5527_v52 = vrot.slane %v5522_v33, %v15117_v12 }
 0x26b   : > { %12120 = vmatmul.mubr.bf16.gmra.mxu1 %v14427_v27  ;;  %v9659_v61 = vmax.bf16 %v19235_v28, %v9403_v29  ;;  %v5534_v43 = vrot.slane %v5529_v4, %v15117_v12  ;;  %v2930_v22 = vrot.slane %v19342_v6, %v15117_v12  ;;  %v11434_v55 = vpop.f32.mrf.mxu0  ;;  %v14173_v1 = vcombine.low %v5499_v48, %v5506_v3 }
 0x26c   : > { %v9661_v42 = vmax.bf16 %v19235_v28, %v9405_v9  ;;  %v2934_v21 = vrot.slane %v19342_v6, %v15123_v14  ;;  %v5536_v5 = vpack.i.b16 %v2914_v2, %v2914_v2  ;;  %v5543_v62 = vpack.i.b16 %v2918_v41, %v2918_v41  ;;  %v16539_v41 = vld [vmem:[%s19053_s7] ss:$0 sm:$0xff] }
 0x26d   : > { %v14175_v49 = vcombine.low %v5527_v52, %v5534_v43  ;;  %v5564_v18 = vpack.i.b16 %v2930_v22, %v2930_v22  ;;  %v2922_v27 = vrot.slane %v19341_v34, %v15120_v13  ;;  %v16529_v51 = vpop.f32.mrf.mxu0  ;;  %v9404_v29 = vsub.bf16 %v19336_v40, %v14173_v1 }
 0x26e   : > { %v14430_v50 = vcombine.high %v9659_v61, %v9661_v42  ;;  %v14429_v33 = vcombine.low %v9659_v61, %v9661_v42  ;;  %v5541_v4 = vrot.slane %v5536_v5, %v15117_v12  ;;  %v5548_v9 = vrot.slane %v5543_v62, %v15117_v12 }
 0x26f   : > { %v9406_v48 = vsub.bf16 %v19336_v40, %v14175_v49  ;;  %v5569_v3 = vrot.slane %v5564_v18, %v15117_v12  ;;  %v5571_v2 = vpack.i.b16 %v2934_v21, %v2934_v21  ;;  %v11437_v61 = vpop.f32.mrf.mxu0  ;;  %v9660_v40 = vmax.bf16 %v19235_v28, %v9404_v29 }
 0x270   : > { %11582 = vmatprep.mubr.bf16.mxu0 %v14430_v50  ;;  %v2926_v52 = vrot.slane %v19341_v34, %v15126_v15  ;;  %v2938_v43 = vrot.slane %v19342_v6, %v15120_v13  ;;  %v2942_v22 = vrot.slane %v19342_v6, %v15126_v15  ;;  %v16554_v55 = vpop.f32.mrf.mxu1  ;;  %v14176_v21 = vcombine.low %v5541_v4, %v5548_v9  ;;  %v16561_v50 = vld [vmem:[%s16545_s13] sm:$0xff]  }
 0x271   : > { %v9662_v42 = vmax.bf16 %v19235_v28, %v9406_v48  ;;  %11583 = vmatmul.mubr.bf16.gmra.mxu0 %v14429_v33  ;;  %v5576_v1 = vrot.slane %v5571_v2, %v15117_v12  ;;  %v5550_v5 = vpack.i.b16 %v2922_v27, %v2922_v27  ;;  %v11401_v34 = vadd.f32 %v16539_v41, %v16223_v57 }
 0x272   : > { %v5557_v49 = vpack.i.b16 %v2926_v52, %v2926_v52  ;;  %v5578_v62 = vpack.i.b16 %v2938_v43, %v2938_v43  ;;  %v5585_v18 = vpack.i.b16 %v2942_v22, %v2942_v22  ;;  %v11979_v29 = vpop.f32.mrf.mxu1  ;;  %v9407_v37 = vsub.bf16 %v19343_v46, %v14176_v21  ;;  %v19344_v22 = vld [vmem:[#allocation52_spill] sm:$0xff] }
 0x273   : > { %v14432_v61 = vcombine.high %v9660_v40, %v9662_v42  ;;  %v14431_v6 = vcombine.low %v9660_v40, %v9662_v42  ;;  %v14178_v44 = vcombine.low %v5569_v3, %v5576_v1  ;;  %v5555_v33 = vrot.slane %v5550_v5, %v15117_v12 }
 0x274   : > { %v5562_v48 = vrot.slane %v5557_v49, %v15117_v12  ;;  %v5583_v27 = vrot.slane %v5578_v62, %v15117_v12  ;;  %v5590_v4 = vrot.slane %v5585_v18, %v15117_v12  ;;  %v16568_v9 = vpop.f32.mrf.mxu1  ;;  %v9663_v2 = vmax.bf16 %v19235_v28, %v9407_v37  ;;  %v19345_v37 = vld [vmem:[#allocation54_spill] sm:$0xff]  ;;  %v19346_v62 = vld [vmem:[#allocation9_spill] sm:$0xff] }
 0x275   : > { %12127 = vmatprep.mubr.bf16.mxu1 %v14432_v61  ;;  %v9409_v57 = vsub.bf16 %v19343_v46, %v14178_v44  ;;  %v11946_v40 = vadd.f32 %v16248_v59, %v11401_v34  ;;  %v16574_v3 = vunpack.c.l.bf16 %v16561_v50  ;;  %v2946_v42 = vrot.slane %v19344_v22, %v15117_v12 }
 0x276   : > { %12128 = vmatmul.mubr.bf16.gmra.mxu1 %v14431_v6  ;;  %v14177_v52 = vcombine.low %v5555_v33, %v5562_v48  ;;  %v14179_v43 = vcombine.low %v5583_v27, %v5590_v4  ;;  %v2950_v1 = vrot.slane %v19344_v22, %v15123_v14  ;;  %v11982_v21 = vpop.f32.mrf.mxu1  ;;  %v2962_v49 = vrot.slane %v19345_v37, %v15117_v12 }
 0x277   : > { %v9665_v5 = vmax.bf16 %v19235_v28, %v9409_v57  ;;  %v12456_v44 = vmax.f32 %v11946_v40, 0.0  ;;  %v2966_v59 = vrot.slane %v19345_v37, %v15123_v14  ;;  %v5592_v29 = vpack.i.b16 %v2946_v42, %v2946_v42 }
 0x278   : > { %v9408_v18 = vsub.bf16 %v19346_v62, %v14177_v52  ;;  %v9410_v34 = vsub.bf16 %v19346_v62, %v14179_v43  ;;  %v5599_v61 = vpack.i.b16 %v2950_v1, %v2950_v1  ;;  %v5620_v27 = vpack.i.b16 %v2962_v49, %v2962_v49 }
 0x279   : > { %v14434_v6 = vcombine.high %v9663_v2, %v9665_v5  ;;  %v14433_v33 = vcombine.low %v9663_v2, %v9665_v5  ;;  %v12616_v48 = vmul.f32 %v16574_v3, %v12456_v44  ;;  %v5597_v40 = vrot.slane %v5592_v29, %v15117_v12 }
 0x27a   : > { %v9664_v4 = vmax.bf16 %v19235_v28, %v9408_v18  ;;  %v9666_v57 = vmax.bf16 %v19235_v28, %v9410_v34  ;;  %v5604_v21 = vrot.slane %v5599_v61, %v15117_v12  ;;  %v5625_v52 = vrot.slane %v5620_v27, %v15117_v12 }
 0x27b   : > { %11590 = vmatprep.mubr.bf16.mxu0 %v14434_v6  ;;  %v12744_v32 = vrot.slane %v12616_v48, 4  ;;  %v5627_v43 = vpack.i.b16 %v2966_v59, %v2966_v59  ;;  %v2954_v42 = vrot.slane %v19344_v22, %v15120_v13  ;;  %v2958_v44 = vrot.slane %v19344_v22, %v15126_v15 }
 0x27c   : > { %v14436_v2 = vcombine.high %v9664_v4, %v9666_v57  ;;  %11591 = vmatmul.mubr.bf16.gmra.mxu0 %v14433_v33  ;;  %v14435_v1 = vcombine.low %v9664_v4, %v9666_v57  ;;  %v14180_v5 = vcombine.low %v5597_v40, %v5604_v21  ;;  %v2970_v34 = vrot.slane %v19345_v37, %v15120_v13 }
 0x27d   : > { %v12745_v49 = vmax.f32 %v12616_v48, %v12744_v32  ;;  %v5632_v18 = vrot.slane %v5627_v43, %v15117_v12  ;;  %v2974_v29 = vrot.slane %v19345_v37, %v15126_v15  ;;  %v5606_v61 = vpack.i.b16 %v2954_v42, %v2954_v42 }
 0x27e   : > { %12135 = vmatprep.mubr.bf16.mxu1 %v14436_v2  ;;  %v9411_v59 = vsub.bf16 %v19343_v46, %v14180_v5  ;;  %v5613_v6 = vpack.i.b16 %v2958_v44, %v2958_v44  ;;  %v11404_v33 = vadd.f32 %v16539_v41, %v16241_v24  ;;  %v5634_v32 = vpack.i.b16 %v2970_v34, %v2970_v34 }
 0x27f   : > { %v12746_v27 = vrot.slane %v12745_v49, 2  ;;  %12136 = vmatmul.mubr.bf16.gmra.mxu1 %v14435_v1  ;;  %v14182_v22 = vcombine.low %v5625_v52, %v5632_v18  ;;  %v5641_v48 = vpack.i.b16 %v2974_v29, %v2974_v29  ;;  %v16605_v4 = vpop.f32.mrf.mxu0  ;;  %v16609_v57 = vpack.i.b16 %v15857_v60, %v15857_v60 }
 0x280   : > { %v5611_v37 = vrot.slane %v5606_v61, %v15117_v12  ;;  %v5618_v40 = vrot.slane %v5613_v6, %v15117_v12  ;;  %v11949_v21 = vadd.f32 %v16262_v63, %v11404_v33  ;;  %v5639_v52 = vrot.slane %v5634_v32, %v15117_v12  ;;  %v19350_v32 = vld [vmem:[#allocation55_spill] sm:$0xff] }
 0x281   : > { %19347 = vst [vmem:[#allocation28_spill] sm:$0xff] %v16609_v57  ;;  %v16614_v43 = vmax.f32 %v12745_v49, %v12746_v27  ;;  %v9413_v24 = vsub.bf16 %v19343_v46, %v14182_v22  ;;  %v5646_v42 = vrot.slane %v5641_v48, %v15117_v12  ;;  %v11442_v2 = vpop.f32.mrf.mxu0  ;;  %v11409_v18 = vadd.f32 %v16539_v41, %v16293_v8  ;;  %v16622_v34 = vpop.f32.mrf.mxu1 }
 0x282   : > { %v14181_v5 = vcombine.low %v5611_v37, %v5618_v40  ;;  %v12457_v44 = vmax.f32 %v11949_v21, 0.0  ;;  %v19348_v63 = vunpack.i.h.s16 %v15847_v54  ;;  %v9667_v29 = vmax.bf16 %v19235_v28, %v9411_v59 }
 0x283   : > { %v9669_v61 = vmax.bf16 %v19235_v28, %v9413_v24  ;;  %v14183_v6 = vcombine.low %v5639_v52, %v5646_v42  ;;  %v16631_v33 = vpop.f32.mrf.mxu0  ;;  %v11954_v8 = vadd.f32 %v16317_v58, %v11409_v18  ;;  %v2978_v48 = vrot.slane %v19350_v32, %v15117_v12  ;;  %v11987_v54 = vpop.f32.mrf.mxu1  ;;  %v19351_v18 = vld [vmem:[#allocation57_spill] sm:$0xff] }
 0x284   : > { %v16627_v49 = vpack.i.b16 %v19348_v63, %v19348_v63  ;;  %v9412_v27 = vsub.bf16 %v19346_v62, %v14181_v5  ;;  %v12617_v22 = vmul.f32 %v16574_v3, %v12457_v44  ;;  %v12748_v37 = vrot.slane %v16614_v43, 1 }
 0x285   : > { %v14438_v40 = vcombine.high %v9667_v29, %v9669_v61  ;;  %v9414_v59 = vsub.bf16 %v19346_v62, %v14183_v6  ;;  %v14437_v21 = vcombine.low %v9667_v29, %v9669_v61  ;;  %v11445_v24 = vpop.f32.mrf.mxu0  ;;  %v12458_v2 = vmax.f32 %v11954_v8, 0.0  ;;  %v16643_v44 = vpop.f32.mrf.mxu1 }
 0x286   : > { %19349 = vst [vmem:[#allocation29_spill] sm:$0xff] %v16627_v49  ;;  %v9668_v52 = vmax.bf16 %v19235_v28, %v9412_v27  ;;  %v12750_v42 = vrot.slane %v12617_v22, 4  ;;  %v2982_v5 = vrot.slane %v19350_v32, %v15123_v14  ;;  %v2994_v63 = vrot.slane %v19351_v18, %v15117_v12 }
 0x287   : > { %11598 = vmatprep.mubr.bf16.mxu0 %v14438_v40  ;;  %v9670_v58 = vmax.bf16 %v19235_v28, %v9414_v59  ;;  %v2998_v6 = vrot.slane %v19351_v18, %v15123_v14  ;;  %v5648_v29 = vpack.i.b16 %v2978_v48, %v2978_v48  ;;  %v16650_v61 = vpop.f32.mrf.mxu0  ;;  %v12618_v8 = vmul.f32 %v16574_v3, %v12458_v2  ;;  %v11990_v40 = vpop.f32.mrf.mxu1 }
 0x288   : > { %v12751_v27 = vmax.f32 %v12617_v22, %v12750_v42  ;;  %11599 = vmatmul.mubr.bf16.gmra.mxu0 %v14437_v21  ;;  %v5655_v54 = vpack.i.b16 %v2982_v5, %v2982_v5  ;;  %v2986_v24 = vrot.slane %v19350_v32, %v15120_v13  ;;  %v5676_v49 = vpack.i.b16 %v2994_v63, %v2994_v63 }
 0x289   : > { %v14440_v1 = vcombine.high %v9668_v52, %v9670_v58  ;;  %v14439_v59 = vcombine.low %v9668_v52, %v9670_v58  ;;  %v5653_v57 = vrot.slane %v5648_v29, %v15117_v12  ;;  %v11450_v31 = vpop.f32.mrf.mxu0  ;;  %v12756_v35 = vrot.slane %v12618_v8, 4 }
 0x28a   : > { %v12752_v19 = vrot.slane %v12751_v27, 2  ;;  %v5660_v48 = vrot.slane %v5655_v54, %v15117_v12  ;;  %v5683_v20 = vpack.i.b16 %v2998_v6, %v2998_v6  ;;  %v5681_v22 = vrot.slane %v5676_v49, %v15117_v12 }
 0x28b   : > { %12143 = vmatprep.mubr.bf16.mxu1 %v14440_v1  ;;  %v2990_v21 = vrot.slane %v19350_v32, %v15126_v15  ;;  %v3002_v42 = vrot.slane %v19351_v18, %v15120_v13  ;;  %v3006_v52 = vrot.slane %v19351_v18, %v15126_v15  ;;  %v16664_v2 = vpop.f32.mrf.mxu0  ;;  %v12757_v5 = vmax.f32 %v12618_v8, %v12756_v35 }
 0x28c   : > { %v12753_v31 = vmax.f32 %v12751_v27, %v12752_v19  ;;  %12144 = vmatmul.mubr.bf16.gmra.mxu1 %v14439_v59  ;;  %v5688_v58 = vrot.slane %v5683_v20, %v15117_v12  ;;  %v14184_v63 = vcombine.low %v5653_v57, %v5660_v48  ;;  %v5662_v1 = vpack.i.b16 %v2986_v24, %v2986_v24 }
 0x28d   : > { %v5669_v6 = vpack.i.b16 %v2990_v21, %v2990_v21  ;;  %v5690_v49 = vpack.i.b16 %v3002_v42, %v3002_v42  ;;  %v5697_v29 = vpack.i.b16 %v3006_v52, %v3006_v52  ;;  %v16667_v54 = vpop.f32.mrf.mxu1  ;;  %v11453_v32 = vpop.f32.mrf.mxu0  ;;  %v12758_v53 = vrot.slane %v12757_v5, 2 }
 0x28e   : > { %v12754_v40 = vrot.slane %v12753_v31, 1  ;;  %v14186_v17 = vcombine.low %v5681_v22, %v5688_v58  ;;  %v9415_v18 = vsub.bf16 %v19343_v46, %v14184_v63  ;;  %v5667_v36 = vrot.slane %v5662_v1, %v15117_v12 }
 0x28f   : > { %v5674_v35 = vrot.slane %v5669_v6, %v15117_v12  ;;  %v5695_v19 = vrot.slane %v5690_v49, %v15117_v12  ;;  %v5702_v20 = vrot.slane %v5697_v29, %v15117_v12  ;;  %v11995_v57 = vpop.f32.mrf.mxu1  ;;  %v16676_v27 = vpack.i.b16 %v15873_v11, %v15873_v11 }
 0x290   : > { %v12755_v8 = vmax.f32 %v12753_v31, %v12754_v40  ;;  %v9417_v24 = vsub.bf16 %v19343_v46, %v14186_v17  ;;  %v12749_v59 = vmax.f32 %v16614_v43, %v12748_v37  ;;  %v11412_v21 = vadd.f32 %v16539_v41, %v16308_v39  ;;  %v16684_v52 = vpop.f32.mrf.mxu0 }
 0x291   : > { %19352 = vst [vmem:[#allocation30_spill] sm:$0xff] %v16676_v27  ;;  %v14185_v48 = vcombine.low %v5667_v36, %v5674_v35  ;;  %v14187_v22 = vcombine.low %v5695_v19, %v5702_v20  ;;  %v16682_v42 = vpop.f32.mrf.mxu1  ;;  %v16686_v58 = vmax.f32 %v12757_v5, %v12758_v53  ;;  %v9671_v63 = vmax.bf16 %v19235_v28, %v9415_v18  ;;  %v19355_v18 = vld [vmem:[#allocation56_spill] sm:$0xff] }
 0x292   : > { %v9673_v31 = vmax.bf16 %v19235_v28, %v9417_v24  ;;  %v11417_v17 = vadd.f32 %v16539_v41, %v16365_v45  ;;  %v19353_v43 = vunpack.i.h.s16 %v15857_v60  ;;  %v11957_v1 = vadd.f32 %v16333_v38, %v11412_v21  ;;  %v11458_v5 = vpop.f32.mrf.mxu0 }
 0x293   : > { %v9416_v39 = vsub.bf16 %v19346_v62, %v14185_v48  ;;  %v9418_v37 = vsub.bf16 %v19346_v62, %v14187_v22  ;;  %v11998_v53 = vpop.f32.mrf.mxu1  ;;  %v16701_v6 = vsel %vm13640_vm3, %v12755_v8, %v12749_v59  ;;  %v3010_v35 = vrot.slane %v19355_v18, %v15117_v12  ;;  %v19356_v8 = vld [vmem:[#allocation58_spill] sm:$0xff] }
 0x294   : > { %v16695_v36 = vpack.i.b16 %v19353_v43, %v19353_v43  ;;  %v14442_v49 = vcombine.high %v9671_v63, %v9673_v31  ;;  %v14441_v29 = vcombine.low %v9671_v63, %v9673_v31  ;;  %v11962_v45 = vadd.f32 %v16389_v56, %v11417_v17  ;;  %v16708_v19 = vpop.f32.mrf.mxu0 }
 0x295   : > { %v9672_v60 = vmax.bf16 %v19235_v28, %v9416_v39  ;;  %v9674_v32 = vmax.bf16 %v19235_v28, %v9418_v37  ;;  %v12459_v40 = vmax.f32 %v11957_v1, 0.0  ;;  %v12760_v38 = vrot.slane %v16686_v58, 1 }
 0x296   : > { %19354 = vst [vmem:[#allocation32_spill] sm:$0xff] %v16695_v36  ;;  %11606 = vmatprep.mubr.bf16.mxu0 %v14442_v49  ;;  %v12460_v20 = vmax.f32 %v11962_v45, 0.0  ;;  %v3014_v57 = vrot.slane %v19355_v18, %v15123_v14  ;;  %v3026_v56 = vrot.slane %v19356_v8, %v15117_v12  ;;  %v16715_v24 = vpop.f32.mrf.mxu1  ;;  %v3030_v21 = vrot.slane %v19356_v8, %v15123_v14  ;;  %v11461_v63 = vpop.f32.mrf.mxu0 }
 0x297   : > { %v14444_v59 = vcombine.high %v9672_v60, %v9674_v32  ;;  %v12619_v48 = vmul.f32 %v16574_v3, %v12459_v40  ;;  %11607 = vmatmul.mubr.bf16.gmra.mxu0 %v14441_v29  ;;  %v14443_v22 = vcombine.low %v9672_v60, %v9674_v32  ;;  %v5704_v17 = vpack.i.b16 %v3010_v35, %v3010_v35 }
 0x298   : > { %v12620_v31 = vmul.f32 %v16574_v3, %v12460_v20  ;;  %v5711_v43 = vpack.i.b16 %v3014_v57, %v3014_v57  ;;  %v5732_v39 = vpack.i.b16 %v3026_v56, %v3026_v56  ;;  %v12003_v37 = vpop.f32.mrf.mxu1  ;;  %v5739_v53 = vpack.i.b16 %v3030_v21, %v3030_v21 }
 0x299   : > { %12151 = vmatprep.mubr.bf16.mxu1 %v14444_v59  ;;  %v12762_v1 = vrot.slane %v12619_v48, 4  ;;  %v3018_v5 = vrot.slane %v19355_v18, %v15120_v13  ;;  %v3022_v49 = vrot.slane %v19355_v18, %v15126_v15  ;;  %v5709_v45 = vrot.slane %v5704_v17, %v15117_v12 }
 0x29a   : > { %v12768_v29 = vrot.slane %v12620_v31, 4  ;;  %12152 = vmatmul.mubr.bf16.gmra.mxu1 %v14443_v22  ;;  %v5716_v60 = vrot.slane %v5711_v43, %v15117_v12  ;;  %v5737_v32 = vrot.slane %v5732_v39, %v15117_v12  ;;  %v16728_v40 = vpop.f32.mrf.mxu1  ;;  %v5744_v20 = vrot.slane %v5739_v53, %v15117_v12 }
 0x29b   : > { %19357 = vst [vmem:[#allocation31_spill] sm:$0xff] %v16728_v40  ;;  %v12763_v35 = vmax.f32 %v12619_v48, %v12762_v1  ;;  %v3034_v57 = vrot.slane %v19356_v8, %v15120_v13  ;;  %v3038_v18 = vrot.slane %v19356_v8, %v15126_v15  ;;  %v5718_v22 = vpack.i.b16 %v3018_v5, %v3018_v5  ;;  %v16735_v17 = vpop.f32.mrf.mxu0 }
 0x29c   : > { %v12769_v56 = vmax.f32 %v12620_v31, %v12768_v29  ;;  %v14188_v59 = vcombine.low %v5709_v45, %v5716_v60  ;;  %v5725_v21 = vpack.i.b16 %v3022_v49, %v3022_v49  ;;  %v12006_v63 = vpop.f32.mrf.mxu1  ;;  %v14190_v39 = vcombine.low %v5737_v32, %v5744_v20 }
 0x29d   : > { %v12764_v43 = vrot.slane %v12763_v35, 2  ;;  %v5746_v37 = vpack.i.b16 %v3034_v57, %v3034_v57  ;;  %v5753_v48 = vpack.i.b16 %v3038_v18, %v3038_v18  ;;  %v5723_v27 = vrot.slane %v5718_v22, %v15117_v12  ;;  %v11466_v40 = vpop.f32.mrf.mxu0 }
 0x29e   : > { %v12770_v1 = vrot.slane %v12769_v56, 2  ;;  %v9419_v53 = vsub.bf16 %v19343_v46, %v14188_v59  ;;  %v5730_v36 = vrot.slane %v5725_v21, %v15117_v12  ;;  %v9421_v31 = vsub.bf16 %v19343_v46, %v14190_v39 }
 0x29f   : > { %v12765_v8 = vmax.f32 %v12763_v35, %v12764_v43  ;;  %v5751_v5 = vrot.slane %v5746_v37, %v15117_v12  ;;  %v5758_v49 = vrot.slane %v5753_v48, %v15117_v12  ;;  %v16743_v29 = vpop.f32.mrf.mxu1  ;;  %v12761_v45 = vmax.f32 %v16686_v58, %v12760_v38  ;;  %v16748_v57 = vpop.f32.mrf.mxu0 }
 0x2a0   : > { %v12771_v60 = vmax.f32 %v12769_v56, %v12770_v1  ;;  %v14189_v32 = vcombine.low %v5723_v27, %v5730_v36  ;;  %v11420_v20 = vadd.f32 %v16539_v41, %v16380_v47  ;;  %v9675_v40 = vmax.bf16 %v19235_v28, %v9419_v53 }
 0x2a1   : > { %v12766_v18 = vrot.slane %v12765_v8, 1  ;;  %v9677_v46 = vmax.bf16 %v19235_v28, %v9421_v31  ;;  %v14191_v35 = vcombine.low %v5751_v5, %v5758_v49  ;;  %v12011_v59 = vpop.f32.mrf.mxu1  ;;  %v11425_v27 = vadd.f32 %v16539_v41, %v16439_v23  ;;  %v11469_v58 = vpop.f32.mrf.mxu0 }
 0x2a2   : > { %v12772_v22 = vrot.slane %v12771_v60, 1  ;;  %v9420_v21 = vsub.bf16 %v19346_v62, %v14189_v32  ;;  %v11965_v63 = vadd.f32 %v16405_v26, %v11420_v20  ;;  %v19358_v39 = vunpack.i.h.s16 %v15873_v11  ;;  %v19361_v20 = vld [vmem:[#allocation61_spill] sm:$0xff] }
 0x2a3   : > { %v12767_v36 = vmax.f32 %v12765_v8, %v12766_v18  ;;  %v14446_v47 = vcombine.high %v9675_v40, %v9677_v46  ;;  %v9422_v38 = vsub.bf16 %v19346_v62, %v14191_v35  ;;  %v14445_v56 = vcombine.low %v9675_v40, %v9677_v46  ;;  %v16757_v43 = vpop.f32.mrf.mxu1  ;;  %v19360_v8 = vld [vmem:[#allocation59_spill] sm:$0xff] }
 0x2a4   : > { %v16762_v37 = vpack.i.b16 %v19358_v39, %v19358_v39  ;;  %v13643_v48 = vsel %vm13642_vm4, %v12761_v45, %v16701_v6  ;;  %v12461_v26 = vmax.f32 %v11965_v63, 0.0  ;;  %v11970_v1 = vadd.f32 %v16471_v7, %v11425_v27  ;;  %v16771_v5 = vpop.f32.mrf.mxu0 }
 0x2a5   : > { %v12773_v23 = vmax.f32 %v12771_v60, %v12772_v22  ;;  %11614 = vmatprep.mubr.bf16.mxu0 %v14446_v47  ;;  %v9676_v53 = vmax.bf16 %v19235_v28, %v9420_v21  ;;  %v9678_v62 = vmax.bf16 %v19235_v28, %v9422_v38  ;;  %v3042_v31 = vrot.slane %v19360_v8, %v15117_v12  ;;  %v12014_v11 = vpop.f32.mrf.mxu1 }
 0x2a6   : > { %19359 = vst [vmem:[#allocation2_spill] sm:$0xff] %v16762_v37  ;;  %v13645_v49 = vsel %vm13644_vm5, %v12767_v36, %v13643_v48  ;;  %v12621_v6 = vmul.f32 %v16574_v3, %v12461_v26  ;;  %11615 = vmatmul.mubr.bf16.gmra.mxu0 %v14445_v56  ;;  %v12462_v45 = vmax.f32 %v11970_v1, 0.0  ;;  %v3046_v7 = vrot.slane %v19360_v8, %v15123_v14  ;;  %v11474_v46 = vpop.f32.mrf.mxu0 }
 0x2a7   : > { %v14448_v60 = vcombine.high %v9676_v53, %v9678_v62  ;;  %v14447_v32 = vcombine.low %v9676_v53, %v9678_v62  ;;  %v3058_v18 = vrot.slane %v19361_v20, %v15117_v12  ;;  %v3062_v40 = vrot.slane %v19361_v20, %v15123_v14 }
 0x2a8   : > { %v12774_v35 = vrot.slane %v12621_v6, 4  ;;  %v12622_v59 = vmul.f32 %v16574_v3, %v12462_v45  ;;  %v5760_v22 = vpack.i.b16 %v3042_v31, %v3042_v31  ;;  %v5767_v21 = vpack.i.b16 %v3046_v7, %v3046_v7  ;;  %v16786_v47 = vpop.f32.mrf.mxu0 }
 0x2a9   : > { %12159 = vmatprep.mubr.bf16.mxu1 %v14448_v60  ;;  %v5788_v63 = vpack.i.b16 %v3058_v18, %v3058_v18  ;;  %v5795_v27 = vpack.i.b16 %v3062_v40, %v3062_v40  ;;  %v3050_v58 = vrot.slane %v19360_v8, %v15120_v13  ;;  %v3054_v36 = vrot.slane %v19360_v8, %v15126_v15 }
 0x2aa   : > { %v12775_v38 = vmax.f32 %v12621_v6, %v12774_v35  ;;  %v12780_v56 = vrot.slane %v12622_v59, 4  ;;  %12160 = vmatmul.mubr.bf16.gmra.mxu1 %v14447_v32  ;;  %v5765_v39 = vrot.slane %v5760_v22, %v15117_v12  ;;  %v5772_v48 = vrot.slane %v5767_v21, %v15117_v12  ;;  %v16790_v26 = vpop.f32.mrf.mxu1  ;;  %v11477_v31 = vpop.f32.mrf.mxu0  ;;  %v19362_v21 = vld [vmem:[#allocation10_spill] sm:$0xff] }
 0x2ab   : > { %v5793_v1 = vrot.slane %v5788_v63, %v15117_v12  ;;  %v5800_v53 = vrot.slane %v5795_v27, %v15117_v12  ;;  %v3066_v62 = vrot.slane %v19361_v20, %v15120_v13  ;;  %v3070_v8 = vrot.slane %v19361_v20, %v15126_v15 }
 0x2ac   : > { %v12776_v11 = vrot.slane %v12775_v38, 2  ;;  %v12781_v6 = vmax.f32 %v12622_v59, %v12780_v56  ;;  %v14192_v45 = vcombine.low %v5765_v39, %v5772_v48  ;;  %v5774_v7 = vpack.i.b16 %v3050_v58, %v3050_v58  ;;  %v12019_v60 = vpop.f32.mrf.mxu1 }
 0x2ad   : > { %v14194_v32 = vcombine.low %v5793_v1, %v5800_v53  ;;  %v5781_v18 = vpack.i.b16 %v3054_v36, %v3054_v36  ;;  %v5802_v40 = vpack.i.b16 %v3066_v62, %v3066_v62  ;;  %v5809_v46 = vpack.i.b16 %v3070_v8, %v3070_v8 }
 0x2ae   : > { %v12777_v35 = vmax.f32 %v12775_v38, %v12776_v11  ;;  %v12782_v22 = vrot.slane %v12781_v6, 2  ;;  %v9423_v63 = vsub.bf16 %v19362_v21, %v14192_v45  ;;  %v5779_v27 = vrot.slane %v5774_v7, %v15117_v12  ;;  %v16800_v37 = vpop.f32.mrf.mxu1 }
 0x2af   : > { %v9425_v20 = vsub.bf16 %v19362_v21, %v14194_v32  ;;  %v5786_v31 = vrot.slane %v5781_v18, %v15117_v12  ;;  %v5807_v59 = vrot.slane %v5802_v40, %v15117_v12  ;;  %v5814_v58 = vrot.slane %v5809_v46, %v15117_v12  ;;  %v19363_v32 = vld [vmem:[#allocation11_spill] sm:$0xff] }
 0x2b0   : > { %v13647_v36 = vsel %vm13646_vm6, %v12773_v23, %v13645_v49  ;;  %v12778_v56 = vrot.slane %v12777_v35, 1  ;;  %v12783_v39 = vmax.f32 %v12781_v6, %v12782_v22  ;;  %v11428_v38 = vadd.f32 %v16539_v41, %v16457_v16  ;;  %v12022_v48 = vpop.f32.mrf.mxu1  ;;  %v16809_v1 = vpop.f32.mrf.mxu0 }
 0x2b1   : > { %v9679_v53 = vmax.bf16 %v19235_v28, %v9423_v63  ;;  %v9681_v62 = vmax.bf16 %v19235_v28, %v9425_v20  ;;  %v14193_v8 = vcombine.low %v5779_v27, %v5786_v31  ;;  %v14195_v11 = vcombine.low %v5807_v59, %v5814_v58  ;;  %v19364_v59 = vld [vmem:[#allocation60_spill] sm:$0xff] }
 0x2b2   : > { %v12779_v45 = vmax.f32 %v12777_v35, %v12778_v56  ;;  %v12784_v7 = vrot.slane %v12783_v39, 1  ;;  %v11973_v60 = vadd.f32 %v16482_v10, %v11428_v38  ;;  %v11433_v23 = vadd.f32 %v16539_v41, %v16511_v30  ;;  %v11482_v49 = vpop.f32.mrf.mxu0 }
 0x2b3   : > { %v14450_v6 = vcombine.high %v9679_v53, %v9681_v62  ;;  %v9424_v16 = vsub.bf16 %v19363_v32, %v14193_v8  ;;  %v9426_v18 = vsub.bf16 %v19363_v32, %v14195_v11  ;;  %v14449_v40 = vcombine.low %v9679_v53, %v9681_v62  ;;  %v16818_v46 = vpop.f32.mrf.mxu1 }
 0x2b4   : > { %v13649_v22 = vsel %vm13648_vm7, %v12779_v45, %v13647_v36  ;;  %v12785_v63 = vmax.f32 %v12783_v39, %v12784_v7  ;;  %v12463_v27 = vmax.f32 %v11973_v60, 0.0  ;;  %v11978_v35 = vadd.f32 %v16554_v55, %v11433_v23  ;;  %v16822_v20 = vpop.f32.mrf.mxu0 }
 0x2b5   : > { %11622 = vmatprep.mubr.bf16.mxu0 %v14450_v6  ;;  %v9680_v10 = vmax.bf16 %v19235_v28, %v9424_v16  ;;  %v9682_v30 = vmax.bf16 %v19235_v28, %v9426_v18  ;;  %v16827_v31 = vunpack.c.h.bf16 %v16561_v50  ;;  %v3074_v58 = vrot.slane %v19364_v59, %v15117_v12  ;;  %v12027_v56 = vpop.f32.mrf.mxu1  ;;  %v19365_v50 = vld [vmem:[#allocation62_spill] sm:$0xff] }
 0x2b6   : > { %v16832_v36 = vsel %vm13650_vm8, %v12785_v63, %v13649_v22  ;;  %v12623_v39 = vmul.f32 %v16574_v3, %v12463_v27  ;;  %11623 = vmatmul.mubr.bf16.gmra.mxu0 %v14449_v40  ;;  %v12464_v55 = vmax.f32 %v11978_v35, 0.0  ;;  %v3078_v38 = vrot.slane %v19364_v59, %v15123_v14  ;;  %v11485_v48 = vpop.f32.mrf.mxu0 }
 0x2b7   : > { %v14452_v53 = vcombine.high %v9680_v10, %v9682_v30  ;;  %v14451_v62 = vcombine.low %v9680_v10, %v9682_v30  ;;  %v3090_v8 = vrot.slane %v19365_v50, %v15117_v12  ;;  %v3094_v11 = vrot.slane %v19365_v50, %v15123_v14  ;;  %v16841_v45 = vpop.f32.mrf.mxu1 }
 0x2b8   : > { %19366 = vst [vmem:[#allocation33_spill] sm:$0xff] %v16841_v45  ;;  %v12786_v7 = vrot.slane %v12623_v39, 4  ;;  %v12624_v60 = vmul.f32 %v16827_v31, %v12464_v55  ;;  %v5816_v3 = vpack.i.b16 %v3074_v58, %v3074_v58  ;;  %v5823_v23 = vpack.i.b16 %v3078_v38, %v3078_v38 }
 0x2b9   : > { %12167 = vmatprep.mubr.bf16.mxu1 %v14452_v53  ;;  %v5844_v49 = vpack.i.b16 %v3090_v8, %v3090_v8  ;;  %v5851_v6 = vpack.i.b16 %v3094_v11, %v3094_v11  ;;  %v3082_v16 = vrot.slane %v19364_v59, %v15120_v13  ;;  %v3086_v18 = vrot.slane %v19364_v59, %v15126_v15  ;;  %v12030_v40 = vpop.f32.mrf.mxu1  ;;  %v16848_v22 = vpop.f32.mrf.mxu0 }
 0x2ba   : > { %v12787_v63 = vmax.f32 %v12623_v39, %v12786_v7  ;;  %v12792_v27 = vrot.slane %v12624_v60, 4  ;;  %12168 = vmatmul.mubr.bf16.gmra.mxu1 %v14451_v62  ;;  %v5821_v35 = vrot.slane %v5816_v3, %v15117_v12  ;;  %v5828_v10 = vrot.slane %v5823_v23, %v15117_v12 }
 0x2bb   : > { %v5849_v30 = vrot.slane %v5844_v49, %v15117_v12  ;;  %v5856_v58 = vrot.slane %v5851_v6, %v15117_v12  ;;  %v3098_v56 = vrot.slane %v19365_v50, %v15120_v13  ;;  %v3102_v59 = vrot.slane %v19365_v50, %v15126_v15  ;;  %v11490_v55 = vpop.f32.mrf.mxu0 }
 0x2bc   : > { %v12788_v38 = vrot.slane %v12787_v63, 2  ;;  %v12793_v39 = vmax.f32 %v12624_v60, %v12792_v27  ;;  %v14196_v48 = vcombine.low %v5821_v35, %v5828_v10  ;;  %v5830_v53 = vpack.i.b16 %v3082_v16, %v3082_v16 }
 0x2bd   : > { %v14198_v62 = vcombine.low %v5849_v30, %v5856_v58  ;;  %v5837_v8 = vpack.i.b16 %v3086_v18, %v3086_v18  ;;  %v5858_v11 = vpack.i.b16 %v3098_v56, %v3098_v56  ;;  %v5865_v7 = vpack.i.b16 %v3102_v59, %v3102_v59  ;;  %v16858_v3 = vpop.f32.mrf.mxu0 }
 0x2be   : > { %v12789_v23 = vmax.f32 %v12787_v63, %v12788_v38  ;;  %v12794_v49 = vrot.slane %v12793_v39, 2  ;;  %v9427_v6 = vsub.bf16 %v19362_v21, %v14196_v48  ;;  %v5835_v40 = vrot.slane %v5830_v53, %v15117_v12  ;;  %v16862_v45 = vpop.f32.mrf.mxu1 }
 0x2bf   : > { %v9429_v50 = vsub.bf16 %v19362_v21, %v14198_v62  ;;  %v5842_v60 = vrot.slane %v5837_v8, %v15117_v12  ;;  %v5863_v16 = vrot.slane %v5858_v11, %v15117_v12  ;;  %v5870_v18 = vrot.slane %v5865_v7, %v15117_v12  ;;  %v11493_v27 = vpop.f32.mrf.mxu0 }
 0x2c0   : > { %v12790_v35 = vrot.slane %v12789_v23, 1  ;;  %v12795_v10 = vmax.f32 %v12793_v39, %v12794_v49  ;;  %v9683_v63 = vmax.bf16 %v19235_v28, %v9427_v6  ;;  %v11436_v30 = vadd.f32 %v16539_v41, %v16529_v51  ;;  %v12035_v58 = vpop.f32.mrf.mxu1  ;;  %v19367_v51 = vld [vmem:[#allocation63_spill] sm:$0xff] }
 0x2c1   : > { %v9685_v56 = vmax.bf16 %v19235_v28, %v9429_v50  ;;  %v14197_v59 = vcombine.low %v5835_v40, %v5842_v60  ;;  %v14199_v55 = vcombine.low %v5863_v16, %v5870_v18  ;;  %v11441_v38 = vadd.f32 %v16539_v41, %v16605_v4 }
 0x2c2   : > { %v12791_v39 = vmax.f32 %v12789_v23, %v12790_v35  ;;  %v12796_v48 = vrot.slane %v12795_v10, 1  ;;  %v11981_v53 = vadd.f32 %v16568_v9, %v11436_v30  ;;  %v3106_v62 = vrot.slane %v19367_v51, %v15117_v12  ;;  %v16883_v8 = vpop.f32.mrf.mxu1  ;;  %v19368_v35 = vld [vmem:[#allocation65_spill] sm:$0xff] }
 0x2c3   : > { %v14454_v11 = vcombine.high %v9683_v63, %v9685_v56  ;;  %v9428_v7 = vsub.bf16 %v19363_v32, %v14197_v59  ;;  %v9430_v4 = vsub.bf16 %v19363_v32, %v14199_v55  ;;  %v14453_v49 = vcombine.low %v9683_v63, %v9685_v56 }
 0x2c4   : > { %v13653_v6 = vsel %vm13652_vm9, %v12791_v39, %v16832_v36  ;;  %v16889_v40 = vmax.f32 %v12795_v10, %v12796_v48  ;;  %v12465_v23 = vmax.f32 %v11981_v53, 0.0  ;;  %v11986_v50 = vadd.f32 %v16622_v34, %v11441_v38  ;;  %v12038_v9 = vpop.f32.mrf.mxu1  ;;  %v16892_v60 = vpop.f32.mrf.mxu0 }
 0x2c5   : > { %13775 = vst [vmem:[%s16878_s15] sm:$0xff] %v13653_v6  ;;  %11630 = vmatprep.mubr.bf16.mxu0 %v14454_v11  ;;  %v9684_v16 = vmax.bf16 %v19235_v28, %v9428_v7  ;;  %v9686_v18 = vmax.bf16 %v19235_v28, %v9430_v4  ;;  %v3110_v27 = vrot.slane %v19367_v51, %v15123_v14 }
 0x2c6   : > { %v3122_v36 = vrot.slane %v19368_v35, %v15117_v12  ;;  %v12625_v10 = vmul.f32 %v16827_v31, %v12465_v23  ;;  %11631 = vmatmul.mubr.bf16.gmra.mxu0 %v14453_v49  ;;  %v12466_v63 = vmax.f32 %v11986_v50, 0.0  ;;  %v3126_v34 = vrot.slane %v19368_v35, %v15123_v14  ;;  %v11498_v58 = vpop.f32.mrf.mxu0 }
 0x2c7   : > { %v5872_v30 = vpack.i.b16 %v3106_v62, %v3106_v62  ;;  %v14456_v56 = vcombine.high %v9684_v16, %v9686_v18  ;;  %v14455_v59 = vcombine.low %v9684_v16, %v9686_v18  ;;  %v5879_v55 = vpack.i.b16 %v3110_v27, %v3110_v27  ;;  %v16904_v39 = vpop.f32.mrf.mxu1 }
 0x2c8   : > { %v5900_v38 = vpack.i.b16 %v3122_v36, %v3122_v36  ;;  %v12798_v48 = vrot.slane %v12625_v10, 4  ;;  %v12626_v53 = vmul.f32 %v16827_v31, %v12466_v63  ;;  %v5907_v7 = vpack.i.b16 %v3126_v34, %v3126_v34  ;;  %v16908_v4 = vpop.f32.mrf.mxu0 }
 0x2c9   : > { %v5877_v11 = vrot.slane %v5872_v30, %v15117_v12  ;;  %12175 = vmatprep.mubr.bf16.mxu1 %v14456_v56  ;;  %v5884_v49 = vrot.slane %v5879_v55, %v15117_v12  ;;  %v3114_v6 = vrot.slane %v19367_v51, %v15120_v13  ;;  %v3118_v23 = vrot.slane %v19367_v51, %v15126_v15  ;;  %v12043_v50 = vpop.f32.mrf.mxu1 }
 0x2ca   : > { %v5905_v62 = vrot.slane %v5900_v38, %v15117_v12  ;;  %v12799_v9 = vmax.f32 %v12625_v10, %v12798_v48  ;;  %v12804_v16 = vrot.slane %v12626_v53, 4  ;;  %12176 = vmatmul.mubr.bf16.gmra.mxu1 %v14455_v59  ;;  %v5912_v18 = vrot.slane %v5907_v7, %v15117_v12  ;;  %v11501_v36 = vpop.f32.mrf.mxu0 }
 0x2cb   : > { %v3130_v27 = vrot.slane %v19368_v35, %v15120_v13  ;;  %v14200_v63 = vcombine.low %v5877_v11, %v5884_v49  ;;  %v3134_v34 = vrot.slane %v19368_v35, %v15126_v15  ;;  %v5886_v30 = vpack.i.b16 %v3114_v6, %v3114_v6  ;;  %v16921_v56 = vpop.f32.mrf.mxu1 }
 0x2cc   : > { %v5893_v58 = vpack.i.b16 %v3118_v23, %v3118_v23  ;;  %v12800_v55 = vrot.slane %v12799_v9, 2  ;;  %v12805_v51 = vmax.f32 %v12626_v53, %v12804_v16  ;;  %v14202_v38 = vcombine.low %v5905_v62, %v5912_v18 }
 0x2cd   : > { %v5914_v10 = vpack.i.b16 %v3130_v27, %v3130_v27  ;;  %v9431_v59 = vsub.bf16 %v19362_v21, %v14200_v63  ;;  %v5891_v48 = vrot.slane %v5886_v30, %v15117_v12  ;;  %v5921_v50 = vpack.i.b16 %v3134_v34, %v3134_v34  ;;  %v12046_v36 = vpop.f32.mrf.mxu1  ;;  %v16935_v34 = vpop.f32.mrf.mxu0 }
 0x2ce   : > { %v5898_v7 = vrot.slane %v5893_v58, %v15117_v12  ;;  %v12801_v11 = vmax.f32 %v12799_v9, %v12800_v55  ;;  %v12806_v49 = vrot.slane %v12805_v51, 2  ;;  %v9433_v35 = vsub.bf16 %v19362_v21, %v14202_v38  ;;  %v19369_v38 = vld [vmem:[#allocation64_spill] sm:$0xff] }
 0x2cf   : > { %v5919_v6 = vrot.slane %v5914_v10, %v15117_v12  ;;  %v9687_v23 = vmax.bf16 %v19235_v28, %v9431_v59  ;;  %v5926_v53 = vrot.slane %v5921_v50, %v15117_v12  ;;  %v11444_v16 = vadd.f32 %v16539_v41, %v16631_v33  ;;  %v11506_v50 = vpop.f32.mrf.mxu0 }
 0x2d0   : > { %v14201_v62 = vcombine.low %v5891_v48, %v5898_v7  ;;  %v12802_v18 = vrot.slane %v12801_v11, 1  ;;  %v12807_v27 = vmax.f32 %v12805_v51, %v12806_v49  ;;  %v9689_v63 = vmax.bf16 %v19235_v28, %v9433_v35 }
 0x2d1   : > { %v11449_v9 = vadd.f32 %v16539_v41, %v16650_v61  ;;  %v14203_v30 = vcombine.low %v5919_v6, %v5926_v53  ;;  %v11989_v55 = vadd.f32 %v16643_v44, %v11444_v16  ;;  %v3138_v10 = vrot.slane %v19369_v38, %v15117_v12  ;;  %v19370_v6 = vld [vmem:[#allocation66_spill] sm:$0xff] }
 0x2d2   : > { %v9432_v58 = vsub.bf16 %v19363_v32, %v14201_v62  ;;  %v12803_v59 = vmax.f32 %v12801_v11, %v12802_v18  ;;  %v12808_v48 = vrot.slane %v12807_v27, 1  ;;  %v14458_v33 = vcombine.high %v9687_v23, %v9689_v63  ;;  %v16941_v51 = vpop.f32.mrf.mxu1  ;;  %v16952_v62 = vpop.f32.mrf.mxu0 }
 0x2d3   : > { %v14457_v7 = vcombine.low %v9687_v23, %v9689_v63  ;;  %v9434_v36 = vsub.bf16 %v19363_v32, %v14203_v30  ;;  %v12467_v61 = vmax.f32 %v11989_v55, 0.0  ;;  %v11994_v49 = vadd.f32 %v16667_v54, %v11449_v9 }
 0x2d4   : > { %v9688_v41 = vmax.bf16 %v19235_v28, %v9432_v58  ;;  %v13654_v44 = vsel %vm13640_vm3, %v12803_v59, %v16889_v40  ;;  %v12809_v35 = vmax.f32 %v12807_v27, %v12808_v48  ;;  %11638 = vmatprep.mubr.bf16.mxu0 %v14458_v33  ;;  %v3142_v11 = vrot.slane %v19369_v38, %v15123_v14  ;;  %v12051_v53 = vpop.f32.mrf.mxu1  ;;  %v11509_v55 = vpop.f32.mrf.mxu0 }
 0x2d5   : > { %v3154_v23 = vrot.slane %v19370_v6, %v15117_v12  ;;  %v9690_v16 = vmax.bf16 %v19235_v28, %v9434_v36  ;;  %v12627_v18 = vmul.f32 %v16827_v31, %v12467_v61  ;;  %11639 = vmatmul.mubr.bf16.gmra.mxu0 %v14457_v7  ;;  %v12468_v54 = vmax.f32 %v11994_v49, 0.0 }
 0x2d6   : > { %v3158_v40 = vrot.slane %v19370_v6, %v15123_v14  ;;  %v16959_v27 = vsel %vm13642_vm4, %v12809_v35, %v13654_v44  ;;  %v5928_v63 = vpack.i.b16 %v3138_v10, %v3138_v10  ;;  %v5935_v9 = vpack.i.b16 %v3142_v11, %v3142_v11  ;;  %v16961_v58 = vpop.f32.mrf.mxu1 }
 0x2d7   : > { %v5956_v30 = vpack.i.b16 %v3154_v23, %v3154_v23  ;;  %v14460_v59 = vcombine.high %v9688_v41, %v9690_v16  ;;  %v12810_v48 = vrot.slane %v12627_v18, 4  ;;  %v12628_v33 = vmul.f32 %v16827_v31, %v12468_v54 }
 0x2d8   : > { %v14459_v50 = vcombine.low %v9688_v41, %v9690_v16  ;;  %v5933_v7 = vrot.slane %v5928_v63, %v15117_v12  ;;  %v5940_v36 = vrot.slane %v5935_v9, %v15117_v12  ;;  %v5963_v49 = vpack.i.b16 %v3158_v40, %v3158_v40  ;;  %v12054_v44 = vpop.f32.mrf.mxu1 }
 0x2d9   : > { %v5961_v61 = vrot.slane %v5956_v30, %v15117_v12  ;;  %12183 = vmatprep.mubr.bf16.mxu1 %v14460_v59  ;;  %v12811_v10 = vmax.f32 %v12627_v18, %v12810_v48  ;;  %v12816_v35 = vrot.slane %v12628_v33, 4  ;;  %v3146_v11 = vrot.slane %v19369_v38, %v15120_v13 }
 0x2da   : > { %v3150_v23 = vrot.slane %v19369_v38, %v15126_v15  ;;  %12184 = vmatmul.mubr.bf16.gmra.mxu1 %v14459_v50  ;;  %v5968_v41 = vrot.slane %v5963_v49, %v15117_v12  ;;  %v14204_v53 = vcombine.low %v5933_v7, %v5940_v36  ;;  %v3162_v16 = vrot.slane %v19370_v6, %v15120_v13 }
 0x2db   : > { %v3166_v54 = vrot.slane %v19370_v6, %v15126_v15  ;;  %v12812_v40 = vrot.slane %v12811_v10, 2  ;;  %v12817_v63 = vmax.f32 %v12628_v33, %v12816_v35  ;;  %v5942_v18 = vpack.i.b16 %v3146_v11, %v3146_v11 }
 0x2dc   : > { %v5949_v9 = vpack.i.b16 %v3150_v23, %v3150_v23  ;;  %v14206_v30 = vcombine.low %v5961_v61, %v5968_v41  ;;  %v9435_v55 = vsub.bf16 %v19362_v21, %v14204_v53  ;;  %v5970_v59 = vpack.i.b16 %v3162_v16, %v3162_v16  ;;  %v16990_v41 = vpop.f32.mrf.mxu0 }
 0x2dd   : > { %v5977_v48 = vpack.i.b16 %v3166_v54, %v3166_v54  ;;  %v12813_v38 = vmax.f32 %v12811_v10, %v12812_v40  ;;  %v12818_v50 = vrot.slane %v12817_v63, 2  ;;  %v5947_v49 = vrot.slane %v5942_v18, %v15117_v12  ;;  %v16986_v10 = vld [vmem:[%s19053_s7] ss:$0 sm:$0xff] }
 0x2de   : > { %v5954_v7 = vrot.slane %v5949_v9, %v15117_v12  ;;  %v9437_v36 = vsub.bf16 %v19362_v21, %v14206_v30  ;;  %v9691_v44 = vmax.bf16 %v19235_v28, %v9435_v55  ;;  %v5975_v6 = vrot.slane %v5970_v59, %v15117_v12  ;;  %v16992_v21 = vpop.f32.mrf.mxu1 }
 0x2df   : > { %v5982_v33 = vrot.slane %v5977_v48, %v15117_v12  ;;  %v12814_v35 = vrot.slane %v12813_v38, 1  ;;  %v12819_v61 = vmax.f32 %v12817_v63, %v12818_v50  ;;  %v11452_v23 = vadd.f32 %v16986_v10, %v16664_v2  ;;  %v11514_v2 = vpop.f32.mrf.mxu0 }
 0x2e0   : > { %v14205_v11 = vcombine.low %v5947_v49, %v5954_v7  ;;  %v9693_v53 = vmax.bf16 %v19235_v28, %v9437_v36  ;;  %v11457_v54 = vadd.f32 %v16986_v10, %v16684_v52  ;;  %v3170_v40 = vrot.slane %v15569_v0, %v15117_v12  ;;  %v12059_v55 = vpop.f32.mrf.mxu1 }
 0x2e1   : > { %v14207_v16 = vcombine.low %v5975_v6, %v5982_v33  ;;  %v12815_v63 = vmax.f32 %v12813_v38, %v12814_v35  ;;  %v12820_v18 = vrot.slane %v12819_v61, 1  ;;  %v11997_v30 = vadd.f32 %v16682_v42, %v11452_v23 }
 0x2e2   : > { %v9436_v9 = vsub.bf16 %v19363_v32, %v14205_v11  ;;  %v14462_v59 = vcombine.high %v9691_v44, %v9693_v53  ;;  %v14461_v50 = vcombine.low %v9691_v44, %v9693_v53  ;;  %v12002_v49 = vadd.f32 %v16715_v24, %v11457_v54  ;;  %v17011_v44 = vpop.f32.mrf.mxu0  ;;  %v17013_v24 = vpop.f32.mrf.mxu1 }
 0x2e3   : > { %v9438_v48 = vsub.bf16 %v19363_v32, %v14207_v16  ;;  %v13656_v52 = vsel %vm13644_vm5, %v12815_v63, %v16959_v27  ;;  %v12821_v7 = vmax.f32 %v12819_v61, %v12820_v18  ;;  %v12469_v38 = vmax.f32 %v11997_v30, 0.0 }
 0x2e4   : > { %v9692_v36 = vmax.bf16 %v19235_v28, %v9436_v9  ;;  %11646 = vmatprep.mubr.bf16.mxu0 %v14462_v59  ;;  %v12470_v33 = vmax.f32 %v12002_v49, 0.0  ;;  %v3174_v42 = vrot.slane %v15569_v0, %v15123_v14  ;;  %v3186_v32 = vrot.slane %v15571_v25, %v15117_v12  ;;  %v11517_v63 = vpop.f32.mrf.mxu0  ;;  %v12062_v18 = vpop.f32.mrf.mxu1 }
 0x2e5   : > { %v9694_v6 = vmax.bf16 %v19235_v28, %v9438_v48  ;;  %v17016_v27 = vsel %vm13646_vm6, %v12821_v7, %v13656_v52  ;;  %v12629_v35 = vmul.f32 %v16827_v31, %v12469_v38  ;;  %11647 = vmatmul.mubr.bf16.gmra.mxu0 %v14461_v50  ;;  %v3190_v61 = vrot.slane %v15571_v25, %v15123_v14 }
 0x2e6   : > { %v5984_v11 = vpack.i.b16 %v3170_v40, %v3170_v40  ;;  %v12630_v53 = vmul.f32 %v16827_v31, %v12470_v33  ;;  %v5991_v54 = vpack.i.b16 %v3174_v42, %v3174_v42  ;;  %v6012_v2 = vpack.i.b16 %v3186_v32, %v3186_v32 }
 0x2e7   : > { %v14464_v23 = vcombine.high %v9692_v36, %v9694_v6  ;;  %v14463_v16 = vcombine.low %v9692_v36, %v9694_v6  ;;  %v12822_v9 = vrot.slane %v12629_v35, 4  ;;  %v6019_v55 = vpack.i.b16 %v3190_v61, %v3190_v61 }
 0x2e8   : > { %v5989_v30 = vrot.slane %v5984_v11, %v15117_v12  ;;  %v12828_v59 = vrot.slane %v12630_v53, 4  ;;  %v5996_v48 = vrot.slane %v5991_v54, %v15117_v12  ;;  %v3178_v50 = vrot.slane %v15569_v0, %v15120_v13 }
 0x2e9   : > { %12191 = vmatprep.mubr.bf16.mxu1 %v14464_v23  ;;  %v3182_v40 = vrot.slane %v15569_v0, %v15126_v15  ;;  %v12823_v49 = vmax.f32 %v12629_v35, %v12822_v9  ;;  %v6017_v52 = vrot.slane %v6012_v2, %v15117_v12  ;;  %v6024_v7 = vrot.slane %v6019_v55, %v15117_v12  ;;  %v19371_v23 = vld [vmem:[#allocation12_spill] sm:$0xff]  ;;  %v17040_v2 = vld [vmem:[%s16545_s13 + $0x8] sm:$0xff]  }
 0x2ea   : > { %12192 = vmatmul.mubr.bf16.gmra.mxu1 %v14463_v16  ;;  %v3194_v36 = vrot.slane %v15571_v25, %v15120_v13  ;;  %v12829_v38 = vmax.f32 %v12630_v53, %v12828_v59  ;;  %v14208_v6 = vcombine.low %v5989_v30, %v5996_v48  ;;  %v3198_v33 = vrot.slane %v15571_v25, %v15126_v15 }
 0x2eb   : > { %v5998_v42 = vpack.i.b16 %v3178_v50, %v3178_v50  ;;  %v12824_v32 = vrot.slane %v12823_v49, 2  ;;  %v14210_v61 = vcombine.low %v6017_v52, %v6024_v7  ;;  %v6005_v11 = vpack.i.b16 %v3182_v40, %v3182_v40  ;;  %v17049_v7 = vpop.f32.mrf.mxu0 }
 0x2ec   : > { %v6026_v0 = vpack.i.b16 %v3194_v36, %v3194_v36  ;;  %v12830_v35 = vrot.slane %v12829_v38, 2  ;;  %v9439_v16 = vsub.bf16 %v19371_v23, %v14208_v6  ;;  %v6033_v63 = vpack.i.b16 %v3198_v33, %v3198_v33  ;;  %v17051_v36 = vpop.f32.mrf.mxu1  ;;  %v19372_v33 = vld [vmem:[#allocation31_spill] sm:$0xff] }
 0x2ed   : > { %v6003_v54 = vrot.slane %v5998_v42, %v15117_v12  ;;  %v12825_v18 = vmax.f32 %v12823_v49, %v12824_v32  ;;  %v9441_v9 = vsub.bf16 %v19371_v23, %v14210_v61  ;;  %v6010_v53 = vrot.slane %v6005_v11, %v15117_v12  ;;  %v19373_v11 = vld [vmem:[#allocation13_spill] sm:$0xff] }
 0x2ee   : > { %v6031_v30 = vrot.slane %v6026_v0, %v15117_v12  ;;  %v12831_v25 = vmax.f32 %v12829_v38, %v12830_v35  ;;  %v9695_v55 = vmax.bf16 %v19235_v28, %v9439_v16  ;;  %v6038_v59 = vrot.slane %v6033_v63, %v15117_v12  ;;  %v11522_v16 = vpop.f32.mrf.mxu0 }
 0x2ef   : > { %v11460_v48 = vadd.f32 %v16986_v10, %v16708_v19  ;;  %v12826_v50 = vrot.slane %v12825_v18, 1  ;;  %v9697_v40 = vmax.bf16 %v19235_v28, %v9441_v9  ;;  %v14209_v49 = vcombine.low %v6003_v54, %v6010_v53  ;;  %v12067_v54 = vpop.f32.mrf.mxu1 }
 0x2f0   : > { %v11465_v52 = vadd.f32 %v16986_v10, %v16735_v17  ;;  %v12832_v6 = vrot.slane %v12831_v25, 1  ;;  %v14211_v38 = vcombine.low %v6031_v30, %v6038_v59  ;;  %v17055_v32 = vunpack.c.l.bf16 %v17040_v2 }
 0x2f1   : > { %v12005_v42 = vadd.f32 %v19372_v33, %v11460_v48  ;;  %v12827_v61 = vmax.f32 %v12825_v18, %v12826_v50  ;;  %v14466_v19 = vcombine.high %v9695_v55, %v9697_v40  ;;  %v9440_v0 = vsub.bf16 %v19373_v11, %v14209_v49  ;;  %v19374_v18 = vld [vmem:[#allocation67_spill] sm:$0xff]  ;;  %v17072_v49 = vpop.f32.mrf.mxu0 }
 0x2f2   : > { %v14465_v35 = vcombine.low %v9695_v55, %v9697_v40  ;;  %v12833_v63 = vmax.f32 %v12831_v25, %v12832_v6  ;;  %v9442_v17 = vsub.bf16 %v19373_v11, %v14211_v38  ;;  %v12010_v53 = vadd.f32 %v16743_v29, %v11465_v52  ;;  %v19375_v52 = vld [vmem:[#allocation68_spill] sm:$0xff] }
 0x2f3   : > { %v12471_v9 = vmax.f32 %v12005_v42, 0.0  ;;  %v13658_v30 = vsel %vm13648_vm7, %v12827_v61, %v17016_v27  ;;  %11654 = vmatprep.mubr.bf16.mxu0 %v14466_v19  ;;  %v9696_v59 = vmax.bf16 %v19235_v28, %v9440_v0  ;;  %v3202_v48 = vrot.slane %v19374_v18, %v15117_v12  ;;  %v17074_v27 = vpop.f32.mrf.mxu1 }
 0x2f4   : > { %v3206_v55 = vrot.slane %v19374_v18, %v15123_v14  ;;  %v17068_v50 = vsel %vm13650_vm8, %v12833_v63, %v13658_v30  ;;  %v9698_v25 = vmax.bf16 %v19235_v28, %v9442_v17  ;;  %11655 = vmatmul.mubr.bf16.gmra.mxu0 %v14465_v35  ;;  %v12472_v29 = vmax.f32 %v12010_v53, 0.0 }
 0x2f5   : > { %v12631_v40 = vmul.f32 %v16827_v31, %v12471_v9  ;;  %v3218_v6 = vrot.slane %v19375_v52, %v15117_v12  ;;  %v3222_v38 = vrot.slane %v19375_v52, %v15123_v14  ;;  %v6040_v33 = vpack.i.b16 %v3202_v48, %v3202_v48  ;;  %v11525_v31 = vpop.f32.mrf.mxu0  ;;  %v12070_v35 = vpop.f32.mrf.mxu1 }
 0x2f6   : > { %v6047_v42 = vpack.i.b16 %v3206_v55, %v3206_v55  ;;  %v14468_v61 = vcombine.high %v9696_v59, %v9698_v25  ;;  %v12632_v0 = vmul.f32 %v17055_v32, %v12472_v29  ;;  %v14467_v16 = vcombine.low %v9696_v59, %v9698_v25 }
 0x2f7   : > { %v12834_v19 = vrot.slane %v12631_v40, 4  ;;  %v6045_v54 = vrot.slane %v6040_v33, %v15117_v12  ;;  %v6068_v17 = vpack.i.b16 %v3218_v6, %v3218_v6  ;;  %v6075_v9 = vpack.i.b16 %v3222_v38, %v3222_v38 }
 0x2f8   : > { %v6052_v63 = vrot.slane %v6047_v42, %v15117_v12  ;;  %12199 = vmatprep.mubr.bf16.mxu1 %v14468_v61  ;;  %v12840_v30 = vrot.slane %v12632_v0, 4  ;;  %v3210_v48 = vrot.slane %v19374_v18, %v15120_v13  ;;  %v3214_v55 = vrot.slane %v19374_v18, %v15126_v15 }
 0x2f9   : > { %v12835_v53 = vmax.f32 %v12631_v40, %v12834_v19  ;;  %12200 = vmatmul.mubr.bf16.gmra.mxu1 %v14467_v16  ;;  %v6073_v59 = vrot.slane %v6068_v17, %v15117_v12  ;;  %v6080_v25 = vrot.slane %v6075_v9, %v15117_v12  ;;  %v3226_v33 = vrot.slane %v19375_v52, %v15120_v13 }
 0x2fa   : > { %v14212_v29 = vcombine.low %v6045_v54, %v6052_v63  ;;  %v12841_v38 = vmax.f32 %v12632_v0, %v12840_v30  ;;  %v3230_v40 = vrot.slane %v19375_v52, %v15126_v15  ;;  %v6054_v42 = vpack.i.b16 %v3210_v48, %v3210_v48 }
 0x2fb   : > { %v12836_v6 = vrot.slane %v12835_v53, 2  ;;  %v14214_v61 = vcombine.low %v6073_v59, %v6080_v25  ;;  %v6061_v31 = vpack.i.b16 %v3214_v55, %v3214_v55  ;;  %v6082_v18 = vpack.i.b16 %v3226_v33, %v3226_v33  ;;  %v19376_v33 = vld [vmem:[#allocation69_spill] sm:$0xff] }
 0x2fc   : > { %v9443_v19 = vsub.bf16 %v19371_v23, %v14212_v29  ;;  %v12842_v35 = vrot.slane %v12841_v38, 2  ;;  %v6059_v17 = vrot.slane %v6054_v42, %v15117_v12  ;;  %v6089_v9 = vpack.i.b16 %v3230_v40, %v3230_v40  ;;  %v17107_v40 = vpop.f32.mrf.mxu0  ;;  %v17109_v42 = vpop.f32.mrf.mxu1 }
 0x2fd   : > { %v12837_v16 = vmax.f32 %v12835_v53, %v12836_v6  ;;  %v9445_v54 = vsub.bf16 %v19371_v23, %v14214_v61  ;;  %v6066_v0 = vrot.slane %v6061_v31, %v15117_v12  ;;  %v6087_v30 = vrot.slane %v6082_v18, %v15117_v12  ;;  %19377 = vst [vmem:[#allocation3_spill] sm:$0xff] %v17109_v42 }
 0x2fe   : > { %v9699_v63 = vmax.bf16 %v19235_v28, %v9443_v19  ;;  %v12843_v48 = vmax.f32 %v12841_v38, %v12842_v35  ;;  %v6094_v59 = vrot.slane %v6089_v9, %v15117_v12  ;;  %v11468_v55 = vadd.f32 %v16986_v10, %v16748_v57  ;;  %v12075_v9 = vpop.f32.mrf.mxu1 }
 0x2ff   : > { %v12838_v52 = vrot.slane %v12837_v16, 1  ;;  %v9701_v53 = vmax.bf16 %v19235_v28, %v9445_v54  ;;  %v14213_v25 = vcombine.low %v6059_v17, %v6066_v0  ;;  %v11473_v29 = vadd.f32 %v16986_v10, %v16771_v5  ;;  %v11530_v5 = vpop.f32.mrf.mxu0 }
 0x300   : > { %v3234_v6 = vrot.slane %v19376_v33, %v15117_v12  ;;  %v12844_v61 = vrot.slane %v12843_v48, 1  ;;  %v14215_v19 = vcombine.low %v6087_v30, %v6094_v59  ;;  %v12013_v31 = vadd.f32 %v16757_v43, %v11468_v55 }
 0x301   : > { %v12839_v38 = vmax.f32 %v12837_v16, %v12838_v52  ;;  %v14470_v57 = vcombine.high %v9699_v63, %v9701_v53  ;;  %v9444_v18 = vsub.bf16 %v19373_v11, %v14213_v25  ;;  %v14469_v35 = vcombine.low %v9699_v63, %v9701_v53  ;;  %v17129_v53 = vpop.f32.mrf.mxu0  ;;  %v17131_v25 = vpop.f32.mrf.mxu1 }
 0x302   : > { %v12018_v17 = vadd.f32 %v16790_v26, %v11473_v29  ;;  %v17116_v0 = vmax.f32 %v12843_v48, %v12844_v61  ;;  %v9446_v42 = vsub.bf16 %v19373_v11, %v14215_v19  ;;  %v12473_v16 = vmax.f32 %v12013_v31, 0.0  ;;  %v19378_v26 = vld [vmem:[#allocation70_spill] sm:$0xff]  ;;  %19379 = vst [vmem:[#allocation34_spill] sm:$0xff] %v17129_v53  ;;  %19380 = vst [vmem:[#allocation35_spill] sm:$0xff] %v17131_v25 }
 0x303   : > { %v13660_v54 = vsel %vm13652_vm9, %v12839_v38, %v17068_v50  ;;  %11662 = vmatprep.mubr.bf16.mxu0 %v14470_v57  ;;  %v9700_v43 = vmax.bf16 %v19235_v28, %v9444_v18  ;;  %v3238_v63 = vrot.slane %v19376_v33, %v15123_v14  ;;  %v3250_v52 = vrot.slane %v19378_v26, %v15117_v12 }
 0x304   : > { %13776 = vst [vmem:[%s16878_s15 + $0x8] sm:$0xff] %v13660_v54  ;;  %v12474_v30 = vmax.f32 %v12018_v17, 0.0  ;;  %v9702_v59 = vmax.bf16 %v19235_v28, %v9446_v42  ;;  %v12633_v50 = vmul.f32 %v17055_v32, %v12473_v16  ;;  %11663 = vmatmul.mubr.bf16.gmra.mxu0 %v14469_v35  ;;  %v3254_v48 = vrot.slane %v19378_v26, %v15123_v14  ;;  %v11533_v35 = vpop.f32.mrf.mxu0  ;;  %v12078_v17 = vpop.f32.mrf.mxu1 }
 0x305   : > { %v6096_v55 = vpack.i.b16 %v3234_v6, %v3234_v6  ;;  %v6103_v38 = vpack.i.b16 %v3238_v63, %v3238_v63  ;;  %v6124_v61 = vpack.i.b16 %v3250_v52, %v3250_v52  ;;  %v3242_v19 = vrot.slane %v19376_v33, %v15120_v13 }
 0x306   : > { %v12634_v29 = vmul.f32 %v17055_v32, %v12474_v30  ;;  %v14472_v31 = vcombine.high %v9700_v43, %v9702_v59  ;;  %v12846_v42 = vrot.slane %v12633_v50, 4  ;;  %v14471_v57 = vcombine.low %v9700_v43, %v9702_v59 }
 0x307   : > { %v6101_v18 = vrot.slane %v6096_v55, %v15117_v12  ;;  %v6108_v6 = vrot.slane %v6103_v38, %v15117_v12  ;;  %v6129_v9 = vrot.slane %v6124_v61, %v15117_v12  ;;  %v6131_v54 = vpack.i.b16 %v3254_v48, %v3254_v48 }
 0x308   : > { %v12852_v5 = vrot.slane %v12634_v29, 4  ;;  %12207 = vmatprep.mubr.bf16.mxu1 %v14472_v31  ;;  %v12847_v16 = vmax.f32 %v12633_v50, %v12846_v42  ;;  %v3246_v30 = vrot.slane %v19376_v33, %v15126_v15  ;;  %v3258_v63 = vrot.slane %v19378_v26, %v15120_v13 }
 0x309   : > { %v3262_v43 = vrot.slane %v19378_v26, %v15126_v15  ;;  %12208 = vmatmul.mubr.bf16.gmra.mxu1 %v14471_v57  ;;  %v6136_v59 = vrot.slane %v6131_v54, %v15117_v12  ;;  %v14216_v55 = vcombine.low %v6101_v18, %v6108_v6  ;;  %v6110_v38 = vpack.i.b16 %v3242_v19, %v3242_v19 }
 0x30a   : > { %v12853_v52 = vmax.f32 %v12634_v29, %v12852_v5  ;;  %v12848_v35 = vrot.slane %v12847_v16, 2  ;;  %v6117_v61 = vpack.i.b16 %v3246_v30, %v3246_v30  ;;  %v6138_v48 = vpack.i.b16 %v3258_v63, %v3258_v63  ;;  %v17157_v30 = vpop.f32.mrf.mxu0  ;;  %v17159_v63 = vpop.f32.mrf.mxu1 }
 0x30b   : > { %v6145_v31 = vpack.i.b16 %v3262_v43, %v3262_v43  ;;  %v14218_v42 = vcombine.low %v6129_v9, %v6136_v59  ;;  %v9447_v33 = vsub.bf16 %v19371_v23, %v14216_v55  ;;  %v6115_v17 = vrot.slane %v6110_v38, %v15117_v12  ;;  %v19381_v55 = vld [vmem:[#allocation71_spill] sm:$0xff] }
 0x30c   : > { %v12854_v50 = vrot.slane %v12853_v52, 2  ;;  %v12849_v25 = vmax.f32 %v12847_v16, %v12848_v35  ;;  %v6122_v53 = vrot.slane %v6117_v61, %v15117_v12  ;;  %v6143_v26 = vrot.slane %v6138_v48, %v15117_v12  ;;  %v12083_v48 = vpop.f32.mrf.mxu1 }
 0x30d   : > { %v6150_v29 = vrot.slane %v6145_v31, %v15117_v12  ;;  %v9449_v19 = vsub.bf16 %v19371_v23, %v14218_v42  ;;  %v9703_v18 = vmax.bf16 %v19235_v28, %v9447_v33  ;;  %v11476_v5 = vadd.f32 %v16986_v10, %v16786_v47 }
 0x30e   : > { %v12855_v57 = vmax.f32 %v12853_v52, %v12854_v50  ;;  %v12850_v6 = vrot.slane %v12849_v25, 1  ;;  %v14217_v9 = vcombine.low %v6115_v17, %v6122_v53  ;;  %v11481_v16 = vadd.f32 %v16986_v10, %v16809_v1  ;;  %v11538_v1 = vpop.f32.mrf.mxu0 }
 0x30f   : > { %v14219_v54 = vcombine.low %v6143_v26, %v6150_v29  ;;  %v9705_v52 = vmax.bf16 %v19235_v28, %v9449_v19  ;;  %v12021_v59 = vadd.f32 %v16800_v37, %v11476_v5  ;;  %v3266_v38 = vrot.slane %v19381_v55, %v15117_v12  ;;  %v17174_v19 = vpop.f32.mrf.mxu1 }
 0x310   : > { %v12856_v43 = vrot.slane %v12855_v57, 1  ;;  %v12851_v35 = vmax.f32 %v12849_v25, %v12850_v6  ;;  %v9448_v47 = vsub.bf16 %v19373_v11, %v14217_v9  ;;  %v12026_v61 = vadd.f32 %v16818_v46, %v11481_v16  ;;  %v17172_v29 = vpop.f32.mrf.mxu0 }
 0x311   : > { %v9450_v53 = vsub.bf16 %v19373_v11, %v14219_v54  ;;  %v14474_v50 = vcombine.high %v9703_v18, %v9705_v52  ;;  %v12475_v42 = vmax.f32 %v12021_v59, 0.0  ;;  %v14473_v33 = vcombine.low %v9703_v18, %v9705_v52  ;;  %v12086_v52 = vpop.f32.mrf.mxu1 }
 0x312   : > { %v12857_v31 = vmax.f32 %v12855_v57, %v12856_v43  ;;  %v13661_v17 = vsel %vm13640_vm3, %v12851_v35, %v17116_v0  ;;  %v9704_v37 = vmax.bf16 %v19235_v28, %v9448_v47  ;;  %v12476_v25 = vmax.f32 %v12026_v61, 0.0  ;;  %v19382_v0 = vld [vmem:[#allocation72_spill] sm:$0xff]  ;;  %v11541_v43 = vpop.f32.mrf.mxu0 }
 0x313   : > { %v9706_v26 = vmax.bf16 %v19235_v28, %v9450_v53  ;;  %11670 = vmatprep.mubr.bf16.mxu0 %v14474_v50  ;;  %v12635_v57 = vmul.f32 %v17055_v32, %v12475_v42  ;;  %v3270_v18 = vrot.slane %v19381_v55, %v15123_v14  ;;  %v3282_v5 = vrot.slane %v19382_v0, %v15117_v12 }
 0x314   : > { %v17177_v46 = vsel %vm13642_vm4, %v12857_v31, %v13661_v17  ;;  %11671 = vmatmul.mubr.bf16.gmra.mxu0 %v14473_v33  ;;  %v12636_v9 = vmul.f32 %v17055_v32, %v12476_v25  ;;  %v3286_v16 = vrot.slane %v19382_v0, %v15123_v14  ;;  %v6152_v35 = vpack.i.b16 %v3266_v38, %v3266_v38 }
 0x315   : > { %v14476_v6 = vcombine.high %v9704_v37, %v9706_v26  ;;  %v14475_v54 = vcombine.low %v9704_v37, %v9706_v26  ;;  %v12858_v59 = vrot.slane %v12635_v57, 4  ;;  %v6159_v47 = vpack.i.b16 %v3270_v18, %v3270_v18 }
 0x316   : > { %v6180_v53 = vpack.i.b16 %v3282_v5, %v3282_v5  ;;  %v12864_v61 = vrot.slane %v12636_v9, 4  ;;  %v6187_v1 = vpack.i.b16 %v3286_v16, %v3286_v16  ;;  %v3274_v48 = vrot.slane %v19381_v55, %v15120_v13 }
 0x317   : > { %12215 = vmatprep.mubr.bf16.mxu1 %v14476_v6  ;;  %v3278_v31 = vrot.slane %v19381_v55, %v15126_v15  ;;  %v12859_v50 = vmax.f32 %v12635_v57, %v12858_v59  ;;  %v6157_v42 = vrot.slane %v6152_v35, %v15117_v12  ;;  %v6164_v33 = vrot.slane %v6159_v47, %v15117_v12 }
 0x318   : > { %12216 = vmatmul.mubr.bf16.gmra.mxu1 %v14475_v54  ;;  %v6185_v17 = vrot.slane %v6180_v53, %v15117_v12  ;;  %v12865_v38 = vmax.f32 %v12636_v9, %v12864_v61  ;;  %v6192_v37 = vrot.slane %v6187_v1, %v15117_v12  ;;  %v3290_v26 = vrot.slane %v19382_v0, %v15120_v13 }
 0x319   : > { %v3294_v25 = vrot.slane %v19382_v0, %v15126_v15  ;;  %v12860_v18 = vrot.slane %v12859_v50, 2  ;;  %v14220_v5 = vcombine.low %v6157_v42, %v6164_v33  ;;  %v6166_v55 = vpack.i.b16 %v3274_v48, %v3274_v48  ;;  %v17208_v42 = vpop.f32.mrf.mxu0  ;;  %v17210_v33 = vpop.f32.mrf.mxu1 }
 0x31a   : > { %v6173_v57 = vpack.i.b16 %v3278_v31, %v3278_v31  ;;  %v12866_v6 = vrot.slane %v12865_v38, 2  ;;  %v14222_v54 = vcombine.low %v6185_v17, %v6192_v37  ;;  %v6194_v16 = vpack.i.b16 %v3290_v26, %v3290_v26 }
 0x31b   : > { %v6201_v43 = vpack.i.b16 %v3294_v25, %v3294_v25  ;;  %v12861_v52 = vmax.f32 %v12859_v50, %v12860_v18  ;;  %v9451_v59 = vsub.bf16 %v19371_v23, %v14220_v5  ;;  %v6171_v9 = vrot.slane %v6166_v55, %v15117_v12  ;;  %v19383_v18 = vld [vmem:[#allocation33_spill] sm:$0xff] }
 0x31c   : > { %v6178_v35 = vrot.slane %v6173_v57, %v15117_v12  ;;  %v12867_v47 = vmax.f32 %v12865_v38, %v12866_v6  ;;  %v9453_v53 = vsub.bf16 %v19371_v23, %v14222_v54  ;;  %v6199_v0 = vrot.slane %v6194_v16, %v15117_v12  ;;  %v19384_v55 = vld [vmem:[#allocation73_spill] sm:$0xff]  ;;  %v12091_v6 = vpop.f32.mrf.mxu1 }
 0x31d   : > { %v6206_v61 = vrot.slane %v6201_v43, %v15117_v12  ;;  %v12862_v1 = vrot.slane %v12861_v52, 1  ;;  %v9707_v48 = vmax.bf16 %v19235_v28, %v9451_v59  ;;  %v11484_v50 = vadd.f32 %v16986_v10, %v16822_v20  ;;  %v11546_v20 = vpop.f32.mrf.mxu0 }
 0x31e   : > { %v14221_v31 = vcombine.low %v6171_v9, %v6178_v35  ;;  %v12868_v17 = vrot.slane %v12867_v47, 1  ;;  %v9709_v38 = vmax.bf16 %v19235_v28, %v9453_v53  ;;  %v11489_v23 = vadd.f32 %v16986_v10, %v16848_v22 }
 0x31f   : > { %v14223_v37 = vcombine.low %v6199_v0, %v6206_v61  ;;  %v12863_v26 = vmax.f32 %v12861_v52, %v12862_v1  ;;  %v12029_v5 = vadd.f32 %v19383_v18, %v11484_v50  ;;  %v3298_v57 = vrot.slane %v19384_v55, %v15117_v12  ;;  %v17232_v1 = vpop.f32.mrf.mxu0 }
 0x320   : > { %v9452_v25 = vsub.bf16 %v19373_v11, %v14221_v31  ;;  %v12869_v54 = vmax.f32 %v12867_v47, %v12868_v17  ;;  %v14478_v16 = vcombine.high %v9707_v48, %v9709_v38  ;;  %v14477_v59 = vcombine.low %v9707_v48, %v9709_v38 }
 0x321   : > { %v9454_v43 = vsub.bf16 %v19373_v11, %v14223_v37  ;;  %v13663_v9 = vsel %vm13644_vm5, %v12863_v26, %v17177_v46  ;;  %v12477_v52 = vmax.f32 %v12029_v5, 0.0  ;;  %v12034_v35 = vadd.f32 %v16862_v45, %v11489_v23  ;;  %v19385_v11 = vld [vmem:[#allocation75_spill] sm:$0xff]  ;;  %v17234_v46 = vpop.f32.mrf.mxu1  ;;  %v11549_v26 = vpop.f32.mrf.mxu0 }
 0x322   : > { %v9708_v22 = vmax.bf16 %v19235_v28, %v9452_v25  ;;  %v17225_v53 = vsel %vm13646_vm6, %v12869_v54, %v13663_v9  ;;  %11678 = vmatprep.mubr.bf16.mxu0 %v14478_v16  ;;  %v3302_v47 = vrot.slane %v19384_v55, %v15123_v14  ;;  %v3314_v61 = vrot.slane %v19385_v11, %v15117_v12 }
 0x323   : > { %v9710_v0 = vmax.bf16 %v19235_v28, %v9454_v43  ;;  %v12637_v48 = vmul.f32 %v17055_v32, %v12477_v52  ;;  %11679 = vmatmul.mubr.bf16.gmra.mxu0 %v14477_v59  ;;  %v12478_v45 = vmax.f32 %v12034_v35, 0.0  ;;  %v3318_v31 = vrot.slane %v19385_v11, %v15123_v14  ;;  %v12094_v25 = vpop.f32.mrf.mxu1 }
 0x324   : > { %v6208_v50 = vpack.i.b16 %v3298_v57, %v3298_v57  ;;  %v6215_v37 = vpack.i.b16 %v3302_v47, %v3302_v47  ;;  %v6236_v23 = vpack.i.b16 %v3314_v61, %v3314_v61  ;;  %v3306_v57 = vrot.slane %v19384_v55, %v15120_v13 }
 0x325   : > { %v14480_v17 = vcombine.high %v9708_v22, %v9710_v0  ;;  %v14479_v38 = vcombine.low %v9708_v22, %v9710_v0  ;;  %v12870_v18 = vrot.slane %v12637_v48, 4  ;;  %v12638_v5 = vmul.f32 %v17055_v32, %v12478_v45 }
 0x326   : > { %v6213_v20 = vrot.slane %v6208_v50, %v15117_v12  ;;  %v6243_v6 = vpack.i.b16 %v3318_v31, %v3318_v31  ;;  %v6220_v54 = vrot.slane %v6215_v37, %v15117_v12  ;;  %v6241_v16 = vrot.slane %v6236_v23, %v15117_v12  ;;  %v19386_v37 = vld [vmem:[#allocation14_spill] sm:$0xff] }
 0x327   : > { %12223 = vmatprep.mubr.bf16.mxu1 %v14480_v17  ;;  %v3310_v43 = vrot.slane %v19384_v55, %v15126_v15  ;;  %v12871_v59 = vmax.f32 %v12637_v48, %v12870_v18  ;;  %v12876_v9 = vrot.slane %v12638_v5, 4  ;;  %v3322_v52 = vrot.slane %v19385_v11, %v15120_v13 }
 0x328   : > { %12224 = vmatmul.mubr.bf16.gmra.mxu1 %v14479_v38  ;;  %v6248_v22 = vrot.slane %v6243_v6, %v15117_v12  ;;  %v14224_v35 = vcombine.low %v6213_v20, %v6220_v54  ;;  %v3326_v0 = vrot.slane %v19385_v11, %v15126_v15  ;;  %v6222_v47 = vpack.i.b16 %v3306_v57, %v3306_v57 }
 0x329   : > { %v6229_v61 = vpack.i.b16 %v3310_v43, %v3310_v43  ;;  %v12872_v45 = vrot.slane %v12871_v59, 2  ;;  %v12877_v31 = vmax.f32 %v12638_v5, %v12876_v9  ;;  %v6250_v17 = vpack.i.b16 %v3322_v52, %v3322_v52  ;;  %v17264_v9 = vpop.f32.mrf.mxu0 }
 0x32a   : > { %v14226_v50 = vcombine.low %v6241_v16, %v6248_v22  ;;  %v9455_v55 = vsub.bf16 %v19386_v37, %v14224_v35  ;;  %v6227_v48 = vrot.slane %v6222_v47, %v15117_v12  ;;  %v6257_v23 = vpack.i.b16 %v3326_v0, %v3326_v0  ;;  %v17266_v22 = vpop.f32.mrf.mxu1  ;;  %v19387_v35 = vld [vmem:[#allocation15_spill] sm:$0xff] }
 0x32b   : > { %v6234_v38 = vrot.slane %v6229_v61, %v15117_v12  ;;  %v12873_v26 = vmax.f32 %v12871_v59, %v12872_v45  ;;  %v12878_v25 = vrot.slane %v12877_v31, 2  ;;  %v6255_v20 = vrot.slane %v6250_v17, %v15117_v12  ;;  %v11554_v17 = vpop.f32.mrf.mxu0 }
 0x32c   : > { %v9457_v18 = vsub.bf16 %v19386_v37, %v14226_v50  ;;  %v9711_v11 = vmax.bf16 %v19235_v28, %v9455_v55  ;;  %v6262_v6 = vrot.slane %v6257_v23, %v15117_v12  ;;  %v11492_v54 = vadd.f32 %v16986_v10, %v16858_v3  ;;  %v12099_v55 = vpop.f32.mrf.mxu1 }
 0x32d   : > { %v14225_v5 = vcombine.low %v6227_v48, %v6234_v38  ;;  %v12874_v16 = vrot.slane %v12873_v26, 1  ;;  %v12879_v57 = vmax.f32 %v12877_v31, %v12878_v25  ;;  %v11497_v59 = vadd.f32 %v16986_v10, %v16892_v60 }
 0x32e   : > { %v9713_v43 = vmax.bf16 %v19235_v28, %v9457_v18  ;;  %v14227_v52 = vcombine.low %v6255_v20, %v6262_v6  ;;  %v12037_v47 = vadd.f32 %v16883_v8, %v11492_v54  ;;  %v17271_v61 = vunpack.c.h.bf16 %v17040_v2  ;;  %v19388_v2 = vld [vmem:[#allocation74_spill] sm:$0xff]  ;;  %v17286_v54 = vpop.f32.mrf.mxu0 }
 0x32f   : > { %v9456_v0 = vsub.bf16 %v19387_v35, %v14225_v5  ;;  %v12875_v3 = vmax.f32 %v12873_v26, %v12874_v16  ;;  %v12880_v45 = vrot.slane %v12879_v57, 1  ;;  %v12042_v23 = vadd.f32 %v16904_v39, %v11497_v59  ;;  %v19389_v5 = vld [vmem:[#allocation77_spill] sm:$0xff] }
 0x330   : > { %v14482_v31 = vcombine.high %v9711_v11, %v9713_v43  ;;  %v14481_v50 = vcombine.low %v9711_v11, %v9713_v43  ;;  %v9458_v60 = vsub.bf16 %v19387_v35, %v14227_v52  ;;  %v12479_v38 = vmax.f32 %v12037_v47, 0.0 }
 0x331   : > { %v9712_v48 = vmax.bf16 %v19235_v28, %v9456_v0  ;;  %v13665_v25 = vsel %vm13648_vm7, %v12875_v3, %v17225_v53  ;;  %v12881_v8 = vmax.f32 %v12879_v57, %v12880_v45  ;;  %v3330_v26 = vrot.slane %v19388_v2, %v15117_v12  ;;  %v17288_v53 = vpop.f32.mrf.mxu1  ;;  %v11557_v3 = vpop.f32.mrf.mxu0 }
 0x332   : > { %11686 = vmatprep.mubr.bf16.mxu0 %v14482_v31  ;;  %v3334_v18 = vrot.slane %v19388_v2, %v15123_v14  ;;  %v9714_v20 = vmax.bf16 %v19235_v28, %v9458_v60  ;;  %v12639_v11 = vmul.f32 %v17055_v32, %v12479_v38  ;;  %v12480_v6 = vmax.f32 %v12042_v23, 0.0 }
 0x333   : > { %11687 = vmatmul.mubr.bf16.gmra.mxu0 %v14481_v50  ;;  %v3346_v39 = vrot.slane %v19389_v5, %v15117_v12  ;;  %v13666_v16 = vsel %vm13650_vm8, %v12881_v8, %v13665_v25  ;;  %v3350_v57 = vrot.slane %v19389_v5, %v15123_v14  ;;  %v6264_v43 = vpack.i.b16 %v3330_v26, %v3330_v26  ;;  %v12102_v45 = vpop.f32.mrf.mxu1 }
 0x334   : > { %v6271_v59 = vpack.i.b16 %v3334_v18, %v3334_v18  ;;  %v14484_v52 = vcombine.high %v9712_v48, %v9714_v20  ;;  %v12882_v0 = vrot.slane %v12639_v11, 4  ;;  %v12640_v32 = vmul.f32 %v17271_v61, %v12480_v6 }
 0x335   : > { %v14483_v47 = vcombine.low %v9712_v48, %v9714_v20  ;;  %v6269_v31 = vrot.slane %v6264_v43, %v15117_v12  ;;  %v6292_v17 = vpack.i.b16 %v3346_v39, %v3346_v39  ;;  %v6299_v55 = vpack.i.b16 %v3350_v57, %v3350_v57 }
 0x336   : > { %v6276_v50 = vrot.slane %v6271_v59, %v15117_v12  ;;  %12231 = vmatprep.mubr.bf16.mxu1 %v14484_v52  ;;  %v12883_v60 = vmax.f32 %v12639_v11, %v12882_v0  ;;  %v12888_v38 = vrot.slane %v12640_v32, 4  ;;  %v3338_v23 = vrot.slane %v19388_v2, %v15120_v13 }
 0x337   : > { %v3342_v25 = vrot.slane %v19388_v2, %v15126_v15  ;;  %12232 = vmatmul.mubr.bf16.gmra.mxu1 %v14483_v47  ;;  %v6297_v48 = vrot.slane %v6292_v17, %v15117_v12  ;;  %v6304_v8 = vrot.slane %v6299_v55, %v15117_v12  ;;  %v3354_v18 = vrot.slane %v19389_v5, %v15120_v13 }
 0x338   : > { %v14228_v26 = vcombine.low %v6269_v31, %v6276_v50  ;;  %v12884_v20 = vrot.slane %v12883_v60, 2  ;;  %v12889_v6 = vmax.f32 %v12640_v32, %v12888_v38  ;;  %v3358_v11 = vrot.slane %v19389_v5, %v15126_v15 }
 0x339   : > { %v6278_v39 = vpack.i.b16 %v3338_v23, %v3338_v23  ;;  %v14230_v57 = vcombine.low %v6297_v48, %v6304_v8  ;;  %v6285_v59 = vpack.i.b16 %v3342_v25, %v3342_v25  ;;  %v6306_v2 = vpack.i.b16 %v3354_v18, %v3354_v18  ;;  %v19390_v48 = vld [vmem:[#allocation76_spill] sm:$0xff]  ;;  %v17322_v18 = vpop.f32.mrf.mxu1 }
 0x33a   : > { %v9459_v43 = vsub.bf16 %v19386_v37, %v14228_v26  ;;  %v12885_v52 = vmax.f32 %v12883_v60, %v12884_v20  ;;  %v12890_v0 = vrot.slane %v12889_v6, 2  ;;  %v6313_v3 = vpack.i.b16 %v3358_v11, %v3358_v11  ;;  %v17320_v26 = vpop.f32.mrf.mxu0 }
 0x33b   : > { %v6283_v47 = vrot.slane %v6278_v39, %v15117_v12  ;;  %v9461_v45 = vsub.bf16 %v19386_v37, %v14230_v57  ;;  %v6290_v32 = vrot.slane %v6285_v59, %v15117_v12  ;;  %v6311_v50 = vrot.slane %v6306_v2, %v15117_v12 }
 0x33c   : > { %v9715_v31 = vmax.bf16 %v19235_v28, %v9459_v43  ;;  %v12886_v5 = vrot.slane %v12885_v52, 1  ;;  %v12891_v17 = vmax.f32 %v12889_v6, %v12890_v0  ;;  %v6318_v55 = vrot.slane %v6313_v3, %v15117_v12 }
 0x33d   : > { %v11500_v38 = vadd.f32 %v16986_v10, %v16908_v4  ;;  %v9717_v60 = vmax.bf16 %v19235_v28, %v9461_v45  ;;  %v14229_v23 = vcombine.low %v6283_v47, %v6290_v32  ;;  %v11505_v25 = vadd.f32 %v16986_v10, %v16935_v34  ;;  %v11562_v34 = vpop.f32.mrf.mxu0  ;;  %v12107_v10 = vpop.f32.mrf.mxu1 }
 0x33e   : > { %v3362_v8 = vrot.slane %v19390_v48, %v15117_v12  ;;  %v12887_v20 = vmax.f32 %v12885_v52, %v12886_v5  ;;  %v12892_v6 = vrot.slane %v12891_v17, 1  ;;  %v14231_v11 = vcombine.low %v6311_v50, %v6318_v55 }
 0x33f   : > { %v12045_v39 = vadd.f32 %v16921_v56, %v11500_v38  ;;  %v14486_v4 = vcombine.high %v9715_v31, %v9717_v60  ;;  %v9460_v57 = vsub.bf16 %v19387_v35, %v14229_v23  ;;  %v14485_v43 = vcombine.low %v9715_v31, %v9717_v60  ;;  %v19391_v31 = vld [vmem:[#allocation78_spill] sm:$0xff]  ;;  %v17343_v55 = vpop.f32.mrf.mxu1 }
 0x340   : > { %v12050_v59 = vadd.f32 %v16941_v51, %v11505_v25  ;;  %v13667_v2 = vsel %vm13652_vm9, %v12887_v20, %v13666_v16  ;;  %v17328_v0 = vmax.f32 %v12891_v17, %v12892_v6  ;;  %v9462_v47 = vsub.bf16 %v19387_v35, %v14231_v11  ;;  %v17341_v17 = vpop.f32.mrf.mxu0 }
 0x341   : > { %v12481_v3 = vmax.f32 %v12045_v39, 0.0  ;;  %13777 = vst [vmem:[%s16878_s15 + $0x10] sm:$0xff] %v13667_v2  ;;  %11694 = vmatprep.mubr.bf16.mxu0 %v14486_v4  ;;  %v9716_v52 = vmax.bf16 %v19235_v28, %v9460_v57  ;;  %v3366_v45 = vrot.slane %v19390_v48, %v15123_v14  ;;  %v3378_v51 = vrot.slane %v19391_v31, %v15117_v12  ;;  %v12110_v57 = vpop.f32.mrf.mxu1 }
 0x342   : > { %v12482_v56 = vmax.f32 %v12050_v59, 0.0  ;;  %v9718_v32 = vmax.bf16 %v19235_v28, %v9462_v47  ;;  %11695 = vmatmul.mubr.bf16.gmra.mxu0 %v14485_v43  ;;  %v3382_v50 = vrot.slane %v19391_v31, %v15123_v14  ;;  %v6320_v5 = vpack.i.b16 %v3362_v8, %v3362_v8  ;;  %v11565_v4 = vpop.f32.mrf.mxu0  ;;  %v17368_v57 = vld [vmem:[%s19053_s7] ss:$0 sm:$0xff] }
 0x343   : > { %v12641_v16 = vmul.f32 %v17271_v61, %v12481_v3  ;;  %v6327_v60 = vpack.i.b16 %v3366_v45, %v3366_v45  ;;  %v6348_v23 = vpack.i.b16 %v3378_v51, %v3378_v51  ;;  %v3370_v25 = vrot.slane %v19390_v48, %v15120_v13 }
 0x344   : > { %v12642_v38 = vmul.f32 %v17271_v61, %v12482_v56  ;;  %v14488_v20 = vcombine.high %v9716_v52, %v9718_v32  ;;  %v14487_v11 = vcombine.low %v9716_v52, %v9718_v32  ;;  %v6325_v39 = vrot.slane %v6320_v5, %v15117_v12 }
 0x345   : > { %v12894_v6 = vrot.slane %v12641_v16, 4  ;;  %v6332_v8 = vrot.slane %v6327_v60, %v15117_v12  ;;  %v6353_v59 = vrot.slane %v6348_v23, %v15117_v12  ;;  %v6355_v34 = vpack.i.b16 %v3382_v50, %v3382_v50 }
 0x346   : > { %v12900_v43 = vrot.slane %v12642_v38, 4  ;;  %12239 = vmatprep.mubr.bf16.mxu1 %v14488_v20  ;;  %v3374_v2 = vrot.slane %v19390_v48, %v15126_v15  ;;  %v3386_v47 = vrot.slane %v19391_v31, %v15120_v13  ;;  %v3390_v3 = vrot.slane %v19391_v31, %v15126_v15 }
 0x347   : > { %v12895_v10 = vmax.f32 %v12641_v16, %v12894_v6  ;;  %12240 = vmatmul.mubr.bf16.gmra.mxu1 %v14487_v11  ;;  %v6360_v56 = vrot.slane %v6355_v34, %v15117_v12  ;;  %v14232_v45 = vcombine.low %v6325_v39, %v6332_v8  ;;  %v6334_v51 = vpack.i.b16 %v3370_v25, %v3370_v25 }
 0x348   : > { %v12901_v52 = vmax.f32 %v12642_v38, %v12900_v43  ;;  %v6341_v5 = vpack.i.b16 %v3374_v2, %v3374_v2  ;;  %v6362_v50 = vpack.i.b16 %v3386_v47, %v3386_v47  ;;  %v6369_v60 = vpack.i.b16 %v3390_v3, %v3390_v3  ;;  %v17374_v2 = vpop.f32.mrf.mxu0  ;;  %v17376_v47 = vpop.f32.mrf.mxu1 }
 0x349   : > { %v12896_v32 = vrot.slane %v12895_v10, 2  ;;  %v14234_v23 = vcombine.low %v6353_v59, %v6360_v56  ;;  %v9463_v48 = vsub.bf16 %v19386_v37, %v14232_v45  ;;  %v6339_v20 = vrot.slane %v6334_v51, %v15117_v12  ;;  %v19392_v45 = vld [vmem:[#allocation79_spill] sm:$0xff] }
 0x34a   : > { %v12902_v16 = vrot.slane %v12901_v52, 2  ;;  %v6346_v4 = vrot.slane %v6341_v5, %v15117_v12  ;;  %v6367_v31 = vrot.slane %v6362_v50, %v15117_v12  ;;  %v6374_v38 = vrot.slane %v6369_v60, %v15117_v12  ;;  %v12115_v60 = vpop.f32.mrf.mxu1 }
 0x34b   : > { %v12897_v6 = vmax.f32 %v12895_v10, %v12896_v32  ;;  %v9465_v25 = vsub.bf16 %v19386_v37, %v14234_v23  ;;  %v9719_v39 = vmax.bf16 %v19235_v28, %v9463_v48  ;;  %v11508_v43 = vadd.f32 %v17368_v57, %v16952_v62 }
 0x34c   : > { %v12903_v11 = vmax.f32 %v12901_v52, %v12902_v16  ;;  %v14233_v59 = vcombine.low %v6339_v20, %v6346_v4  ;;  %v14235_v34 = vcombine.low %v6367_v31, %v6374_v38  ;;  %v11513_v10 = vadd.f32 %v17368_v57, %v16990_v41  ;;  %v11570_v41 = vpop.f32.mrf.mxu0 }
 0x34d   : > { %v12898_v8 = vrot.slane %v12897_v6, 1  ;;  %v9721_v52 = vmax.bf16 %v19235_v28, %v9465_v25  ;;  %v12053_v56 = vadd.f32 %v16961_v58, %v11508_v43  ;;  %v3394_v51 = vrot.slane %v19392_v45, %v15117_v12  ;;  %v17391_v25 = vpop.f32.mrf.mxu1 }
 0x34e   : > { %v12904_v3 = vrot.slane %v12903_v11, 1  ;;  %v9464_v62 = vsub.bf16 %v19387_v35, %v14233_v59  ;;  %v9466_v5 = vsub.bf16 %v19387_v35, %v14235_v34  ;;  %v12058_v50 = vadd.f32 %v16992_v21, %v11513_v10  ;;  %v17389_v38 = vpop.f32.mrf.mxu0 }
 0x34f   : > { %v12899_v32 = vmax.f32 %v12897_v6, %v12898_v8  ;;  %v14490_v23 = vcombine.high %v9719_v39, %v9721_v52  ;;  %v12483_v48 = vmax.f32 %v12053_v56, 0.0  ;;  %v14489_v20 = vcombine.low %v9719_v39, %v9721_v52  ;;  %v12118_v52 = vpop.f32.mrf.mxu1 }
 0x350   : > { %v12905_v16 = vmax.f32 %v12903_v11, %v12904_v3  ;;  %v9720_v58 = vmax.bf16 %v19235_v28, %v9464_v62  ;;  %v9722_v31 = vmax.bf16 %v19235_v28, %v9466_v5  ;;  %v12484_v6 = vmax.f32 %v12058_v50, 0.0  ;;  %v11573_v3 = vpop.f32.mrf.mxu0 }
 0x351   : > { %v13668_v4 = vsel %vm13640_vm3, %v12899_v32, %v17328_v0  ;;  %11702 = vmatprep.mubr.bf16.mxu0 %v14490_v23  ;;  %v12643_v11 = vmul.f32 %v17271_v61, %v12483_v48  ;;  %v3398_v39 = vrot.slane %v19392_v45, %v15123_v14  ;;  %v19393_v0 = vld [vmem:[#allocation80_spill] sm:$0xff]  ;;  %v6376_v32 = vpack.i.b16 %v3394_v51, %v3394_v51 }
 0x352   : > { %v17394_v21 = vsel %vm13642_vm4, %v12905_v16, %v13668_v4  ;;  %v3410_v43 = vrot.slane %v19393_v0, %v15117_v12  ;;  %v14492_v8 = vcombine.high %v9720_v58, %v9722_v31  ;;  %11703 = vmatmul.mubr.bf16.gmra.mxu0 %v14489_v20  ;;  %v12644_v59 = vmul.f32 %v17271_v61, %v12484_v6 }
 0x353   : > { %v14491_v34 = vcombine.low %v9720_v58, %v9722_v31  ;;  %v3414_v10 = vrot.slane %v19393_v0, %v15123_v14  ;;  %v12906_v56 = vrot.slane %v12643_v11, 4  ;;  %v6383_v62 = vpack.i.b16 %v3398_v39, %v3398_v39 }
 0x354   : > { %v6404_v5 = vpack.i.b16 %v3410_v43, %v3410_v43  ;;  %12247 = vmatprep.mubr.bf16.mxu1 %v14492_v8  ;;  %v12912_v50 = vrot.slane %v12644_v59, 4  ;;  %v3402_v60 = vrot.slane %v19392_v45, %v15120_v13  ;;  %v3406_v16 = vrot.slane %v19392_v45, %v15126_v15 }
 0x355   : > { %v6411_v41 = vpack.i.b16 %v3414_v10, %v3414_v10  ;;  %v12907_v23 = vmax.f32 %v12643_v11, %v12906_v56  ;;  %12248 = vmatmul.mubr.bf16.gmra.mxu1 %v14491_v34  ;;  %v6381_v48 = vrot.slane %v6376_v32, %v15117_v12  ;;  %v6388_v20 = vrot.slane %v6383_v62, %v15117_v12 }
 0x356   : > { %v6409_v4 = vrot.slane %v6404_v5, %v15117_v12  ;;  %v12913_v51 = vmax.f32 %v12644_v59, %v12912_v50  ;;  %v3418_v31 = vrot.slane %v19393_v0, %v15120_v13  ;;  %v3422_v6 = vrot.slane %v19393_v0, %v15126_v15 }
 0x357   : > { %v6416_v58 = vrot.slane %v6411_v41, %v15117_v12  ;;  %v12908_v39 = vrot.slane %v12907_v23, 2  ;;  %v14236_v43 = vcombine.low %v6381_v48, %v6388_v20  ;;  %v6390_v45 = vpack.i.b16 %v3402_v60, %v3402_v60  ;;  %v17425_v48 = vpop.f32.mrf.mxu0  ;;  %v17427_v20 = vpop.f32.mrf.mxu1 }
 0x358   : > { %v6397_v11 = vpack.i.b16 %v3406_v16, %v3406_v16  ;;  %v12914_v8 = vrot.slane %v12913_v51, 2  ;;  %v6418_v10 = vpack.i.b16 %v3418_v31, %v3418_v31  ;;  %v6425_v3 = vpack.i.b16 %v3422_v6, %v3422_v6 }
 0x359   : > { %v14238_v34 = vcombine.low %v6409_v4, %v6416_v58  ;;  %v12909_v52 = vmax.f32 %v12907_v23, %v12908_v39  ;;  %v9467_v56 = vsub.bf16 %v19386_v37, %v14236_v43  ;;  %v6395_v59 = vrot.slane %v6390_v45, %v15117_v12  ;;  %v19394_v43 = vld [vmem:[#allocation81_spill] sm:$0xff] }
 0x35a   : > { %v6402_v32 = vrot.slane %v6397_v11, %v15117_v12  ;;  %v12915_v62 = vmax.f32 %v12913_v51, %v12914_v8  ;;  %v6423_v0 = vrot.slane %v6418_v10, %v15117_v12  ;;  %v6430_v50 = vrot.slane %v6425_v3, %v15117_v12  ;;  %v12123_v11 = vpop.f32.mrf.mxu1 }
 0x35b   : > { %v9469_v5 = vsub.bf16 %v19386_v37, %v14238_v34  ;;  %v12910_v41 = vrot.slane %v12909_v52, 1  ;;  %v9723_v60 = vmax.bf16 %v19235_v28, %v9467_v56  ;;  %v11516_v23 = vadd.f32 %v17368_v57, %v17011_v44  ;;  %v11578_v44 = vpop.f32.mrf.mxu0 }
 0x35c   : > { %v14237_v16 = vcombine.low %v6395_v59, %v6402_v32  ;;  %v12916_v4 = vrot.slane %v12915_v62, 1  ;;  %v14239_v58 = vcombine.low %v6423_v0, %v6430_v50  ;;  %v11521_v37 = vadd.f32 %v17368_v57, %v17049_v7 }
 0x35d   : > { %v9725_v51 = vmax.bf16 %v19235_v28, %v9469_v5  ;;  %v12911_v31 = vmax.f32 %v12909_v52, %v12910_v41  ;;  %v12061_v39 = vadd.f32 %v17013_v24, %v11516_v23  ;;  %v3426_v45 = vrot.slane %v19394_v43, %v15117_v12  ;;  %v17449_v0 = vpop.f32.mrf.mxu0 }
 0x35e   : > { %v9468_v6 = vsub.bf16 %v19387_v35, %v14237_v16  ;;  %v12917_v8 = vmax.f32 %v12915_v62, %v12916_v4  ;;  %v9470_v10 = vsub.bf16 %v19387_v35, %v14239_v58  ;;  %v12066_v59 = vadd.f32 %v17051_v36, %v11521_v37  ;;  %v19395_v35 = vld [vmem:[#allocation82_spill] sm:$0xff] }
 0x35f   : > { %v14494_v34 = vcombine.high %v9723_v60, %v9725_v51  ;;  %v14493_v3 = vcombine.low %v9723_v60, %v9725_v51  ;;  %v13670_v56 = vsel %vm13644_vm5, %v12911_v31, %v17394_v21  ;;  %v12485_v52 = vmax.f32 %v12061_v39, 0.0  ;;  %v17451_v21 = vpop.f32.mrf.mxu1  ;;  %v11581_v58 = vpop.f32.mrf.mxu0 }
 0x360   : > { %v9724_v7 = vmax.bf16 %v19235_v28, %v9468_v6  ;;  %v17442_v24 = vsel %vm13646_vm6, %v12917_v8, %v13670_v56  ;;  %v9726_v32 = vmax.bf16 %v19235_v28, %v9470_v10  ;;  %v3430_v62 = vrot.slane %v19394_v43, %v15123_v14 }
 0x361   : > { %11710 = vmatprep.mubr.bf16.mxu0 %v14494_v34  ;;  %v3442_v5 = vrot.slane %v19395_v35, %v15117_v12  ;;  %v12645_v50 = vmul.f32 %v17271_v61, %v12485_v52  ;;  %v12486_v36 = vmax.f32 %v12066_v59, 0.0  ;;  %v3446_v41 = vrot.slane %v19395_v35, %v15123_v14  ;;  %v12126_v37 = vpop.f32.mrf.mxu1 }
 0x362   : > { %11711 = vmatmul.mubr.bf16.gmra.mxu0 %v14493_v3  ;;  %v6432_v60 = vpack.i.b16 %v3426_v45, %v3426_v45  ;;  %v14496_v16 = vcombine.high %v9724_v7, %v9726_v32  ;;  %v14495_v23 = vcombine.low %v9724_v7, %v9726_v32  ;;  %v6439_v4 = vpack.i.b16 %v3430_v62, %v3430_v62 }
 0x363   : > { %v6460_v51 = vpack.i.b16 %v3442_v5, %v3442_v5  ;;  %v12918_v31 = vrot.slane %v12645_v50, 4  ;;  %v12646_v6 = vmul.f32 %v17271_v61, %v12486_v36  ;;  %v6467_v44 = vpack.i.b16 %v3446_v41, %v3446_v41 }
 0x364   : > { %v6437_v39 = vrot.slane %v6432_v60, %v15117_v12  ;;  %12255 = vmatprep.mubr.bf16.mxu1 %v14496_v16  ;;  %v6444_v11 = vrot.slane %v6439_v4, %v15117_v12  ;;  %v3434_v45 = vrot.slane %v19394_v43, %v15120_v13  ;;  %v3438_v34 = vrot.slane %v19394_v43, %v15126_v15  ;;  %v19396_v43 = vld [vmem:[#allocation16_spill] sm:$0xff] }
 0x365   : > { %v6465_v8 = vrot.slane %v6460_v51, %v15117_v12  ;;  %v12919_v10 = vmax.f32 %v12645_v50, %v12918_v31  ;;  %v12924_v3 = vrot.slane %v12646_v6, 4  ;;  %12256 = vmatmul.mubr.bf16.gmra.mxu1 %v14495_v23  ;;  %v6472_v56 = vrot.slane %v6467_v44, %v15117_v12 }
 0x366   : > { %v3450_v7 = vrot.slane %v19395_v35, %v15120_v13  ;;  %v14240_v52 = vcombine.low %v6437_v39, %v6444_v11  ;;  %v3454_v59 = vrot.slane %v19395_v35, %v15126_v15  ;;  %v6446_v32 = vpack.i.b16 %v3434_v45, %v3434_v45  ;;  %v17475_v35 = vld [vmem:[%s16545_s13 + $0x10] sm:$0xff]  }
 0x367   : > { %v6453_v62 = vpack.i.b16 %v3438_v34, %v3438_v34  ;;  %v12920_v5 = vrot.slane %v12919_v10, 2  ;;  %v12925_v36 = vmax.f32 %v12646_v6, %v12924_v3  ;;  %v14242_v41 = vcombine.low %v6465_v8, %v6472_v56  ;;  %v17484_v3 = vpop.f32.mrf.mxu0  ;;  %v17486_v56 = vpop.f32.mrf.mxu1 }
 0x368   : > { %v6474_v60 = vpack.i.b16 %v3450_v7, %v3450_v7  ;;  %v9471_v50 = vsub.bf16 %v19396_v43, %v14240_v52  ;;  %v6451_v16 = vrot.slane %v6446_v32, %v15117_v12  ;;  %v6481_v4 = vpack.i.b16 %v3454_v59, %v3454_v59  ;;  %v19397_v52 = vld [vmem:[#allocation17_spill] sm:$0xff] }
 0x369   : > { %v6458_v23 = vrot.slane %v6453_v62, %v15117_v12  ;;  %v12921_v51 = vmax.f32 %v12919_v10, %v12920_v5  ;;  %v12926_v58 = vrot.slane %v12925_v36, 2  ;;  %v9473_v37 = vsub.bf16 %v19396_v43, %v14242_v41 }
 0x36a   : > { %v6479_v31 = vrot.slane %v6474_v60, %v15117_v12  ;;  %v9727_v39 = vmax.bf16 %v19235_v28, %v9471_v50  ;;  %v6486_v6 = vrot.slane %v6481_v4, %v15117_v12  ;;  %v11524_v11 = vadd.f32 %v17368_v57, %v17072_v49  ;;  %v11586_v60 = vpop.f32.mrf.mxu0  ;;  %v12131_v50 = vpop.f32.mrf.mxu1  ;;  %v19398_v4 = vld [vmem:[#allocation3_spill] sm:$0xff] }
 0x36b   : > { %v14241_v44 = vcombine.low %v6451_v16, %v6458_v23  ;;  %v12922_v8 = vrot.slane %v12921_v51, 1  ;;  %v12927_v45 = vmax.f32 %v12925_v36, %v12926_v58  ;;  %v9729_v34 = vmax.bf16 %v19235_v28, %v9473_v37 }
 0x36c   : > { %v11529_v10 = vadd.f32 %v17368_v57, %v17107_v40  ;;  %v14243_v7 = vcombine.low %v6479_v31, %v6486_v6  ;;  %v12069_v32 = vadd.f32 %v17074_v27, %v11524_v11  ;;  %v17491_v62 = vunpack.c.l.bf16 %v17475_v35  ;;  %v19399_v31 = vld [vmem:[#allocation83_spill] sm:$0xff] }
 0x36d   : > { %v9472_v59 = vsub.bf16 %v19397_v52, %v14241_v44  ;;  %v12923_v49 = vmax.f32 %v12921_v51, %v12922_v8  ;;  %v12928_v5 = vrot.slane %v12927_v45, 1  ;;  %v14498_v36 = vcombine.high %v9727_v39, %v9729_v34  ;;  %v19400_v8 = vld [vmem:[#allocation84_spill] sm:$0xff] }
 0x36e   : > { %v14497_v41 = vcombine.low %v9727_v39, %v9729_v34  ;;  %v9474_v40 = vsub.bf16 %v19397_v52, %v14243_v7  ;;  %v12487_v23 = vmax.f32 %v12069_v32, 0.0  ;;  %v12074_v58 = vadd.f32 %v19398_v4, %v11529_v10  ;;  %v17506_v10 = vpop.f32.mrf.mxu0 }
 0x36f   : > { %v9728_v16 = vmax.bf16 %v19235_v28, %v9472_v59  ;;  %v13672_v37 = vsel %vm13648_vm7, %v12923_v49, %v17442_v24  ;;  %v12929_v27 = vmax.f32 %v12927_v45, %v12928_v5  ;;  %11718 = vmatprep.mubr.bf16.mxu0 %v14498_v36  ;;  %v3458_v51 = vrot.slane %v19399_v31, %v15117_v12  ;;  %v17508_v24 = vpop.f32.mrf.mxu1 }
 0x370   : > { %v3462_v39 = vrot.slane %v19399_v31, %v15123_v14  ;;  %v9730_v6 = vmax.bf16 %v19235_v28, %v9474_v40  ;;  %v12647_v44 = vmul.f32 %v17271_v61, %v12487_v23  ;;  %11719 = vmatmul.mubr.bf16.gmra.mxu0 %v14497_v41  ;;  %v12488_v11 = vmax.f32 %v12074_v58, 0.0  ;;  %19401 = vst [vmem:[#allocation37_spill] sm:$0xff] %v17508_v24  ;;  %v11589_v41 = vpop.f32.mrf.mxu0 }
 0x371   : > { %v3474_v34 = vrot.slane %v19400_v8, %v15117_v12  ;;  %v13673_v45 = vsel %vm13650_vm8, %v12929_v27, %v13672_v37  ;;  %v3478_v7 = vrot.slane %v19400_v8, %v15123_v14  ;;  %v6488_v59 = vpack.i.b16 %v3458_v51, %v3458_v51  ;;  %v12134_v60 = vpop.f32.mrf.mxu1 }
 0x372   : > { %v6495_v32 = vpack.i.b16 %v3462_v39, %v3462_v39  ;;  %v14500_v49 = vcombine.high %v9728_v16, %v9730_v6  ;;  %v12930_v5 = vrot.slane %v12647_v44, 4  ;;  %v12648_v61 = vmul.f32 %v17491_v62, %v12488_v11 }
 0x373   : > { %v14499_v36 = vcombine.low %v9728_v16, %v9730_v6  ;;  %v6493_v50 = vrot.slane %v6488_v59, %v15117_v12  ;;  %v6516_v23 = vpack.i.b16 %v3474_v34, %v3474_v34  ;;  %v6523_v4 = vpack.i.b16 %v3478_v7, %v3478_v7 }
 0x374   : > { %v6500_v40 = vrot.slane %v6495_v32, %v15117_v12  ;;  %12263 = vmatprep.mubr.bf16.mxu1 %v14500_v49  ;;  %v12931_v58 = vmax.f32 %v12647_v44, %v12930_v5  ;;  %v12936_v37 = vrot.slane %v12648_v61, 4  ;;  %v3466_v27 = vrot.slane %v19399_v31, %v15120_v13 }
 0x375   : > { %v3470_v51 = vrot.slane %v19399_v31, %v15126_v15  ;;  %12264 = vmatmul.mubr.bf16.gmra.mxu1 %v14499_v36  ;;  %v6521_v16 = vrot.slane %v6516_v23, %v15117_v12  ;;  %v6528_v39 = vrot.slane %v6523_v4, %v15117_v12  ;;  %v3482_v11 = vrot.slane %v19400_v8, %v15120_v13 }
 0x376   : > { %v14244_v6 = vcombine.low %v6493_v50, %v6500_v40  ;;  %v12932_v34 = vrot.slane %v12931_v58, 2  ;;  %v12937_v7 = vmax.f32 %v12648_v61, %v12936_v37  ;;  %v3486_v44 = vrot.slane %v19400_v8, %v15126_v15 }
 0x377   : > { %v6502_v59 = vpack.i.b16 %v3466_v27, %v3466_v27  ;;  %v14246_v32 = vcombine.low %v6521_v16, %v6528_v39  ;;  %v6509_v5 = vpack.i.b16 %v3470_v51, %v3470_v51  ;;  %v6530_v31 = vpack.i.b16 %v3482_v11, %v3482_v11  ;;  %v19402_v16 = vld [vmem:[#allocation34_spill] sm:$0xff]  ;;  %v19403_v11 = vld [vmem:[#allocation85_spill] sm:$0xff] }
 0x378   : > { %v9475_v49 = vsub.bf16 %v19396_v43, %v14244_v6  ;;  %v12933_v36 = vmax.f32 %v12931_v58, %v12932_v34  ;;  %v12938_v41 = vrot.slane %v12937_v7, 2  ;;  %v6537_v23 = vpack.i.b16 %v3486_v44, %v3486_v44  ;;  %v17540_v44 = vpop.f32.mrf.mxu0 }
 0x379   : > { %v6507_v60 = vrot.slane %v6502_v59, %v15117_v12  ;;  %v9477_v50 = vsub.bf16 %v19396_v43, %v14246_v32  ;;  %v6514_v61 = vrot.slane %v6509_v5, %v15117_v12  ;;  %v6535_v4 = vrot.slane %v6530_v31, %v15117_v12  ;;  %19404 = vst [vmem:[#allocation36_spill] sm:$0xff] %v17540_v44  ;;  %v17542_v59 = vpop.f32.mrf.mxu1  ;;  %v19406_v5 = vld [vmem:[#allocation35_spill] sm:$0xff] }
 0x37a   : > { %v9731_v40 = vmax.bf16 %v19235_v28, %v9475_v49  ;;  %v12934_v8 = vrot.slane %v12933_v36, 1  ;;  %v12939_v37 = vmax.f32 %v12937_v7, %v12938_v41  ;;  %v6542_v27 = vrot.slane %v6537_v23, %v15117_v12  ;;  %19405 = vst [vmem:[#allocation4_spill] sm:$0xff] %v17542_v59 }
 0x37b   : > { %v11532_v51 = vadd.f32 %v17368_v57, %v19402_v16  ;;  %v9733_v58 = vmax.bf16 %v19235_v28, %v9477_v50  ;;  %v14245_v39 = vcombine.low %v6507_v60, %v6514_v61  ;;  %v11537_v6 = vadd.f32 %v17368_v57, %v17157_v30  ;;  %v11594_v30 = vpop.f32.mrf.mxu0  ;;  %v12139_v61 = vpop.f32.mrf.mxu1 }
 0x37c   : > { %v3490_v34 = vrot.slane %v19403_v11, %v15117_v12  ;;  %v12935_v7 = vmax.f32 %v12933_v36, %v12934_v8  ;;  %v12940_v32 = vrot.slane %v12939_v37, 1  ;;  %v14247_v49 = vcombine.low %v6535_v4, %v6542_v27 }
 0x37d   : > { %v12077_v31 = vadd.f32 %v19406_v5, %v11532_v51  ;;  %v14502_v41 = vcombine.high %v9731_v40, %v9733_v58  ;;  %v9476_v23 = vsub.bf16 %v19397_v52, %v14245_v39  ;;  %v14501_v60 = vcombine.low %v9731_v40, %v9733_v58  ;;  %v19407_v40 = vld [vmem:[#allocation87_spill] sm:$0xff]  ;;  %v17561_v58 = vpop.f32.mrf.mxu0  ;;  %v17563_v39 = vpop.f32.mrf.mxu1 }
 0x37e   : > { %v12082_v50 = vadd.f32 %v17159_v63, %v11537_v6  ;;  %v13674_v16 = vsel %vm13652_vm9, %v12935_v7, %v13673_v45  ;;  %v17548_v24 = vmax.f32 %v12939_v37, %v12940_v32  ;;  %v9478_v44 = vsub.bf16 %v19397_v52, %v14247_v49  ;;  %19408 = vst [vmem:[#allocation38_spill] sm:$0xff] %v17563_v39 }
 0x37f   : > { %v12489_v59 = vmax.f32 %v12077_v31, 0.0  ;;  %13778 = vst [vmem:[%s16878_s15 + $0x18] sm:$0xff] %v13674_v16  ;;  %11726 = vmatprep.mubr.bf16.mxu0 %v14502_v41  ;;  %v9732_v36 = vmax.bf16 %v19235_v28, %v9476_v23  ;;  %v3494_v8 = vrot.slane %v19403_v11, %v15123_v14  ;;  %v3506_v63 = vrot.slane %v19407_v40, %v15117_v12  ;;  %v11597_v41 = vpop.f32.mrf.mxu0  ;;  %v12142_v23 = vpop.f32.mrf.mxu1 }
 0x380   : > { %v12490_v4 = vmax.f32 %v12082_v50, 0.0  ;;  %v9734_v27 = vmax.bf16 %v19235_v28, %v9478_v44  ;;  %11727 = vmatmul.mubr.bf16.gmra.mxu0 %v14501_v60  ;;  %v3510_v37 = vrot.slane %v19407_v40, %v15123_v14  ;;  %v6544_v51 = vpack.i.b16 %v3490_v34, %v3490_v34 }
 0x381   : > { %v12649_v45 = vmul.f32 %v17491_v62, %v12489_v59  ;;  %v6551_v7 = vpack.i.b16 %v3494_v8, %v3494_v8  ;;  %v6572_v32 = vpack.i.b16 %v3506_v63, %v3506_v63  ;;  %v3498_v49 = vrot.slane %v19403_v11, %v15120_v13 }
 0x382   : > { %v12650_v6 = vmul.f32 %v17491_v62, %v12490_v4  ;;  %v14504_v5 = vcombine.high %v9732_v36, %v9734_v27  ;;  %v14503_v31 = vcombine.low %v9732_v36, %v9734_v27  ;;  %v6549_v59 = vrot.slane %v6544_v51, %v15117_v12 }
 0x383   : > { %v12942_v44 = vrot.slane %v12649_v45, 4  ;;  %v6556_v34 = vrot.slane %v6551_v7, %v15117_v12  ;;  %v6577_v50 = vrot.slane %v6572_v32, %v15117_v12  ;;  %v6579_v30 = vpack.i.b16 %v3510_v37, %v3510_v37 }
 0x384   : > { %v12948_v60 = vrot.slane %v12650_v6, 4  ;;  %12271 = vmatprep.mubr.bf16.mxu1 %v14504_v5  ;;  %v3502_v16 = vrot.slane %v19403_v11, %v15126_v15  ;;  %v3514_v4 = vrot.slane %v19407_v40, %v15120_v13  ;;  %v3518_v36 = vrot.slane %v19407_v40, %v15126_v15 }
 0x385   : > { %v12943_v61 = vmax.f32 %v12649_v45, %v12942_v44  ;;  %12272 = vmatmul.mubr.bf16.gmra.mxu1 %v14503_v31  ;;  %v6584_v63 = vrot.slane %v6579_v30, %v15117_v12  ;;  %v14248_v27 = vcombine.low %v6549_v59, %v6556_v34  ;;  %v6558_v51 = vpack.i.b16 %v3498_v49, %v3498_v49 }
 0x386   : > { %v12949_v8 = vmax.f32 %v12650_v6, %v12948_v60  ;;  %v6565_v32 = vpack.i.b16 %v3502_v16, %v3502_v16  ;;  %v6586_v37 = vpack.i.b16 %v3514_v4, %v3514_v4  ;;  %v6593_v5 = vpack.i.b16 %v3518_v36, %v3518_v36  ;;  %v17589_v16 = vpop.f32.mrf.mxu0  ;;  %v17591_v4 = vpop.f32.mrf.mxu1 }
 0x387   : > { %v12944_v7 = vrot.slane %v12943_v61, 2  ;;  %v14250_v44 = vcombine.low %v6577_v50, %v6584_v63  ;;  %v9479_v11 = vsub.bf16 %v19396_v43, %v14248_v27  ;;  %v6563_v41 = vrot.slane %v6558_v51, %v15117_v12  ;;  %v19409_v27 = vld [vmem:[#allocation86_spill] sm:$0xff] }
 0x388   : > { %v12950_v45 = vrot.slane %v12949_v8, 2  ;;  %v6570_v39 = vrot.slane %v6565_v32, %v15117_v12  ;;  %v6591_v40 = vrot.slane %v6586_v37, %v15117_v12  ;;  %v6598_v6 = vrot.slane %v6593_v5, %v15117_v12  ;;  %v12147_v37 = vpop.f32.mrf.mxu1 }
 0x389   : > { %v12945_v23 = vmax.f32 %v12943_v61, %v12944_v7  ;;  %v9481_v49 = vsub.bf16 %v19396_v43, %v14250_v44  ;;  %v9735_v59 = vmax.bf16 %v19235_v28, %v9479_v11  ;;  %v11540_v60 = vadd.f32 %v17368_v57, %v17172_v29 }
 0x38a   : > { %v12951_v31 = vmax.f32 %v12949_v8, %v12950_v45  ;;  %v14249_v50 = vcombine.low %v6563_v41, %v6570_v39  ;;  %v14251_v30 = vcombine.low %v6591_v40, %v6598_v6  ;;  %v11545_v61 = vadd.f32 %v17368_v57, %v17208_v42  ;;  %v11602_v42 = vpop.f32.mrf.mxu0 }
 0x38b   : > { %v12946_v34 = vrot.slane %v12945_v23, 1  ;;  %v9737_v8 = vmax.bf16 %v19235_v28, %v9481_v49  ;;  %v12085_v63 = vadd.f32 %v17174_v19, %v11540_v60  ;;  %v3522_v51 = vrot.slane %v19409_v27, %v15117_v12  ;;  %v17606_v49 = vpop.f32.mrf.mxu1 }
 0x38c   : > { %v12952_v36 = vrot.slane %v12951_v31, 1  ;;  %v9480_v29 = vsub.bf16 %v19397_v52, %v14249_v50  ;;  %v9482_v39 = vsub.bf16 %v19397_v52, %v14251_v30  ;;  %v12090_v32 = vadd.f32 %v17210_v33, %v11545_v61  ;;  %v17604_v6 = vpop.f32.mrf.mxu0 }
 0x38d   : > { %v12947_v7 = vmax.f32 %v12945_v23, %v12946_v34  ;;  %v14506_v45 = vcombine.high %v9735_v59, %v9737_v8  ;;  %v12491_v44 = vmax.f32 %v12085_v63, 0.0  ;;  %v14505_v11 = vcombine.low %v9735_v59, %v9737_v8  ;;  %v12150_v8 = vpop.f32.mrf.mxu1 }
 0x38e   : > { %v12953_v5 = vmax.f32 %v12951_v31, %v12952_v36  ;;  %v9736_v19 = vmax.bf16 %v19235_v28, %v9480_v29  ;;  %v9738_v40 = vmax.bf16 %v19235_v28, %v9482_v39  ;;  %v12492_v23 = vmax.f32 %v12090_v32, 0.0  ;;  %v11605_v36 = vpop.f32.mrf.mxu0 }
 0x38f   : > { %v13675_v41 = vsel %vm13640_vm3, %v12947_v7, %v17548_v24  ;;  %11734 = vmatprep.mubr.bf16.mxu0 %v14506_v45  ;;  %v12651_v31 = vmul.f32 %v17491_v62, %v12491_v44  ;;  %v3526_v59 = vrot.slane %v19409_v27, %v15123_v14  ;;  %v19410_v24 = vld [vmem:[#allocation88_spill] sm:$0xff]  ;;  %v6600_v7 = vpack.i.b16 %v3522_v51, %v3522_v51 }
 0x390   : > { %v17609_v33 = vsel %vm13642_vm4, %v12953_v5, %v13675_v41  ;;  %v3538_v60 = vrot.slane %v19410_v24, %v15117_v12  ;;  %v14508_v34 = vcombine.high %v9736_v19, %v9738_v40  ;;  %11735 = vmatmul.mubr.bf16.gmra.mxu0 %v14505_v11  ;;  %v12652_v50 = vmul.f32 %v17491_v62, %v12492_v23 }
 0x391   : > { %v14507_v30 = vcombine.low %v9736_v19, %v9738_v40  ;;  %v3542_v61 = vrot.slane %v19410_v24, %v15123_v14  ;;  %v12954_v63 = vrot.slane %v12651_v31, 4  ;;  %v6607_v29 = vpack.i.b16 %v3526_v59, %v3526_v59 }
 0x392   : > { %v6628_v39 = vpack.i.b16 %v3538_v60, %v3538_v60  ;;  %12279 = vmatprep.mubr.bf16.mxu1 %v14508_v34  ;;  %v12960_v32 = vrot.slane %v12652_v50, 4  ;;  %v3530_v37 = vrot.slane %v19409_v27, %v15120_v13  ;;  %v3534_v5 = vrot.slane %v19409_v27, %v15126_v15 }
 0x393   : > { %v6635_v42 = vpack.i.b16 %v3542_v61, %v3542_v61  ;;  %v12955_v45 = vmax.f32 %v12651_v31, %v12954_v63  ;;  %12280 = vmatmul.mubr.bf16.gmra.mxu1 %v14507_v30  ;;  %v6605_v44 = vrot.slane %v6600_v7, %v15117_v12  ;;  %v6612_v11 = vrot.slane %v6607_v29, %v15117_v12 }
 0x394   : > { %v6633_v41 = vrot.slane %v6628_v39, %v15117_v12  ;;  %v12961_v51 = vmax.f32 %v12652_v50, %v12960_v32  ;;  %v3546_v40 = vrot.slane %v19410_v24, %v15120_v13  ;;  %v3550_v23 = vrot.slane %v19410_v24, %v15126_v15 }
 0x395   : > { %v6640_v19 = vrot.slane %v6635_v42, %v15117_v12  ;;  %v12956_v59 = vrot.slane %v12955_v45, 2  ;;  %v14252_v60 = vcombine.low %v6605_v44, %v6612_v11  ;;  %v6614_v27 = vpack.i.b16 %v3530_v37, %v3530_v37  ;;  %v17640_v44 = vpop.f32.mrf.mxu0  ;;  %v17642_v11 = vpop.f32.mrf.mxu1 }
 0x396   : > { %v6621_v31 = vpack.i.b16 %v3534_v5, %v3534_v5  ;;  %v12962_v34 = vrot.slane %v12961_v51, 2  ;;  %v6642_v61 = vpack.i.b16 %v3546_v40, %v3546_v40  ;;  %v6649_v36 = vpack.i.b16 %v3550_v23, %v3550_v23 }
 0x397   : > { %v14254_v30 = vcombine.low %v6633_v41, %v6640_v19  ;;  %v12957_v8 = vmax.f32 %v12955_v45, %v12956_v59  ;;  %v9483_v63 = vsub.bf16 %v19396_v43, %v14252_v60  ;;  %v6619_v50 = vrot.slane %v6614_v27, %v15117_v12  ;;  %v19411_v60 = vld [vmem:[#allocation89_spill] sm:$0xff] }
 0x398   : > { %v6626_v7 = vrot.slane %v6621_v31, %v15117_v12  ;;  %v12963_v29 = vmax.f32 %v12961_v51, %v12962_v34  ;;  %v6647_v24 = vrot.slane %v6642_v61, %v15117_v12  ;;  %v6654_v32 = vrot.slane %v6649_v36, %v15117_v12  ;;  %v12155_v31 = vpop.f32.mrf.mxu1 }
 0x399   : > { %v9485_v39 = vsub.bf16 %v19396_v43, %v14254_v30  ;;  %v12958_v42 = vrot.slane %v12957_v8, 1  ;;  %v9739_v37 = vmax.bf16 %v19235_v28, %v9483_v63  ;;  %v11548_v45 = vadd.f32 %v17368_v57, %v17232_v1  ;;  %v11610_v1 = vpop.f32.mrf.mxu0 }
 0x39a   : > { %v14253_v5 = vcombine.low %v6619_v50, %v6626_v7  ;;  %v12964_v41 = vrot.slane %v12963_v29, 1  ;;  %v14255_v19 = vcombine.low %v6647_v24, %v6654_v32  ;;  %v11553_v43 = vadd.f32 %v17368_v57, %v17264_v9 }
 0x39b   : > { %v9741_v51 = vmax.bf16 %v19235_v28, %v9485_v39  ;;  %v12959_v40 = vmax.f32 %v12957_v8, %v12958_v42  ;;  %v12093_v59 = vadd.f32 %v17234_v46, %v11548_v45  ;;  %v3554_v27 = vrot.slane %v19411_v60, %v15117_v12  ;;  %v17664_v24 = vpop.f32.mrf.mxu0 }
 0x39c   : > { %v9484_v23 = vsub.bf16 %v19397_v52, %v14253_v5  ;;  %v12965_v34 = vmax.f32 %v12963_v29, %v12964_v41  ;;  %v9486_v61 = vsub.bf16 %v19397_v52, %v14255_v19  ;;  %v12098_v50 = vadd.f32 %v17266_v22, %v11553_v43  ;;  %v19412_v52 = vld [vmem:[#allocation91_spill] sm:$0xff] }
 0x39d   : > { %v14510_v30 = vcombine.high %v9739_v37, %v9741_v51  ;;  %v14509_v36 = vcombine.low %v9739_v37, %v9741_v51  ;;  %v13677_v63 = vsel %vm13644_vm5, %v12959_v40, %v17609_v33  ;;  %v12493_v8 = vmax.f32 %v12093_v59, 0.0  ;;  %v17666_v33 = vpop.f32.mrf.mxu1  ;;  %v11613_v19 = vpop.f32.mrf.mxu0 }
 0x39e   : > { %v9740_v9 = vmax.bf16 %v19235_v28, %v9484_v23  ;;  %v17657_v46 = vsel %vm13646_vm6, %v12965_v34, %v13677_v63  ;;  %v9742_v7 = vmax.bf16 %v19235_v28, %v9486_v61  ;;  %v3558_v29 = vrot.slane %v19411_v60, %v15123_v14 }
 0x39f   : > { %11742 = vmatprep.mubr.bf16.mxu0 %v14510_v30  ;;  %v3570_v39 = vrot.slane %v19412_v52, %v15117_v12  ;;  %v12653_v32 = vmul.f32 %v17491_v62, %v12493_v8  ;;  %v12494_v22 = vmax.f32 %v12098_v50, 0.0  ;;  %v3574_v42 = vrot.slane %v19412_v52, %v15123_v14  ;;  %v12158_v43 = vpop.f32.mrf.mxu1 }
 0x3a0   : > { %11743 = vmatmul.mubr.bf16.gmra.mxu0 %v14509_v36  ;;  %v6656_v37 = vpack.i.b16 %v3554_v27, %v3554_v27  ;;  %v14512_v5 = vcombine.high %v9740_v9, %v9742_v7  ;;  %v14511_v45 = vcombine.low %v9740_v9, %v9742_v7  ;;  %v6663_v41 = vpack.i.b16 %v3558_v29, %v3558_v29 }
 0x3a1   : > { %v6684_v51 = vpack.i.b16 %v3570_v39, %v3570_v39  ;;  %v12966_v40 = vrot.slane %v12653_v32, 4  ;;  %v12654_v23 = vmul.f32 %v17491_v62, %v12494_v22  ;;  %v6691_v1 = vpack.i.b16 %v3574_v42, %v3574_v42 }
 0x3a2   : > { %v6661_v59 = vrot.slane %v6656_v37, %v15117_v12  ;;  %12287 = vmatprep.mubr.bf16.mxu1 %v14512_v5  ;;  %v6668_v31 = vrot.slane %v6663_v41, %v15117_v12  ;;  %v3562_v27 = vrot.slane %v19411_v60, %v15120_v13  ;;  %v3566_v30 = vrot.slane %v19411_v60, %v15126_v15  ;;  %v19413_v5 = vld [vmem:[#allocation18_spill] sm:$0xff] }
 0x3a3   : > { %v6689_v34 = vrot.slane %v6684_v51, %v15117_v12  ;;  %v12967_v61 = vmax.f32 %v12653_v32, %v12966_v40  ;;  %v12972_v36 = vrot.slane %v12654_v23, 4  ;;  %12288 = vmatmul.mubr.bf16.gmra.mxu1 %v14511_v45  ;;  %v6696_v63 = vrot.slane %v6691_v1, %v15117_v12 }
 0x3a4   : > { %v3578_v9 = vrot.slane %v19412_v52, %v15120_v13  ;;  %v14256_v8 = vcombine.low %v6661_v59, %v6668_v31  ;;  %v3582_v50 = vrot.slane %v19412_v52, %v15126_v15  ;;  %v6670_v7 = vpack.i.b16 %v3562_v27, %v3562_v27 }
 0x3a5   : > { %v6677_v29 = vpack.i.b16 %v3566_v30, %v3566_v30  ;;  %v12968_v39 = vrot.slane %v12967_v61, 2  ;;  %v12973_v22 = vmax.f32 %v12654_v23, %v12972_v36  ;;  %v14258_v42 = vcombine.low %v6689_v34, %v6696_v63  ;;  %v17698_v36 = vpop.f32.mrf.mxu1 }
 0x3a6   : > { %v6698_v37 = vpack.i.b16 %v3578_v9, %v3578_v9  ;;  %v9487_v60 = vsub.bf16 %v19413_v5, %v14256_v8  ;;  %v6675_v32 = vrot.slane %v6670_v7, %v15117_v12  ;;  %v6705_v41 = vpack.i.b16 %v3582_v50, %v3582_v50  ;;  %v19414_v9 = vld [vmem:[#allocation19_spill] sm:$0xff] }
 0x3a7   : > { %v6682_v45 = vrot.slane %v6677_v29, %v15117_v12  ;;  %v12969_v51 = vmax.f32 %v12967_v61, %v12968_v39  ;;  %v12974_v19 = vrot.slane %v12973_v22, 2  ;;  %v9489_v43 = vsub.bf16 %v19413_v5, %v14258_v42  ;;  %v17696_v61 = vpop.f32.mrf.mxu0 }
 0x3a8   : > { %v6703_v40 = vrot.slane %v6698_v37, %v15117_v12  ;;  %v9743_v52 = vmax.bf16 %v19235_v28, %v9487_v60  ;;  %v6710_v59 = vrot.slane %v6705_v41, %v15117_v12  ;;  %v11556_v1 = vadd.f32 %v17368_v57, %v17286_v54  ;;  %v12163_v37 = vpop.f32.mrf.mxu1 }
 0x3a9   : > { %v14257_v23 = vcombine.low %v6675_v32, %v6682_v45  ;;  %v12970_v31 = vrot.slane %v12969_v51, 1  ;;  %v12975_v34 = vmax.f32 %v12973_v22, %v12974_v19  ;;  %v9745_v27 = vmax.bf16 %v19235_v28, %v9489_v43  ;;  %v11618_v42 = vpop.f32.mrf.mxu0 }
 0x3aa   : > { %v11561_v30 = vadd.f32 %v17368_v57, %v17320_v26  ;;  %v14259_v63 = vcombine.low %v6703_v40, %v6710_v59  ;;  %v12101_v50 = vadd.f32 %v17288_v53, %v11556_v1  ;;  %v17703_v7 = vunpack.c.h.bf16 %v17475_v35  ;;  %v19415_v35 = vld [vmem:[#allocation90_spill] sm:$0xff] }
 0x3ab   : > { %v9488_v8 = vsub.bf16 %v19414_v9, %v14257_v23  ;;  %v12971_v54 = vmax.f32 %v12969_v51, %v12970_v31  ;;  %v12976_v29 = vrot.slane %v12975_v34, 1  ;;  %v14514_v39 = vcombine.high %v9743_v52, %v9745_v27  ;;  %v17718_v59 = vpop.f32.mrf.mxu0 }
 0x3ac   : > { %v14513_v22 = vcombine.low %v9743_v52, %v9745_v27  ;;  %v9490_v26 = vsub.bf16 %v19414_v9, %v14259_v63  ;;  %v12495_v60 = vmax.f32 %v12101_v50, 0.0  ;;  %v12106_v32 = vadd.f32 %v17322_v18, %v11561_v30  ;;  %v19416_v52 = vld [vmem:[#allocation93_spill] sm:$0xff] }
 0x3ad   : > { %v9744_v57 = vmax.bf16 %v19235_v28, %v9488_v8  ;;  %v13679_v45 = vsel %vm13648_vm7, %v12971_v54, %v17657_v46  ;;  %v12977_v53 = vmax.f32 %v12975_v34, %v12976_v29  ;;  %11750 = vmatprep.mubr.bf16.mxu0 %v14514_v39  ;;  %v3586_v41 = vrot.slane %v19415_v35, %v15117_v12  ;;  %v17720_v46 = vpop.f32.mrf.mxu1  ;;  %v11621_v8 = vpop.f32.mrf.mxu0 }
 0x3ae   : > { %v3590_v51 = vrot.slane %v19415_v35, %v15123_v14  ;;  %v9746_v19 = vmax.bf16 %v19235_v28, %v9490_v26  ;;  %v12655_v43 = vmul.f32 %v17491_v62, %v12495_v60  ;;  %11751 = vmatmul.mubr.bf16.gmra.mxu0 %v14513_v22  ;;  %v12496_v40 = vmax.f32 %v12106_v32, 0.0 }
 0x3af   : > { %v3602_v18 = vrot.slane %v19416_v52, %v15117_v12  ;;  %v13680_v23 = vsel %vm13650_vm8, %v12977_v53, %v13679_v45  ;;  %v3606_v1 = vrot.slane %v19416_v52, %v15123_v14  ;;  %v6712_v31 = vpack.i.b16 %v3586_v41, %v3586_v41  ;;  %v12166_v50 = vpop.f32.mrf.mxu1 }
 0x3b0   : > { %v6719_v34 = vpack.i.b16 %v3590_v51, %v3590_v51  ;;  %v14516_v27 = vcombine.high %v9744_v57, %v9746_v19  ;;  %v12978_v30 = vrot.slane %v12655_v43, 4  ;;  %v12656_v62 = vmul.f32 %v17703_v7, %v12496_v40 }
 0x3b1   : > { %v14515_v63 = vcombine.low %v9744_v57, %v9746_v19  ;;  %v6717_v54 = vrot.slane %v6712_v31, %v15117_v12  ;;  %v6740_v39 = vpack.i.b16 %v3602_v18, %v3602_v18  ;;  %v6747_v22 = vpack.i.b16 %v3606_v1, %v3606_v1 }
 0x3b2   : > { %v6724_v29 = vrot.slane %v6719_v34, %v15117_v12  ;;  %12295 = vmatprep.mubr.bf16.mxu1 %v14516_v27  ;;  %v12979_v42 = vmax.f32 %v12655_v43, %v12978_v30  ;;  %v12984_v37 = vrot.slane %v12656_v62, 4  ;;  %v3594_v26 = vrot.slane %v19415_v35, %v15120_v13 }
 0x3b3   : > { %v3598_v60 = vrot.slane %v19415_v35, %v15126_v15  ;;  %12296 = vmatmul.mubr.bf16.gmra.mxu1 %v14515_v63  ;;  %v6745_v57 = vrot.slane %v6740_v39, %v15117_v12  ;;  %v6752_v32 = vrot.slane %v6747_v22, %v15117_v12  ;;  %v3610_v53 = vrot.slane %v19416_v52, %v15120_v13  ;;  %v17748_v39 = vld [vmem:[%s19053_s7] ss:$0 sm:$0xff] }
 0x3b4   : > { %v14260_v45 = vcombine.low %v6717_v54, %v6724_v29  ;;  %v12980_v41 = vrot.slane %v12979_v42, 2  ;;  %v12985_v51 = vmax.f32 %v12656_v62, %v12984_v37  ;;  %v3614_v19 = vrot.slane %v19416_v52, %v15126_v15 }
 0x3b5   : > { %v6726_v43 = vpack.i.b16 %v3594_v26, %v3594_v26  ;;  %v14262_v40 = vcombine.low %v6745_v57, %v6752_v32  ;;  %v6733_v1 = vpack.i.b16 %v3598_v60, %v3598_v60  ;;  %v6754_v35 = vpack.i.b16 %v3610_v53, %v3610_v53  ;;  %v19417_v60 = vld [vmem:[#allocation92_spill] sm:$0xff]  ;;  %v17757_v32 = vpop.f32.mrf.mxu0 }
 0x3b6   : > { %v9491_v18 = vsub.bf16 %v19413_v5, %v14260_v45  ;;  %v12981_v31 = vmax.f32 %v12979_v42, %v12980_v41  ;;  %v12986_v34 = vrot.slane %v12985_v51, 2  ;;  %v6761_v30 = vpack.i.b16 %v3614_v19, %v3614_v19  ;;  %v17759_v45 = vpop.f32.mrf.mxu1 }
 0x3b7   : > { %v6731_v27 = vrot.slane %v6726_v43, %v15117_v12  ;;  %v9493_v63 = vsub.bf16 %v19413_v5, %v14262_v40  ;;  %v6738_v62 = vrot.slane %v6733_v1, %v15117_v12  ;;  %v6759_v50 = vrot.slane %v6754_v35, %v15117_v12 }
 0x3b8   : > { %v9747_v8 = vmax.bf16 %v19235_v28, %v9491_v18  ;;  %v12982_v52 = vrot.slane %v12981_v31, 1  ;;  %v12987_v54 = vmax.f32 %v12985_v51, %v12986_v34  ;;  %v6766_v29 = vrot.slane %v6761_v30, %v15117_v12  ;;  %v12171_v1 = vpop.f32.mrf.mxu1 }
 0x3b9   : > { %v11564_v22 = vadd.f32 %v17748_v39, %v17341_v17  ;;  %v9749_v42 = vmax.bf16 %v19235_v28, %v9493_v63  ;;  %v14261_v37 = vcombine.low %v6731_v27, %v6738_v62  ;;  %v11569_v26 = vadd.f32 %v17748_v39, %v17374_v2  ;;  %v11626_v2 = vpop.f32.mrf.mxu0 }
 0x3ba   : > { %v3618_v57 = vrot.slane %v19417_v60, %v15117_v12  ;;  %v12983_v53 = vmax.f32 %v12981_v31, %v12982_v52  ;;  %v12988_v41 = vrot.slane %v12987_v54, 1  ;;  %v14263_v51 = vcombine.low %v6759_v50, %v6766_v29  ;;  %v17780_v29 = vpop.f32.mrf.mxu1 }
 0x3bb   : > { %v12109_v19 = vadd.f32 %v17343_v55, %v11564_v22  ;;  %v14518_v17 = vcombine.high %v9747_v8, %v9749_v42  ;;  %v9492_v43 = vsub.bf16 %v19414_v9, %v14261_v37  ;;  %v14517_v40 = vcombine.low %v9747_v8, %v9749_v42  ;;  %v19418_v8 = vld [vmem:[#allocation95_spill] sm:$0xff] }
 0x3bc   : > { %v12114_v18 = vadd.f32 %v17376_v47, %v11569_v26  ;;  %v13681_v35 = vsel %vm13652_vm9, %v12983_v53, %v13680_v23  ;;  %v17765_v34 = vmax.f32 %v12987_v54, %v12988_v41  ;;  %v9494_v27 = vsub.bf16 %v19414_v9, %v14263_v51  ;;  %v17778_v54 = vpop.f32.mrf.mxu0 }
 0x3bd   : > { %v12497_v30 = vmax.f32 %v12109_v19, 0.0  ;;  %13779 = vst [vmem:[%s16878_s15 + $0x20] sm:$0xff] %v13681_v35  ;;  %11758 = vmatprep.mubr.bf16.mxu0 %v14518_v17  ;;  %v9748_v31 = vmax.bf16 %v19235_v28, %v9492_v43  ;;  %v3622_v63 = vrot.slane %v19417_v60, %v15123_v14  ;;  %v3634_v47 = vrot.slane %v19418_v8, %v15117_v12  ;;  %v12174_v43 = vpop.f32.mrf.mxu1 }
 0x3be   : > { %v12498_v55 = vmax.f32 %v12114_v18, 0.0  ;;  %v9750_v62 = vmax.bf16 %v19235_v28, %v9494_v27  ;;  %11759 = vmatmul.mubr.bf16.gmra.mxu0 %v14517_v40  ;;  %v3638_v50 = vrot.slane %v19418_v8, %v15123_v14  ;;  %v6768_v52 = vpack.i.b16 %v3618_v57, %v3618_v57  ;;  %v11629_v17 = vpop.f32.mrf.mxu0 }
 0x3bf   : > { %v12657_v23 = vmul.f32 %v17703_v7, %v12497_v30  ;;  %v6775_v42 = vpack.i.b16 %v3622_v63, %v3622_v63  ;;  %v6796_v37 = vpack.i.b16 %v3634_v47, %v3634_v47  ;;  %v3626_v26 = vrot.slane %v19417_v60, %v15120_v13 }
 0x3c0   : > { %v12658_v22 = vmul.f32 %v17703_v7, %v12498_v55  ;;  %v14520_v53 = vcombine.high %v9748_v31, %v9750_v62  ;;  %v14519_v51 = vcombine.low %v9748_v31, %v9750_v62  ;;  %v6773_v19 = vrot.slane %v6768_v52, %v15117_v12 }
 0x3c1   : > { %v12990_v41 = vrot.slane %v12657_v23, 4  ;;  %v6780_v57 = vrot.slane %v6775_v42, %v15117_v12  ;;  %v6801_v18 = vrot.slane %v6796_v37, %v15117_v12  ;;  %v6803_v2 = vpack.i.b16 %v3638_v50, %v3638_v50 }
 0x3c2   : > { %v12996_v40 = vrot.slane %v12658_v22, 4  ;;  %12303 = vmatprep.mubr.bf16.mxu1 %v14520_v53  ;;  %v3630_v35 = vrot.slane %v19417_v60, %v15126_v15  ;;  %v3642_v27 = vrot.slane %v19418_v8, %v15120_v13  ;;  %v3646_v30 = vrot.slane %v19418_v8, %v15126_v15 }
 0x3c3   : > { %v12991_v1 = vmax.f32 %v12657_v23, %v12990_v41  ;;  %12304 = vmatmul.mubr.bf16.gmra.mxu1 %v14519_v51  ;;  %v6808_v55 = vrot.slane %v6803_v2, %v15117_v12  ;;  %v14264_v63 = vcombine.low %v6773_v19, %v6780_v57  ;;  %v6782_v47 = vpack.i.b16 %v3626_v26, %v3626_v26 }
 0x3c4   : > { %v12997_v31 = vmax.f32 %v12658_v22, %v12996_v40  ;;  %v6789_v52 = vpack.i.b16 %v3630_v35, %v3630_v35  ;;  %v6810_v50 = vpack.i.b16 %v3642_v27, %v3642_v27  ;;  %v6817_v42 = vpack.i.b16 %v3646_v30, %v3646_v30  ;;  %v17808_v35 = vpop.f32.mrf.mxu1 }
 0x3c5   : > { %v12992_v62 = vrot.slane %v12991_v1, 2  ;;  %v14266_v37 = vcombine.low %v6801_v18, %v6808_v55  ;;  %v9495_v60 = vsub.bf16 %v19413_v5, %v14264_v63  ;;  %v6787_v53 = vrot.slane %v6782_v47, %v15117_v12  ;;  %v19419_v55 = vld [vmem:[#allocation94_spill] sm:$0xff] }
 0x3c6   : > { %v12998_v23 = vrot.slane %v12997_v31, 2  ;;  %v6794_v17 = vrot.slane %v6789_v52, %v15117_v12  ;;  %v6815_v8 = vrot.slane %v6810_v50, %v15117_v12  ;;  %v6822_v22 = vrot.slane %v6817_v42, %v15117_v12  ;;  %v12179_v50 = vpop.f32.mrf.mxu1 }
 0x3c7   : > { %v12993_v41 = vmax.f32 %v12991_v1, %v12992_v62  ;;  %v9497_v26 = vsub.bf16 %v19413_v5, %v14266_v37  ;;  %v9751_v19 = vmax.bf16 %v19235_v28, %v9495_v60  ;;  %v11572_v43 = vadd.f32 %v17748_v39, %v17389_v38  ;;  %v17806_v1 = vpop.f32.mrf.mxu0 }
 0x3c8   : > { %v12999_v51 = vmax.f32 %v12997_v31, %v12998_v23  ;;  %v14265_v57 = vcombine.low %v6787_v53, %v6794_v17  ;;  %v14267_v18 = vcombine.low %v6815_v8, %v6822_v22  ;;  %v11577_v2 = vadd.f32 %v17748_v39, %v17425_v48  ;;  %v17823_v22 = vpop.f32.mrf.mxu1 }
 0x3c9   : > { %v12994_v40 = vrot.slane %v12993_v41, 1  ;;  %v9753_v30 = vmax.bf16 %v19235_v28, %v9497_v26  ;;  %v12117_v31 = vadd.f32 %v17391_v25, %v11572_v43  ;;  %v3650_v63 = vrot.slane %v19419_v55, %v15117_v12  ;;  %v11634_v48 = vpop.f32.mrf.mxu0 }
 0x3ca   : > { %v13000_v27 = vrot.slane %v12999_v51, 1  ;;  %v9496_v38 = vsub.bf16 %v19414_v9, %v14265_v57  ;;  %v9498_v62 = vsub.bf16 %v19414_v9, %v14267_v18  ;;  %v12122_v52 = vadd.f32 %v17427_v20, %v11577_v2 }
 0x3cb   : > { %v12995_v47 = vmax.f32 %v12993_v41, %v12994_v40  ;;  %v14522_v23 = vcombine.high %v9751_v19, %v9753_v30  ;;  %v12499_v37 = vmax.f32 %v12117_v31, 0.0  ;;  %v14521_v60 = vcombine.low %v9751_v19, %v9753_v30  ;;  %v17821_v8 = vpop.f32.mrf.mxu0 }
 0x3cc   : > { %v13001_v42 = vmax.f32 %v12999_v51, %v13000_v27  ;;  %v9752_v25 = vmax.bf16 %v19235_v28, %v9496_v38  ;;  %v9754_v17 = vmax.bf16 %v19235_v28, %v9498_v62  ;;  %v12500_v41 = vmax.f32 %v12122_v52, 0.0  ;;  %v12182_v27 = vpop.f32.mrf.mxu1 }
 0x3cd   : > { %v13682_v53 = vsel %vm13640_vm3, %v12995_v47, %v17765_v34  ;;  %11766 = vmatprep.mubr.bf16.mxu0 %v14522_v23  ;;  %v12659_v51 = vmul.f32 %v17703_v7, %v12499_v37  ;;  %v3654_v26 = vrot.slane %v19419_v55, %v15123_v14  ;;  %v19420_v34 = vld [vmem:[#allocation96_spill] sm:$0xff]  ;;  %v11637_v2 = vpop.f32.mrf.mxu0  ;;  %v6824_v31 = vpack.i.b16 %v3650_v63, %v3650_v63 }
 0x3ce   : > { %v17826_v20 = vsel %vm13642_vm4, %v13001_v42, %v13682_v53  ;;  %v3666_v19 = vrot.slane %v19420_v34, %v15117_v12  ;;  %v14524_v43 = vcombine.high %v9752_v25, %v9754_v17  ;;  %11767 = vmatmul.mubr.bf16.gmra.mxu0 %v14521_v60  ;;  %v12660_v40 = vmul.f32 %v17703_v7, %v12500_v41 }
 0x3cf   : > { %v14523_v57 = vcombine.low %v9752_v25, %v9754_v17  ;;  %v3670_v18 = vrot.slane %v19420_v34, %v15123_v14  ;;  %v13002_v30 = vrot.slane %v12659_v51, 4  ;;  %v6831_v47 = vpack.i.b16 %v3654_v26, %v3654_v26 }
 0x3d0   : > { %v6852_v38 = vpack.i.b16 %v3666_v19, %v3666_v19  ;;  %12311 = vmatprep.mubr.bf16.mxu1 %v14524_v43  ;;  %v13008_v62 = vrot.slane %v12660_v40, 4  ;;  %v3658_v48 = vrot.slane %v19419_v55, %v15120_v13  ;;  %v3662_v50 = vrot.slane %v19419_v55, %v15126_v15 }
 0x3d1   : > { %v6859_v52 = vpack.i.b16 %v3670_v18, %v3670_v18  ;;  %v13003_v42 = vmax.f32 %v12659_v51, %v13002_v30  ;;  %12312 = vmatmul.mubr.bf16.gmra.mxu1 %v14523_v57  ;;  %v6829_v23 = vrot.slane %v6824_v31, %v15117_v12  ;;  %v6836_v37 = vrot.slane %v6831_v47, %v15117_v12 }
 0x3d2   : > { %v6857_v60 = vrot.slane %v6852_v38, %v15117_v12  ;;  %v13009_v63 = vmax.f32 %v12660_v40, %v13008_v62  ;;  %v3674_v25 = vrot.slane %v19420_v34, %v15120_v13  ;;  %v3678_v17 = vrot.slane %v19420_v34, %v15126_v15 }
 0x3d3   : > { %v6864_v53 = vrot.slane %v6859_v52, %v15117_v12  ;;  %v13004_v41 = vrot.slane %v13003_v42, 2  ;;  %v14268_v26 = vcombine.low %v6829_v23, %v6836_v37  ;;  %v6838_v55 = vpack.i.b16 %v3658_v48, %v3658_v48  ;;  %v17859_v23 = vpop.f32.mrf.mxu1 }
 0x3d4   : > { %v6845_v51 = vpack.i.b16 %v3662_v50, %v3662_v50  ;;  %v13010_v19 = vrot.slane %v13009_v63, 2  ;;  %v6866_v57 = vpack.i.b16 %v3674_v25, %v3674_v25  ;;  %v6873_v18 = vpack.i.b16 %v3678_v17, %v3678_v17 }
 0x3d5   : > { %v14270_v43 = vcombine.low %v6857_v60, %v6864_v53  ;;  %v13005_v2 = vmax.f32 %v13003_v42, %v13004_v41  ;;  %v9499_v27 = vsub.bf16 %v19413_v5, %v14268_v26  ;;  %v6843_v40 = vrot.slane %v6838_v55, %v15117_v12  ;;  %v17857_v42 = vpop.f32.mrf.mxu0  ;;  %v19421_v41 = vld [vmem:[#allocation97_spill] sm:$0xff]  ;;  %v12187_v55 = vpop.f32.mrf.mxu1 }
 0x3d6   : > { %v6850_v30 = vrot.slane %v6845_v51, %v15117_v12  ;;  %v13011_v31 = vmax.f32 %v13009_v63, %v13010_v19  ;;  %v6871_v34 = vrot.slane %v6866_v57, %v15117_v12  ;;  %v6878_v38 = vrot.slane %v6873_v18, %v15117_v12 }
 0x3d7   : > { %v9501_v47 = vsub.bf16 %v19413_v5, %v14270_v43  ;;  %v13006_v62 = vrot.slane %v13005_v2, 1  ;;  %v9755_v52 = vmax.bf16 %v19235_v28, %v9499_v27  ;;  %v11580_v50 = vadd.f32 %v17748_v39, %v17449_v0  ;;  %v11642_v0 = vpop.f32.mrf.mxu0 }
 0x3d8   : > { %v14269_v48 = vcombine.low %v6843_v40, %v6850_v30  ;;  %v13012_v37 = vrot.slane %v13011_v31, 1  ;;  %v14271_v63 = vcombine.low %v6871_v34, %v6878_v38  ;;  %v11585_v5 = vadd.f32 %v17748_v39, %v17484_v3 }
 0x3d9   : > { %v9757_v60 = vmax.bf16 %v19235_v28, %v9501_v47  ;;  %v13007_v53 = vmax.f32 %v13005_v2, %v13006_v62  ;;  %v12125_v17 = vadd.f32 %v17451_v21, %v11580_v50  ;;  %v3682_v26 = vrot.slane %v19421_v41, %v15117_v12  ;;  %v17881_v47 = vpop.f32.mrf.mxu0 }
 0x3da   : > { %v9500_v25 = vsub.bf16 %v19414_v9, %v14269_v48  ;;  %v13013_v51 = vmax.f32 %v13011_v31, %v13012_v37  ;;  %v9502_v43 = vsub.bf16 %v19414_v9, %v14271_v63  ;;  %v12130_v27 = vadd.f32 %v17486_v56, %v11585_v5  ;;  %v19422_v9 = vld [vmem:[#allocation98_spill] sm:$0xff] }
 0x3db   : > { %v14526_v19 = vcombine.high %v9755_v52, %v9757_v60  ;;  %v14525_v57 = vcombine.low %v9755_v52, %v9757_v60  ;;  %v13684_v18 = vsel %vm13644_vm5, %v13007_v53, %v17826_v20  ;;  %v12501_v2 = vmax.f32 %v12125_v17, 0.0  ;;  %v17883_v20 = vpop.f32.mrf.mxu1  ;;  %v11645_v60 = vpop.f32.mrf.mxu0 }
 0x3dc   : > { %v9756_v3 = vmax.bf16 %v19235_v28, %v9500_v25  ;;  %v17874_v21 = vsel %vm13646_vm6, %v13013_v51, %v13684_v18  ;;  %v9758_v40 = vmax.bf16 %v19235_v28, %v9502_v43  ;;  %v3686_v30 = vrot.slane %v19421_v41, %v15123_v14 }
 0x3dd   : > { %11774 = vmatprep.mubr.bf16.mxu0 %v14526_v19  ;;  %v3698_v31 = vrot.slane %v19422_v9, %v15117_v12  ;;  %v12661_v34 = vmul.f32 %v17703_v7, %v12501_v2  ;;  %v12502_v56 = vmax.f32 %v12130_v27, 0.0  ;;  %v3702_v38 = vrot.slane %v19422_v9, %v15123_v14  ;;  %v12190_v63 = vpop.f32.mrf.mxu1 }
 0x3de   : > { %11775 = vmatmul.mubr.bf16.gmra.mxu0 %v14525_v57  ;;  %v6880_v62 = vpack.i.b16 %v3682_v26, %v3682_v26  ;;  %v14528_v52 = vcombine.high %v9756_v3, %v9758_v40  ;;  %v14527_v48 = vcombine.low %v9756_v3, %v9758_v40  ;;  %v6887_v50 = vpack.i.b16 %v3686_v30, %v3686_v30 }
 0x3df   : > { %v6908_v37 = vpack.i.b16 %v3698_v31, %v3698_v31  ;;  %v13014_v5 = vrot.slane %v12661_v34, 4  ;;  %v12662_v53 = vmul.f32 %v17703_v7, %v12502_v56  ;;  %v6915_v17 = vpack.i.b16 %v3702_v38, %v3702_v38 }
 0x3e0   : > { %v6885_v25 = vrot.slane %v6880_v62, %v15117_v12  ;;  %12319 = vmatprep.mubr.bf16.mxu1 %v14528_v52  ;;  %v6892_v0 = vrot.slane %v6887_v50, %v15117_v12  ;;  %v3690_v26 = vrot.slane %v19421_v41, %v15120_v13  ;;  %v3694_v51 = vrot.slane %v19421_v41, %v15126_v15  ;;  %v19423_v41 = vld [vmem:[#allocation20_spill] sm:$0xff] }
 0x3e1   : > { %v6913_v55 = vrot.slane %v6908_v37, %v15117_v12  ;;  %v13015_v19 = vmax.f32 %v12661_v34, %v13014_v5  ;;  %v13020_v43 = vrot.slane %v12662_v53, 4  ;;  %12320 = vmatmul.mubr.bf16.gmra.mxu1 %v14527_v48  ;;  %v6920_v57 = vrot.slane %v6915_v17, %v15117_v12 }
 0x3e2   : > { %v3706_v18 = vrot.slane %v19422_v9, %v15120_v13  ;;  %v14272_v3 = vcombine.low %v6885_v25, %v6892_v0  ;;  %v3710_v2 = vrot.slane %v19422_v9, %v15126_v15  ;;  %v6894_v27 = vpack.i.b16 %v3690_v26, %v3690_v26  ;;  %v17907_v9 = vld [vmem:[%s16545_s13 + $0x18] sm:$0xff]  }
 0x3e3   : > { %v6901_v40 = vpack.i.b16 %v3694_v51, %v3694_v51  ;;  %v13016_v30 = vrot.slane %v13015_v19, 2  ;;  %v13021_v31 = vmax.f32 %v12662_v53, %v13020_v43  ;;  %v14274_v56 = vcombine.low %v6913_v55, %v6920_v57  ;;  %v19424_v51 = vld [vmem:[#allocation36_spill] sm:$0xff]  ;;  %v17916_v43 = vpop.f32.mrf.mxu0  ;;  %v17918_v57 = vpop.f32.mrf.mxu1 }
 0x3e4   : > { %v6922_v38 = vpack.i.b16 %v3706_v18, %v3706_v18  ;;  %v9503_v34 = vsub.bf16 %v19423_v41, %v14272_v3  ;;  %v6899_v62 = vrot.slane %v6894_v27, %v15117_v12  ;;  %v6929_v48 = vpack.i.b16 %v3710_v2, %v3710_v2  ;;  %v19425_v3 = vld [vmem:[#allocation21_spill] sm:$0xff] }
 0x3e5   : > { %v6906_v52 = vrot.slane %v6901_v40, %v15117_v12  ;;  %v13017_v50 = vmax.f32 %v13015_v19, %v13016_v30  ;;  %v13022_v37 = vrot.slane %v13021_v31, 2  ;;  %v9505_v60 = vsub.bf16 %v19423_v41, %v14274_v56  ;;  %v19426_v27 = vld [vmem:[#allocation37_spill] sm:$0xff] }
 0x3e6   : > { %v6927_v63 = vrot.slane %v6922_v38, %v15117_v12  ;;  %v9759_v5 = vmax.bf16 %v19235_v28, %v9503_v34  ;;  %v6934_v53 = vrot.slane %v6929_v48, %v15117_v12  ;;  %v11588_v17 = vadd.f32 %v17748_v39, %v17506_v10  ;;  %v11650_v34 = vpop.f32.mrf.mxu0 }
 0x3e7   : > { %v14273_v25 = vcombine.low %v6899_v62, %v6906_v52  ;;  %v13018_v0 = vrot.slane %v13017_v50, 1  ;;  %v13023_v55 = vmax.f32 %v13021_v31, %v13022_v37  ;;  %v9761_v26 = vmax.bf16 %v19235_v28, %v9505_v60  ;;  %v12195_v62 = vpop.f32.mrf.mxu1  ;;  %v19427_v60 = vld [vmem:[#allocation4_spill] sm:$0xff] }
 0x3e8   : > { %v11593_v19 = vadd.f32 %v17748_v39, %v19424_v51  ;;  %v14275_v18 = vcombine.low %v6927_v63, %v6934_v53  ;;  %v12133_v40 = vadd.f32 %v19426_v27, %v11588_v17  ;;  %v17923_v30 = vunpack.c.l.bf16 %v17907_v9  ;;  %v19428_v17 = vld [vmem:[#allocation99_spill] sm:$0xff] }
 0x3e9   : > { %v9504_v2 = vsub.bf16 %v19425_v3, %v14273_v25  ;;  %v13019_v10 = vmax.f32 %v13017_v50, %v13018_v0  ;;  %v13024_v56 = vrot.slane %v13023_v55, 1  ;;  %v14530_v31 = vcombine.high %v9759_v5, %v9761_v26 }
 0x3ea   : > { %v14529_v38 = vcombine.low %v9759_v5, %v9761_v26  ;;  %v9506_v52 = vsub.bf16 %v19425_v3, %v14275_v18  ;;  %v12503_v37 = vmax.f32 %v12133_v40, 0.0  ;;  %v12138_v63 = vadd.f32 %v19427_v60, %v11593_v19  ;;  %v19429_v18 = vld [vmem:[#allocation100_spill] sm:$0xff] }
 0x3eb   : > { %v9760_v48 = vmax.bf16 %v19235_v28, %v9504_v2  ;;  %v13686_v53 = vsel %vm13648_vm7, %v13019_v10, %v17874_v21  ;;  %v13025_v25 = vmax.f32 %v13023_v55, %v13024_v56  ;;  %11782 = vmatprep.mubr.bf16.mxu0 %v14530_v31  ;;  %v3714_v50 = vrot.slane %v19428_v17, %v15117_v12  ;;  %v17938_v2 = vpop.f32.mrf.mxu0  ;;  %v17940_v21 = vpop.f32.mrf.mxu1 }
 0x3ec   : > { %v3718_v5 = vrot.slane %v19428_v17, %v15123_v14  ;;  %v9762_v0 = vmax.bf16 %v19235_v28, %v9506_v52  ;;  %v12663_v26 = vmul.f32 %v17703_v7, %v12503_v37  ;;  %11783 = vmatmul.mubr.bf16.gmra.mxu0 %v14529_v38  ;;  %v12504_v51 = vmax.f32 %v12138_v63, 0.0  ;;  %19430 = vst [vmem:[#allocation5_spill] sm:$0xff] %v17940_v21 }
 0x3ed   : > { %v3730_v19 = vrot.slane %v19429_v18, %v15117_v12  ;;  %v13687_v55 = vsel %vm13650_vm8, %v13025_v25, %v13686_v53  ;;  %v3734_v27 = vrot.slane %v19429_v18, %v15123_v14  ;;  %v6936_v40 = vpack.i.b16 %v3714_v50, %v3714_v50  ;;  %v11653_v34 = vpop.f32.mrf.mxu0  ;;  %v12198_v62 = vpop.f32.mrf.mxu1 }
 0x3ee   : > { %v6943_v10 = vpack.i.b16 %v3718_v5, %v3718_v5  ;;  %v14532_v56 = vcombine.high %v9760_v48, %v9762_v0  ;;  %v13026_v31 = vrot.slane %v12663_v26, 4  ;;  %v12664_v7 = vmul.f32 %v17923_v30, %v12504_v51 }
 0x3ef   : > { %v14531_v38 = vcombine.low %v9760_v48, %v9762_v0  ;;  %v6941_v52 = vrot.slane %v6936_v40, %v15117_v12  ;;  %v6964_v60 = vpack.i.b16 %v3730_v19, %v3730_v19  ;;  %v6971_v63 = vpack.i.b16 %v3734_v27, %v3734_v27 }
 0x3f0   : > { %v6948_v37 = vrot.slane %v6943_v10, %v15117_v12  ;;  %12327 = vmatprep.mubr.bf16.mxu1 %v14532_v56  ;;  %v13027_v53 = vmax.f32 %v12663_v26, %v13026_v31  ;;  %v13032_v25 = vrot.slane %v12664_v7, 4  ;;  %v3722_v50 = vrot.slane %v19428_v17, %v15120_v13 }
 0x3f1   : > { %v3726_v5 = vrot.slane %v19428_v17, %v15126_v15  ;;  %12328 = vmatmul.mubr.bf16.gmra.mxu1 %v14531_v38  ;;  %v6969_v48 = vrot.slane %v6964_v60, %v15117_v12  ;;  %v6976_v0 = vrot.slane %v6971_v63, %v15117_v12  ;;  %v3738_v40 = vrot.slane %v19429_v18, %v15120_v13 }
 0x3f2   : > { %v14276_v51 = vcombine.low %v6941_v52, %v6948_v37  ;;  %v13028_v19 = vrot.slane %v13027_v53, 2  ;;  %v13033_v27 = vmax.f32 %v12664_v7, %v13032_v25  ;;  %v3742_v26 = vrot.slane %v19429_v18, %v15126_v15 }
 0x3f3   : > { %v6950_v10 = vpack.i.b16 %v3722_v50, %v3722_v50  ;;  %v14278_v56 = vcombine.low %v6969_v48, %v6976_v0  ;;  %v6957_v34 = vpack.i.b16 %v3726_v5, %v3726_v5  ;;  %v6978_v17 = vpack.i.b16 %v3738_v40, %v3738_v40  ;;  %v19431_v40 = vld [vmem:[#allocation101_spill] sm:$0xff] }
 0x3f4   : > { %v9507_v31 = vsub.bf16 %v19423_v41, %v14276_v51  ;;  %v13029_v38 = vmax.f32 %v13027_v53, %v13028_v19  ;;  %v13034_v62 = vrot.slane %v13033_v27, 2  ;;  %v6985_v63 = vpack.i.b16 %v3742_v26, %v3742_v26  ;;  %v17972_v26 = vpop.f32.mrf.mxu0 }
 0x3f5   : > { %v6955_v60 = vrot.slane %v6950_v10, %v15117_v12  ;;  %v9509_v52 = vsub.bf16 %v19423_v41, %v14278_v56  ;;  %v6962_v7 = vrot.slane %v6957_v34, %v15117_v12  ;;  %v6983_v25 = vrot.slane %v6978_v17, %v15117_v12  ;;  %19432 = vst [vmem:[#allocation39_spill] sm:$0xff] %v17972_v26  ;;  %v17974_v10 = vpop.f32.mrf.mxu1  ;;  %v19434_v34 = vld [vmem:[#allocation38_spill] sm:$0xff] }
 0x3f6   : > { %v9763_v37 = vmax.bf16 %v19235_v28, %v9507_v31  ;;  %v13030_v18 = vrot.slane %v13029_v38, 1  ;;  %v13035_v50 = vmax.f32 %v13033_v27, %v13034_v62  ;;  %v6990_v48 = vrot.slane %v6985_v63, %v15117_v12  ;;  %19433 = vst [vmem:[#allocation41_spill] sm:$0xff] %v17974_v10 }
 0x3f7   : > { %v11596_v5 = vadd.f32 %v17748_v39, %v17561_v58  ;;  %v9765_v53 = vmax.bf16 %v19235_v28, %v9509_v52  ;;  %v14277_v0 = vcombine.low %v6955_v60, %v6962_v7  ;;  %v11601_v51 = vadd.f32 %v17748_v39, %v17589_v16  ;;  %v11658_v16 = vpop.f32.mrf.mxu0  ;;  %v12203_v52 = vpop.f32.mrf.mxu1 }
 0x3f8   : > { %v3746_v19 = vrot.slane %v19431_v40, %v15117_v12  ;;  %v13031_v27 = vmax.f32 %v13029_v38, %v13030_v18  ;;  %v13036_v56 = vrot.slane %v13035_v50, 1  ;;  %v14279_v31 = vcombine.low %v6983_v25, %v6990_v48 }
 0x3f9   : > { %v12141_v17 = vadd.f32 %v19434_v34, %v11596_v5  ;;  %v14534_v58 = vcombine.high %v9763_v37, %v9765_v53  ;;  %v9508_v62 = vsub.bf16 %v19425_v3, %v14277_v0  ;;  %v14533_v60 = vcombine.low %v9763_v37, %v9765_v53  ;;  %v19435_v37 = vld [vmem:[#allocation102_spill] sm:$0xff]  ;;  %v17993_v53 = vpop.f32.mrf.mxu0  ;;  %v17995_v0 = vpop.f32.mrf.mxu1 }
 0x3fa   : > { %v12146_v63 = vadd.f32 %v17591_v4, %v11601_v51  ;;  %v13688_v7 = vsel %vm13652_vm9, %v13031_v27, %v13687_v55  ;;  %v17980_v21 = vmax.f32 %v13035_v50, %v13036_v56  ;;  %v9510_v26 = vsub.bf16 %v19425_v3, %v14279_v31  ;;  %19436 = vst [vmem:[#allocation40_spill] sm:$0xff] %v17995_v0 }
 0x3fb   : > { %v12505_v10 = vmax.f32 %v12141_v17, 0.0  ;;  %13780 = vst [vmem:[%s16878_s15 + $0x28] sm:$0xff] %v13688_v7  ;;  %11790 = vmatprep.mubr.bf16.mxu0 %v14534_v58  ;;  %v9764_v38 = vmax.bf16 %v19235_v28, %v9508_v62  ;;  %v3750_v18 = vrot.slane %v19431_v40, %v15123_v14  ;;  %v3762_v4 = vrot.slane %v19435_v37, %v15117_v12  ;;  %v11661_v58 = vpop.f32.mrf.mxu0  ;;  %v12206_v62 = vpop.f32.mrf.mxu1 }
 0x3fc   : > { %v12506_v25 = vmax.f32 %v12146_v63, 0.0  ;;  %v9766_v48 = vmax.bf16 %v19235_v28, %v9510_v26  ;;  %11791 = vmatmul.mubr.bf16.gmra.mxu0 %v14533_v60  ;;  %v3766_v50 = vrot.slane %v19435_v37, %v15123_v14  ;;  %v6992_v5 = vpack.i.b16 %v3746_v19, %v3746_v19 }
 0x3fd   : > { %v12665_v55 = vmul.f32 %v17923_v30, %v12505_v10  ;;  %v6999_v27 = vpack.i.b16 %v3750_v18, %v3750_v18  ;;  %v7020_v56 = vpack.i.b16 %v3762_v4, %v3762_v4  ;;  %v3754_v31 = vrot.slane %v19431_v40, %v15120_v13 }
 0x3fe   : > { %v12666_v51 = vmul.f32 %v17923_v30, %v12506_v25  ;;  %v14536_v34 = vcombine.high %v9764_v38, %v9766_v48  ;;  %v14535_v17 = vcombine.low %v9764_v38, %v9766_v48  ;;  %v6997_v10 = vrot.slane %v6992_v5, %v15117_v12 }
 0x3ff   : > { %v13038_v26 = vrot.slane %v12665_v55, 4  ;;  %v7004_v19 = vrot.slane %v6999_v27, %v15117_v12  ;;  %v7025_v63 = vrot.slane %v7020_v56, %v15117_v12  ;;  %v7027_v16 = vpack.i.b16 %v3766_v50, %v3766_v50 }
 0x400   : > { %v13044_v60 = vrot.slane %v12666_v51, 4  ;;  %12335 = vmatprep.mubr.bf16.mxu1 %v14536_v34  ;;  %v3758_v7 = vrot.slane %v19431_v40, %v15126_v15  ;;  %v3770_v25 = vrot.slane %v19435_v37, %v15120_v13  ;;  %v3774_v38 = vrot.slane %v19435_v37, %v15126_v15 }
 0x401   : > { %v13039_v52 = vmax.f32 %v12665_v55, %v13038_v26  ;;  %12336 = vmatmul.mubr.bf16.gmra.mxu1 %v14535_v17  ;;  %v7032_v4 = vrot.slane %v7027_v16, %v15117_v12  ;;  %v14280_v48 = vcombine.low %v6997_v10, %v7004_v19  ;;  %v7006_v5 = vpack.i.b16 %v3754_v31, %v3754_v31 }
 0x402   : > { %v13045_v18 = vmax.f32 %v12666_v51, %v13044_v60  ;;  %v7013_v56 = vpack.i.b16 %v3758_v7, %v3758_v7  ;;  %v7034_v50 = vpack.i.b16 %v3770_v25, %v3770_v25  ;;  %v7041_v34 = vpack.i.b16 %v3774_v38, %v3774_v38  ;;  %v18021_v7 = vpop.f32.mrf.mxu0  ;;  %v18023_v25 = vpop.f32.mrf.mxu1 }
 0x403   : > { %v13040_v27 = vrot.slane %v13039_v52, 2  ;;  %v14282_v26 = vcombine.low %v7025_v63, %v7032_v4  ;;  %v9511_v40 = vsub.bf16 %v19423_v41, %v14280_v48  ;;  %v7011_v58 = vrot.slane %v7006_v5, %v15117_v12  ;;  %v19437_v48 = vld [vmem:[#allocation103_spill] sm:$0xff] }
 0x404   : > { %v13046_v55 = vrot.slane %v13045_v18, 2  ;;  %v7018_v0 = vrot.slane %v7013_v56, %v15117_v12  ;;  %v7039_v37 = vrot.slane %v7034_v50, %v15117_v12  ;;  %v7046_v51 = vrot.slane %v7041_v34, %v15117_v12  ;;  %v12211_v50 = vpop.f32.mrf.mxu1 }
 0x405   : > { %v13041_v62 = vmax.f32 %v13039_v52, %v13040_v27  ;;  %v9513_v31 = vsub.bf16 %v19423_v41, %v14282_v26  ;;  %v9767_v10 = vmax.bf16 %v19235_v28, %v9511_v40  ;;  %v11604_v60 = vadd.f32 %v17748_v39, %v17604_v6 }
 0x406   : > { %v13047_v17 = vmax.f32 %v13045_v18, %v13046_v55  ;;  %v14281_v63 = vcombine.low %v7011_v58, %v7018_v0  ;;  %v14283_v16 = vcombine.low %v7039_v37, %v7046_v51  ;;  %v11609_v52 = vadd.f32 %v17748_v39, %v17640_v44  ;;  %v11666_v44 = vpop.f32.mrf.mxu0 }
 0x407   : > { %v13042_v19 = vrot.slane %v13041_v62, 1  ;;  %v9769_v18 = vmax.bf16 %v19235_v28, %v9513_v31  ;;  %v12149_v4 = vadd.f32 %v17606_v49, %v11604_v60  ;;  %v3778_v5 = vrot.slane %v19437_v48, %v15117_v12  ;;  %v18038_v31 = vpop.f32.mrf.mxu1 }
 0x408   : > { %v13048_v38 = vrot.slane %v13047_v17, 1  ;;  %v9512_v6 = vsub.bf16 %v19425_v3, %v14281_v63  ;;  %v9514_v0 = vsub.bf16 %v19425_v3, %v14283_v16  ;;  %v12154_v56 = vadd.f32 %v17642_v11, %v11609_v52  ;;  %v18036_v51 = vpop.f32.mrf.mxu0 }
 0x409   : > { %v13043_v27 = vmax.f32 %v13041_v62, %v13042_v19  ;;  %v14538_v55 = vcombine.high %v9767_v10, %v9769_v18  ;;  %v12507_v26 = vmax.f32 %v12149_v4, 0.0  ;;  %v14537_v40 = vcombine.low %v9767_v10, %v9769_v18  ;;  %v12214_v18 = vpop.f32.mrf.mxu1 }
 0x40a   : > { %v13049_v34 = vmax.f32 %v13047_v17, %v13048_v38  ;;  %v9768_v49 = vmax.bf16 %v19235_v28, %v9512_v6  ;;  %v9770_v37 = vmax.bf16 %v19235_v28, %v9514_v0  ;;  %v12508_v62 = vmax.f32 %v12154_v56, 0.0  ;;  %v11669_v38 = vpop.f32.mrf.mxu0 }
 0x40b   : > { %v13689_v58 = vsel %vm13640_vm3, %v13043_v27, %v17980_v21  ;;  %11798 = vmatprep.mubr.bf16.mxu0 %v14538_v55  ;;  %v12667_v17 = vmul.f32 %v17923_v30, %v12507_v26  ;;  %v3782_v10 = vrot.slane %v19437_v48, %v15123_v14  ;;  %v19438_v21 = vld [vmem:[#allocation104_spill] sm:$0xff]  ;;  %v7048_v27 = vpack.i.b16 %v3778_v5, %v3778_v5 }
 0x40c   : > { %v18041_v11 = vsel %vm13642_vm4, %v13049_v34, %v13689_v58  ;;  %v3794_v60 = vrot.slane %v19438_v21, %v15117_v12  ;;  %v14540_v19 = vcombine.high %v9768_v49, %v9770_v37  ;;  %11799 = vmatmul.mubr.bf16.gmra.mxu0 %v14537_v40  ;;  %v12668_v63 = vmul.f32 %v17923_v30, %v12508_v62 }
 0x40d   : > { %v14539_v16 = vcombine.low %v9768_v49, %v9770_v37  ;;  %v3798_v52 = vrot.slane %v19438_v21, %v15123_v14  ;;  %v13050_v4 = vrot.slane %v12667_v17, 4  ;;  %v7055_v6 = vpack.i.b16 %v3782_v10, %v3782_v10 }
 0x40e   : > { %v7076_v0 = vpack.i.b16 %v3794_v60, %v3794_v60  ;;  %12343 = vmatprep.mubr.bf16.mxu1 %v14540_v19  ;;  %v13056_v56 = vrot.slane %v12668_v63, 4  ;;  %v3786_v50 = vrot.slane %v19437_v48, %v15120_v13  ;;  %v3790_v34 = vrot.slane %v19437_v48, %v15126_v15 }
 0x40f   : > { %v7083_v44 = vpack.i.b16 %v3798_v52, %v3798_v52  ;;  %v13051_v55 = vmax.f32 %v12667_v17, %v13050_v4  ;;  %12344 = vmatmul.mubr.bf16.gmra.mxu1 %v14539_v16  ;;  %v7053_v26 = vrot.slane %v7048_v27, %v15117_v12  ;;  %v7060_v40 = vrot.slane %v7055_v6, %v15117_v12 }
 0x410   : > { %v7081_v58 = vrot.slane %v7076_v0, %v15117_v12  ;;  %v13057_v5 = vmax.f32 %v12668_v63, %v13056_v56  ;;  %v3802_v37 = vrot.slane %v19438_v21, %v15120_v13  ;;  %v3806_v62 = vrot.slane %v19438_v21, %v15126_v15 }
 0x411   : > { %v7088_v49 = vrot.slane %v7083_v44, %v15117_v12  ;;  %v13052_v10 = vrot.slane %v13051_v55, 2  ;;  %v14284_v60 = vcombine.low %v7053_v26, %v7060_v40  ;;  %v7062_v48 = vpack.i.b16 %v3786_v50, %v3786_v50  ;;  %v18072_v26 = vpop.f32.mrf.mxu0  ;;  %v18074_v40 = vpop.f32.mrf.mxu1 }
 0x412   : > { %v7069_v17 = vpack.i.b16 %v3790_v34, %v3790_v34  ;;  %v13058_v19 = vrot.slane %v13057_v5, 2  ;;  %v7090_v52 = vpack.i.b16 %v3802_v37, %v3802_v37  ;;  %v7097_v38 = vpack.i.b16 %v3806_v62, %v3806_v62 }
 0x413   : > { %v14286_v16 = vcombine.low %v7081_v58, %v7088_v49  ;;  %v13053_v18 = vmax.f32 %v13051_v55, %v13052_v10  ;;  %v9515_v4 = vsub.bf16 %v19423_v41, %v14284_v60  ;;  %v7067_v63 = vrot.slane %v7062_v48, %v15117_v12  ;;  %v19439_v60 = vld [vmem:[#allocation105_spill] sm:$0xff] }
 0x414   : > { %v7074_v27 = vrot.slane %v7069_v17, %v15117_v12  ;;  %v13059_v6 = vmax.f32 %v13057_v5, %v13058_v19  ;;  %v7095_v21 = vrot.slane %v7090_v52, %v15117_v12  ;;  %v7102_v56 = vrot.slane %v7097_v38, %v15117_v12  ;;  %v12219_v17 = vpop.f32.mrf.mxu1 }
 0x415   : > { %v9517_v0 = vsub.bf16 %v19423_v41, %v14286_v16  ;;  %v13054_v44 = vrot.slane %v13053_v18, 1  ;;  %v9771_v50 = vmax.bf16 %v19235_v28, %v9515_v4  ;;  %v11612_v55 = vadd.f32 %v17748_v39, %v17664_v24  ;;  %v11674_v24 = vpop.f32.mrf.mxu0 }
 0x416   : > { %v14285_v34 = vcombine.low %v7067_v63, %v7074_v27  ;;  %v13060_v58 = vrot.slane %v13059_v6, 1  ;;  %v14287_v49 = vcombine.low %v7095_v21, %v7102_v56  ;;  %v11617_v41 = vadd.f32 %v17748_v39, %v17696_v61 }
 0x417   : > { %v9773_v5 = vmax.bf16 %v19235_v28, %v9517_v0  ;;  %v13055_v37 = vmax.f32 %v13053_v18, %v13054_v44  ;;  %v12157_v10 = vadd.f32 %v17666_v33, %v11612_v55  ;;  %v3810_v48 = vrot.slane %v19439_v60, %v15117_v12  ;;  %v18096_v0 = vpop.f32.mrf.mxu0 }
 0x418   : > { %v9516_v62 = vsub.bf16 %v19425_v3, %v14285_v34  ;;  %v13061_v19 = vmax.f32 %v13059_v6, %v13060_v58  ;;  %v9518_v52 = vsub.bf16 %v19425_v3, %v14287_v49  ;;  %v12162_v18 = vadd.f32 %v17698_v36, %v11617_v41  ;;  %v19440_v3 = vld [vmem:[#allocation107_spill] sm:$0xff] }
 0x419   : > { %v14542_v16 = vcombine.high %v9771_v50, %v9773_v5  ;;  %v14541_v38 = vcombine.low %v9771_v50, %v9773_v5  ;;  %v13691_v4 = vsel %vm13644_vm5, %v13055_v37, %v18041_v11  ;;  %v12509_v39 = vmax.f32 %v12157_v10, 0.0  ;;  %v18098_v11 = vpop.f32.mrf.mxu1  ;;  %v11677_v5 = vpop.f32.mrf.mxu0 }
 0x41a   : > { %v9772_v61 = vmax.bf16 %v19235_v28, %v9516_v62  ;;  %v18089_v33 = vsel %vm13646_vm6, %v13061_v19, %v13691_v4  ;;  %v9774_v63 = vmax.bf16 %v19235_v28, %v9518_v52  ;;  %v3814_v27 = vrot.slane %v19439_v60, %v15123_v14 }
 0x41b   : > { %11806 = vmatprep.mubr.bf16.mxu0 %v14542_v16  ;;  %v3826_v6 = vrot.slane %v19440_v3, %v15117_v12  ;;  %v12669_v21 = vmul.f32 %v17923_v30, %v12509_v39  ;;  %v12510_v36 = vmax.f32 %v12162_v18, 0.0  ;;  %v3830_v56 = vrot.slane %v19440_v3, %v15123_v14  ;;  %v12222_v49 = vpop.f32.mrf.mxu1 }
 0x41c   : > { %11807 = vmatmul.mubr.bf16.gmra.mxu0 %v14541_v38  ;;  %v7104_v44 = vpack.i.b16 %v3810_v48, %v3810_v48  ;;  %v14544_v50 = vcombine.high %v9772_v61, %v9774_v63  ;;  %v14543_v34 = vcombine.low %v9772_v61, %v9774_v63  ;;  %v7111_v55 = vpack.i.b16 %v3814_v27, %v3814_v27 }
 0x41d   : > { %v7132_v58 = vpack.i.b16 %v3826_v6, %v3826_v6  ;;  %v13062_v41 = vrot.slane %v12669_v21, 4  ;;  %v12670_v37 = vmul.f32 %v17923_v30, %v12510_v36  ;;  %v7139_v10 = vpack.i.b16 %v3830_v56, %v3830_v56 }
 0x41e   : > { %v7109_v62 = vrot.slane %v7104_v44, %v15117_v12  ;;  %12351 = vmatprep.mubr.bf16.mxu1 %v14544_v50  ;;  %v7116_v24 = vrot.slane %v7111_v55, %v15117_v12  ;;  %v3818_v48 = vrot.slane %v19439_v60, %v15120_v13  ;;  %v3822_v19 = vrot.slane %v19439_v60, %v15126_v15  ;;  %v19441_v44 = vld [vmem:[#allocation22_spill] sm:$0xff] }
 0x41f   : > { %v7137_v17 = vrot.slane %v7132_v58, %v15117_v12  ;;  %v13063_v16 = vmax.f32 %v12669_v21, %v13062_v41  ;;  %v13068_v52 = vrot.slane %v12670_v37, 4  ;;  %12352 = vmatmul.mubr.bf16.gmra.mxu1 %v14543_v34  ;;  %v7144_v38 = vrot.slane %v7139_v10, %v15117_v12 }
 0x420   : > { %v3834_v4 = vrot.slane %v19440_v3, %v15120_v13  ;;  %v14288_v61 = vcombine.low %v7109_v62, %v7116_v24  ;;  %v3838_v39 = vrot.slane %v19440_v3, %v15126_v15  ;;  %v7118_v18 = vpack.i.b16 %v3818_v48, %v3818_v48  ;;  %v18126_v62 = vld [vmem:[%s19053_s7] ss:$0 sm:$0xff] }
 0x421   : > { %v7125_v63 = vpack.i.b16 %v3822_v19, %v3822_v19  ;;  %v13064_v27 = vrot.slane %v13063_v16, 2  ;;  %v13069_v6 = vmax.f32 %v12670_v37, %v13068_v52  ;;  %v14290_v36 = vcombine.low %v7137_v17, %v7144_v38  ;;  %v18135_v52 = vpop.f32.mrf.mxu1 }
 0x422   : > { %v7146_v56 = vpack.i.b16 %v3834_v4, %v3834_v4  ;;  %v9519_v60 = vsub.bf16 %v19441_v44, %v14288_v61  ;;  %v7123_v21 = vrot.slane %v7118_v18, %v15117_v12  ;;  %v7153_v34 = vpack.i.b16 %v3838_v39, %v3838_v39  ;;  %v19442_v4 = vld [vmem:[#allocation23_spill] sm:$0xff] }
 0x423   : > { %v7130_v50 = vrot.slane %v7125_v63, %v15117_v12  ;;  %v13065_v55 = vmax.f32 %v13063_v16, %v13064_v27  ;;  %v13070_v58 = vrot.slane %v13069_v6, 2  ;;  %v9521_v5 = vsub.bf16 %v19441_v44, %v14290_v36  ;;  %v18133_v16 = vpop.f32.mrf.mxu0 }
 0x424   : > { %v7151_v49 = vrot.slane %v7146_v56, %v15117_v12  ;;  %v9775_v3 = vmax.bf16 %v19235_v28, %v9519_v60  ;;  %v7158_v41 = vrot.slane %v7153_v34, %v15117_v12  ;;  %v11620_v10 = vadd.f32 %v18126_v62, %v17718_v59  ;;  %v12227_v56 = vpop.f32.mrf.mxu1 }
 0x425   : > { %v14289_v37 = vcombine.low %v7123_v21, %v7130_v50  ;;  %v13066_v24 = vrot.slane %v13065_v55, 1  ;;  %v13071_v17 = vmax.f32 %v13069_v6, %v13070_v58  ;;  %v9777_v48 = vmax.bf16 %v19235_v28, %v9521_v5  ;;  %v11682_v36 = vpop.f32.mrf.mxu0 }
 0x426   : > { %v11625_v19 = vadd.f32 %v18126_v62, %v17757_v32  ;;  %v14291_v38 = vcombine.low %v7151_v49, %v7158_v41  ;;  %v12165_v39 = vadd.f32 %v17720_v46, %v11620_v10  ;;  %v18140_v18 = vunpack.c.h.bf16 %v17907_v9  ;;  %v19443_v9 = vld [vmem:[#allocation106_spill] sm:$0xff]  ;;  %v19444_v41 = vld [vmem:[#allocation109_spill] sm:$0xff] }
 0x427   : > { %v9520_v61 = vsub.bf16 %v19442_v4, %v14289_v37  ;;  %v13067_v59 = vmax.f32 %v13065_v55, %v13066_v24  ;;  %v13072_v63 = vrot.slane %v13071_v17, 1  ;;  %v14546_v27 = vcombine.high %v9775_v3, %v9777_v48  ;;  %v18155_v37 = vpop.f32.mrf.mxu0 }
 0x428   : > { %v14545_v6 = vcombine.low %v9775_v3, %v9777_v48  ;;  %v9522_v32 = vsub.bf16 %v19442_v4, %v14291_v38  ;;  %v12511_v21 = vmax.f32 %v12165_v39, 0.0  ;;  %v12170_v50 = vadd.f32 %v17759_v45, %v11625_v19 }
 0x429   : > { %v9776_v60 = vmax.bf16 %v19235_v28, %v9520_v61  ;;  %v13693_v34 = vsel %vm13648_vm7, %v13067_v59, %v18089_v33  ;;  %v13073_v46 = vmax.f32 %v13071_v17, %v13072_v63  ;;  %11814 = vmatprep.mubr.bf16.mxu0 %v14546_v27  ;;  %v3842_v55 = vrot.slane %v19443_v9, %v15117_v12  ;;  %v18157_v33 = vpop.f32.mrf.mxu1  ;;  %v11685_v39 = vpop.f32.mrf.mxu0 }
 0x42a   : > { %v3846_v58 = vrot.slane %v19443_v9, %v15123_v14  ;;  %v9778_v5 = vmax.bf16 %v19235_v28, %v9522_v32  ;;  %v12671_v49 = vmul.f32 %v17923_v30, %v12511_v21  ;;  %11815 = vmatmul.mubr.bf16.gmra.mxu0 %v14545_v6  ;;  %v12512_v3 = vmax.f32 %v12170_v50, 0.0 }
 0x42b   : > { %v3858_v45 = vrot.slane %v19444_v41, %v15117_v12  ;;  %v13694_v10 = vsel %vm13650_vm8, %v13073_v46, %v13693_v34  ;;  %v3862_v24 = vrot.slane %v19444_v41, %v15123_v14  ;;  %v7160_v17 = vpack.i.b16 %v3842_v55, %v3842_v55  ;;  %v12230_v59 = vpop.f32.mrf.mxu1 }
 0x42c   : > { %v7167_v48 = vpack.i.b16 %v3846_v58, %v3846_v58  ;;  %v14548_v19 = vcombine.high %v9776_v60, %v9778_v5  ;;  %v13074_v38 = vrot.slane %v12671_v49, 4  ;;  %v12672_v30 = vmul.f32 %v18140_v18, %v12512_v3 }
 0x42d   : > { %v14547_v61 = vcombine.low %v9776_v60, %v9778_v5  ;;  %v7165_v63 = vrot.slane %v7160_v17, %v15117_v12  ;;  %v7188_v6 = vpack.i.b16 %v3858_v45, %v3858_v45  ;;  %v7195_v36 = vpack.i.b16 %v3862_v24, %v3862_v24 }
 0x42e   : > { %v7172_v27 = vrot.slane %v7167_v48, %v15117_v12  ;;  %12359 = vmatprep.mubr.bf16.mxu1 %v14548_v19  ;;  %v13075_v56 = vmax.f32 %v12671_v49, %v13074_v38  ;;  %v13080_v32 = vrot.slane %v12672_v30, 4  ;;  %v3850_v21 = vrot.slane %v19443_v9, %v15120_v13 }
 0x42f   : > { %v3854_v50 = vrot.slane %v19443_v9, %v15126_v15  ;;  %12360 = vmatmul.mubr.bf16.gmra.mxu1 %v14547_v61  ;;  %v7193_v60 = vrot.slane %v7188_v6, %v15117_v12  ;;  %v7200_v34 = vrot.slane %v7195_v36, %v15117_v12  ;;  %v3866_v55 = vrot.slane %v19444_v41, %v15120_v13 }
 0x430   : > { %v14292_v46 = vcombine.low %v7165_v63, %v7172_v27  ;;  %v13076_v58 = vrot.slane %v13075_v56, 2  ;;  %v13081_v5 = vmax.f32 %v12672_v30, %v13080_v32  ;;  %v3870_v49 = vrot.slane %v19444_v41, %v15126_v15 }
 0x431   : > { %v7174_v3 = vpack.i.b16 %v3850_v21, %v3850_v21  ;;  %v14294_v45 = vcombine.low %v7193_v60, %v7200_v34  ;;  %v7181_v17 = vpack.i.b16 %v3854_v50, %v3854_v50  ;;  %v7202_v9 = vpack.i.b16 %v3866_v55, %v3866_v55  ;;  %v19445_v50 = vld [vmem:[#allocation108_spill] sm:$0xff]  ;;  %v18189_v34 = vpop.f32.mrf.mxu0 }
 0x432   : > { %v9523_v24 = vsub.bf16 %v19441_v44, %v14292_v46  ;;  %v13077_v48 = vmax.f32 %v13075_v56, %v13076_v58  ;;  %v13082_v19 = vrot.slane %v13081_v5, 2  ;;  %v7209_v61 = vpack.i.b16 %v3870_v49, %v3870_v49  ;;  %v18191_v46 = vpop.f32.mrf.mxu1 }
 0x433   : > { %v7179_v38 = vrot.slane %v7174_v3, %v15117_v12  ;;  %v9525_v39 = vsub.bf16 %v19441_v44, %v14294_v45  ;;  %v7186_v30 = vrot.slane %v7181_v17, %v15117_v12  ;;  %v7207_v63 = vrot.slane %v7202_v9, %v15117_v12 }
 0x434   : > { %v9779_v59 = vmax.bf16 %v19235_v28, %v9523_v24  ;;  %v13078_v41 = vrot.slane %v13077_v48, 1  ;;  %v13083_v27 = vmax.f32 %v13081_v5, %v13082_v19  ;;  %v7214_v6 = vrot.slane %v7209_v61, %v15117_v12  ;;  %v12235_v17 = vpop.f32.mrf.mxu1 }
 0x435   : > { %v11628_v36 = vadd.f32 %v18126_v62, %v17778_v54  ;;  %v9781_v56 = vmax.bf16 %v19235_v28, %v9525_v39  ;;  %v14293_v32 = vcombine.low %v7179_v38, %v7186_v30  ;;  %v11633_v21 = vadd.f32 %v18126_v62, %v17806_v1  ;;  %v11690_v1 = vpop.f32.mrf.mxu0 }
 0x436   : > { %v3874_v60 = vrot.slane %v19445_v50, %v15117_v12  ;;  %v13079_v55 = vmax.f32 %v13077_v48, %v13078_v41  ;;  %v13084_v58 = vrot.slane %v13083_v27, 1  ;;  %v14295_v5 = vcombine.low %v7207_v63, %v7214_v6  ;;  %v18212_v6 = vpop.f32.mrf.mxu1 }
 0x437   : > { %v12173_v49 = vadd.f32 %v17780_v29, %v11628_v36  ;;  %v14550_v54 = vcombine.high %v9779_v59, %v9781_v56  ;;  %v9524_v3 = vsub.bf16 %v19442_v4, %v14293_v32  ;;  %v14549_v45 = vcombine.low %v9779_v59, %v9781_v56  ;;  %v19446_v59 = vld [vmem:[#allocation110_spill] sm:$0xff] }
 0x438   : > { %v12178_v24 = vadd.f32 %v17808_v35, %v11633_v21  ;;  %v13695_v9 = vsel %vm13652_vm9, %v13079_v55, %v13694_v10  ;;  %v18197_v19 = vmax.f32 %v13083_v27, %v13084_v58  ;;  %v9526_v38 = vsub.bf16 %v19442_v4, %v14295_v5  ;;  %v18210_v27 = vpop.f32.mrf.mxu0 }
 0x439   : > { %v12513_v61 = vmax.f32 %v12173_v49, 0.0  ;;  %13781 = vst [vmem:[%s16878_s15 + $0x30] sm:$0xff] %v13695_v9  ;;  %11822 = vmatprep.mubr.bf16.mxu0 %v14550_v54  ;;  %v9780_v48 = vmax.bf16 %v19235_v28, %v9524_v3  ;;  %v3878_v39 = vrot.slane %v19445_v50, %v15123_v14  ;;  %v3890_v35 = vrot.slane %v19446_v59, %v15117_v12  ;;  %v12238_v3 = vpop.f32.mrf.mxu1 }
 0x43a   : > { %v12514_v29 = vmax.f32 %v12178_v24, 0.0  ;;  %v9782_v30 = vmax.bf16 %v19235_v28, %v9526_v38  ;;  %11823 = vmatmul.mubr.bf16.gmra.mxu0 %v14549_v45  ;;  %v3894_v63 = vrot.slane %v19446_v59, %v15123_v14  ;;  %v7216_v41 = vpack.i.b16 %v3874_v60, %v3874_v60  ;;  %v11693_v54 = vpop.f32.mrf.mxu0 }
 0x43b   : > { %v12673_v10 = vmul.f32 %v18140_v18, %v12513_v61  ;;  %v7223_v56 = vpack.i.b16 %v3878_v39, %v3878_v39  ;;  %v7244_v32 = vpack.i.b16 %v3890_v35, %v3890_v35  ;;  %v3882_v21 = vrot.slane %v19445_v50, %v15120_v13 }
 0x43c   : > { %v12674_v36 = vmul.f32 %v18140_v18, %v12514_v29  ;;  %v14552_v55 = vcombine.high %v9780_v48, %v9782_v30  ;;  %v14551_v5 = vcombine.low %v9780_v48, %v9782_v30  ;;  %v7221_v49 = vrot.slane %v7216_v41, %v15117_v12 }
 0x43d   : > { %v13086_v58 = vrot.slane %v12673_v10, 4  ;;  %v7228_v60 = vrot.slane %v7223_v56, %v15117_v12  ;;  %v7249_v24 = vrot.slane %v7244_v32, %v15117_v12  ;;  %v7251_v1 = vpack.i.b16 %v3894_v63, %v3894_v63 }
 0x43e   : > { %v13092_v45 = vrot.slane %v12674_v36, 4  ;;  %12367 = vmatprep.mubr.bf16.mxu1 %v14552_v55  ;;  %v3886_v9 = vrot.slane %v19445_v50, %v15126_v15  ;;  %v3898_v38 = vrot.slane %v19446_v59, %v15120_v13  ;;  %v3902_v61 = vrot.slane %v19446_v59, %v15126_v15 }
 0x43f   : > { %v13087_v17 = vmax.f32 %v12673_v10, %v13086_v58  ;;  %12368 = vmatmul.mubr.bf16.gmra.mxu1 %v14551_v5  ;;  %v7256_v29 = vrot.slane %v7251_v1, %v15117_v12  ;;  %v14296_v39 = vcombine.low %v7221_v49, %v7228_v60  ;;  %v7230_v35 = vpack.i.b16 %v3882_v21, %v3882_v21 }
 0x440   : > { %v13093_v48 = vmax.f32 %v12674_v36, %v13092_v45  ;;  %v7237_v41 = vpack.i.b16 %v3886_v9, %v3886_v9  ;;  %v7258_v63 = vpack.i.b16 %v3898_v38, %v3898_v38  ;;  %v7265_v56 = vpack.i.b16 %v3902_v61, %v3902_v61  ;;  %v18240_v9 = vpop.f32.mrf.mxu1 }
 0x441   : > { %v13088_v30 = vrot.slane %v13087_v17, 2  ;;  %v14298_v32 = vcombine.low %v7249_v24, %v7256_v29  ;;  %v9527_v50 = vsub.bf16 %v19441_v44, %v14296_v39  ;;  %v7235_v55 = vrot.slane %v7230_v35, %v15117_v12  ;;  %v19447_v29 = vld [vmem:[#allocation111_spill] sm:$0xff] }
 0x442   : > { %v13094_v10 = vrot.slane %v13093_v48, 2  ;;  %v7242_v54 = vrot.slane %v7237_v41, %v15117_v12  ;;  %v7263_v59 = vrot.slane %v7258_v63, %v15117_v12  ;;  %v7270_v36 = vrot.slane %v7265_v56, %v15117_v12  ;;  %v12243_v63 = vpop.f32.mrf.mxu1 }
 0x443   : > { %v13089_v58 = vmax.f32 %v13087_v17, %v13088_v30  ;;  %v9529_v21 = vsub.bf16 %v19441_v44, %v14298_v32  ;;  %v9783_v49 = vmax.bf16 %v19235_v28, %v9527_v50  ;;  %v11636_v3 = vadd.f32 %v18126_v62, %v17821_v8  ;;  %v18238_v17 = vpop.f32.mrf.mxu0 }
 0x444   : > { %v13095_v5 = vmax.f32 %v13093_v48, %v13094_v10  ;;  %v14297_v60 = vcombine.low %v7235_v55, %v7242_v54  ;;  %v14299_v24 = vcombine.low %v7263_v59, %v7270_v36  ;;  %v11641_v1 = vadd.f32 %v18126_v62, %v17857_v42  ;;  %v18255_v36 = vpop.f32.mrf.mxu1 }
 0x445   : > { %v13090_v45 = vrot.slane %v13089_v58, 1  ;;  %v9785_v61 = vmax.bf16 %v19235_v28, %v9529_v21  ;;  %v12181_v48 = vadd.f32 %v17823_v22, %v11636_v3  ;;  %v3906_v39 = vrot.slane %v19447_v29, %v15117_v12  ;;  %v11698_v42 = vpop.f32.mrf.mxu0 }
 0x446   : > { %v13096_v38 = vrot.slane %v13095_v5, 1  ;;  %v9528_v8 = vsub.bf16 %v19442_v4, %v14297_v60  ;;  %v9530_v30 = vsub.bf16 %v19442_v4, %v14299_v24  ;;  %v12186_v41 = vadd.f32 %v17859_v23, %v11641_v1 }
 0x447   : > { %v13091_v35 = vmax.f32 %v13089_v58, %v13090_v45  ;;  %v14554_v10 = vcombine.high %v9783_v49, %v9785_v61  ;;  %v12515_v32 = vmax.f32 %v12181_v48, 0.0  ;;  %v14553_v50 = vcombine.low %v9783_v49, %v9785_v61  ;;  %v18253_v59 = vpop.f32.mrf.mxu0 }
 0x448   : > { %v13097_v56 = vmax.f32 %v13095_v5, %v13096_v38  ;;  %v9784_v22 = vmax.bf16 %v19235_v28, %v9528_v8  ;;  %v9786_v54 = vmax.bf16 %v19235_v28, %v9530_v30  ;;  %v12516_v58 = vmax.f32 %v12186_v41, 0.0  ;;  %v12246_v38 = vpop.f32.mrf.mxu1 }
 0x449   : > { %v13696_v55 = vsel %vm13640_vm3, %v13091_v35, %v18197_v19  ;;  %11830 = vmatprep.mubr.bf16.mxu0 %v14554_v10  ;;  %v12675_v5 = vmul.f32 %v18140_v18, %v12515_v32  ;;  %v3910_v21 = vrot.slane %v19447_v29, %v15123_v14  ;;  %v19448_v19 = vld [vmem:[#allocation112_spill] sm:$0xff]  ;;  %v11701_v1 = vpop.f32.mrf.mxu0  ;;  %v7272_v48 = vpack.i.b16 %v3906_v39, %v3906_v39 }
 0x44a   : > { %v18258_v23 = vsel %vm13642_vm4, %v13097_v56, %v13696_v55  ;;  %v3922_v49 = vrot.slane %v19448_v19, %v15117_v12  ;;  %v14556_v3 = vcombine.high %v9784_v22, %v9786_v54  ;;  %11831 = vmatmul.mubr.bf16.gmra.mxu0 %v14553_v50  ;;  %v12676_v45 = vmul.f32 %v18140_v18, %v12516_v58 }
 0x44b   : > { %v14555_v60 = vcombine.low %v9784_v22, %v9786_v54  ;;  %v3926_v24 = vrot.slane %v19448_v19, %v15123_v14  ;;  %v13098_v61 = vrot.slane %v12675_v5, 4  ;;  %v7279_v35 = vpack.i.b16 %v3910_v21, %v3910_v21 }
 0x44c   : > { %v7300_v8 = vpack.i.b16 %v3922_v49, %v3922_v49  ;;  %12375 = vmatprep.mubr.bf16.mxu1 %v14556_v3  ;;  %v13104_v30 = vrot.slane %v12676_v45, 4  ;;  %v3914_v42 = vrot.slane %v19447_v29, %v15120_v13  ;;  %v3918_v63 = vrot.slane %v19447_v29, %v15126_v15 }
 0x44d   : > { %v7307_v41 = vpack.i.b16 %v3926_v24, %v3926_v24  ;;  %v13099_v56 = vmax.f32 %v12675_v5, %v13098_v61  ;;  %12376 = vmatmul.mubr.bf16.gmra.mxu1 %v14555_v60  ;;  %v7277_v10 = vrot.slane %v7272_v48, %v15117_v12  ;;  %v7284_v32 = vrot.slane %v7279_v35, %v15117_v12 }
 0x44e   : > { %v7305_v50 = vrot.slane %v7300_v8, %v15117_v12  ;;  %v13105_v39 = vmax.f32 %v12676_v45, %v13104_v30  ;;  %v3930_v22 = vrot.slane %v19448_v19, %v15120_v13  ;;  %v3934_v54 = vrot.slane %v19448_v19, %v15126_v15 }
 0x44f   : > { %v7312_v55 = vrot.slane %v7307_v41, %v15117_v12  ;;  %v13100_v58 = vrot.slane %v13099_v56, 2  ;;  %v14300_v21 = vcombine.low %v7277_v10, %v7284_v32  ;;  %v7286_v29 = vpack.i.b16 %v3914_v42, %v3914_v42  ;;  %v18291_v10 = vpop.f32.mrf.mxu1 }
 0x450   : > { %v7293_v5 = vpack.i.b16 %v3918_v63, %v3918_v63  ;;  %v13106_v49 = vrot.slane %v13105_v39, 2  ;;  %v7314_v60 = vpack.i.b16 %v3930_v22, %v3930_v22  ;;  %v7321_v24 = vpack.i.b16 %v3934_v54, %v3934_v54 }
 0x451   : > { %v14302_v3 = vcombine.low %v7305_v50, %v7312_v55  ;;  %v13101_v1 = vmax.f32 %v13099_v56, %v13100_v58  ;;  %v9531_v38 = vsub.bf16 %v19441_v44, %v14300_v21  ;;  %v7291_v45 = vrot.slane %v7286_v29, %v15117_v12  ;;  %v18289_v56 = vpop.f32.mrf.mxu0  ;;  %v19449_v58 = vld [vmem:[#allocation113_spill] sm:$0xff]  ;;  %v12251_v29 = vpop.f32.mrf.mxu1 }
 0x452   : > { %v7298_v61 = vrot.slane %v7293_v5, %v15117_v12  ;;  %v13107_v48 = vmax.f32 %v13105_v39, %v13106_v49  ;;  %v7319_v19 = vrot.slane %v7314_v60, %v15117_v12  ;;  %v7326_v8 = vrot.slane %v7321_v24, %v15117_v12 }
 0x453   : > { %v9533_v35 = vsub.bf16 %v19441_v44, %v14302_v3  ;;  %v13102_v30 = vrot.slane %v13101_v1, 1  ;;  %v9787_v41 = vmax.bf16 %v19235_v28, %v9531_v38  ;;  %v11644_v63 = vadd.f32 %v18126_v62, %v17881_v47  ;;  %v11706_v47 = vpop.f32.mrf.mxu0 }
 0x454   : > { %v14301_v42 = vcombine.low %v7291_v45, %v7298_v61  ;;  %v13108_v32 = vrot.slane %v13107_v48, 1  ;;  %v14303_v39 = vcombine.low %v7319_v19, %v7326_v8  ;;  %v11649_v44 = vadd.f32 %v18126_v62, %v17916_v43 }
 0x455   : > { %v9789_v50 = vmax.bf16 %v19235_v28, %v9533_v35  ;;  %v13103_v55 = vmax.f32 %v13101_v1, %v13102_v30  ;;  %v12189_v54 = vadd.f32 %v17883_v20, %v11644_v63  ;;  %v3938_v21 = vrot.slane %v19449_v58, %v15117_v12  ;;  %v18313_v35 = vpop.f32.mrf.mxu0 }
 0x456   : > { %v9532_v22 = vsub.bf16 %v19442_v4, %v14301_v42  ;;  %v13109_v5 = vmax.f32 %v13107_v48, %v13108_v32  ;;  %v9534_v3 = vsub.bf16 %v19442_v4, %v14303_v39  ;;  %v12194_v38 = vadd.f32 %v17918_v57, %v11649_v44  ;;  %v19450_v4 = vld [vmem:[#allocation114_spill] sm:$0xff] }
 0x457   : > { %v14558_v49 = vcombine.high %v9787_v41, %v9789_v50  ;;  %v14557_v60 = vcombine.low %v9787_v41, %v9789_v50  ;;  %v13698_v24 = vsel %vm13644_vm5, %v13103_v55, %v18258_v23  ;;  %v12517_v1 = vmax.f32 %v12189_v54, 0.0  ;;  %v18315_v23 = vpop.f32.mrf.mxu1  ;;  %v11709_v50 = vpop.f32.mrf.mxu0 }
 0x458   : > { %v9788_v43 = vmax.bf16 %v19235_v28, %v9532_v22  ;;  %v18306_v20 = vsel %vm13646_vm6, %v13109_v5, %v13698_v24  ;;  %v9790_v45 = vmax.bf16 %v19235_v28, %v9534_v3  ;;  %v3942_v61 = vrot.slane %v19449_v58, %v15123_v14 }
 0x459   : > { %11838 = vmatprep.mubr.bf16.mxu0 %v14558_v49  ;;  %v3954_v48 = vrot.slane %v19450_v4, %v15117_v12  ;;  %v12677_v19 = vmul.f32 %v18140_v18, %v12517_v1  ;;  %v12518_v57 = vmax.f32 %v12194_v38, 0.0  ;;  %v3958_v8 = vrot.slane %v19450_v4, %v15123_v14  ;;  %v12254_v39 = vpop.f32.mrf.mxu1 }
 0x45a   : > { %11839 = vmatmul.mubr.bf16.gmra.mxu0 %v14557_v60  ;;  %v7328_v30 = vpack.i.b16 %v3938_v21, %v3938_v21  ;;  %v14560_v41 = vcombine.high %v9788_v43, %v9790_v45  ;;  %v14559_v42 = vcombine.low %v9788_v43, %v9790_v45  ;;  %v7335_v63 = vpack.i.b16 %v3942_v61, %v3942_v61 }
 0x45b   : > { %v7356_v32 = vpack.i.b16 %v3954_v48, %v3954_v48  ;;  %v13110_v44 = vrot.slane %v12677_v19, 4  ;;  %v12678_v55 = vmul.f32 %v18140_v18, %v12518_v57  ;;  %v7363_v54 = vpack.i.b16 %v3958_v8, %v3958_v8 }
 0x45c   : > { %v7333_v22 = vrot.slane %v7328_v30, %v15117_v12  ;;  %12383 = vmatprep.mubr.bf16.mxu1 %v14560_v41  ;;  %v7340_v47 = vrot.slane %v7335_v63, %v15117_v12  ;;  %v3946_v21 = vrot.slane %v19449_v58, %v15120_v13  ;;  %v3950_v5 = vrot.slane %v19449_v58, %v15126_v15  ;;  %v19451_v58 = vld [vmem:[#allocation24_spill] sm:$0xff] }
 0x45d   : > { %v7361_v29 = vrot.slane %v7356_v32, %v15117_v12  ;;  %v13111_v49 = vmax.f32 %v12677_v19, %v13110_v44  ;;  %v13116_v3 = vrot.slane %v12678_v55, 4  ;;  %12384 = vmatmul.mubr.bf16.gmra.mxu1 %v14559_v42  ;;  %v7368_v60 = vrot.slane %v7363_v54, %v15117_v12 }
 0x45e   : > { %v3962_v24 = vrot.slane %v19450_v4, %v15120_v13  ;;  %v14304_v43 = vcombine.low %v7333_v22, %v7340_v47  ;;  %v3966_v1 = vrot.slane %v19450_v4, %v15126_v15  ;;  %v7342_v38 = vpack.i.b16 %v3946_v21, %v3946_v21  ;;  %v18339_v4 = vld [vmem:[%s16545_s13 + $0x20] sm:$0xff]  }
 0x45f   : > { %v7349_v45 = vpack.i.b16 %v3950_v5, %v3950_v5  ;;  %v13112_v61 = vrot.slane %v13111_v49, 2  ;;  %v13117_v48 = vmax.f32 %v12678_v55, %v13116_v3  ;;  %v14306_v57 = vcombine.low %v7361_v29, %v7368_v60  ;;  %v19452_v5 = vld [vmem:[#allocation39_spill] sm:$0xff]  ;;  %v18348_v3 = vpop.f32.mrf.mxu0  ;;  %v18350_v60 = vpop.f32.mrf.mxu1 }
 0x460   : > { %v7370_v8 = vpack.i.b16 %v3962_v24, %v3962_v24  ;;  %v9535_v19 = vsub.bf16 %v19451_v58, %v14304_v43  ;;  %v7347_v30 = vrot.slane %v7342_v38, %v15117_v12  ;;  %v7377_v42 = vpack.i.b16 %v3966_v1, %v3966_v1  ;;  %v19453_v43 = vld [vmem:[#allocation25_spill] sm:$0xff] }
 0x461   : > { %v7354_v41 = vrot.slane %v7349_v45, %v15117_v12  ;;  %v13113_v63 = vmax.f32 %v13111_v49, %v13112_v61  ;;  %v13118_v32 = vrot.slane %v13117_v48, 2  ;;  %v9537_v50 = vsub.bf16 %v19451_v58, %v14306_v57  ;;  %v19454_v38 = vld [vmem:[#allocation5_spill] sm:$0xff] }
 0x462   : > { %v7375_v39 = vrot.slane %v7370_v8, %v15117_v12  ;;  %v9791_v44 = vmax.bf16 %v19235_v28, %v9535_v19  ;;  %v7382_v55 = vrot.slane %v7377_v42, %v15117_v12  ;;  %v11652_v54 = vadd.f32 %v18126_v62, %v17938_v2  ;;  %v11714_v19 = vpop.f32.mrf.mxu0 }
 0x463   : > { %v14305_v22 = vcombine.low %v7347_v30, %v7354_v41  ;;  %v13114_v47 = vrot.slane %v13113_v63, 1  ;;  %v13119_v29 = vmax.f32 %v13117_v48, %v13118_v32  ;;  %v9793_v21 = vmax.bf16 %v19235_v28, %v9537_v50  ;;  %v12259_v30 = vpop.f32.mrf.mxu1  ;;  %v19455_v50 = vld [vmem:[#allocation41_spill] sm:$0xff] }
 0x464   : > { %v11657_v49 = vadd.f32 %v18126_v62, %v19452_v5  ;;  %v14307_v24 = vcombine.low %v7375_v39, %v7382_v55  ;;  %v12197_v45 = vadd.f32 %v19454_v38, %v11652_v54  ;;  %v18355_v61 = vunpack.c.l.bf16 %v18339_v4  ;;  %v19456_v54 = vld [vmem:[#allocation115_spill] sm:$0xff] }
 0x465   : > { %v9536_v1 = vsub.bf16 %v19453_v43, %v14305_v22  ;;  %v13115_v2 = vmax.f32 %v13113_v63, %v13114_v47  ;;  %v13120_v57 = vrot.slane %v13119_v29, 1  ;;  %v14562_v48 = vcombine.high %v9791_v44, %v9793_v21  ;;  %v18366_v47 = vpop.f32.mrf.mxu0 }
 0x466   : > { %v14561_v8 = vcombine.low %v9791_v44, %v9793_v21  ;;  %v9538_v41 = vsub.bf16 %v19453_v43, %v14307_v24  ;;  %v12519_v32 = vmax.f32 %v12197_v45, 0.0  ;;  %v12202_v39 = vadd.f32 %v19455_v50, %v11657_v49  ;;  %v18368_v21 = vpop.f32.mrf.mxu1 }
 0x467   : > { %v9792_v42 = vmax.bf16 %v19235_v28, %v9536_v1  ;;  %v13700_v55 = vsel %vm13648_vm7, %v13115_v2, %v18306_v20  ;;  %v13121_v22 = vmax.f32 %v13119_v29, %v13120_v57  ;;  %11846 = vmatprep.mubr.bf16.mxu0 %v14562_v48  ;;  %v3970_v63 = vrot.slane %v19456_v54, %v15117_v12  ;;  %v19458_v20 = vld [vmem:[#allocation116_spill] sm:$0xff]  ;;  %v11717_v57 = vpop.f32.mrf.mxu0 }
 0x468   : > { %v3974_v44 = vrot.slane %v19456_v54, %v15123_v14  ;;  %19457 = vst [vmem:[#allocation42_spill] sm:$0xff] %v18368_v21  ;;  %v9794_v5 = vmax.bf16 %v19235_v28, %v9538_v41  ;;  %v12679_v24 = vmul.f32 %v18140_v18, %v12519_v32  ;;  %11847 = vmatmul.mubr.bf16.gmra.mxu0 %v14561_v8  ;;  %v12520_v49 = vmax.f32 %v12202_v39, 0.0  ;;  %v12262_v48 = vpop.f32.mrf.mxu1 }
 0x469   : > { %v3986_v29 = vrot.slane %v19458_v20, %v15117_v12  ;;  %v18375_v1 = vsel %vm13650_vm8, %v13121_v22, %v13700_v55  ;;  %v3990_v38 = vrot.slane %v19458_v20, %v15123_v14  ;;  %v7384_v45 = vpack.i.b16 %v3970_v63, %v3970_v63  ;;  %v18382_v55 = vpop.f32.mrf.mxu0 }
 0x46a   : > { %v7391_v2 = vpack.i.b16 %v3974_v44, %v3974_v44  ;;  %v14564_v19 = vcombine.high %v9792_v42, %v9794_v5  ;;  %v13122_v30 = vrot.slane %v12679_v24, 4  ;;  %v12680_v41 = vmul.f32 %v18355_v61, %v12520_v49  ;;  %19459 = vst [vmem:[#allocation43_spill] sm:$0xff] %v18382_v55  ;;  %v18384_v22 = vpop.f32.mrf.mxu1 }
 0x46b   : > { %v14563_v18 = vcombine.low %v9792_v42, %v9794_v5  ;;  %v7389_v8 = vrot.slane %v7384_v45, %v15117_v12  ;;  %v7412_v50 = vpack.i.b16 %v3986_v29, %v3986_v29  ;;  %v7419_v39 = vpack.i.b16 %v3990_v38, %v3990_v38  ;;  %19460 = vst [vmem:[#allocation44_spill] sm:$0xff] %v18384_v22  ;;  %v11722_v45 = vpop.f32.mrf.mxu0 }
 0x46c   : > { %v7396_v32 = vrot.slane %v7391_v2, %v15117_v12  ;;  %12391 = vmatprep.mubr.bf16.mxu1 %v14564_v19  ;;  %v13123_v63 = vmax.f32 %v12679_v24, %v13122_v30  ;;  %v13128_v44 = vrot.slane %v12680_v41, 4  ;;  %v3978_v57 = vrot.slane %v19456_v54, %v15120_v13  ;;  %v12267_v2 = vpop.f32.mrf.mxu1 }
 0x46d   : > { %v3982_v49 = vrot.slane %v19456_v54, %v15126_v15  ;;  %12392 = vmatmul.mubr.bf16.gmra.mxu1 %v14563_v18  ;;  %v7417_v42 = vrot.slane %v7412_v50, %v15117_v12  ;;  %v7424_v5 = vrot.slane %v7419_v39, %v15117_v12  ;;  %v3994_v38 = vrot.slane %v19458_v20, %v15120_v13  ;;  %v18397_v50 = vpop.f32.mrf.mxu0 }
 0x46e   : > { %v14308_v29 = vcombine.low %v7389_v8, %v7396_v32  ;;  %v13124_v48 = vrot.slane %v13123_v63, 2  ;;  %v13129_v24 = vmax.f32 %v12680_v41, %v13128_v44  ;;  %v3998_v19 = vrot.slane %v19458_v20, %v15126_v15  ;;  %19461 = vst [vmem:[#allocation45_spill] sm:$0xff] %v18397_v50  ;;  %v18399_v39 = vpop.f32.mrf.mxu1 }
 0x46f   : > { %v7398_v30 = vpack.i.b16 %v3978_v57, %v3978_v57  ;;  %v14310_v22 = vcombine.low %v7417_v42, %v7424_v5  ;;  %v7405_v18 = vpack.i.b16 %v3982_v49, %v3982_v49  ;;  %v7426_v55 = vpack.i.b16 %v3994_v38, %v3994_v38  ;;  %19462 = vst [vmem:[#allocation6_spill] sm:$0xff] %v18399_v39  ;;  %v11725_v42 = vpop.f32.mrf.mxu0 }
 0x470   : > { %v9539_v54 = vsub.bf16 %v19451_v58, %v14308_v29  ;;  %v13125_v8 = vmax.f32 %v13123_v63, %v13124_v48  ;;  %v13130_v32 = vrot.slane %v13129_v24, 2  ;;  %v7433_v2 = vpack.i.b16 %v3998_v19, %v3998_v19  ;;  %v12270_v49 = vpop.f32.mrf.mxu1  ;;  %v19466_v42 = vld [vmem:[#allocation40_spill] sm:$0xff] }
 0x471   : > { %v7403_v45 = vrot.slane %v7398_v30, %v15117_v12  ;;  %v9541_v41 = vsub.bf16 %v19451_v58, %v14310_v22  ;;  %v7410_v20 = vrot.slane %v7405_v18, %v15117_v12  ;;  %v7431_v57 = vrot.slane %v7426_v55, %v15117_v12  ;;  %v19463_v30 = vld [vmem:[#allocation117_spill] sm:$0xff]  ;;  %v18414_v18 = vpop.f32.mrf.mxu0 }
 0x472   : > { %v9795_v44 = vmax.bf16 %v19235_v28, %v9539_v54  ;;  %v13126_v5 = vrot.slane %v13125_v8, 1  ;;  %v13131_v29 = vmax.f32 %v13129_v24, %v13130_v32  ;;  %v7438_v38 = vrot.slane %v7433_v2, %v15117_v12  ;;  %19464 = vst [vmem:[#allocation46_spill] sm:$0xff] %v18414_v18  ;;  %v18416_v55 = vpop.f32.mrf.mxu1 }
 0x473   : > { %v11660_v63 = vadd.f32 %v18126_v62, %v17993_v53  ;;  %v9797_v48 = vmax.bf16 %v19235_v28, %v9541_v41  ;;  %v14309_v19 = vcombine.low %v7403_v45, %v7410_v20  ;;  %v11665_v22 = vadd.f32 %v18126_v62, %v18021_v7  ;;  %19465 = vst [vmem:[#allocation7_spill] sm:$0xff] %v18416_v55  ;;  %v11730_v7 = vpop.f32.mrf.mxu0 }
 0x474   : > { %v4002_v54 = vrot.slane %v19463_v30, %v15117_v12  ;;  %v13127_v24 = vmax.f32 %v13125_v8, %v13126_v5  ;;  %v13132_v32 = vrot.slane %v13131_v29, 1  ;;  %v14311_v2 = vcombine.low %v7431_v57, %v7438_v38  ;;  %v12275_v39 = vpop.f32.mrf.mxu1 }
 0x475   : > { %v12205_v49 = vadd.f32 %v19466_v42, %v11660_v63  ;;  %v14566_v53 = vcombine.high %v9795_v44, %v9797_v48  ;;  %v9540_v41 = vsub.bf16 %v19453_v43, %v14309_v19  ;;  %v14565_v45 = vcombine.low %v9795_v44, %v9797_v48  ;;  %v18432_v39 = vpop.f32.mrf.mxu0 }
 0x476   : > { %v12210_v20 = vadd.f32 %v18023_v25, %v11665_v22  ;;  %v13702_v50 = vsel %vm13652_vm9, %v13127_v24, %v18375_v1  ;;  %v18423_v18 = vmax.f32 %v13131_v29, %v13132_v32  ;;  %v9542_v55 = vsub.bf16 %v19453_v43, %v14311_v2  ;;  %v19467_v25 = vld [vmem:[#allocation119_spill] sm:$0xff]  ;;  %19468 = vst [vmem:[#allocation47_spill] sm:$0xff] %v18432_v39  ;;  %v18434_v63 = vpop.f32.mrf.mxu1 }
 0x477   : > { %v12521_v8 = vmax.f32 %v12205_v49, 0.0  ;;  %13782 = vst [vmem:[%s16878_s15 + $0x38] sm:$0xff] %v13702_v50  ;;  %11854 = vmatprep.mubr.bf16.mxu0 %v14566_v53  ;;  %v9796_v57 = vmax.bf16 %v19235_v28, %v9540_v41  ;;  %v4006_v44 = vrot.slane %v19463_v30, %v15123_v14  ;;  %v4018_v38 = vrot.slane %v19467_v25, %v15117_v12  ;;  %v11733_v2 = vpop.f32.mrf.mxu0 }
 0x478   : > { %v12522_v5 = vmax.f32 %v12210_v20, 0.0  ;;  %19469 = vst [vmem:[#allocation49_spill] sm:$0xff] %v18434_v63  ;;  %v9798_v1 = vmax.bf16 %v19235_v28, %v9542_v55  ;;  %11855 = vmatmul.mubr.bf16.gmra.mxu0 %v14565_v45  ;;  %v4022_v50 = vrot.slane %v19467_v25, %v15123_v14  ;;  %v7440_v48 = vpack.i.b16 %v4002_v54, %v4002_v54  ;;  %v12278_v42 = vpop.f32.mrf.mxu1 }
 0x479   : > { %v12681_v29 = vmul.f32 %v18355_v61, %v12521_v8  ;;  %v7447_v22 = vpack.i.b16 %v4006_v44, %v4006_v44  ;;  %v7468_v24 = vpack.i.b16 %v4018_v38, %v4018_v38  ;;  %v4010_v32 = vrot.slane %v19463_v30, %v15120_v13  ;;  %v18446_v8 = vpop.f32.mrf.mxu0 }
 0x47a   : > { %v12682_v19 = vmul.f32 %v18355_v61, %v12522_v5  ;;  %v14568_v49 = vcombine.high %v9796_v57, %v9798_v1  ;;  %v14567_v41 = vcombine.low %v9796_v57, %v9798_v1  ;;  %v7445_v55 = vrot.slane %v7440_v48, %v15117_v12  ;;  %19470 = vst [vmem:[#allocation48_spill] sm:$0xff] %v18446_v8  ;;  %v18448_v5 = vpop.f32.mrf.mxu1 }
 0x47b   : > { %v13134_v53 = vrot.slane %v12681_v29, 4  ;;  %v7452_v45 = vrot.slane %v7447_v22, %v15117_v12  ;;  %v7473_v7 = vrot.slane %v7468_v24, %v15117_v12  ;;  %v7475_v54 = vpack.i.b16 %v4022_v50, %v4022_v50  ;;  %19471 = vst [vmem:[#allocation50_spill] sm:$0xff] %v18448_v5  ;;  %v11738_v2 = vpop.f32.mrf.mxu0 }
 0x47c   : > { %v13140_v20 = vrot.slane %v12682_v19, 4  ;;  %12399 = vmatprep.mubr.bf16.mxu1 %v14568_v49  ;;  %v4014_v38 = vrot.slane %v19463_v30, %v15126_v15  ;;  %v4026_v57 = vrot.slane %v19467_v25, %v15120_v13  ;;  %v4030_v1 = vrot.slane %v19467_v25, %v15126_v15  ;;  %v12283_v42 = vpop.f32.mrf.mxu1 }
 0x47d   : > { %v13135_v44 = vmax.f32 %v12681_v29, %v13134_v53  ;;  %12400 = vmatmul.mubr.bf16.gmra.mxu1 %v14567_v41  ;;  %v7480_v22 = vrot.slane %v7475_v54, %v15117_v12  ;;  %v14312_v50 = vcombine.low %v7445_v55, %v7452_v45  ;;  %v7454_v24 = vpack.i.b16 %v4010_v32, %v4010_v32  ;;  %v18459_v21 = vpop.f32.mrf.mxu0 }
 0x47e   : > { %v13141_v48 = vmax.f32 %v12682_v19, %v13140_v20  ;;  %v7461_v49 = vpack.i.b16 %v4014_v38, %v4014_v38  ;;  %v7482_v29 = vpack.i.b16 %v4026_v57, %v4026_v57  ;;  %v7489_v53 = vpack.i.b16 %v4030_v1, %v4030_v1  ;;  %v18461_v25 = vpop.f32.mrf.mxu1 }
 0x47f   : > { %v13136_v5 = vrot.slane %v13135_v44, 2  ;;  %v14314_v30 = vcombine.low %v7473_v7, %v7480_v22  ;;  %v9543_v8 = vsub.bf16 %v19451_v58, %v14312_v50  ;;  %v7459_v39 = vrot.slane %v7454_v24, %v15117_v12  ;;  %v11741_v38 = vpop.f32.mrf.mxu0 }
 0x480   : > { %v13142_v63 = vrot.slane %v13141_v48, 2  ;;  %v7466_v41 = vrot.slane %v7461_v49, %v15117_v12  ;;  %v7487_v32 = vrot.slane %v7482_v29, %v15117_v12  ;;  %v7494_v55 = vrot.slane %v7489_v53, %v15117_v12  ;;  %v12286_v57 = vpop.f32.mrf.mxu1 }
 0x481   : > { %v13137_v19 = vmax.f32 %v13135_v44, %v13136_v5  ;;  %v9545_v45 = vsub.bf16 %v19451_v58, %v14314_v30  ;;  %v9799_v7 = vmax.bf16 %v19235_v28, %v9543_v8  ;;  %v11668_v54 = vadd.f32 %v18126_v62, %v18036_v51  ;;  %v18476_v8 = vpop.f32.mrf.mxu0 }
 0x482   : > { %v13143_v20 = vmax.f32 %v13141_v48, %v13142_v63  ;;  %v14313_v22 = vcombine.low %v7459_v39, %v7466_v41  ;;  %v14315_v50 = vcombine.low %v7487_v32, %v7494_v55  ;;  %v11673_v5 = vadd.f32 %v18126_v62, %v18072_v26  ;;  %v19472_v48 = vld [vmem:[#allocation118_spill] sm:$0xff]  ;;  %v18478_v42 = vpop.f32.mrf.mxu1 }
 0x483   : > { %v13138_v1 = vrot.slane %v13137_v19, 1  ;;  %v9801_v24 = vmax.bf16 %v19235_v28, %v9545_v45  ;;  %v12213_v63 = vadd.f32 %v18038_v31, %v11668_v54  ;;  %v4034_v2 = vrot.slane %v19472_v48, %v15117_v12  ;;  %v11746_v41 = vpop.f32.mrf.mxu0 }
 0x484   : > { %v13144_v44 = vrot.slane %v13143_v20, 1  ;;  %v9544_v49 = vsub.bf16 %v19453_v43, %v14313_v22  ;;  %v9546_v39 = vsub.bf16 %v19453_v43, %v14315_v50  ;;  %v12218_v29 = vadd.f32 %v18074_v40, %v11673_v5  ;;  %v12291_v31 = vpop.f32.mrf.mxu1 }
 0x485   : > { %v13139_v51 = vmax.f32 %v13137_v19, %v13138_v1  ;;  %v14570_v62 = vcombine.high %v9799_v7, %v9801_v24  ;;  %v12523_v53 = vmax.f32 %v12213_v63, 0.0  ;;  %v14569_v30 = vcombine.low %v9799_v7, %v9801_v24  ;;  %v19473_v7 = vld [vmem:[#allocation120_spill] sm:$0xff]  ;;  %v18495_v57 = vpop.f32.mrf.mxu0 }
 0x486   : > { %v13145_v26 = vmax.f32 %v13143_v20, %v13144_v44  ;;  %v9800_v55 = vmax.bf16 %v19235_v28, %v9544_v49  ;;  %v9802_v45 = vmax.bf16 %v19235_v28, %v9546_v39  ;;  %v12524_v19 = vmax.f32 %v12218_v29, 0.0 }
 0x487   : > { %v13703_v32 = vsel %vm13640_vm3, %v13139_v51, %v18423_v18  ;;  %11862 = vmatprep.mubr.bf16.mxu0 %v14570_v62  ;;  %v12683_v40 = vmul.f32 %v18355_v61, %v12523_v53  ;;  %v4038_v20 = vrot.slane %v19472_v48, %v15123_v14  ;;  %v4050_v38 = vrot.slane %v19473_v7, %v15117_v12  ;;  %v18497_v18 = vpop.f32.mrf.mxu1  ;;  %v11749_v49 = vpop.f32.mrf.mxu0 }
 0x488   : > { %v18488_v54 = vsel %vm13642_vm4, %v13145_v26, %v13703_v32  ;;  %v14572_v1 = vcombine.high %v9800_v55, %v9802_v45  ;;  %11863 = vmatmul.mubr.bf16.gmra.mxu0 %v14569_v30  ;;  %v12684_v22 = vmul.f32 %v18355_v61, %v12524_v19  ;;  %v14571_v50 = vcombine.low %v9800_v55, %v9802_v45 }
 0x489   : > { %v4054_v5 = vrot.slane %v19473_v7, %v15123_v14  ;;  %v13146_v44 = vrot.slane %v12683_v40, 4  ;;  %v7496_v24 = vpack.i.b16 %v4034_v2, %v4034_v2  ;;  %v7503_v63 = vpack.i.b16 %v4038_v20, %v4038_v20  ;;  %v12294_v39 = vpop.f32.mrf.mxu1  ;;  %v18509_v32 = vpop.f32.mrf.mxu0 }
 0x48a   : > { %v7524_v51 = vpack.i.b16 %v4050_v38, %v4050_v38  ;;  %12407 = vmatprep.mubr.bf16.mxu1 %v14572_v1  ;;  %v13152_v29 = vrot.slane %v12684_v22, 4  ;;  %v4042_v62 = vrot.slane %v19472_v48, %v15120_v13  ;;  %v4046_v53 = vrot.slane %v19472_v48, %v15126_v15 }
 0x48b   : > { %v7531_v26 = vpack.i.b16 %v4054_v5, %v4054_v5  ;;  %v13147_v30 = vmax.f32 %v12683_v40, %v13146_v44  ;;  %12408 = vmatmul.mubr.bf16.gmra.mxu1 %v14571_v50  ;;  %v7501_v41 = vrot.slane %v7496_v24, %v15117_v12  ;;  %v7508_v31 = vrot.slane %v7503_v63, %v15117_v12  ;;  %v18511_v55 = vpop.f32.mrf.mxu1  ;;  %v11754_v5 = vpop.f32.mrf.mxu0 }
 0x48c   : > { %v7529_v2 = vrot.slane %v7524_v51, %v15117_v12  ;;  %19474 = vst [vmem:[#allocation51_spill] sm:$0xff] %v18511_v55  ;;  %v13153_v45 = vmax.f32 %v12684_v22, %v13152_v29  ;;  %v4058_v20 = vrot.slane %v19473_v7, %v15120_v13  ;;  %v4062_v48 = vrot.slane %v19473_v7, %v15126_v15 }
 0x48d   : > { %v7536_v19 = vrot.slane %v7531_v26, %v15117_v12  ;;  %v13148_v40 = vrot.slane %v13147_v30, 2  ;;  %v14316_v38 = vcombine.low %v7501_v41, %v7508_v31  ;;  %v7510_v1 = vpack.i.b16 %v4042_v62, %v4042_v62  ;;  %v12299_v44 = vpop.f32.mrf.mxu1  ;;  %v18521_v55 = vpop.f32.mrf.mxu0 }
 0x48e   : > { %v7517_v50 = vpack.i.b16 %v4046_v53, %v4046_v53  ;;  %v13154_v24 = vrot.slane %v13153_v45, 2  ;;  %v7538_v51 = vpack.i.b16 %v4058_v20, %v4058_v20  ;;  %v7545_v49 = vpack.i.b16 %v4062_v48, %v4062_v48  ;;  %v18532_v20 = vld [vmem:[%s19053_s7] ss:$0 sm:$0xff] }
 0x48f   : > { %v14318_v63 = vcombine.low %v7529_v2, %v7536_v19  ;;  %v13149_v39 = vmax.f32 %v13147_v30, %v13148_v40  ;;  %v9547_v22 = vsub.bf16 %v19451_v58, %v14316_v38  ;;  %v7515_v29 = vrot.slane %v7510_v1, %v15117_v12  ;;  %v18523_v7 = vpop.f32.mrf.mxu1  ;;  %v11757_v40 = vpop.f32.mrf.mxu0 }
 0x490   : > { %v7522_v26 = vrot.slane %v7517_v50, %v15117_v12  ;;  %v13155_v41 = vmax.f32 %v13153_v45, %v13154_v24  ;;  %v7543_v53 = vrot.slane %v7538_v51, %v15117_v12  ;;  %v7550_v31 = vrot.slane %v7545_v49, %v15117_v12 }
 0x491   : > { %v9549_v62 = vsub.bf16 %v19451_v58, %v14318_v63  ;;  %v13150_v2 = vrot.slane %v13149_v39, 1  ;;  %v9803_v30 = vmax.bf16 %v19235_v28, %v9547_v22  ;;  %v11676_v48 = vadd.f32 %v18532_v20, %v18096_v0  ;;  %v12302_v45 = vpop.f32.mrf.mxu1  ;;  %v19475_v63 = vld [vmem:[#allocation121_spill] sm:$0xff]  ;;  %v18543_v49 = vpop.f32.mrf.mxu0 }
 0x492   : > { %v14317_v19 = vcombine.low %v7515_v29, %v7522_v26  ;;  %v13156_v38 = vrot.slane %v13155_v41, 1  ;;  %v14319_v1 = vcombine.low %v7543_v53, %v7550_v31  ;;  %v11681_v50 = vadd.f32 %v18532_v20, %v18133_v16 }
 0x493   : > { %v9805_v58 = vmax.bf16 %v19235_v28, %v9549_v62  ;;  %v13151_v5 = vmax.f32 %v13149_v39, %v13150_v2  ;;  %v12221_v24 = vadd.f32 %v18098_v11, %v11676_v48  ;;  %v4066_v51 = vrot.slane %v19475_v63, %v15117_v12  ;;  %v18545_v0 = vpop.f32.mrf.mxu1  ;;  %v11762_v31 = vpop.f32.mrf.mxu0 }
 0x494   : > { %v9548_v44 = vsub.bf16 %v19453_v43, %v14317_v19  ;;  %19476 = vst [vmem:[#allocation53_spill] sm:$0xff] %v18545_v0  ;;  %v13157_v22 = vmax.f32 %v13155_v41, %v13156_v38  ;;  %v9550_v26 = vsub.bf16 %v19453_v43, %v14319_v1  ;;  %v12226_v11 = vadd.f32 %v18135_v52, %v11681_v50 }
 0x495   : > { %v14574_v29 = vcombine.high %v9803_v30, %v9805_v58  ;;  %v14573_v62 = vcombine.low %v9803_v30, %v9805_v58  ;;  %v13705_v16 = vsel %vm13644_vm5, %v13151_v5, %v18488_v54  ;;  %v12525_v53 = vmax.f32 %v12221_v24, 0.0  ;;  %v12307_v2 = vpop.f32.mrf.mxu1  ;;  %v19477_v30 = vld [vmem:[#allocation123_spill] sm:$0xff]  ;;  %v18563_v38 = vpop.f32.mrf.mxu0 }
 0x496   : > { %v9804_v39 = vmax.bf16 %v19235_v28, %v9548_v44  ;;  %v18553_v19 = vsel %vm13646_vm6, %v13157_v22, %v13705_v16  ;;  %v9806_v41 = vmax.bf16 %v19235_v28, %v9550_v26  ;;  %v4070_v43 = vrot.slane %v19475_v63, %v15123_v14 }
 0x497   : > { %11870 = vmatprep.mubr.bf16.mxu0 %v14574_v29  ;;  %v4082_v48 = vrot.slane %v19477_v30, %v15117_v12  ;;  %v12685_v54 = vmul.f32 %v18355_v61, %v12525_v53  ;;  %v12526_v40 = vmax.f32 %v12226_v11, 0.0  ;;  %v4086_v52 = vrot.slane %v19477_v30, %v15123_v14  ;;  %v18565_v58 = vpop.f32.mrf.mxu1 }
 0x498   : > { %11871 = vmatmul.mubr.bf16.gmra.mxu0 %v14573_v62  ;;  %v7552_v45 = vpack.i.b16 %v4066_v51, %v4066_v51  ;;  %19478 = vst [vmem:[#allocation8_spill] sm:$0xff] %v18565_v58  ;;  %v14576_v1 = vcombine.high %v9804_v39, %v9806_v41  ;;  %v14575_v50 = vcombine.low %v9804_v39, %v9806_v41  ;;  %v11765_v62 = vpop.f32.mrf.mxu0 }
 0x499   : > { %v7559_v5 = vpack.i.b16 %v4070_v43, %v4070_v43  ;;  %v7580_v44 = vpack.i.b16 %v4082_v48, %v4082_v48  ;;  %v13158_v24 = vrot.slane %v12685_v54, 4  ;;  %v12686_v22 = vmul.f32 %v18355_v61, %v12526_v40  ;;  %v12310_v16 = vpop.f32.mrf.mxu1 }
 0x49a   : > { %v7557_v29 = vrot.slane %v7552_v45, %v15117_v12  ;;  %v7587_v26 = vpack.i.b16 %v4086_v52, %v4086_v52  ;;  %12415 = vmatprep.mubr.bf16.mxu1 %v14576_v1  ;;  %v4074_v11 = vrot.slane %v19475_v63, %v15120_v13  ;;  %v4078_v39 = vrot.slane %v19475_v63, %v15126_v15  ;;  %v18578_v48 = vpop.f32.mrf.mxu0 }
 0x49b   : > { %v7564_v53 = vrot.slane %v7559_v5, %v15117_v12  ;;  %v7585_v51 = vrot.slane %v7580_v44, %v15117_v12  ;;  %v13159_v31 = vmax.f32 %v12685_v54, %v13158_v24  ;;  %v13164_v2 = vrot.slane %v12686_v22, 4  ;;  %12416 = vmatmul.mubr.bf16.gmra.mxu1 %v14575_v50  ;;  %19479 = vst [vmem:[#allocation52_spill] sm:$0xff] %v18578_v48  ;;  %v18580_v40 = vpop.f32.mrf.mxu1 }
 0x49c   : > { %v7592_v41 = vrot.slane %v7587_v26, %v15117_v12  ;;  %v4090_v43 = vrot.slane %v19477_v30, %v15120_v13  ;;  %19480 = vst [vmem:[#allocation54_spill] sm:$0xff] %v18580_v40  ;;  %v4094_v45 = vrot.slane %v19477_v30, %v15126_v15  ;;  %v7566_v1 = vpack.i.b16 %v4074_v11, %v4074_v11  ;;  %v11770_v50 = vpop.f32.mrf.mxu0  ;;  %v19481_v26 = vld [vmem:[#allocation26_spill] sm:$0xff] }
 0x49d   : > { %v14320_v52 = vcombine.low %v7557_v29, %v7564_v53  ;;  %v7573_v5 = vpack.i.b16 %v4078_v39, %v4078_v39  ;;  %v13160_v44 = vrot.slane %v13159_v31, 2  ;;  %v13165_v63 = vmax.f32 %v12686_v22, %v13164_v2  ;;  %v12315_v62 = vpop.f32.mrf.mxu1 }
 0x49e   : > { %v14322_v54 = vcombine.low %v7585_v51, %v7592_v41  ;;  %v7594_v24 = vpack.i.b16 %v4090_v43, %v4090_v43  ;;  %v7571_v58 = vrot.slane %v7566_v1, %v15117_v12  ;;  %v7601_v0 = vpack.i.b16 %v4094_v45, %v4094_v45  ;;  %v18589_v11 = vpop.f32.mrf.mxu0 }
 0x49f   : > { %v9551_v16 = vsub.bf16 %v19481_v26, %v14320_v52  ;;  %v7578_v48 = vrot.slane %v7573_v5, %v15117_v12  ;;  %v13161_v40 = vmax.f32 %v13159_v31, %v13160_v44  ;;  %v13166_v29 = vrot.slane %v13165_v63, 2  ;;  %v18591_v22 = vpop.f32.mrf.mxu1 }
 0x4a0   : > { %v9553_v53 = vsub.bf16 %v19481_v26, %v14322_v54  ;;  %v7599_v30 = vrot.slane %v7594_v24, %v15117_v12  ;;  %v7606_v39 = vrot.slane %v7601_v0, %v15117_v12  ;;  %v11684_v41 = vadd.f32 %v18532_v20, %v18155_v37  ;;  %v11773_v1 = vpop.f32.mrf.mxu0  ;;  %v19482_v54 = vld [vmem:[#allocation27_spill] sm:$0xff] }
 0x4a1   : > { %v9807_v51 = vmax.bf16 %v19235_v28, %v9551_v16  ;;  %v14321_v2 = vcombine.low %v7571_v58, %v7578_v48  ;;  %v13162_v43 = vrot.slane %v13161_v40, 1  ;;  %v13167_v52 = vmax.f32 %v13165_v63, %v13166_v29  ;;  %v12318_v5 = vpop.f32.mrf.mxu1 }
 0x4a2   : > { %v9809_v31 = vmax.bf16 %v19235_v28, %v9553_v53  ;;  %v11689_v45 = vadd.f32 %v18532_v20, %v18189_v34  ;;  %v14323_v44 = vcombine.low %v7599_v30, %v7606_v39  ;;  %v12229_v50 = vadd.f32 %v18157_v33, %v11684_v41  ;;  %v18605_v63 = vpop.f32.mrf.mxu0 }
 0x4a3   : > { %v9552_v24 = vsub.bf16 %v19482_v54, %v14321_v2  ;;  %v18603_v0 = vunpack.c.h.bf16 %v18339_v4  ;;  %v13163_v58 = vmax.f32 %v13161_v40, %v13162_v43  ;;  %v13168_v48 = vrot.slane %v13167_v52, 1  ;;  %v18607_v16 = vpop.f32.mrf.mxu1  ;;  %v19483_v40 = vld [vmem:[#allocation122_spill] sm:$0xff] }
 0x4a4   : > { %v14578_v37 = vcombine.high %v9807_v51, %v9809_v31  ;;  %v14577_v62 = vcombine.low %v9807_v51, %v9809_v31  ;;  %v9554_v34 = vsub.bf16 %v19482_v54, %v14323_v44  ;;  %v12527_v53 = vmax.f32 %v12229_v50, 0.0  ;;  %v11778_v2 = vpop.f32.mrf.mxu0 }
 0x4a5   : > { %v9808_v29 = vmax.bf16 %v19235_v28, %v9552_v24  ;;  %v12234_v30 = vadd.f32 %v18191_v46, %v11689_v45  ;;  %v13707_v33 = vsel %vm13648_vm7, %v13163_v58, %v18553_v19  ;;  %v13169_v4 = vmax.f32 %v13167_v52, %v13168_v48  ;;  %v12323_v41 = vpop.f32.mrf.mxu1  ;;  %v19484_v46 = vld [vmem:[#allocation29_spill] sm:$0xff] }
 0x4a6   : > { %11878 = vmatprep.mubr.bf16.mxu0 %v14578_v37  ;;  %v4098_v39 = vrot.slane %v19483_v40, %v15117_v12  ;;  %v4102_v51 = vrot.slane %v19483_v40, %v15123_v14  ;;  %v9810_v43 = vmax.bf16 %v19235_v28, %v9554_v34  ;;  %v12687_v31 = vmul.f32 %v18355_v61, %v12527_v53  ;;  %v18627_v24 = vpop.f32.mrf.mxu0 }
 0x4a7   : > { %11879 = vmatmul.mubr.bf16.gmra.mxu0 %v14577_v62  ;;  %v12528_v1 = vmax.f32 %v12234_v30, 0.0  ;;  %v4114_v45 = vrot.slane %v19484_v46, %v15117_v12  ;;  %v18623_v19 = vsel %vm13650_vm8, %v13169_v4, %v13707_v33  ;;  %v4118_v52 = vrot.slane %v19484_v46, %v15123_v14  ;;  %v18629_v50 = vpop.f32.mrf.mxu1 }
 0x4a8   : > { %v7608_v5 = vpack.i.b16 %v4098_v39, %v4098_v39  ;;  %v7615_v44 = vpack.i.b16 %v4102_v51, %v4102_v51  ;;  %19485 = vst [vmem:[#allocation9_spill] sm:$0xff] %v18629_v50  ;;  %v14580_v58 = vcombine.high %v9808_v29, %v9810_v43  ;;  %v13170_v48 = vrot.slane %v12687_v31, 4  ;;  %v11781_v33 = vpop.f32.mrf.mxu0 }
 0x4a9   : > { %v12688_v61 = vmul.f32 %v18603_v0, %v12528_v1  ;;  %v14579_v37 = vcombine.low %v9808_v29, %v9810_v43  ;;  %v7636_v53 = vpack.i.b16 %v4114_v45, %v4114_v45  ;;  %v7643_v30 = vpack.i.b16 %v4118_v52, %v4118_v52  ;;  %v12326_v4 = vpop.f32.mrf.mxu1 }
 0x4aa   : > { %v7613_v62 = vrot.slane %v7608_v5, %v15117_v12  ;;  %v7620_v34 = vrot.slane %v7615_v44, %v15117_v12  ;;  %12423 = vmatprep.mubr.bf16.mxu1 %v14580_v58  ;;  %v13171_v39 = vmax.f32 %v12687_v31, %v13170_v48  ;;  %v4106_v2 = vrot.slane %v19483_v40, %v15120_v13 }
 0x4ab   : > { %v13176_v51 = vrot.slane %v12688_v61, 4  ;;  %v4110_v41 = vrot.slane %v19483_v40, %v15126_v15  ;;  %12424 = vmatmul.mubr.bf16.gmra.mxu1 %v14579_v37  ;;  %v7641_v29 = vrot.slane %v7636_v53, %v15117_v12  ;;  %v7648_v43 = vrot.slane %v7643_v30, %v15117_v12 }
 0x4ac   : > { %v14324_v1 = vcombine.low %v7613_v62, %v7620_v34  ;;  %v4122_v45 = vrot.slane %v19484_v46, %v15120_v13  ;;  %v13172_v52 = vrot.slane %v13171_v39, 2  ;;  %v4126_v31 = vrot.slane %v19484_v46, %v15126_v15  ;;  %v18644_v58 = vpop.f32.mrf.mxu0 }
 0x4ad   : > { %v13177_v5 = vmax.f32 %v12688_v61, %v13176_v51  ;;  %v7622_v44 = vpack.i.b16 %v4106_v2, %v4106_v2  ;;  %v14326_v48 = vcombine.low %v7641_v29, %v7648_v43  ;;  %v7629_v37 = vpack.i.b16 %v4110_v41, %v4110_v41 }
 0x4ae   : > { %v9555_v40 = vsub.bf16 %v19481_v26, %v14324_v1  ;;  %v7650_v33 = vpack.i.b16 %v4122_v45, %v4122_v45  ;;  %v13173_v53 = vmax.f32 %v13171_v39, %v13172_v52  ;;  %v7657_v34 = vpack.i.b16 %v4126_v31, %v4126_v31  ;;  %v11786_v30 = vpop.f32.mrf.mxu0  ;;  %v19487_v31 = vld [vmem:[#allocation28_spill] sm:$0xff] }
 0x4af   : > { %v13178_v4 = vrot.slane %v13177_v5, 2  ;;  %v7627_v62 = vrot.slane %v7622_v44, %v15117_v12  ;;  %v9557_v50 = vsub.bf16 %v19481_v26, %v14326_v48  ;;  %v7634_v46 = vrot.slane %v7629_v37, %v15117_v12 }
 0x4b0   : > { %v9811_v61 = vmax.bf16 %v19235_v28, %v9555_v40  ;;  %v7655_v51 = vrot.slane %v7650_v33, %v15117_v12  ;;  %v13174_v2 = vrot.slane %v13173_v53, 1  ;;  %v7662_v43 = vrot.slane %v7657_v34, %v15117_v12  ;;  %v18655_v41 = vpop.f32.mrf.mxu0 }
 0x4b1   : > { %v13179_v29 = vmax.f32 %v13177_v5, %v13178_v4  ;;  %v11692_v39 = vadd.f32 %v18532_v20, %v18210_v27  ;;  %19486 = vst [vmem:[#allocation55_spill] sm:$0xff] %v18655_v41  ;;  %v9813_v1 = vmax.bf16 %v19235_v28, %v9557_v50  ;;  %v14325_v45 = vcombine.low %v7627_v62, %v7634_v46  ;;  %v18662_v48 = vpop.f32.mrf.mxu1 }
 0x4b2   : > { %v11697_v52 = vadd.f32 %v18532_v20, %v18238_v17  ;;  %v4130_v44 = vrot.slane %v19487_v31, %v15117_v12  ;;  %v13175_v5 = vmax.f32 %v13173_v53, %v13174_v2  ;;  %v14327_v37 = vcombine.low %v7655_v51, %v7662_v43  ;;  %v11789_v27 = vpop.f32.mrf.mxu0 }
 0x4b3   : > { %v13180_v40 = vrot.slane %v13179_v29, 1  ;;  %v12237_v33 = vadd.f32 %v18212_v6, %v11692_v39  ;;  %v14582_v4 = vcombine.high %v9811_v61, %v9813_v1  ;;  %v9556_v34 = vsub.bf16 %v19482_v54, %v14325_v45  ;;  %v12331_v30 = vpop.f32.mrf.mxu1 }
 0x4b4   : > { %v14581_v50 = vcombine.low %v9811_v61, %v9813_v1  ;;  %v12242_v62 = vadd.f32 %v18240_v9, %v11697_v52  ;;  %v13709_v17 = vsel %vm13652_vm9, %v13175_v5, %v18623_v19  ;;  %v9558_v41 = vsub.bf16 %v19482_v54, %v14327_v37  ;;  %v19488_v61 = vld [vmem:[#allocation32_spill] sm:$0xff] }
 0x4b5   : > { %v18669_v46 = vmax.f32 %v13179_v29, %v13180_v40  ;;  %v12529_v53 = vmax.f32 %v12237_v33, 0.0  ;;  %13783 = vst [vmem:[%s16878_s15 + $0x40] sm:$0xff] %v13709_v17  ;;  %11886 = vmatprep.mubr.bf16.mxu0 %v14582_v4  ;;  %v9812_v6 = vmax.bf16 %v19235_v28, %v9556_v34  ;;  %v4134_v2 = vrot.slane %v19487_v31, %v15123_v14  ;;  %v18678_v43 = vpop.f32.mrf.mxu1 }
 0x4b6   : > { %v12530_v51 = vmax.f32 %v12242_v62, 0.0  ;;  %v4146_v9 = vrot.slane %v19488_v61, %v15117_v12  ;;  %19489 = vst [vmem:[#allocation57_spill] sm:$0xff] %v18678_v43  ;;  %v9814_v19 = vmax.bf16 %v19235_v28, %v9558_v41  ;;  %11887 = vmatmul.mubr.bf16.gmra.mxu0 %v14581_v50  ;;  %v4150_v39 = vrot.slane %v19488_v61, %v15123_v14 }
 0x4b7   : > { %v12689_v29 = vmul.f32 %v18603_v0, %v12529_v53  ;;  %v7664_v1 = vpack.i.b16 %v4130_v44, %v4130_v44  ;;  %v7671_v52 = vpack.i.b16 %v4134_v2, %v4134_v2  ;;  %v4138_v40 = vrot.slane %v19487_v31, %v15120_v13  ;;  %v12334_v37 = vpop.f32.mrf.mxu1 }
 0x4b8   : > { %v12690_v45 = vmul.f32 %v18603_v0, %v12530_v51  ;;  %v7692_v5 = vpack.i.b16 %v4146_v9, %v4146_v9  ;;  %v14584_v33 = vcombine.high %v9812_v6, %v9814_v19  ;;  %v14583_v4 = vcombine.low %v9812_v6, %v9814_v19 }
 0x4b9   : > { %v13182_v27 = vrot.slane %v12689_v29, 4  ;;  %v7669_v41 = vrot.slane %v7664_v1, %v15117_v12  ;;  %v7676_v50 = vrot.slane %v7671_v52, %v15117_v12  ;;  %v7699_v30 = vpack.i.b16 %v4150_v39, %v4150_v39 }
 0x4ba   : > { %v13188_v34 = vrot.slane %v12690_v45, 4  ;;  %v7697_v62 = vrot.slane %v7692_v5, %v15117_v12  ;;  %12431 = vmatprep.mubr.bf16.mxu1 %v14584_v33  ;;  %v4142_v17 = vrot.slane %v19487_v31, %v15126_v15  ;;  %v4154_v53 = vrot.slane %v19488_v61, %v15120_v13 }
 0x4bb   : > { %v13183_v44 = vmax.f32 %v12689_v29, %v13182_v27  ;;  %v4158_v51 = vrot.slane %v19488_v61, %v15126_v15  ;;  %12432 = vmatmul.mubr.bf16.gmra.mxu1 %v14583_v4  ;;  %v7704_v2 = vrot.slane %v7699_v30, %v15117_v12  ;;  %v14328_v9 = vcombine.low %v7669_v41, %v7676_v50 }
 0x4bc   : > { %v13189_v6 = vmax.f32 %v12690_v45, %v13188_v34  ;;  %v7678_v19 = vpack.i.b16 %v4138_v40, %v4138_v40  ;;  %v7685_v52 = vpack.i.b16 %v4142_v17, %v4142_v17  ;;  %v7706_v39 = vpack.i.b16 %v4154_v53, %v4154_v53  ;;  %v18697_v29 = vpop.f32.mrf.mxu0 }
 0x4bd   : > { %v13184_v1 = vrot.slane %v13183_v44, 2  ;;  %v7713_v5 = vpack.i.b16 %v4158_v51, %v4158_v51  ;;  %v14330_v31 = vcombine.low %v7697_v62, %v7704_v2  ;;  %v9559_v33 = vsub.bf16 %v19481_v26, %v14328_v9 }
 0x4be   : > { %v13190_v37 = vrot.slane %v13189_v6, 2  ;;  %v7683_v27 = vrot.slane %v7678_v19, %v15117_v12  ;;  %v7690_v61 = vrot.slane %v7685_v52, %v15117_v12  ;;  %v7711_v45 = vrot.slane %v7706_v39, %v15117_v12  ;;  %v11794_v40 = vpop.f32.mrf.mxu0  ;;  %v19490_v19 = vld [vmem:[#allocation30_spill] sm:$0xff] }
 0x4bf   : > { %v13185_v43 = vmax.f32 %v13183_v44, %v13184_v1  ;;  %v7718_v4 = vrot.slane %v7713_v5, %v15117_v12  ;;  %v9561_v34 = vsub.bf16 %v19481_v26, %v14330_v31  ;;  %v9815_v50 = vmax.bf16 %v19235_v28, %v9559_v33 }
 0x4c0   : > { %v13191_v41 = vmax.f32 %v13189_v6, %v13190_v37  ;;  %v11700_v62 = vadd.f32 %v18532_v20, %v18253_v59  ;;  %v14329_v17 = vcombine.low %v7683_v27, %v7690_v61  ;;  %v11705_v44 = vadd.f32 %v18532_v20, %v18289_v56  ;;  %v18710_v51 = vpop.f32.mrf.mxu0 }
 0x4c1   : > { %v13186_v30 = vrot.slane %v13185_v43, 1  ;;  %v14331_v53 = vcombine.low %v7711_v45, %v7718_v4  ;;  %v9817_v9 = vmax.bf16 %v19235_v28, %v9561_v34  ;;  %v4162_v1 = vrot.slane %v19490_v19, %v15117_v12  ;;  %v18716_v52 = vpop.f32.mrf.mxu1 }
 0x4c2   : > { %v13192_v2 = vrot.slane %v13191_v41, 1  ;;  %v12245_v6 = vadd.f32 %v18255_v36, %v11700_v62  ;;  %v9560_v59 = vsub.bf16 %v19482_v54, %v14329_v17  ;;  %v12250_v37 = vadd.f32 %v18291_v10, %v11705_v44  ;;  %v11797_v56 = vpop.f32.mrf.mxu0 }
 0x4c3   : > { %v13187_v39 = vmax.f32 %v13185_v43, %v13186_v30  ;;  %v9562_v5 = vsub.bf16 %v19482_v54, %v14331_v53  ;;  %v14586_v33 = vcombine.high %v9815_v50, %v9817_v9  ;;  %v14585_v61 = vcombine.low %v9815_v50, %v9817_v9  ;;  %v12339_v45 = vpop.f32.mrf.mxu1  ;;  %v19491_v50 = vld [vmem:[#allocation2_spill] sm:$0xff] }
 0x4c4   : > { %v13193_v31 = vmax.f32 %v13191_v41, %v13192_v2  ;;  %v12531_v27 = vmax.f32 %v12245_v6, 0.0  ;;  %v9816_v4 = vmax.bf16 %v19235_v28, %v9560_v59  ;;  %v12532_v43 = vmax.f32 %v12250_v37, 0.0 }
 0x4c5   : > { %v13710_v36 = vsel %vm13640_vm3, %v13187_v39, %v18669_v46  ;;  %v9818_v40 = vmax.bf16 %v19235_v28, %v9562_v5  ;;  %11894 = vmatprep.mubr.bf16.mxu0 %v14586_v33  ;;  %v4166_v41 = vrot.slane %v19490_v19, %v15123_v14  ;;  %v4178_v62 = vrot.slane %v19491_v50, %v15117_v12  ;;  %v18733_v30 = vpop.f32.mrf.mxu1 }
 0x4c6   : > { %v18726_v34 = vsel %vm13642_vm4, %v13193_v31, %v13710_v36  ;;  %v12691_v10 = vmul.f32 %v18603_v0, %v12531_v27  ;;  %11895 = vmatmul.mubr.bf16.gmra.mxu0 %v14585_v61  ;;  %v12692_v17 = vmul.f32 %v18603_v0, %v12532_v43  ;;  %v4182_v44 = vrot.slane %v19491_v50, %v15123_v14 }
 0x4c7   : > { %v14588_v46 = vcombine.high %v9816_v4, %v9818_v40  ;;  %v14587_v53 = vcombine.low %v9816_v4, %v9818_v40  ;;  %v7720_v9 = vpack.i.b16 %v4162_v1, %v4162_v1  ;;  %v7727_v6 = vpack.i.b16 %v4166_v41, %v4166_v41  ;;  %v12342_v59 = vpop.f32.mrf.mxu1 }
 0x4c8   : > { %v13194_v2 = vrot.slane %v12691_v10, 4  ;;  %v7748_v39 = vpack.i.b16 %v4178_v62, %v4178_v62  ;;  %v13200_v5 = vrot.slane %v12692_v17, 4  ;;  %v7755_v37 = vpack.i.b16 %v4182_v44, %v4182_v44 }
 0x4c9   : > { %12439 = vmatprep.mubr.bf16.mxu1 %v14588_v46  ;;  %v4170_v56 = vrot.slane %v19490_v19, %v15120_v13  ;;  %v4174_v31 = vrot.slane %v19490_v19, %v15126_v15  ;;  %v7725_v27 = vrot.slane %v7720_v9, %v15117_v12  ;;  %v7732_v14 = vrot.slane %v7727_v6, %v15117_v12 }
 0x4ca   : > { %v13195_v33 = vmax.f32 %v12691_v10, %v13194_v2  ;;  %12440 = vmatmul.mubr.bf16.gmra.mxu1 %v14587_v53  ;;  %v7753_v1 = vrot.slane %v7748_v39, %v15117_v12  ;;  %v13201_v61 = vmax.f32 %v12692_v17, %v13200_v5  ;;  %v7760_v45 = vrot.slane %v7755_v37, %v15117_v12 }
 0x4cb   : > { %v4186_v36 = vrot.slane %v19491_v50, %v15120_v13  ;;  %v4190_v4 = vrot.slane %v19491_v50, %v15126_v15  ;;  %v14332_v43 = vcombine.low %v7725_v27, %v7732_v14  ;;  %v7734_v19 = vpack.i.b16 %v4170_v56, %v4170_v56 }
 0x4cc   : > { %v13196_v40 = vrot.slane %v13195_v33, 2  ;;  %v7741_v10 = vpack.i.b16 %v4174_v31, %v4174_v31  ;;  %v13202_v41 = vrot.slane %v13201_v61, 2  ;;  %v14334_v62 = vcombine.low %v7753_v1, %v7760_v45  ;;  %v18750_v44 = vpop.f32.mrf.mxu0 }
 0x4cd   : > { %v7762_v46 = vpack.i.b16 %v4186_v36, %v4186_v36  ;;  %v7769_v53 = vpack.i.b16 %v4190_v4, %v4190_v4  ;;  %v9563_v17 = vsub.bf16 %v19481_v26, %v14332_v43  ;;  %v7739_v9 = vrot.slane %v7734_v19, %v15117_v12 }
 0x4ce   : > { %v13197_v2 = vmax.f32 %v13195_v33, %v13196_v40  ;;  %v7746_v13 = vrot.slane %v7741_v10, %v15117_v12  ;;  %v13203_v6 = vmax.f32 %v13201_v61, %v13202_v41  ;;  %v9565_v15 = vsub.bf16 %v19481_v26, %v14334_v62  ;;  %v11802_v59 = vpop.f32.mrf.mxu0  ;;  %v18774_v41 = vld [vmem:[%s16545_s13 + $0x28] sm:$0xff]  }
 0x4cf   : > { %v7767_v50 = vrot.slane %v7762_v46, %v15117_v12  ;;  %v7774_v39 = vrot.slane %v7769_v53, %v15117_v12  ;;  %v9819_v37 = vmax.bf16 %v19235_v28, %v9563_v17  ;;  %v11708_v31 = vadd.f32 %v18532_v20, %v18313_v35  ;;  %v18761_v33 = vpop.f32.mrf.mxu1  ;;  %v19492_v17 = vld [vmem:[#allocation42_spill] sm:$0xff] }
 0x4d0   : > { %v13198_v5 = vrot.slane %v13197_v2, 1  ;;  %v14333_v56 = vcombine.low %v7739_v9, %v7746_v13  ;;  %v13204_v27 = vrot.slane %v13203_v6, 1  ;;  %v9821_v14 = vmax.bf16 %v19235_v28, %v9565_v15  ;;  %v18766_v61 = vpop.f32.mrf.mxu0  ;;  %v19493_v13 = vld [vmem:[#allocation43_spill] sm:$0xff] }
 0x4d1   : > { %v14335_v1 = vcombine.low %v7767_v50, %v7774_v39  ;;  %v11713_v26 = vadd.f32 %v18532_v20, %v18348_v3  ;;  %v12253_v36 = vadd.f32 %v18315_v23, %v11708_v31  ;;  %v11716_v35 = vadd.f32 %v18532_v20, %v18366_v47  ;;  %v12347_v4 = vpop.f32.mrf.mxu1 }
 0x4d2   : > { %v13199_v12 = vmax.f32 %v13197_v2, %v13198_v5  ;;  %v9564_v45 = vsub.bf16 %v19482_v54, %v14333_v56  ;;  %v13205_v40 = vmax.f32 %v13203_v6, %v13204_v27  ;;  %v14590_v43 = vcombine.high %v9819_v37, %v9821_v14  ;;  %v11805_v62 = vpop.f32.mrf.mxu0  ;;  %v19498_v4 = vld [vmem:[#allocation47_spill] sm:$0xff] }
 0x4d3   : > { %v9566_v19 = vsub.bf16 %v19482_v54, %v14335_v1  ;;  %v14589_v10 = vcombine.low %v9819_v37, %v9821_v14  ;;  %v12533_v53 = vmax.f32 %v12253_v36, 0.0  ;;  %v12258_v23 = vadd.f32 %v18350_v60, %v11713_v26  ;;  %v18780_v2 = vpop.f32.mrf.mxu1  ;;  %v19494_v60 = vld [vmem:[#allocation45_spill] sm:$0xff]  ;;  %v19496_v1 = vld [vmem:[#allocation6_spill] sm:$0xff] }
 0x4d4   : > { %v13712_v3 = vsel %vm13644_vm5, %v13199_v12, %v18726_v34  ;;  %v9820_v46 = vmax.bf16 %v19235_v28, %v9564_v45  ;;  %11902 = vmatprep.mubr.bf16.mxu0 %v14590_v43  ;;  %v12261_v9 = vadd.f32 %v19492_v17, %v11716_v35  ;;  %v11721_v6 = vadd.f32 %v18532_v20, %v19493_v13  ;;  %v19497_v12 = vld [vmem:[#allocation46_spill] sm:$0xff]  ;;  %v19499_v43 = vld [vmem:[#allocation48_spill] sm:$0xff]  ;;  %v19501_v17 = vld [vmem:[#allocation49_spill] sm:$0xff] }
 0x4d5   : > { %v18783_v47 = vsel %vm13646_vm6, %v13205_v40, %v13712_v3  ;;  %v9822_v54 = vmax.bf16 %v19235_v28, %v9566_v19  ;;  %v12693_v34 = vmul.f32 %v18603_v0, %v12533_v53  ;;  %11903 = vmatmul.mubr.bf16.gmra.mxu0 %v14589_v10  ;;  %v12534_v15 = vmax.f32 %v12258_v23, 0.0  ;;  %v12350_v59 = vpop.f32.mrf.mxu1  ;;  %v19495_v28 = vld [vmem:[#allocation44_spill] sm:$0xff]  ;;  %v19502_v13 = vld [vmem:[#allocation50_spill] sm:$0xff] }
 0x4d6   : > { %v18791_v50 = vunpack.c.l.bf16 %v18774_v41  ;;  %v11724_v39 = vadd.f32 %v18532_v20, %v19494_v60  ;;  %v12535_v56 = vmax.f32 %v12261_v9, 0.0  ;;  %v12266_v31 = vadd.f32 %v19495_v28, %v11721_v6 }
 0x4d7   : > { %v14592_v5 = vcombine.high %v9820_v46, %v9822_v54  ;;  %v14591_v37 = vcombine.low %v9820_v46, %v9822_v54  ;;  %v13206_v27 = vrot.slane %v12693_v34, 4  ;;  %v12694_v14 = vmul.f32 %v18603_v0, %v12534_v15  ;;  %v19500_v46 = vld [vmem:[#allocation7_spill] sm:$0xff] }
 0x4d8   : > { %v12269_v26 = vadd.f32 %v19496_v1, %v11724_v39  ;;  %v11729_v45 = vadd.f32 %v18532_v20, %v19497_v12  ;;  %v12695_v36 = vmul.f32 %v18603_v0, %v12535_v56  ;;  %v12536_v35 = vmax.f32 %v12266_v31, 0.0 }
 0x4d9   : > { %12447 = vmatprep.mubr.bf16.mxu1 %v14592_v5  ;;  %v11732_v40 = vadd.f32 %v18532_v20, %v19498_v4  ;;  %v11737_v19 = vadd.f32 %v18532_v20, %v19499_v43  ;;  %v13207_v10 = vmax.f32 %v12693_v34, %v13206_v27  ;;  %v13212_v62 = vrot.slane %v12694_v14, 4 }
 0x4da   : > { %12448 = vmatmul.mubr.bf16.gmra.mxu1 %v14591_v37  ;;  %v12537_v3 = vmax.f32 %v12269_v26, 0.0  ;;  %v12274_v53 = vadd.f32 %v19500_v46, %v11729_v45  ;;  %v13218_v23 = vrot.slane %v12695_v36, 4  ;;  %v12696_v54 = vmul.f32 %v18791_v50, %v12536_v35 }
 0x4db   : > { %v12277_v9 = vadd.f32 %v19501_v17, %v11732_v40  ;;  %v12282_v0 = vadd.f32 %v19502_v13, %v11737_v19  ;;  %v13208_v6 = vrot.slane %v13207_v10, 2  ;;  %v13213_v15 = vmax.f32 %v12694_v14, %v13212_v62 }
 0x4dc   : > { %v12697_v60 = vmul.f32 %v18791_v50, %v12537_v3  ;;  %v12538_v39 = vmax.f32 %v12274_v53, 0.0  ;;  %v18810_v59 = vpop.f32.mrf.mxu0  ;;  %v13219_v34 = vmax.f32 %v12695_v36, %v13218_v23  ;;  %v13224_v5 = vrot.slane %v12696_v54, 4 }
 0x4dd   : > { %v12539_v37 = vmax.f32 %v12277_v9, 0.0  ;;  %v12540_v56 = vmax.f32 %v12282_v0, 0.0  ;;  %v13209_v28 = vmax.f32 %v13207_v10, %v13208_v6  ;;  %v13214_v31 = vrot.slane %v13213_v15, 2 }
 0x4de   : > { %v13230_v27 = vrot.slane %v12697_v60, 4  ;;  %v12698_v1 = vmul.f32 %v18791_v50, %v12538_v39  ;;  %v11810_v26 = vpop.f32.mrf.mxu0  ;;  %v13220_v12 = vrot.slane %v13219_v34, 2  ;;  %v13225_v45 = vmax.f32 %v12696_v54, %v13224_v5 }
 0x4df   : > { %v12699_v35 = vmul.f32 %v18791_v50, %v12539_v37  ;;  %v12700_v14 = vmul.f32 %v18791_v50, %v12540_v56  ;;  %v13210_v4 = vrot.slane %v13209_v28, 1  ;;  %v13215_v40 = vmax.f32 %v13213_v15, %v13214_v31  ;;  %v18815_v36 = vpop.f32.mrf.mxu1 }
 0x4e0   : > { %v13231_v43 = vmax.f32 %v12697_v60, %v13230_v27  ;;  %v13236_v19 = vrot.slane %v12698_v1, 4  ;;  %v18817_v62 = vpop.f32.mrf.mxu0  ;;  %v13221_v10 = vmax.f32 %v13219_v34, %v13220_v12  ;;  %v13226_v3 = vrot.slane %v13225_v45, 2 }
 0x4e1   : > { %v13242_v46 = vrot.slane %v12699_v35, 4  ;;  %v13248_v53 = vrot.slane %v12700_v14, 4  ;;  %v13211_v23 = vmax.f32 %v13209_v28, %v13210_v4  ;;  %v13216_v17 = vrot.slane %v13215_v40, 1  ;;  %v12355_v13 = vpop.f32.mrf.mxu1 }
 0x4e2   : > { %v13232_v9 = vrot.slane %v13231_v43, 2  ;;  %v13237_v54 = vmax.f32 %v12698_v1, %v13236_v19  ;;  %v11813_v0 = vpop.f32.mrf.mxu0  ;;  %v13222_v6 = vrot.slane %v13221_v10, 1  ;;  %v13227_v39 = vmax.f32 %v13225_v45, %v13226_v3 }
 0x4e3   : > { %v13243_v5 = vmax.f32 %v12699_v35, %v13242_v46  ;;  %v13249_v15 = vmax.f32 %v12700_v14, %v13248_v53  ;;  %v13714_v60 = vsel %vm13648_vm7, %v13211_v23, %v18783_v47  ;;  %v13217_v37 = vmax.f32 %v13215_v40, %v13216_v17  ;;  %v18821_v31 = vpop.f32.mrf.mxu1 }
 0x4e4   : > { %v13233_v56 = vmax.f32 %v13231_v43, %v13232_v9  ;;  %v13238_v34 = vrot.slane %v13237_v54, 2  ;;  %v13223_v27 = vmax.f32 %v13221_v10, %v13222_v6  ;;  %v13228_v28 = vrot.slane %v13227_v39, 1 }
 0x4e5   : > { %v13244_v26 = vrot.slane %v13243_v5, 2  ;;  %v13250_v12 = vrot.slane %v13249_v15, 2  ;;  %v13715_v1 = vsel %vm13650_vm8, %v13217_v37, %v13714_v60  ;;  %v11740_v45 = vadd.f32 %v18532_v20, %v18459_v21  ;;  %v12358_v35 = vpop.f32.mrf.mxu1 }
 0x4e6   : > { %v13234_v4 = vrot.slane %v13233_v56, 1  ;;  %v13239_v19 = vmax.f32 %v13237_v54, %v13238_v34  ;;  %v13716_v47 = vsel %vm13652_vm9, %v13223_v27, %v13715_v1  ;;  %v13229_v14 = vmax.f32 %v13227_v39, %v13228_v28 }
 0x4e7   : > { %v13245_v40 = vmax.f32 %v13243_v5, %v13244_v26  ;;  %v13251_v43 = vmax.f32 %v13249_v15, %v13250_v12  ;;  %13784 = vst [vmem:[%s16878_s15 + $0x48] sm:$0xff] %v13716_v47  ;;  %v12285_v10 = vadd.f32 %v18461_v25, %v11740_v45  ;;  %v11745_v53 = vadd.f32 %v18532_v20, %v18476_v8  ;;  %v19503_v15 = vld [vmem:[#allocation51_spill] sm:$0xff] }
 0x4e8   : > { %v13235_v3 = vmax.f32 %v13233_v56, %v13234_v4  ;;  %v13240_v46 = vrot.slane %v13239_v19, 1  ;;  %v11748_v9 = vadd.f32 %v18532_v20, %v18495_v57  ;;  %v11753_v21 = vadd.f32 %v18532_v20, %v18509_v32 }
 0x4e9   : > { %v13246_v23 = vrot.slane %v13245_v40, 1  ;;  %v13252_v17 = vrot.slane %v13251_v43, 1  ;;  %v12541_v0 = vmax.f32 %v12285_v10, 0.0  ;;  %v12290_v6 = vadd.f32 %v18478_v42, %v11745_v53 }
 0x4ea   : > { %v13717_v54 = vsel %vm13640_vm3, %v13235_v3, %v13229_v14  ;;  %v13241_v13 = vmax.f32 %v13239_v19, %v13240_v46  ;;  %v12293_v25 = vadd.f32 %v18497_v18, %v11748_v9  ;;  %v12298_v8 = vadd.f32 %v19503_v15, %v11753_v21  ;;  %v18839_v60 = vpop.f32.mrf.mxu0  ;;  %v19505_v3 = vld [vmem:[#allocation52_spill] sm:$0xff] }
 0x4eb   : > { %v13247_v39 = vmax.f32 %v13245_v40, %v13246_v23  ;;  %v13253_v5 = vmax.f32 %v13251_v43, %v13252_v17  ;;  %v12701_v57 = vmul.f32 %v18791_v50, %v12541_v0  ;;  %v12542_v56 = vmax.f32 %v12290_v6, 0.0  ;;  %v19504_v40 = vld [vmem:[#allocation53_spill] sm:$0xff]  ;;  %v19506_v23 = vld [vmem:[#allocation8_spill] sm:$0xff] }
 0x4ec   : > { %v13718_v37 = vsel %vm13642_vm4, %v13241_v13, %v13717_v54  ;;  %v18844_v32 = vunpack.c.h.bf16 %v18774_v41  ;;  %v12543_v27 = vmax.f32 %v12293_v25, 0.0  ;;  %v12544_v42 = vmax.f32 %v12298_v8, 0.0  ;;  %v11818_v18 = vpop.f32.mrf.mxu0  ;;  %v19507_v54 = vld [vmem:[#allocation54_spill] sm:$0xff] }
 0x4ed   : > { %v13719_v34 = vsel %vm13644_vm5, %v13247_v39, %v13718_v37  ;;  %v11756_v28 = vadd.f32 %v18532_v20, %v18521_v55  ;;  %v13254_v12 = vrot.slane %v12701_v57, 4  ;;  %v12702_v1 = vmul.f32 %v18791_v50, %v12542_v56 }
 0x4ee   : > { %v13720_v26 = vsel %vm13646_vm6, %v13253_v5, %v13719_v34  ;;  %v11761_v4 = vadd.f32 %v18532_v20, %v18543_v49  ;;  %v12703_v19 = vmul.f32 %v18791_v50, %v12543_v27  ;;  %v12704_v41 = vmul.f32 %v18844_v32, %v12544_v42  ;;  %v18858_v47 = vpop.f32.mrf.mxu0 }
 0x4ef   : > { %v12301_v45 = vadd.f32 %v18523_v7, %v11756_v28  ;;  %v11764_v35 = vadd.f32 %v18532_v20, %v18563_v38  ;;  %v13255_v55 = vmax.f32 %v12701_v57, %v13254_v12  ;;  %v13260_v14 = vrot.slane %v12702_v1, 4  ;;  %v18863_v10 = vpop.f32.mrf.mxu1 }
 0x4f0   : > { %v12306_v43 = vadd.f32 %v19504_v40, %v11761_v4  ;;  %v11769_v46 = vadd.f32 %v18532_v20, %v19505_v3  ;;  %v13266_v49 = vrot.slane %v12703_v19, 4  ;;  %v13272_v50 = vrot.slane %v12704_v41, 4  ;;  %v11821_v7 = vpop.f32.mrf.mxu0 }
 0x4f1   : > { %v12545_v53 = vmax.f32 %v12301_v45, 0.0  ;;  %v12309_v17 = vadd.f32 %v19506_v23, %v11764_v35  ;;  %v13256_v9 = vrot.slane %v13255_v55, 2  ;;  %v13261_v21 = vmax.f32 %v12702_v1, %v13260_v14  ;;  %v12363_v0 = vpop.f32.mrf.mxu1 }
 0x4f2   : > { %v12546_v38 = vmax.f32 %v12306_v43, 0.0  ;;  %v12314_v13 = vadd.f32 %v19507_v54, %v11769_v46  ;;  %v13267_v6 = vmax.f32 %v12703_v19, %v13266_v49  ;;  %v13273_v39 = vmax.f32 %v12704_v41, %v13272_v50 }
 0x4f3   : > { %v12705_v5 = vmul.f32 %v18844_v32, %v12545_v53  ;;  %v12547_v25 = vmax.f32 %v12309_v17, 0.0  ;;  %v13257_v20 = vmax.f32 %v13255_v55, %v13256_v9  ;;  %v13262_v15 = vrot.slane %v13261_v21, 2  ;;  %v18869_v57 = vpop.f32.mrf.mxu1 }
 0x4f4   : > { %v12706_v8 = vmul.f32 %v18844_v32, %v12546_v38  ;;  %v12548_v37 = vmax.f32 %v12314_v13, 0.0  ;;  %v13268_v56 = vrot.slane %v13267_v6, 2  ;;  %v13274_v34 = vrot.slane %v13273_v39, 2 }
 0x4f5   : > { %v13278_v27 = vrot.slane %v12705_v5, 4  ;;  %v12707_v42 = vmul.f32 %v18844_v32, %v12547_v25  ;;  %v13258_v28 = vrot.slane %v13257_v20, 1  ;;  %v13263_v18 = vmax.f32 %v13261_v21, %v13262_v15  ;;  %v12366_v4 = vpop.f32.mrf.mxu1 }
 0x4f6   : > { %v13284_v12 = vrot.slane %v12706_v8, 4  ;;  %v12708_v1 = vmul.f32 %v18844_v32, %v12548_v37  ;;  %v13269_v19 = vmax.f32 %v13267_v6, %v13268_v56  ;;  %v13275_v41 = vmax.f32 %v13273_v39, %v13274_v34 }
 0x4f7   : > { %v13279_v45 = vmax.f32 %v12705_v5, %v13278_v27  ;;  %v13290_v35 = vrot.slane %v12707_v42, 4  ;;  %v13259_v55 = vmax.f32 %v13257_v20, %v13258_v28  ;;  %v13264_v14 = vrot.slane %v13263_v18, 1  ;;  %v18880_v5 = vld [vmem:[%s19053_s7] ss:$0 sm:$0xff] }
 0x4f8   : > { %v13285_v40 = vmax.f32 %v12706_v8, %v13284_v12  ;;  %v13296_v43 = vrot.slane %v12708_v1, 4  ;;  %v13270_v3 = vrot.slane %v13269_v19, 1  ;;  %v13276_v46 = vrot.slane %v13275_v41, 1 }
 0x4f9   : > { %v13280_v49 = vrot.slane %v13279_v45, 2  ;;  %v13291_v50 = vmax.f32 %v12707_v42, %v13290_v35  ;;  %v13721_v53 = vsel %vm13648_vm7, %v13259_v55, %v13720_v26  ;;  %v13265_v23 = vmax.f32 %v13263_v18, %v13264_v14  ;;  %v18898_v35 = vld [vmem:[%s16545_s13 + $0x30] sm:$0xff]  }
 0x4fa   : > { %v13286_v17 = vrot.slane %v13285_v40, 2  ;;  %v13297_v7 = vmax.f32 %v12708_v1, %v13296_v43  ;;  %v13271_v9 = vmax.f32 %v13269_v19, %v13270_v3  ;;  %v13277_v21 = vmax.f32 %v13275_v41, %v13276_v46  ;;  %v18874_v13 = vpop.f32.mrf.mxu0  ;;  %v19508_v41 = vld [vmem:[#allocation9_spill] sm:$0xff] }
 0x4fb   : > { %v13281_v38 = vmax.f32 %v13279_v45, %v13280_v49  ;;  %v13292_v54 = vrot.slane %v13291_v50, 2  ;;  %v13722_v0 = vsel %vm13650_vm8, %v13265_v23, %v13721_v53  ;;  %v11772_v26 = vadd.f32 %v18880_v5, %v18589_v11 }
 0x4fc   : > { %v13287_v6 = vmax.f32 %v13285_v40, %v13286_v17  ;;  %v13298_v39 = vrot.slane %v13297_v7, 2  ;;  %v13723_v25 = vsel %vm13652_vm9, %v13271_v9, %v13722_v0  ;;  %v11777_v8 = vadd.f32 %v18880_v5, %v18605_v63  ;;  %v11826_v37 = vpop.f32.mrf.mxu0 }
 0x4fd   : > { %v13282_v20 = vrot.slane %v13281_v38, 1  ;;  %v13293_v15 = vmax.f32 %v13291_v50, %v13292_v54  ;;  %13785 = vst [vmem:[%s16878_s15 + $0x50] sm:$0xff] %v13723_v25  ;;  %v12317_v27 = vadd.f32 %v18591_v22, %v11772_v26  ;;  %v11780_v42 = vadd.f32 %v18880_v5, %v18627_v24 }
 0x4fe   : > { %v13288_v56 = vrot.slane %v13287_v6, 1  ;;  %v13299_v34 = vmax.f32 %v13297_v7, %v13298_v39  ;;  %v12322_v11 = vadd.f32 %v18607_v16, %v11777_v8  ;;  %v11785_v12 = vadd.f32 %v18880_v5, %v18644_v58  ;;  %v18894_v1 = vpop.f32.mrf.mxu0 }
 0x4ff   : > { %v13283_v28 = vmax.f32 %v13281_v38, %v13282_v20  ;;  %v13294_v18 = vrot.slane %v13293_v15, 1  ;;  %v12549_v19 = vmax.f32 %v12317_v27, 0.0  ;;  %v12325_v45 = vadd.f32 %v19508_v41, %v11780_v42  ;;  %v18900_v22 = vpop.f32.mrf.mxu1 }
 0x500   : > { %v13289_v63 = vmax.f32 %v13287_v6, %v13288_v56  ;;  %v13300_v4 = vrot.slane %v13299_v34, 1  ;;  %v12550_v14 = vmax.f32 %v12322_v11, 0.0  ;;  %v12330_v16 = vadd.f32 %v18662_v48, %v11785_v12  ;;  %v11829_v40 = vpop.f32.mrf.mxu0 }
 0x501   : > { %v13724_v24 = vsel %vm13640_vm3, %v13283_v28, %v13277_v21  ;;  %v13295_v55 = vmax.f32 %v13293_v15, %v13294_v18  ;;  %v12709_v3 = vmul.f32 %v18844_v32, %v12549_v19  ;;  %v12551_v46 = vmax.f32 %v12325_v45, 0.0  ;;  %v12371_v49 = vpop.f32.mrf.mxu1  ;;  %v19509_v21 = vld [vmem:[#allocation55_spill] sm:$0xff]  ;;  %v19510_v15 = vld [vmem:[#allocation57_spill] sm:$0xff] }
 0x502   : > { %v13725_v58 = vsel %vm13642_vm4, %v13289_v63, %v13724_v24  ;;  %v13301_v43 = vmax.f32 %v13299_v34, %v13300_v4  ;;  %v12710_v53 = vmul.f32 %v18844_v32, %v12550_v14  ;;  %v12552_v23 = vmax.f32 %v12330_v16, 0.0 }
 0x503   : > { %v13726_v50 = vsel %vm13644_vm5, %v13295_v55, %v13725_v58  ;;  %v18909_v17 = vunpack.c.l.bf16 %v18898_v35  ;;  %v13302_v9 = vrot.slane %v12709_v3, 4  ;;  %v12711_v48 = vmul.f32 %v18844_v32, %v12551_v46  ;;  %v18915_v54 = vpop.f32.mrf.mxu1 }
 0x504   : > { %v13727_v7 = vsel %vm13646_vm6, %v13301_v43, %v13726_v50  ;;  %v11788_v38 = vadd.f32 %v18880_v5, %v19509_v21  ;;  %v13308_v0 = vrot.slane %v12710_v53, 4  ;;  %v11793_v39 = vadd.f32 %v18880_v5, %v18697_v29 }
 0x505   : > { %v12712_v6 = vmul.f32 %v18909_v17, %v12552_v23  ;;  %v11796_v26 = vadd.f32 %v18880_v5, %v18710_v51  ;;  %v13303_v25 = vmax.f32 %v12709_v3, %v13302_v9  ;;  %v13314_v20 = vrot.slane %v12711_v48, 4  ;;  %v12374_v37 = vpop.f32.mrf.mxu1 }
 0x506   : > { %v12333_v8 = vadd.f32 %v19510_v15, %v11788_v38  ;;  %v11801_v32 = vadd.f32 %v18880_v5, %v18750_v44  ;;  %v13309_v56 = vmax.f32 %v12710_v53, %v13308_v0  ;;  %v12338_v27 = vadd.f32 %v18716_v52, %v11793_v39 }
 0x507   : > { %v13320_v34 = vrot.slane %v12712_v6, 4  ;;  %v12341_v42 = vadd.f32 %v18733_v30, %v11796_v26  ;;  %v13304_v28 = vrot.slane %v13303_v25, 2  ;;  %v13315_v18 = vmax.f32 %v12711_v48, %v13314_v20 }
 0x508   : > { %v12553_v29 = vmax.f32 %v12333_v8, 0.0  ;;  %v12346_v11 = vadd.f32 %v18761_v33, %v11801_v32  ;;  %v13310_v51 = vrot.slane %v13309_v56, 2  ;;  %v12554_v63 = vmax.f32 %v12338_v27, 0.0 }
 0x509   : > { %v13321_v12 = vmax.f32 %v12712_v6, %v13320_v34  ;;  %v12555_v4 = vmax.f32 %v12341_v42, 0.0  ;;  %v13305_v19 = vmax.f32 %v13303_v25, %v13304_v28  ;;  %v13316_v41 = vrot.slane %v13315_v18, 2 }
 0x50a   : > { %v12713_v44 = vmul.f32 %v18909_v17, %v12553_v29  ;;  %v12556_v45 = vmax.f32 %v12346_v11, 0.0  ;;  %v13311_v24 = vmax.f32 %v13309_v56, %v13310_v51  ;;  %v12714_v52 = vmul.f32 %v18909_v17, %v12554_v63  ;;  %v18931_v14 = vpop.f32.mrf.mxu0 }
 0x50b   : > { %v13322_v55 = vrot.slane %v13321_v12, 2  ;;  %v12715_v30 = vmul.f32 %v18909_v17, %v12555_v4  ;;  %v13306_v16 = vrot.slane %v13305_v19, 1  ;;  %v13317_v40 = vmax.f32 %v13315_v18, %v13316_v41 }
 0x50c   : > { %v13326_v33 = vrot.slane %v12713_v44, 4  ;;  %v12716_v58 = vmul.f32 %v18909_v17, %v12556_v45  ;;  %v13312_v43 = vrot.slane %v13311_v24, 1  ;;  %v13332_v46 = vrot.slane %v12714_v52, 4  ;;  %v11834_v50 = vpop.f32.mrf.mxu0 }
 0x50d   : > { %v13323_v3 = vmax.f32 %v13321_v12, %v13322_v55  ;;  %v13338_v49 = vrot.slane %v12715_v30, 4  ;;  %v13307_v53 = vmax.f32 %v13305_v19, %v13306_v16  ;;  %v13318_v23 = vrot.slane %v13317_v40, 1  ;;  %v18934_v21 = vpop.f32.mrf.mxu1 }
 0x50e   : > { %v13327_v9 = vmax.f32 %v12713_v44, %v13326_v33  ;;  %v13344_v48 = vrot.slane %v12716_v58, 4  ;;  %v13313_v38 = vmax.f32 %v13311_v24, %v13312_v43  ;;  %v13333_v6 = vmax.f32 %v12714_v52, %v13332_v46  ;;  %v18936_v26 = vpop.f32.mrf.mxu0 }
 0x50f   : > { %v13324_v0 = vrot.slane %v13323_v3, 1  ;;  %v13339_v39 = vmax.f32 %v12715_v30, %v13338_v49  ;;  %v13728_v25 = vsel %vm13648_vm7, %v13307_v53, %v13727_v7  ;;  %v13319_v20 = vmax.f32 %v13317_v40, %v13318_v23  ;;  %v12379_v32 = vpop.f32.mrf.mxu1 }
 0x510   : > { %v13328_v15 = vrot.slane %v13327_v9, 2  ;;  %v13345_v8 = vmax.f32 %v12716_v58, %v13344_v48  ;;  %v13729_v37 = vsel %vm13650_vm8, %v13313_v38, %v13728_v25  ;;  %v13334_v34 = vrot.slane %v13333_v6, 2  ;;  %v11837_v42 = vpop.f32.mrf.mxu0 }
 0x511   : > { %v13325_v56 = vmax.f32 %v13323_v3, %v13324_v0  ;;  %v13340_v27 = vrot.slane %v13339_v39, 2  ;;  %v13730_v28 = vsel %vm13652_vm9, %v13319_v20, %v13729_v37  ;;  %v11804_v11 = vadd.f32 %v18880_v5, %v18766_v61  ;;  %v18943_v51 = vpop.f32.mrf.mxu1 }
 0x512   : > { %v13329_v18 = vmax.f32 %v13327_v9, %v13328_v15  ;;  %v13346_v29 = vrot.slane %v13345_v8, 2  ;;  %13786 = vst [vmem:[%s16878_s15 + $0x58] sm:$0xff] %v13730_v28  ;;  %v13335_v7 = vmax.f32 %v13333_v6, %v13334_v34  ;;  %v11809_v63 = vadd.f32 %v18880_v5, %v18810_v59 }
 0x513   : > { %v13341_v12 = vmax.f32 %v13339_v39, %v13340_v27  ;;  %v11812_v4 = vadd.f32 %v18880_v5, %v18817_v62  ;;  %v12349_v44 = vadd.f32 %v18780_v2, %v11804_v11  ;;  %v11817_v45 = vadd.f32 %v18880_v5, %v18839_v60  ;;  %v12382_v24 = vpop.f32.mrf.mxu1 }
 0x514   : > { %v13330_v19 = vrot.slane %v13329_v18, 1  ;;  %v13347_v41 = vmax.f32 %v13345_v8, %v13346_v29  ;;  %v13336_v61 = vrot.slane %v13335_v7, 1  ;;  %v12354_v52 = vadd.f32 %v18815_v36, %v11809_v63 }
 0x515   : > { %v13342_v55 = vrot.slane %v13341_v12, 1  ;;  %v12357_v30 = vadd.f32 %v18821_v31, %v11812_v4  ;;  %v12557_v59 = vmax.f32 %v12349_v44, 0.0  ;;  %v12362_v33 = vadd.f32 %v18863_v10, %v11817_v45 }
 0x516   : > { %v13331_v16 = vmax.f32 %v13329_v18, %v13330_v19  ;;  %v13348_v40 = vrot.slane %v13347_v41, 1  ;;  %v13337_v62 = vmax.f32 %v13335_v7, %v13336_v61  ;;  %v12558_v43 = vmax.f32 %v12354_v52, 0.0 }
 0x517   : > { %v13343_v58 = vmax.f32 %v13341_v12, %v13342_v55  ;;  %v12559_v3 = vmax.f32 %v12357_v30, 0.0  ;;  %v12717_v60 = vmul.f32 %v18909_v17, %v12557_v59  ;;  %v12560_v49 = vmax.f32 %v12362_v33, 0.0 }
 0x518   : > { %v13731_v2 = vsel %vm13640_vm3, %v13331_v16, %v13325_v56  ;;  %v13349_v46 = vmax.f32 %v13347_v41, %v13348_v40  ;;  %v12718_v36 = vmul.f32 %v18909_v17, %v12558_v43  ;;  %v18962_v53 = vunpack.c.h.bf16 %v18898_v35 }
 0x519   : > { %v13732_v50 = vsel %vm13642_vm4, %v13337_v62, %v13731_v2  ;;  %v12719_v31 = vmul.f32 %v18909_v17, %v12559_v3  ;;  %v13350_v23 = vrot.slane %v12717_v60, 4  ;;  %v11820_v9 = vadd.f32 %v18880_v5, %v18858_v47 }
 0x51a   : > { %v13733_v10 = vsel %vm13644_vm5, %v13343_v58, %v13732_v50  ;;  %v11825_v48 = vadd.f32 %v18880_v5, %v18874_v13  ;;  %v11840_v38 = vpop.f32.mrf.mxu0  ;;  %v13356_v6 = vrot.slane %v12718_v36, 4  ;;  %v11828_v20 = vadd.f32 %v18880_v5, %v18894_v1 }
 0x51b   : > { %v13734_v0 = vsel %vm13646_vm6, %v13349_v46, %v13733_v10  ;;  %v13362_v39 = vrot.slane %v12719_v31, 4  ;;  %v13351_v25 = vmax.f32 %v12717_v60, %v13350_v23  ;;  %v12365_v17 = vadd.f32 %v18869_v57, %v11820_v9 }
 0x51c   : > { %v12370_v35 = vadd.f32 %v18900_v22, %v11825_v48  ;;  %v11842_v15 = vpop.f32.mrf.mxu0  ;;  %v13357_v8 = vmax.f32 %v12718_v36, %v13356_v6  ;;  %v12720_v47 = vmul.f32 %v18962_v53, %v12560_v49  ;;  %v11833_v13 = vadd.f32 %v18880_v5, %v18931_v14 }
 0x51d   : > { %v13363_v32 = vmax.f32 %v12719_v31, %v13362_v39  ;;  %v13352_v37 = vrot.slane %v13351_v25, 2  ;;  %v12561_v56 = vmax.f32 %v12365_v17, 0.0  ;;  %v12373_v27 = vadd.f32 %v18915_v54, %v11828_v20  ;;  %v12385_v42 = vpop.f32.mrf.mxu1 }
 0x51e   : > { %v12562_v34 = vmax.f32 %v12370_v35, 0.0  ;;  %v11843_v57 = vpop.f32.mrf.mxu0  ;;  %v13358_v28 = vrot.slane %v13357_v8, 2  ;;  %v12378_v18 = vadd.f32 %v18934_v21, %v11833_v13  ;;  %v13368_v19 = vrot.slane %v12720_v47, 4 }
 0x51f   : > { %v13364_v22 = vrot.slane %v13363_v32, 2  ;;  %v13353_v1 = vmax.f32 %v13351_v25, %v13352_v37  ;;  %v12721_v29 = vmul.f32 %v18962_v53, %v12561_v56  ;;  %v12563_v7 = vmax.f32 %v12373_v27, 0.0  ;;  %v12387_v12 = vpop.f32.mrf.mxu1 }
 0x520   : > { %v12722_v11 = vmul.f32 %v18962_v53, %v12562_v34  ;;  %v11845_v63 = vpop.f32.mrf.mxu0  ;;  %v13359_v14 = vmax.f32 %v13357_v8, %v13358_v28  ;;  %v12564_v41 = vmax.f32 %v12378_v18, 0.0  ;;  %v13369_v2 = vmax.f32 %v12720_v47, %v13368_v19 }
 0x521   : > { %v13365_v4 = vmax.f32 %v13363_v32, %v13364_v22  ;;  %v13354_v44 = vrot.slane %v13353_v1, 1  ;;  %v13374_v54 = vrot.slane %v12721_v29, 4  ;;  %v12723_v24 = vmul.f32 %v18962_v53, %v12563_v7  ;;  %v12388_v61 = vpop.f32.mrf.mxu1 }
 0x522   : > { %v13380_v45 = vrot.slane %v12722_v11, 4  ;;  %v13360_v55 = vrot.slane %v13359_v14, 1  ;;  %v12724_v52 = vmul.f32 %v18962_v53, %v12564_v41  ;;  %v11836_v50 = vadd.f32 %v18880_v5, %v18936_v26 }
 0x523   : > { %v13366_v21 = vrot.slane %v13365_v4, 1  ;;  %v13355_v30 = vmax.f32 %v13353_v1, %v13354_v44  ;;  %v13375_v16 = vmax.f32 %v12721_v29, %v13374_v54  ;;  %v13386_v40 = vrot.slane %v12723_v24, 4  ;;  %v12390_v59 = vpop.f32.mrf.mxu1 }
 0x524   : > { %v13361_v33 = vmax.f32 %v13359_v14, %v13360_v55  ;;  %v13381_v58 = vmax.f32 %v12722_v11, %v13380_v45  ;;  %v13392_v43 = vrot.slane %v12724_v52, 4  ;;  %v12381_v23 = vadd.f32 %v18943_v51, %v11836_v50 }
 0x525   : > { %v13367_v62 = vmax.f32 %v13365_v4, %v13366_v21  ;;  %v13735_v3 = vsel %vm13648_vm7, %v13355_v30, %v13734_v0  ;;  %v13387_v46 = vmax.f32 %v12723_v24, %v13386_v40  ;;  %v13376_v31 = vrot.slane %v13375_v16, 2 }
 0x526   : > { %v13736_v60 = vsel %vm13650_vm8, %v13361_v33, %v13735_v3  ;;  %v13393_v49 = vmax.f32 %v12724_v52, %v13392_v43  ;;  %v13382_v10 = vrot.slane %v13381_v58, 2  ;;  %v11841_v9 = vadd.f32 %v18880_v5, %v11840_v38 }
 0x527   : > { %v13737_v36 = vsel %vm13652_vm9, %v13367_v62, %v13736_v60  ;;  %v11844_v48 = vadd.f32 %v18880_v5, %v11843_v57  ;;  %v13370_v6 = vrot.slane %v13369_v2, 2  ;;  %v13388_v39 = vrot.slane %v13387_v46, 2 }
 0x528   : > { %13787 = vst [vmem:[%s16878_s15 + $0x60] sm:$0xff] %v13737_v36  ;;  %v18992_v0 = vpop.f32.mrf.mxu0  ;;  %v13394_v25 = vrot.slane %v13393_v49, 2  ;;  %v12565_v17 = vmax.f32 %v12381_v23, 0.0  ;;  %v12386_v35 = vadd.f32 %v12385_v42, %v11841_v9  ;;  %v13377_v15 = vmax.f32 %v13375_v16, %v13376_v31 }
 0x529   : > { %v12389_v20 = vadd.f32 %v12388_v61, %v11844_v48  ;;  %v13383_v8 = vmax.f32 %v13381_v58, %v13382_v10  ;;  %v13371_v37 = vmax.f32 %v13369_v2, %v13370_v6  ;;  %v13389_v38 = vmax.f32 %v13387_v46, %v13388_v39 }
 0x52a   : > { %v11850_v26 = vpop.f32.mrf.mxu0  ;;  %v12725_v32 = vmul.f32 %v18962_v53, %v12565_v17  ;;  %v12566_v47 = vmax.f32 %v12386_v35, 0.0  ;;  %v13395_v34 = vmax.f32 %v13393_v49, %v13394_v25  ;;  %v13378_v22 = vrot.slane %v13377_v15, 1 }
 0x52b   : > { %v12567_v13 = vmax.f32 %v12389_v20, 0.0  ;;  %v13384_v1 = vrot.slane %v13383_v8, 1  ;;  %v13372_v7 = vrot.slane %v13371_v37, 1  ;;  %v13390_v12 = vrot.slane %v13389_v38, 1 }
 0x52c   : > { %v11851_v51 = vpop.f32.mrf.mxu0  ;;  %v13398_v27 = vrot.slane %v12725_v32, 4  ;;  %v12726_v57 = vmul.f32 %v18962_v53, %v12566_v47  ;;  %v13396_v4 = vrot.slane %v13395_v34, 1  ;;  %v13379_v44 = vmax.f32 %v13377_v15, %v13378_v22 }
 0x52d   : > { %v12393_v56 = vpop.f32.mrf.mxu1  ;;  %v12727_v42 = vmul.f32 %v18962_v53, %v12567_v13  ;;  %v13385_v24 = vmax.f32 %v13383_v8, %v13384_v1  ;;  %v13373_v21 = vmax.f32 %v13371_v37, %v13372_v7  ;;  %v13391_v52 = vmax.f32 %v13389_v38, %v13390_v12 }
 0x52e   : > { %v11853_v28 = vpop.f32.mrf.mxu0  ;;  %v13399_v29 = vmax.f32 %v12725_v32, %v13398_v27  ;;  %v13404_v11 = vrot.slane %v12726_v57, 4  ;;  %v13397_v30 = vmax.f32 %v13395_v34, %v13396_v4  ;;  %v11852_v35 = vadd.f32 %v18880_v5, %v11851_v51  ;;  %v19012_v27 = vld [vmem:[%s16545_s13 + $0x38] sm:$0xff]  }
 0x52f   : > { %v12395_v18 = vpop.f32.mrf.mxu1  ;;  %v13410_v63 = vrot.slane %v12727_v42, 4  ;;  %v13738_v59 = vsel %vm13640_vm3, %v13379_v44, %v13373_v21  ;;  %v11849_v26 = vadd.f32 %v18880_v5, %v18992_v0 }
 0x530   : > { %v13400_v19 = vrot.slane %v13399_v29, 2  ;;  %v13405_v41 = vmax.f32 %v12726_v57, %v13404_v11  ;;  %v13739_v62 = vsel %vm13642_vm4, %v13385_v24, %v13738_v59 }
 0x531   : > { %v12396_v14 = vpop.f32.mrf.mxu1  ;;  %v13411_v54 = vmax.f32 %v12727_v42, %v13410_v63  ;;  %v13740_v2 = vsel %vm13644_vm5, %v13391_v52, %v13739_v62  ;;  %v12394_v37 = vadd.f32 %v12393_v56, %v11849_v26 }
 0x532   : > { %v13401_v61 = vmax.f32 %v13399_v29, %v13400_v19  ;;  %v13406_v55 = vrot.slane %v13405_v41, 2  ;;  %v13741_v60 = vsel %vm13646_vm6, %v13397_v30, %v13740_v2  ;;  %v12397_v8 = vadd.f32 %v12396_v14, %v11852_v35 }
 0x533   : > { %v12398_v45 = vpop.f32.mrf.mxu1  ;;  %v13412_v53 = vrot.slane %v13411_v54, 2  ;;  %v12568_v1 = vmax.f32 %v12394_v37, 0.0  ;;  %v14689_v29 = vunpack.c.l.bf16 %v19012_v27 }
 0x534   : > { %v13402_v16 = vrot.slane %v13401_v61, 1  ;;  %v13407_v40 = vmax.f32 %v13405_v41, %v13406_v55  ;;  %v12569_v28 = vmax.f32 %v12397_v8, 0.0 }
 0x535   : > { %v13413_v33 = vmax.f32 %v13411_v54, %v13412_v53  ;;  %v12728_v41 = vmul.f32 %v14689_v29, %v12568_v1 }
 0x536   : > { %v13403_v58 = vmax.f32 %v13401_v61, %v13402_v16  ;;  %v13408_v43 = vrot.slane %v13407_v40, 1  ;;  %v12729_v56 = vmul.f32 %v14689_v29, %v12569_v28 }
 0x537   : > { %v13414_v46 = vrot.slane %v13413_v33, 1  ;;  %v13416_v21 = vrot.slane %v12728_v41, 4 }
 0x538   : > { %v11856_v3 = vpop.f32.mrf.mxu0  ;;  %v13409_v49 = vmax.f32 %v13407_v40, %v13408_v43  ;;  %v13742_v36 = vsel %vm13648_vm7, %v13403_v58, %v13741_v60  ;;  %v13422_v24 = vrot.slane %v12729_v56, 4 }
 0x539   : > { %v13415_v31 = vmax.f32 %v13413_v33, %v13414_v46  ;;  %v11857_v20 = vadd.f32 %v18880_v5, %v11856_v3  ;;  %v13417_v58 = vmax.f32 %v12728_v41, %v13416_v21 }
 0x53a   : > { %v11858_v50 = vpop.f32.mrf.mxu0  ;;  %v13743_v10 = vsel %vm13650_vm8, %v13409_v49, %v13742_v36  ;;  %v13423_v16 = vmax.f32 %v12729_v56, %v13422_v24 }
 0x53b   : > { %v13744_v9 = vsel %vm13652_vm9, %v13415_v31, %v13743_v10 }
 0x53c   : > { %v11859_v23 = vpop.f32.mrf.mxu0  ;;  %13788 = vst [vmem:[%s16878_s15 + $0x68] sm:$0xff] %v13744_v9  ;;  %v13424_v60 = vrot.slane %v13423_v16, 2  ;;  %v13418_v9 = vrot.slane %v13417_v58, 2 }
 0x53d   : > { %v12401_v48 = vpop.f32.mrf.mxu1  ;;  %v11860_v15 = vadd.f32 %v18880_v5, %v11859_v23 }
 0x53e   : > { %v11861_v6 = vpop.f32.mrf.mxu0  ;;  %v12402_v47 = vadd.f32 %v12401_v48, %v11857_v20 }
 0x53f   : > { %v12403_v39 = vpop.f32.mrf.mxu1 }
 0x540   : > { %v12570_v42 = vmax.f32 %v12402_v47, 0.0 }
 0x541   : > { %v12404_v25 = vpop.f32.mrf.mxu1 }
 0x542   : > { %v12405_v38 = vadd.f32 %v12404_v25, %v11860_v15  ;;  %v12730_v4 = vmul.f32 %v14689_v29, %v12570_v42 }
 0x543   : > { %v12406_v17 = vpop.f32.mrf.mxu1 }
 0x544   : > { %v12571_v11 = vmax.f32 %v12405_v38, 0.0  ;;  %v13428_v55 = vrot.slane %v12730_v4, 4  ;;  %v13425_v17 = vmax.f32 %v13423_v16, %v13424_v60 }
 0x546   : > { %v12731_v44 = vmul.f32 %v14689_v29, %v12571_v11  ;;  %v13429_v33 = vmax.f32 %v12730_v4, %v13428_v55 }
 0x548   : > { %v11864_v32 = vpop.f32.mrf.mxu0  ;;  %v13434_v52 = vrot.slane %v12731_v44, 4  ;;  %v13430_v31 = vrot.slane %v13429_v33, 2 }
 0x549   : > { %v11865_v13 = vadd.f32 %v18880_v5, %v11864_v32  ;;  %v13419_v32 = vmax.f32 %v13417_v58, %v13418_v9 }
 0x54a   : > { %v11866_v34 = vpop.f32.mrf.mxu0  ;;  %v13435_v43 = vmax.f32 %v12731_v44, %v13434_v52  ;;  %v13431_v15 = vmax.f32 %v13429_v33, %v13430_v31 }
 0x54b   : > { %v12409_v57 = vpop.f32.mrf.mxu1  ;;  %v13426_v34 = vrot.slane %v13425_v17, 1  ;;  %v13420_v42 = vrot.slane %v13419_v32, 1 }
 0x54c   : > { %v12410_v51 = vadd.f32 %v12409_v57, %v11865_v13  ;;  %v11867_v22 = vpop.f32.mrf.mxu0  ;;  %v13436_v48 = vrot.slane %v13435_v43, 2 }
 0x54d   : > { %v12411_v18 = vpop.f32.mrf.mxu1  ;;  %v11868_v0 = vadd.f32 %v18880_v5, %v11867_v22  ;;  %v13432_v22 = vrot.slane %v13431_v15, 1  ;;  %v13421_v41 = vmax.f32 %v13419_v32, %v13420_v42  ;;  %v14690_v42 = vunpack.c.h.bf16 %v19012_v27 }
 0x54e   : > { %v11869_v7 = vpop.f32.mrf.mxu0  ;;  %v12572_v12 = vmax.f32 %v12410_v51, 0.0  ;;  %v13437_v47 = vmax.f32 %v13435_v43, %v13436_v48 }
 0x54f   : > { %v12412_v63 = vpop.f32.mrf.mxu1 }
 0x550   : > { %v12413_v14 = vadd.f32 %v12412_v63, %v11868_v0  ;;  %v12732_v45 = vmul.f32 %v14689_v29, %v12572_v12  ;;  %v13438_v18 = vrot.slane %v13437_v47, 1  ;;  %v13427_v12 = vmax.f32 %v13425_v17, %v13426_v34 }
 0x551   : > { %v12414_v19 = vpop.f32.mrf.mxu1 }
 0x552   : > { %v12573_v54 = vmax.f32 %v12413_v14, 0.0  ;;  %v13440_v53 = vrot.slane %v12732_v45, 4  ;;  %v13433_v19 = vmax.f32 %v13431_v15, %v13432_v22  ;;  %v13439_v44 = vmax.f32 %v13437_v47, %v13438_v18 }
 0x553   : > { %v13745_v55 = vsel %vm13640_vm3, %v13427_v12, %v13421_v41 }
 0x554   : > { %v12733_v61 = vmul.f32 %v14689_v29, %v12573_v54  ;;  %v13441_v3 = vmax.f32 %v12732_v45, %v13440_v53 }
 0x556   : > { %v13446_v40 = vrot.slane %v12733_v61, 4  ;;  %v13442_v39 = vrot.slane %v13441_v3, 2 }
 0x558   : > { %v11872_v30 = vpop.f32.mrf.mxu0  ;;  %v13447_v49 = vmax.f32 %v12733_v61, %v13446_v40  ;;  %v13443_v38 = vmax.f32 %v13441_v3, %v13442_v39 }
 0x559   : > { %v11873_v59 = vadd.f32 %v18880_v5, %v11872_v30  ;;  %v13746_v30 = vsel %vm13642_vm4, %v13433_v19, %v13745_v55 }
 0x55a   : > { %v11874_v62 = vpop.f32.mrf.mxu0  ;;  %v13448_v35 = vrot.slane %v13447_v49, 2  ;;  %v13444_v7 = vrot.slane %v13443_v38, 1 }
 0x55b   : > { %v12417_v2 = vpop.f32.mrf.mxu1 }
 0x55c   : > { %v11875_v46 = vpop.f32.mrf.mxu0  ;;  %v12418_v50 = vadd.f32 %v12417_v2, %v11873_v59  ;;  %v13449_v57 = vmax.f32 %v13447_v49, %v13448_v35  ;;  %v13445_v61 = vmax.f32 %v13443_v38, %v13444_v7  ;;  %v13747_v59 = vsel %vm13644_vm5, %v13439_v44, %v13746_v30 }
 0x55d   : > { %v11876_v36 = vadd.f32 %v18880_v5, %v11875_v46  ;;  %v12419_v10 = vpop.f32.mrf.mxu1 }
 0x55e   : > { %v11877_v23 = vpop.f32.mrf.mxu0  ;;  %v12574_v6 = vmax.f32 %v12418_v50, 0.0  ;;  %v13450_v63 = vrot.slane %v13449_v57, 1  ;;  %v13748_v62 = vsel %vm13646_vm6, %v13445_v61, %v13747_v59 }
 0x55f   : > { %v12420_v25 = vpop.f32.mrf.mxu1 }
 0x560   : > { %v12734_v20 = vmul.f32 %v14689_v29, %v12574_v6  ;;  %v12421_v26 = vadd.f32 %v12420_v25, %v11876_v36  ;;  %v13451_v21 = vmax.f32 %v13449_v57, %v13450_v63 }
 0x561   : > { %v12422_v8 = vpop.f32.mrf.mxu1 }
 0x562   : > { %v13452_v13 = vrot.slane %v12734_v20, 4  ;;  %v12575_v37 = vmax.f32 %v12421_v26, 0.0  ;;  %v13749_v43 = vsel %vm13648_vm7, %v13451_v21, %v13748_v62 }
 0x564   : > { %v13453_v28 = vmax.f32 %v12734_v20, %v13452_v13  ;;  %v12735_v51 = vmul.f32 %v14689_v29, %v12575_v37 }
 0x566   : > { %v13454_v0 = vrot.slane %v13453_v28, 2  ;;  %v13458_v1 = vrot.slane %v12735_v51, 4 }
 0x567   : > { %v11880_v11 = vpop.f32.mrf.mxu0 }
 0x568   : > { %v13455_v56 = vmax.f32 %v13453_v28, %v13454_v0  ;;  %v13459_v14 = vmax.f32 %v12735_v51, %v13458_v1  ;;  %v11881_v25 = vadd.f32 %v18880_v5, %v11880_v11 }
 0x569   : > { %v11882_v4 = vpop.f32.mrf.mxu0 }
 0x56a   : > { %v13456_v54 = vrot.slane %v13455_v56, 1  ;;  %v13460_v45 = vrot.slane %v13459_v14, 2 }
 0x56b   : > { %v11883_v24 = vpop.f32.mrf.mxu0  ;;  %v12425_v29 = vpop.f32.mrf.mxu1 }
 0x56c   : > { %v13461_v52 = vmax.f32 %v13459_v14, %v13460_v45  ;;  %v13457_v16 = vmax.f32 %v13455_v56, %v13456_v54  ;;  %v11884_v6 = vadd.f32 %v18880_v5, %v11883_v24  ;;  %v12426_v8 = vadd.f32 %v12425_v29, %v11881_v25 }
 0x56d   : > { %v11885_v53 = vpop.f32.mrf.mxu0  ;;  %v12427_v40 = vpop.f32.mrf.mxu1 }
 0x56e   : > { %v13462_v33 = vrot.slane %v13461_v52, 1  ;;  %v13750_v2 = vsel %vm13650_vm8, %v13457_v16, %v13749_v43  ;;  %v12576_v22 = vmax.f32 %v12426_v8, 0.0 }
 0x56f   : > { %v12428_v58 = vpop.f32.mrf.mxu1 }
 0x570   : > { %v13463_v3 = vmax.f32 %v13461_v52, %v13462_v33  ;;  %v12429_v35 = vadd.f32 %v12428_v58, %v11884_v6  ;;  %v12736_v14 = vmul.f32 %v14690_v42, %v12576_v22 }
 0x571   : > { %v12430_v46 = vpop.f32.mrf.mxu1 }
 0x572   : > { %v13751_v60 = vsel %vm13652_vm9, %v13463_v3, %v13750_v2  ;;  %v12577_v37 = vmax.f32 %v12429_v35, 0.0  ;;  %v13464_v24 = vrot.slane %v12736_v14, 4 }
 0x573   : > { %13789 = vst [vmem:[%s16878_s15 + $0x70] sm:$0xff] %v13751_v60 }
 0x574   : > { %v12737_v7 = vmul.f32 %v14690_v42, %v12577_v37  ;;  %v13465_v16 = vmax.f32 %v12736_v14, %v13464_v24 }
 0x576   : > { %v11888_v49 = vpop.f32.mrf.mxu0  ;;  %v13470_v44 = vrot.slane %v12737_v7, 4 }
 0x577   : > { %v11889_v39 = vadd.f32 %v18880_v5, %v11888_v49 }
 0x578   : > { %v11890_v50 = vpop.f32.mrf.mxu0  ;;  %v13471_v27 = vmax.f32 %v12737_v7, %v13470_v44 }
 0x579   : > { %v13466_v50 = vrot.slane %v13465_v16, 2 }
 0x57a   : > { %v11891_v36 = vpop.f32.mrf.mxu0  ;;  %v13472_v58 = vrot.slane %v13471_v27, 2 }
 0x57b   : > { %v12433_v31 = vpop.f32.mrf.mxu1  ;;  %v11892_v17 = vadd.f32 %v18880_v5, %v11891_v36  ;;  %v13467_v35 = vmax.f32 %v13465_v16, %v13466_v50 }
 0x57c   : > { %v11893_v10 = vpop.f32.mrf.mxu0  ;;  %v12434_v26 = vadd.f32 %v12433_v31, %v11889_v39 }
 0x57d   : > { %v12435_v23 = vpop.f32.mrf.mxu1 }
 0x57e   : > { %v12578_v57 = vmax.f32 %v12434_v26, 0.0 }
 0x57f   : > { %v12436_v9 = vpop.f32.mrf.mxu1 }
 0x580   : > { %v12437_v32 = vadd.f32 %v12436_v9, %v11892_v17  ;;  %v12738_v63 = vmul.f32 %v14690_v42, %v12578_v57  ;;  %v13473_v9 = vmax.f32 %v13471_v27, %v13472_v58 }
 0x581   : > { %v12438_v48 = vpop.f32.mrf.mxu1 }
 0x582   : > { %v12579_v18 = vmax.f32 %v12437_v32, 0.0  ;;  %v13476_v45 = vrot.slane %v12738_v63, 4 }
 0x584   : > { %v12739_v4 = vmul.f32 %v14690_v42, %v12579_v18  ;;  %v13477_v53 = vmax.f32 %v12738_v63, %v13476_v45 }
 0x586   : > { %v11896_v20 = vpop.f32.mrf.mxu0  ;;  %v13482_v61 = vrot.slane %v12739_v4, 4  ;;  %v13478_v46 = vrot.slane %v13477_v53, 2 }
 0x587   : > { %v11897_v15 = vadd.f32 %v18880_v5, %v11896_v20 }
 0x588   : > { %v11898_v47 = vpop.f32.mrf.mxu0  ;;  %v13483_v40 = vmax.f32 %v12739_v4, %v13482_v61  ;;  %v13479_v25 = vmax.f32 %v13477_v53, %v13478_v46 }
 0x58a   : > { %v12441_v13 = vpop.f32.mrf.mxu1  ;;  %v11899_v34 = vpop.f32.mrf.mxu0  ;;  %v13484_v36 = vrot.slane %v13483_v40, 2  ;;  %v13480_v37 = vrot.slane %v13479_v25, 1 }
 0x58b   : > { %v12442_v38 = vadd.f32 %v12441_v13, %v11897_v15  ;;  %v11900_v51 = vadd.f32 %v18880_v5, %v11899_v34 }
 0x58c   : > { %v12443_v28 = vpop.f32.mrf.mxu1  ;;  %v11901_v0 = vpop.f32.mrf.mxu0  ;;  %v13485_v20 = vmax.f32 %v13483_v40, %v13484_v36 }
 0x58d   : > { %v12580_v1 = vmax.f32 %v12442_v38, 0.0  ;;  %v13468_v38 = vrot.slane %v13467_v35, 1 }
 0x58e   : > { %v12444_v11 = vpop.f32.mrf.mxu1  ;;  %v13486_v34 = vrot.slane %v13485_v20, 1 }
 0x58f   : > { %v12445_v12 = vadd.f32 %v12444_v11, %v11900_v51  ;;  %v12740_v41 = vmul.f32 %v14690_v42, %v12580_v1  ;;  %v13481_v11 = vmax.f32 %v13479_v25, %v13480_v37  ;;  %v13469_v7 = vmax.f32 %v13467_v35, %v13468_v38 }
 0x590   : > { %v12446_v56 = vpop.f32.mrf.mxu1 }
 0x591   : > { %v12581_v19 = vmax.f32 %v12445_v12, 0.0  ;;  %v13488_v29 = vrot.slane %v12740_v41, 4  ;;  %v13487_v12 = vmax.f32 %v13485_v20, %v13486_v34 }
 0x593   : > { %v12741_v54 = vmul.f32 %v14690_v42, %v12581_v19  ;;  %v13489_v59 = vmax.f32 %v12740_v41, %v13488_v29 }
 0x595   : > { %v11904_v55 = vpop.f32.mrf.mxu0  ;;  %v13494_v21 = vrot.slane %v12741_v54, 4  ;;  %v13490_v10 = vrot.slane %v13489_v59, 2 }
 0x596   : > { %v11905_v52 = vadd.f32 %v18880_v5, %v11904_v55 }
 0x597   : > { %v11906_v30 = vpop.f32.mrf.mxu0  ;;  %v13495_v43 = vmax.f32 %v12741_v54, %v13494_v21  ;;  %v13491_v8 = vmax.f32 %v13489_v59, %v13490_v10 }
 0x599   : > { %v11907_v62 = vpop.f32.mrf.mxu0  ;;  %v13496_v48 = vrot.slane %v13495_v43, 2  ;;  %v13492_v51 = vrot.slane %v13491_v8, 1 }
 0x59a   : > { %v12449_v33 = vpop.f32.mrf.mxu1  ;;  %v11908_v2 = vadd.f32 %v18880_v5, %v11907_v62  ;;  %v13474_v5 = vrot.slane %v13473_v9, 1 }
 0x59b   : > { %v12450_v3 = vadd.f32 %v12449_v33, %v11905_v52  ;;  %v11909_v49 = vpop.f32.mrf.mxu0  ;;  %v13497_v32 = vmax.f32 %v13495_v43, %v13496_v48  ;;  %v13493_v14 = vmax.f32 %v13491_v8, %v13492_v51 }
 0x59c   : > { %v12451_v60 = vpop.f32.mrf.mxu1  ;;  %v13475_v22 = vmax.f32 %v13473_v9, %v13474_v5 }
 0x59d   : > { %v12582_v31 = vmax.f32 %v12450_v3, 0.0  ;;  %v13498_v18 = vrot.slane %v13497_v32, 1 }
 0x59e   : > { %v12452_v23 = vpop.f32.mrf.mxu1  ;;  %v13752_v4 = vsel %vm13640_vm3, %v13475_v22, %v13469_v7 }
 0x59f   : > { %v12742_v6 = vmul.f32 %v14690_v42, %v12582_v31  ;;  %v12453_v39 = vadd.f32 %v12452_v23, %v11908_v2  ;;  %v13753_v41 = vsel %vm13642_vm4, %v13481_v11, %v13752_v4 }
 0x5a0   : > { %v12454_v17 = vpop.f32.mrf.mxu1  ;;  %v13754_v54 = vsel %vm13644_vm5, %v13487_v12, %v13753_v41 }
 0x5a1   : > { %v13500_v26 = vrot.slane %v12742_v6, 4  ;;  %v12583_v15 = vmax.f32 %v12453_v39, 0.0  ;;  %v13755_v24 = vsel %vm13646_vm6, %v13493_v14, %v13754_v54 }
 0x5a3   : > { %v13501_v47 = vmax.f32 %v12742_v6, %v13500_v26  ;;  %v12743_v13 = vmul.f32 %v14690_v42, %v12583_v15  ;;  %v13499_v42 = vmax.f32 %v13497_v32, %v13498_v18 }
 0x5a5   : > { %v13502_v57 = vrot.slane %v13501_v47, 2  ;;  %v13506_v28 = vrot.slane %v12743_v13, 4  ;;  %v13756_v61 = vsel %vm13648_vm7, %v13499_v42, %v13755_v24 }
 0x5a7   : > { %v13503_v0 = vmax.f32 %v13501_v47, %v13502_v57  ;;  %v13507_v1 = vmax.f32 %v12743_v13, %v13506_v28 }
 0x5a9   : > { %v13504_v63 = vrot.slane %v13503_v0, 1  ;;  %v13508_v56 = vrot.slane %v13507_v1, 2 }
 0x5ab   : > { %v13509_v19 = vmax.f32 %v13507_v1, %v13508_v56  ;;  %v13505_v44 = vmax.f32 %v13503_v0, %v13504_v63 }
 0x5ad   : > { %v13510_v45 = vrot.slane %v13509_v19, 1  ;;  %v13757_v55 = vsel %vm13650_vm8, %v13505_v44, %v13756_v61 }
 0x5af   : > { %v13511_v29 = vmax.f32 %v13509_v19, %v13510_v45 }
 0x5b1   : > { %v13758_v27 = vsel %vm13652_vm9, %v13511_v29, %v13757_v55 }
 0x5b2   : > { %13790 = vst [vmem:[%s16878_s15 + $0x78] sm:$0xff] %v13758_v27 }
 0x5b3 PF: > { %s18_s27 = sadd.s32 1, %s14788_s27  }
 0x5b4   : > { %p15_p4 = scmp.ge.s32.totalorder %s18_s27, 4  }
 0x5b6   :  { %17 = sbr.rel (!%p15_p4) target bundleno = 1 (0x1), region = 88 }

</bundles_post_ra>
